<compile_context>
chip_gen: v5e
topology: v5e:2x2
jax: 0.10.0
libtpu: 0.0.40
codegen_flags: <defaults>
</compile_context>

<pallas_src>
import functools

import jax
import jax.numpy as jnp
from jax.experimental import pallas as pl
from jax.experimental.pallas import tpu as pltpu


def _hint(idx, mult):
    """Alignment hint; only applied for power-of-two multiples."""
    if mult > 0 and (mult & (mult - 1)) == 0:
        return pl.multiple_of(idx, mult)
    return idx


def conv_block_kernel(x_ref, w_ref, b_ref, g_ref, bt_ref, gmix_ref, *rest,
                      cg, gn_eps, th, cout, has_ss, cf_out):
    """One batch block (NB whole images) per grid step.

    x_ref   : (NB, H, W, Cin)         bf16 NHWC input block
    w_ref   : (9*Cin, Cp)             standardized conv weight (bf16)
    b_ref   : (1, Cp)                 conv bias            (zero padded to Cp)
    g_ref, bt_ref : (1, Cp)           GroupNorm gamma/beta (zero padded)
    gmix_ref: (Cp, Cp)                0/1 block-diagonal group-mixing matrix
    [sc_ref, sh_ref : (NB, 1, Cp)]    per-sample scale/shift (only if has_ss)
    o_ref   : cf_out -> (NB, Cout, n_tiles, th*W)  channels-first output
              else   -> (NB, n_tiles, th*W, Cp)    lane-dense padded output
    xp_ref  : (NB, H+2, W+2, Cin)     bf16 halo scratch
    y_ref   : (NB, n_tiles, th*W, Cp) f32 conv+bias scratch
    """
    if has_ss:
        sc_ref, sh_ref, o_ref, xp_ref, y_ref = rest
    else:
        sc_ref = sh_ref = None
        o_ref, xp_ref, y_ref = rest

    NB, H, W, Cin = x_ref.shape
    Cp = y_ref.shape[-1]
    HW = H * W
    n_tiles = H // th
    tr = th * W                                    # output rows per spatial tile

    # ---- halo (padding=1): zero the border every step (megacore safe, the
    #      scratch is per-core and persists), then copy the interior, in bf16.
    zrow = jnp.zeros((NB, 1, W + 2, Cin), xp_ref.dtype)
    zcol = jnp.zeros((NB, H + 2, 1, Cin), xp_ref.dtype)
    xp_ref[:, 0:1, :, :] = zrow
    xp_ref[:, H + 1:H + 2, :, :] = zrow
    xp_ref[:, :, 0:1, :] = zcol
    xp_ref[:, :, W + 1:W + 2, :] = zcol
    xp_ref[:, 1:H + 1, 1:W + 1, :] = x_ref[...]

    w2d = w_ref[...]                               # (9*Cin, Cp) bf16
    bias = b_ref[...].astype(jnp.float32)          # (1, Cp)

    # ---- pass 1: per-row-tile bf16 im2col -> single MXU matmul (f32 acc),
    #      fused GroupNorm statistics (sum, sum of squares).
    def conv_tile(t, carry):
        s1, s2 = carry
        r0 = _hint(t * th, th)
        xt = xp_ref[:, pl.ds(r0, th + 2), :, :]    # (NB, th+2, W+2, Cin) bf16
        patches = jnp.concatenate(
            [xt[:, ky:ky + th, kx:kx + W, :]
             for ky in range(3) for kx in range(3)], axis=-1)
        patches = patches.reshape(NB * tr, 9 * Cin)
        acc = jnp.dot(patches, w2d, preferred_element_type=jnp.float32)
        yt = (acc + bias).reshape(NB, tr, Cp)
        y_ref[:, t, :, :] = yt
        return (s1 + jnp.sum(yt, axis=1), s2 + jnp.sum(yt * yt, axis=1))

    zero_stat = jnp.zeros((NB, Cp), jnp.float32)
    s1, s2 = jax.lax.fori_loop(0, n_tiles, conv_tile, (zero_stat, zero_stat))

    # ---- GroupNorm statistics (per sample, per group), single fused pass.
    #      Padded channels carry exact zeros -> var 0, gamma/beta 0 -> stay 0.
    gmix = gmix_ref[...]                           # (Cp, Cp) f32
    cnt = jnp.float32(HW * cg)
    mean = jnp.dot(s1, gmix, preferred_element_type=jnp.float32) / cnt
    ex2 = jnp.dot(s2, gmix, preferred_element_type=jnp.float32) / cnt
    inv = jax.lax.rsqrt(jnp.maximum(ex2 - mean * mean, 0.0) + gn_eps)
    mean_b = mean[:, None, :]
    inv_b = inv[:, None, :]
    gamma = g_ref[...].astype(jnp.float32).reshape(1, 1, Cp)
    beta = bt_ref[...].astype(jnp.float32).reshape(1, 1, Cp)
    if has_ss:
        sc = sc_ref[...].astype(jnp.float32) + 1.0     # (NB, 1, Cp)
        sh = sh_ref[...].astype(jnp.float32)

    # ---- pass 2: normalize + affine (+ scale/shift) + SiLU, per row tile.
    def epi_tile(t, carry):
        yt = y_ref[:, t, :, :]                     # (NB, tr, Cp) f32
        yt = (yt - mean_b) * inv_b * gamma + beta
        if has_ss:
            yt = yt * sc + sh
        yt = yt * pl.reciprocal(1.0 + jnp.exp(-yt), approx=True)      # SiLU
        if cf_out:
            # channels-first: transpose the full (lane-friendly) Cp lanes, then
            # keep only the real Cout channels -> no padded HBM writeback.
            ytt = jnp.transpose(yt, (0, 2, 1))[:, :cout, :]   # (NB, Cout, tr)
            o_ref[:, :, t, :] = ytt.astype(o_ref.dtype)
        else:
            o_ref[:, t, :, :] = yt.astype(o_ref.dtype)
        return carry

    jax.lax.fori_loop(0, n_tiles, epi_tile, 0)


def _vmem_config():
    """Generation-aware scoped-VMEM limit and per-grid-step block budget."""
    try:
        cap = int(pltpu.get_tpu_info().vmem_capacity_bytes)
    except Exception:                       # off-TPU tracing / older jax
        cap = 64 << 20
    cap = max(cap, 64 << 20)
    limit = max(min(cap // 2, 96 << 20), 32 << 20)   # 128MiB parts->64MiB, v7x->32MiB
    budget = max(limit // 2 - (2 << 20), 6 << 20)
    return limit, budget


def _pick_batch_block(n, per_image_bytes, budget_bytes):
    """Largest batch block fitting the budget that divides N, but keep >=2 grid
    steps when N >= 2 (pipeline overlap + both v7x TensorCores)."""
    nb = max(1, min(n, budget_bytes // max(per_image_bytes, 1)))
    while n % nb:
        nb -= 1
    if n >= 2 and n // nb < 2:
        nb = max(1, n // 2)
        while n % nb:
            nb -= 1
    return nb


def _pick_row_tile(H, W, Cin, Cp, nb, cf_out, tile_budget):
    """Largest row-tile height dividing H that keeps the per-tile im2col /
    matmul temporaries under tile_budget; prefers lane/sublane friendly tr."""
    per_row = nb * W * (9 * Cin * 2 + 2 * Cp * 4)   # bf16 patches + f32 acc/epilogue
    divs = [d for d in range(1, H + 1) if H % d == 0]
    lane_mult = 128 if cf_out else 8
    pref = [d for d in divs if (d * W) % lane_mult == 0] or divs
    fit = [d for d in pref if d * per_row <= tile_budget]
    return max(fit) if fit else min(pref)


def conv_block_forward(x_nchw, weight, bias, gn_weight, gn_bias,
                       scale_shift=None, groups=8, row_tile=None):
    """Mirrors conv_block.forward. x_nchw: (N, Cin, H, W)."""
    N, Cin, H, W = x_nchw.shape
    Cout = weight.shape[0]
    assert Cout % groups == 0
    cg = Cout // groups
    Cp = ((Cout + 127) // 128) * 128
    HW = H * W

    # --- weight standardization (batch independent) done once in the wrapper.
    ws_eps = 1e-5 if x_nchw.dtype == jnp.float32 else 1e-4
    w32 = weight.astype(jnp.float32)
    wm = jnp.mean(w32, axis=(1, 2, 3), keepdims=True)
    wv = jnp.mean(jnp.square(w32 - wm), axis=(1, 2, 3), keepdims=True)
    wn = (w32 - wm) * jax.lax.rsqrt(wv + ws_eps)
    # OIHW -> (ky, kx, cin, cout) -> (9*Cin, Cout) -> pad cout -> bf16
    w2d = jnp.transpose(wn, (2, 3, 1, 0)).reshape(9 * Cin, Cout)
    w2d = jnp.pad(w2d, ((0, 0), (0, Cp - Cout))).astype(jnp.bfloat16)

    def pad_vec(v):                          # (Cout,) -> (1, Cp) zero padded
        return jnp.pad(v.astype(jnp.float32).reshape(1, Cout),
                       ((0, 0), (0, Cp - Cout)))

    b_p, g_p, bt_p = pad_vec(bias), pad_vec(gn_weight), pad_vec(gn_bias)

    # block-diagonal group-mixing matrix, built once here (constant DMA) rather
    # than from iota // cg every grid step inside the kernel.
    gidx = jnp.arange(Cp, dtype=jnp.int32) // cg
    gmix = (gidx[:, None] == gidx[None, :]).astype(jnp.float32)

    has_ss = scale_shift is not None
    if has_ss:
        s, sh = scale_shift                  # PyTorch shapes (N, Cout, 1, 1)
        scale = jnp.pad(s.astype(jnp.float32).reshape(N, 1, Cout),
                        ((0, 0), (0, 0), (0, Cp - Cout)))
        shift = jnp.pad(sh.astype(jnp.float32).reshape(N, 1, Cout),
                        ((0, 0), (0, 0), (0, Cp - Cout)))

    # fuse NCHW->NHWC with the bf16 cast (conv MXU operands are bf16 anyway).
    # TODO(synk): keep the surrounding model NHWC end-to-end to drop this
    # boundary transpose entirely.
    x = jnp.transpose(x_nchw, (0, 2, 3, 1)).astype(jnp.bfloat16)

    vmem_limit, budget = _vmem_config()
    cf_pref = Cout < Cp      # small Cout: channels-first output, no 8x padding

    def build_and_run(cf_out, single_buffer_consts):
        bytes_out = 4 * HW * (Cout if cf_out else Cp)
        per_image = (2 * 2 * HW * Cin                 # x block (bf16, dbl buf)
                     + 2 * (H + 2) * (W + 2) * Cin    # halo scratch (bf16)
                     + 4 * HW * Cp                    # conv scratch (f32)
                     + 2 * bytes_out)                 # output block (dbl buf)
        const_bytes = 2 * 9 * Cin * Cp + 4 * Cp * Cp + 6 * 4 * Cp
        blk_budget = max(budget - const_bytes, per_image)
        nb = _pick_batch_block(N, per_image, blk_budget)
        if row_tile is not None:
            assert H % row_tile == 0
            th = row_tile
        else:
            th = _pick_row_tile(H, W, Cin, Cp, nb, cf_out,
                                tile_budget=min(4 << 20, blk_budget // 4))
        n_tiles = H // th
        tr = th * W

        kernel = functools.partial(conv_block_kernel, cg=cg, gn_eps=1e-5,
                                   th=th, cout=Cout, has_ss=has_ss,
                                   cf_out=cf_out)

        kw = {"pipeline_mode": pl.Buffered(1)} if single_buffer_consts else {}
        in_specs = [
            pl.BlockSpec((nb, H, W, Cin), lambda n: (n, 0, 0, 0)),
            pl.BlockSpec((9 * Cin, Cp), lambda n: (0, 0), **kw),
            pl.BlockSpec((1, Cp), lambda n: (0, 0), **kw),
            pl.BlockSpec((1, Cp), lambda n: (0, 0), **kw),
            pl.BlockSpec((1, Cp), lambda n: (0, 0), **kw),
            pl.BlockSpec((Cp, Cp), lambda n: (0, 0), **kw),
        ]
        operands = [x, w2d, b_p, g_p, bt_p, gmix]
        if has_ss:
            in_specs += [pl.BlockSpec((nb, 1, Cp), lambda n: (n, 0, 0)),
                         pl.BlockSpec((nb, 1, Cp), lambda n: (n, 0, 0))]
            operands += [scale, shift]

        if cf_out:
            out_shape = jax.ShapeDtypeStruct((N, Cout, n_tiles, tr), jnp.float32)
            out_spec = pl.BlockSpec((nb, Cout, n_tiles, tr),
                                    lambda n: (n, 0, 0, 0))
        else:
            out_shape = jax.ShapeDtypeStruct((N, n_tiles, tr, Cp), jnp.float32)
            out_spec = pl.BlockSpec((nb, n_tiles, tr, Cp),
                                    lambda n: (n, 0, 0, 0))

        raw = pl.pallas_call(
            kernel,
            out_shape=out_shape,
            grid=(N // nb,),
            in_specs=in_specs,
            out_specs=out_spec,
            scratch_shapes=[
                pltpu.VMEM((nb, H + 2, W + 2, Cin), jnp.bfloat16),
                pltpu.VMEM((nb, n_tiles, tr, Cp), jnp.float32),
            ],
            compiler_params=pltpu.CompilerParams(
                dimension_semantics=("parallel",),
                vmem_limit_bytes=int(vmem_limit)),
        )(*operands)

        if cf_out:
            out = raw.reshape(N, Cout, H, W)          # no boundary transpose
        else:
            out = raw.reshape(N, H, W, Cp)[..., :Cout]
            out = jnp.transpose(out, (0, 3, 1, 2))
        return out.astype(x_nchw.dtype)

    # Preferred config first, then progressively safer fallbacks (older jax
    # without pipeline_mode support; last resort: padded-channel output path).
    attempts = [(cf_pref, True), (cf_pref, False)]
    if cf_pref:
        attempts.append((False, False))
    last_err = None
    for cf, buf in attempts:
        try:
            return build_and_run(cf, buf)
        except Exception as e:                        # retry with safer config
            last_err = e
    raise last_err


def conv_block_reference(x, weight, bias, gn_weight, gn_bias,
                         scale_shift=None, groups=8):
    """Pure-JAX reference matching the PyTorch module."""
    eps = 1e-5 if x.dtype == jnp.float32 else 1e-4
    wm = weight.mean(axis=(1, 2, 3), keepdims=True)
    wv = jnp.mean(jnp.square(weight - wm), axis=(1, 2, 3), keepdims=True)
    wn = (weight - wm) * jax.lax.rsqrt(wv + eps)
    y = jax.lax.conv_general_dilated(
        x, wn, window_strides=(1, 1), padding=((1, 1), (1, 1)),
        dimension_numbers=("NCHW", "OIHW", "NCHW"),
        precision=jax.lax.Precision.HIGHEST)
    y = y + bias[None, :, None, None]
    N, C, H, W = y.shape
    yg = y.reshape(N, groups, C // groups, H, W)
    m = yg.mean(axis=(2, 3, 4), keepdims=True)
    v = yg.var(axis=(2, 3, 4), keepdims=True)
    yg = (yg - m) / jnp.sqrt(v + 1e-5)
    y = yg.reshape(N, C, H, W)
    y = y * gn_weight[None, :, None, None] + gn_bias[None, :, None, None]
    if scale_shift is not None:
        s, sh = scale_shift
        y = y * (s + 1.0) + sh
    return y * jax.nn.sigmoid(y)


if __name__ == "__main__":
    # shapes consistent with the module: dim=8 -> dim_out=16, groups=8
    N, Cin, H, W = 2, 8, 16, 16
    Cout, groups = 16, 8

    key = jax.random.PRNGKey(0)
    ks = jax.random.split(key, 8)
    x = jax.random.normal(ks[0], (N, Cin, H, W), jnp.float32)
    weight = 0.2 * jax.random.normal(ks[1], (Cout, Cin, 3, 3), jnp.float32)
    bias = 0.1 * jax.random.normal(ks[2], (Cout,), jnp.float32)
    gn_weight = 1.0 + 0.1 * jax.random.normal(ks[3], (Cout,), jnp.float32)
    gn_bias = 0.1 * jax.random.normal(ks[4], (Cout,), jnp.float32)
    scale = 0.1 * jax.random.normal(ks[5], (N, Cout, 1, 1), jnp.float32)
    shift = 0.1 * jax.random.normal(ks[6], (N, Cout, 1, 1), jnp.float32)

    def check(out, ref):
        assert out.shape == ref.shape
        err = float(jnp.max(jnp.abs(out - ref)))
        assert jnp.allclose(out, ref, atol=1e-2, rtol=1e-2), err

    # path 1: scale_shift=None (default forward)
    out0 = jax.block_until_ready(
        conv_block_forward(x, weight, bias, gn_weight, gn_bias, None, groups))
    check(out0, conv_block_reference(x, weight, bias, gn_weight, gn_bias,
                                     None, groups))

    # path 2: with scale_shift conditioning
    out1 = jax.block_until_ready(
        conv_block_forward(x, weight, bias, gn_weight, gn_bias,
                           (scale, shift), groups))
    check(out1, conv_block_reference(x, weight, bias, gn_weight, gn_bias,
                                     (scale, shift), groups))

    # path 3: larger batch (multi-image blocks, 2 grid steps) + forced spatial
    # row tiling (row_tile=8 -> 2 tiles) to exercise the chunked im2col path
    x4 = jax.random.normal(ks[7], (4, Cin, H, W), jnp.float32)
    out2 = jax.block_until_ready(
        conv_block_forward(x4, weight, bias, gn_weight, gn_bias, None, groups,
                           row_tile=8))
    check(out2, conv_block_reference(x4, weight, bias, gn_weight, gn_bias,
                                     None, groups))

    print("KERNEL_OK")
</pallas_src>

<mosaic_0001>
module attributes {stable_mosaic.version = 11 : i64} {
  func.func @conv_block_kernel(%arg0: i32, %arg1: memref<1x16x16x8xbf16, #tpu.memory_space<vmem>>, %arg2: memref<72x128xbf16, #tpu.memory_space<vmem>>, %arg3: memref<1x128xf32, #tpu.memory_space<vmem>>, %arg4: memref<1x128xf32, #tpu.memory_space<vmem>>, %arg5: memref<1x128xf32, #tpu.memory_space<vmem>>, %arg6: memref<128x128xf32, #tpu.memory_space<vmem>>, %arg7: memref<1x16x1x256xf32, #tpu.memory_space<vmem>>, %arg8: memref<1x18x18x8xbf16, #tpu.memory_space<vmem>>, %arg9: memref<1x1x256x128xf32, #tpu.memory_space<vmem>>) attributes {dimension_semantics = [#tpu.dimension_semantics<parallel>], iteration_bounds = array<i64: 2>, scalar_prefetch = 0 : i64, scratch_operands = 2 : i64, tpu.core_type = #tpu.core_type<tc>, window_params = [{transform_indices = @transform_0, window_bounds = array<i64: 1, 16, 16, 8>}, {pipeline_mode = #tpu.pipeline_mode<synchronous>, transform_indices = @transform_1, window_bounds = array<i64: 72, 128>}, {pipeline_mode = #tpu.pipeline_mode<synchronous>, transform_indices = @transform_2, window_bounds = array<i64: 1, 128>}, {pipeline_mode = #tpu.pipeline_mode<synchronous>, transform_indices = @transform_3, window_bounds = array<i64: 1, 128>}, {pipeline_mode = #tpu.pipeline_mode<synchronous>, transform_indices = @transform_4, window_bounds = array<i64: 1, 128>}, {pipeline_mode = #tpu.pipeline_mode<synchronous>, transform_indices = @transform_5, window_bounds = array<i64: 128, 128>}, {transform_indices = @transform_6, window_bounds = array<i64: 1, 16, 1, 256>}]} {
    %cst = arith.constant 0.000000e+00 : bf16
    %0 = vector.broadcast %cst : bf16 to vector<1x1x18x8xbf16>
    %cst_0 = arith.constant 0.000000e+00 : bf16
    %1 = vector.broadcast %cst_0 : bf16 to vector<1x18x1x8xbf16>
    %c0 = arith.constant 0 : index
    %c0_1 = arith.constant 0 : index
    %c0_2 = arith.constant 0 : index
    %c0_3 = arith.constant 0 : index
    %2 = vector.load %arg8[%c0, %c0_1, %c0_2, %c0_3] : memref<1x18x18x8xbf16, #tpu.memory_space<vmem>>, vector<1x1x18x8xbf16>
    tpu.vector_store %arg8[%c0, %c0_1, %c0_2, %c0_3], %0 {strides = array<i32>} : memref<1x18x18x8xbf16, #tpu.memory_space<vmem>>, vector<1x1x18x8xbf16>,
    %c0_4 = arith.constant 0 : index
    %c17 = arith.constant 17 : index
    %c0_5 = arith.constant 0 : index
    %c0_6 = arith.constant 0 : index
    %3 = vector.load %arg8[%c0_4, %c17, %c0_5, %c0_6] : memref<1x18x18x8xbf16, #tpu.memory_space<vmem>>, vector<1x1x18x8xbf16>
    tpu.vector_store %arg8[%c0_4, %c17, %c0_5, %c0_6], %0 {strides = array<i32>} : memref<1x18x18x8xbf16, #tpu.memory_space<vmem>>, vector<1x1x18x8xbf16>,
    %c0_7 = arith.constant 0 : index
    %c0_8 = arith.constant 0 : index
    %c0_9 = arith.constant 0 : index
    %c0_10 = arith.constant 0 : index
    %4 = vector.load %arg8[%c0_7, %c0_8, %c0_9, %c0_10] : memref<1x18x18x8xbf16, #tpu.memory_space<vmem>>, vector<1x18x1x8xbf16>
    tpu.vector_store %arg8[%c0_7, %c0_8, %c0_9, %c0_10], %1 {strides = array<i32>} : memref<1x18x18x8xbf16, #tpu.memory_space<vmem>>, vector<1x18x1x8xbf16>,
    %c0_11 = arith.constant 0 : index
    %c0_12 = arith.constant 0 : index
    %c17_13 = arith.constant 17 : index
    %c0_14 = arith.constant 0 : index
    %5 = vector.load %arg8[%c0_11, %c0_12, %c17_13, %c0_14] : memref<1x18x18x8xbf16, #tpu.memory_space<vmem>>, vector<1x18x1x8xbf16>
    tpu.vector_store %arg8[%c0_11, %c0_12, %c17_13, %c0_14], %1 {strides = array<i32>} : memref<1x18x18x8xbf16, #tpu.memory_space<vmem>>, vector<1x18x1x8xbf16>,
    %c0_15 = arith.constant 0 : index
    %c0_16 = arith.constant 0 : index
    %c0_17 = arith.constant 0 : index
    %c0_18 = arith.constant 0 : index
    %6 = vector.load %arg1[%c0_15, %c0_16, %c0_17, %c0_18] : memref<1x16x16x8xbf16, #tpu.memory_space<vmem>>, vector<1x16x16x8xbf16>
    %c0_19 = arith.constant 0 : index
    %c1 = arith.constant 1 : index
    %c1_20 = arith.constant 1 : index
    %c0_21 = arith.constant 0 : index
    %7 = vector.load %arg8[%c0_19, %c1, %c1_20, %c0_21] : memref<1x18x18x8xbf16, #tpu.memory_space<vmem>>, vector<1x16x16x8xbf16>
    tpu.vector_store %arg8[%c0_19, %c1, %c1_20, %c0_21], %6 {strides = array<i32>} : memref<1x18x18x8xbf16, #tpu.memory_space<vmem>>, vector<1x16x16x8xbf16>,
    %c0_22 = arith.constant 0 : index
    %c0_23 = arith.constant 0 : index
    %8 = vector.load %arg2[%c0_22, %c0_23] : memref<72x128xbf16, #tpu.memory_space<vmem>>, vector<72x128xbf16>
    %c0_24 = arith.constant 0 : index
    %c0_25 = arith.constant 0 : index
    %9 = vector.load %arg3[%c0_24, %c0_25] : memref<1x128xf32, #tpu.memory_space<vmem>>, vector<1x128xf32>
    %cst_26 = arith.constant 0.000000e+00 : f32
    %10 = vector.broadcast %cst_26 : f32 to vector<1x128xf32>
    %c0_i32 = arith.constant 0 : i32
    %c16_i32 = arith.constant 16 : i32
    %11 = arith.muli %c0_i32, %c16_i32 : i32
    %12 = tpu.assume_multiple %11, 16 : i32
    %c0_27 = arith.constant 0 : index
    %13 = arith.index_cast %12 : i32 to index
    %c0_28 = arith.constant 0 : index
    %c0_29 = arith.constant 0 : index
    %14 = vector.load %arg8[%c0_27, %13, %c0_28, %c0_29] : memref<1x18x18x8xbf16, #tpu.memory_space<vmem>>, vector<1x18x18x8xbf16>
    %15 = vector.extract_strided_slice %14 {offsets = [0, 0, 0, 0], sizes = [1, 16, 16, 8], strides = [1, 1, 1, 1]} : vector<1x18x18x8xbf16> to vector<1x16x16x8xbf16>
    %16 = vector.extract_strided_slice %14 {offsets = [0, 0, 1, 0], sizes = [1, 16, 16, 8], strides = [1, 1, 1, 1]} : vector<1x18x18x8xbf16> to vector<1x16x16x8xbf16>
    %17 = vector.extract_strided_slice %14 {offsets = [0, 0, 2, 0], sizes = [1, 16, 16, 8], strides = [1, 1, 1, 1]} : vector<1x18x18x8xbf16> to vector<1x16x16x8xbf16>
    %18 = vector.extract_strided_slice %14 {offsets = [0, 1, 0, 0], sizes = [1, 16, 16, 8], strides = [1, 1, 1, 1]} : vector<1x18x18x8xbf16> to vector<1x16x16x8xbf16>
    %19 = vector.extract_strided_slice %14 {offsets = [0, 1, 1, 0], sizes = [1, 16, 16, 8], strides = [1, 1, 1, 1]} : vector<1x18x18x8xbf16> to vector<1x16x16x8xbf16>
    %20 = vector.extract_strided_slice %14 {offsets = [0, 1, 2, 0], sizes = [1, 16, 16, 8], strides = [1, 1, 1, 1]} : vector<1x18x18x8xbf16> to vector<1x16x16x8xbf16>
    %21 = vector.extract_strided_slice %14 {offsets = [0, 2, 0, 0], sizes = [1, 16, 16, 8], strides = [1, 1, 1, 1]} : vector<1x18x18x8xbf16> to vector<1x16x16x8xbf16>
    %22 = vector.extract_strided_slice %14 {offsets = [0, 2, 1, 0], sizes = [1, 16, 16, 8], strides = [1, 1, 1, 1]} : vector<1x18x18x8xbf16> to vector<1x16x16x8xbf16>
    %23 = vector.extract_strided_slice %14 {offsets = [0, 2, 2, 0], sizes = [1, 16, 16, 8], strides = [1, 1, 1, 1]} : vector<1x18x18x8xbf16> to vector<1x16x16x8xbf16>
    %24 = tpu.concatenate %15, %16, %17, %18, %19, %20, %21, %22, %23 in 3 : vector<1x16x16x8xbf16>, vector<1x16x16x8xbf16>, vector<1x16x16x8xbf16>, vector<1x16x16x8xbf16>, vector<1x16x16x8xbf16>, vector<1x16x16x8xbf16>, vector<1x16x16x8xbf16>, vector<1x16x16x8xbf16>, vector<1x16x16x8xbf16> -> vector<1x16x16x72xbf16>
    %25 = vector.shape_cast %24 : vector<1x16x16x72xbf16> to vector<256x72xbf16>
    %cst_30 = arith.constant dense<0.000000e+00> : vector<256x128xf32>
    %26 = tpu.matmul %25, %8, %cst_30 {dimension_numbers = #tpu.dot_dimension_numbers<[1], [0], [0], [1], [0, 0, 1, 1], [], []>} : vector<256x72xbf16>, vector<72x128xbf16>, vector<256x128xf32> -> vector<256x128xf32>
    %27 = vector.broadcast %9 : vector<1x128xf32> to vector<256x128xf32>
    %28 = arith.addf %26, %27 : vector<256x128xf32>
    %29 = vector.shape_cast %28 : vector<256x128xf32> to vector<1x256x128xf32>
    %c0_31 = arith.constant 0 : index
    %30 = arith.index_cast %c0_i32 : i32 to index
    %c0_32 = arith.constant 0 : index
    %c0_33 = arith.constant 0 : index
    %31 = vector.load %arg9[%c0_31, %30, %c0_32, %c0_33] : memref<1x1x256x128xf32, #tpu.memory_space<vmem>>, vector<1x1x256x128xf32>
    %32 = vector.shape_cast %31 : vector<1x1x256x128xf32> to vector<1x256x128xf32>
    %33 = vector.shape_cast %29 : vector<1x256x128xf32> to vector<1x1x256x128xf32>
    tpu.vector_store %arg9[%c0_31, %30, %c0_32, %c0_33], %33 {strides = array<i32>} : memref<1x1x256x128xf32, #tpu.memory_space<vmem>>, vector<1x1x256x128xf32>,
    %cst_34 = arith.constant dense<0.000000e+00> : vector<1x128xf32>
    %34 = vector.multi_reduction <add>, %29, %cst_34 [1] : vector<1x256x128xf32> to vector<1x128xf32>
    %35 = arith.addf %10, %34 : vector<1x128xf32>
    %36 = arith.mulf %29, %29 : vector<1x256x128xf32>
    %cst_35 = arith.constant dense<0.000000e+00> : vector<1x128xf32>
    %37 = vector.multi_reduction <add>, %36, %cst_35 [1] : vector<1x256x128xf32> to vector<1x128xf32>
    %38 = arith.addf %10, %37 : vector<1x128xf32>
    %c1_i32 = arith.constant 1 : i32
    %c0_36 = arith.constant 0 : index
    %c0_37 = arith.constant 0 : index
    %39 = vector.load %arg6[%c0_36, %c0_37] : memref<128x128xf32, #tpu.memory_space<vmem>>, vector<128x128xf32>
    %cst_38 = arith.constant dense<0.000000e+00> : vector<1x128xf32>
    %40 = tpu.matmul %35, %39, %cst_38 {dimension_numbers = #tpu.dot_dimension_numbers<[1], [0], [0], [1], [0, 0, 1, 1], [], []>} : vector<1x128xf32>, vector<128x128xf32>, vector<1x128xf32> -> vector<1x128xf32>
    %cst_39 = arith.constant 5.120000e+02 : f32
    %41 = vector.broadcast %cst_39 : f32 to vector<1x128xf32>
    %42 = arith.divf %40, %41 : vector<1x128xf32>
    %cst_40 = arith.constant dense<0.000000e+00> : vector<1x128xf32>
    %43 = tpu.matmul %38, %39, %cst_40 {dimension_numbers = #tpu.dot_dimension_numbers<[1], [0], [0], [1], [0, 0, 1, 1], [], []>} : vector<1x128xf32>, vector<128x128xf32>, vector<1x128xf32> -> vector<1x128xf32>
    %cst_41 = arith.constant 5.120000e+02 : f32
    %44 = vector.broadcast %cst_41 : f32 to vector<1x128xf32>
    %45 = arith.divf %43, %44 : vector<1x128xf32>
    %46 = arith.mulf %42, %42 : vector<1x128xf32>
    %47 = arith.subf %45, %46 : vector<1x128xf32>
    %cst_42 = arith.constant 0.000000e+00 : f32
    %48 = vector.broadcast %cst_42 : f32 to vector<1x128xf32>
    %49 = arith.maximumf %47, %48 : vector<1x128xf32>
    %cst_43 = arith.constant 9.99999974E-6 : f32
    %50 = vector.broadcast %cst_43 : f32 to vector<1x128xf32>
    %51 = arith.addf %49, %50 : vector<1x128xf32>
    %52 = math.rsqrt %51 : vector<1x128xf32>
    %53 = vector.shape_cast %42 : vector<1x128xf32> to vector<1x1x128xf32>
    %54 = vector.shape_cast %52 : vector<1x128xf32> to vector<1x1x128xf32>
    %c0_44 = arith.constant 0 : index
    %c0_45 = arith.constant 0 : index
    %55 = vector.load %arg4[%c0_44, %c0_45] : memref<1x128xf32, #tpu.memory_space<vmem>>, vector<1x128xf32>
    %56 = vector.shape_cast %55 : vector<1x128xf32> to vector<1x1x128xf32>
    %c0_46 = arith.constant 0 : index
    %c0_47 = arith.constant 0 : index
    %57 = vector.load %arg5[%c0_46, %c0_47] : memref<1x128xf32, #tpu.memory_space<vmem>>, vector<1x128xf32>
    %58 = vector.shape_cast %57 : vector<1x128xf32> to vector<1x1x128xf32>
    %c0_i32_48 = arith.constant 0 : i32
    %c0_49 = arith.constant 0 : index
    %59 = arith.index_cast %c0_i32_48 : i32 to index
    %c0_50 = arith.constant 0 : index
    %c0_51 = arith.constant 0 : index
    %60 = vector.load %arg9[%c0_49, %59, %c0_50, %c0_51] : memref<1x1x256x128xf32, #tpu.memory_space<vmem>>, vector<1x1x256x128xf32>
    %61 = vector.shape_cast %60 : vector<1x1x256x128xf32> to vector<1x256x128xf32>
    %62 = vector.broadcast %53 : vector<1x1x128xf32> to vector<1x256x128xf32>
    %63 = arith.subf %61, %62 : vector<1x256x128xf32>
    %64 = vector.broadcast %54 : vector<1x1x128xf32> to vector<1x256x128xf32>
    %65 = arith.mulf %63, %64 : vector<1x256x128xf32>
    %66 = vector.broadcast %56 : vector<1x1x128xf32> to vector<1x256x128xf32>
    %67 = arith.mulf %65, %66 : vector<1x256x128xf32>
    %68 = vector.broadcast %58 : vector<1x1x128xf32> to vector<1x256x128xf32>
    %69 = arith.addf %67, %68 : vector<1x256x128xf32>
    %cst_52 = arith.constant 0.000000e+00 : f32
    %70 = vector.broadcast %cst_52 : f32 to vector<1x256x128xf32>
    %71 = arith.subf %70, %69 : vector<1x256x128xf32>
    %72 = math.exp %71 : vector<1x256x128xf32>
    %cst_53 = arith.constant 1.000000e+00 : f32
    %73 = vector.broadcast %cst_53 : f32 to vector<1x256x128xf32>
    %74 = arith.addf %73, %72 : vector<1x256x128xf32>
    %75 = tpu.reciprocal %74 {approx = true} : vector<1x256x128xf32> -> vector<1x256x128xf32>
    %76 = arith.mulf %69, %75 : vector<1x256x128xf32>
    %77 = tpu.transpose %76, [0, 2, 1] : vector<1x256x128xf32> -> vector<1x128x256xf32>
    %78 = vector.extract_strided_slice %77 {offsets = [0, 0, 0], sizes = [1, 16, 256], strides = [1, 1, 1]} : vector<1x128x256xf32> to vector<1x16x256xf32>
    %c0_54 = arith.constant 0 : index
    %c0_55 = arith.constant 0 : index
    %79 = arith.index_cast %c0_i32_48 : i32 to index
    %c0_56 = arith.constant 0 : index
    %80 = vector.load %arg7[%c0_54, %c0_55, %79, %c0_56] : memref<1x16x1x256xf32, #tpu.memory_space<vmem>>, vector<1x16x1x256xf32>
    %81 = vector.shape_cast %80 : vector<1x16x1x256xf32> to vector<1x16x256xf32>
    %82 = vector.shape_cast %78 : vector<1x16x256xf32> to vector<1x16x1x256xf32>
    tpu.vector_store %arg7[%c0_54, %c0_55, %79, %c0_56], %82 {strides = array<i32>} : memref<1x16x1x256xf32, #tpu.memory_space<vmem>>, vector<1x16x1x256xf32>,
    %c1_i32_57 = arith.constant 1 : i32
    return
  }
  func.func @transform_0(%arg0: i32) -> (i32, i32, i32, i32) {
    %c0_i32 = arith.constant 0 : i32
    %c0_i32_0 = arith.constant 0 : i32
    %c0_i32_1 = arith.constant 0 : i32
    %c0_i32_2 = arith.constant 0 : i32
    return %arg0, %c0_i32, %c0_i32_0, %c0_i32_1 : i32, i32, i32, i32
  }
  func.func @transform_1(%arg0: i32) -> (i32, i32) {
    %c0_i32 = arith.constant 0 : i32
    %c0_i32_0 = arith.constant 0 : i32
    %c0_i32_1 = arith.constant 0 : i32
    return %c0_i32, %c0_i32_0 : i32, i32
  }
  func.func @transform_2(%arg0: i32) -> (i32, i32) {
    %c0_i32 = arith.constant 0 : i32
    %c0_i32_0 = arith.constant 0 : i32
    %c0_i32_1 = arith.constant 0 : i32
    return %c0_i32, %c0_i32_0 : i32, i32
  }
  func.func @transform_3(%arg0: i32) -> (i32, i32) {
    %c0_i32 = arith.constant 0 : i32
    %c0_i32_0 = arith.constant 0 : i32
    %c0_i32_1 = arith.constant 0 : i32
    return %c0_i32, %c0_i32_0 : i32, i32
  }
  func.func @transform_4(%arg0: i32) -> (i32, i32) {
    %c0_i32 = arith.constant 0 : i32
    %c0_i32_0 = arith.constant 0 : i32
    %c0_i32_1 = arith.constant 0 : i32
    return %c0_i32, %c0_i32_0 : i32, i32
  }
  func.func @transform_5(%arg0: i32) -> (i32, i32) {
    %c0_i32 = arith.constant 0 : i32
    %c0_i32_0 = arith.constant 0 : i32
    %c0_i32_1 = arith.constant 0 : i32
    return %c0_i32, %c0_i32_0 : i32, i32
  }
  func.func @transform_6(%arg0: i32) -> (i32, i32, i32, i32) {
    %c0_i32 = arith.constant 0 : i32
    %c0_i32_0 = arith.constant 0 : i32
    %c0_i32_1 = arith.constant 0 : i32
    %c0_i32_2 = arith.constant 0 : i32
    return %arg0, %c0_i32, %c0_i32_0, %c0_i32_1 : i32, i32, i32, i32
  }
}

module attributes {stable_mosaic.version = 11 : i64} {
  func.func @conv_block_kernel(%arg0: i32, %arg1: memref<1x16x16x8xbf16, #tpu.memory_space<vmem>>, %arg2: memref<72x128xbf16, #tpu.memory_space<vmem>>, %arg3: memref<1x128xf32, #tpu.memory_space<vmem>>, %arg4: memref<1x128xf32, #tpu.memory_space<vmem>>, %arg5: memref<1x128xf32, #tpu.memory_space<vmem>>, %arg6: memref<128x128xf32, #tpu.memory_space<vmem>>, %arg7: memref<1x16x1x256xf32, #tpu.memory_space<vmem>>, %arg8: memref<1x18x18x8xbf16, #tpu.memory_space<vmem>>, %arg9: memref<1x1x256x128xf32, #tpu.memory_space<vmem>>) attributes {dimension_semantics = [#tpu.dimension_semantics<parallel>], iteration_bounds = array<i64: 2>, scalar_prefetch = 0 : i64, scratch_operands = 2 : i64, tpu.core_type = #tpu.core_type<tc>, window_params = [{transform_indices = @transform_0, window_bounds = array<i64: 1, 16, 16, 8>}, {pipeline_mode = #tpu.pipeline_mode<synchronous>, transform_indices = @transform_1, window_bounds = array<i64: 72, 128>}, {pipeline_mode = #tpu.pipeline_mode<synchronous>, transform_indices = @transform_2, window_bounds = array<i64: 1, 128>}, {pipeline_mode = #tpu.pipeline_mode<synchronous>, transform_indices = @transform_3, window_bounds = array<i64: 1, 128>}, {pipeline_mode = #tpu.pipeline_mode<synchronous>, transform_indices = @transform_4, window_bounds = array<i64: 1, 128>}, {pipeline_mode = #tpu.pipeline_mode<synchronous>, transform_indices = @transform_5, window_bounds = array<i64: 128, 128>}, {transform_indices = @transform_6, window_bounds = array<i64: 1, 16, 1, 256>}]} {
    %cst = arith.constant 0.000000e+00 : bf16
    %0 = vector.broadcast %cst : bf16 to vector<1x1x18x8xbf16>
    %cst_0 = arith.constant 0.000000e+00 : bf16
    %1 = vector.broadcast %cst_0 : bf16 to vector<1x18x1x8xbf16>
    %c0 = arith.constant 0 : index
    %c0_1 = arith.constant 0 : index
    %c0_2 = arith.constant 0 : index
    %c0_3 = arith.constant 0 : index
    %2 = vector.load %arg8[%c0, %c0_1, %c0_2, %c0_3] : memref<1x18x18x8xbf16, #tpu.memory_space<vmem>>, vector<1x1x18x8xbf16>
    tpu.vector_store %arg8[%c0, %c0_1, %c0_2, %c0_3], %0 {strides = array<i32>} : memref<1x18x18x8xbf16, #tpu.memory_space<vmem>>, vector<1x1x18x8xbf16>,
    %c0_4 = arith.constant 0 : index
    %c17 = arith.constant 17 : index
    %c0_5 = arith.constant 0 : index
    %c0_6 = arith.constant 0 : index
    %3 = vector.load %arg8[%c0_4, %c17, %c0_5, %c0_6] : memref<1x18x18x8xbf16, #tpu.memory_space<vmem>>, vector<1x1x18x8xbf16>
    tpu.vector_store %arg8[%c0_4, %c17, %c0_5, %c0_6], %0 {strides = array<i32>} : memref<1x18x18x8xbf16, #tpu.memory_space<vmem>>, vector<1x1x18x8xbf16>,
    %c0_7 = arith.constant 0 : index
    %c0_8 = arith.constant 0 : index
    %c0_9 = arith.constant 0 : index
    %c0_10 = arith.constant 0 : index
    %4 = vector.load %arg8[%c0_7, %c0_8, %c0_9, %c0_10] : memref<1x18x18x8xbf16, #tpu.memory_space<vmem>>, vector<1x18x1x8xbf16>
    tpu.vector_store %arg8[%c0_7, %c0_8, %c0_9, %c0_10], %1 {strides = array<i32>} : memref<1x18x18x8xbf16, #tpu.memory_space<vmem>>, vector<1x18x1x8xbf16>,
    %c0_11 = arith.constant 0 : index
    %c0_12 = arith.constant 0 : index
    %c17_13 = arith.constant 17 : index
    %c0_14 = arith.constant 0 : index
    %5 = vector.load %arg8[%c0_11, %c0_12, %c17_13, %c0_14] : memref<1x18x18x8xbf16, #tpu.memory_space<vmem>>, vector<1x18x1x8xbf16>
    tpu.vector_store %arg8[%c0_11, %c0_12, %c17_13, %c0_14], %1 {strides = array<i32>} : memref<1x18x18x8xbf16, #tpu.memory_space<vmem>>, vector<1x18x1x8xbf16>,
    %c0_15 = arith.constant 0 : index
    %c0_16 = arith.constant 0 : index
    %c0_17 = arith.constant 0 : index
    %c0_18 = arith.constant 0 : index
    %6 = vector.load %arg1[%c0_15, %c0_16, %c0_17, %c0_18] : memref<1x16x16x8xbf16, #tpu.memory_space<vmem>>, vector<1x16x16x8xbf16>
    %c0_19 = arith.constant 0 : index
    %c1 = arith.constant 1 : index
    %c1_20 = arith.constant 1 : index
    %c0_21 = arith.constant 0 : index
    %7 = vector.load %arg8[%c0_19, %c1, %c1_20, %c0_21] : memref<1x18x18x8xbf16, #tpu.memory_space<vmem>>, vector<1x16x16x8xbf16>
    tpu.vector_store %arg8[%c0_19, %c1, %c1_20, %c0_21], %6 {strides = array<i32>} : memref<1x18x18x8xbf16, #tpu.memory_space<vmem>>, vector<1x16x16x8xbf16>,
    %c0_22 = arith.constant 0 : index
    %c0_23 = arith.constant 0 : index
    %8 = vector.load %arg2[%c0_22, %c0_23] : memref<72x128xbf16, #tpu.memory_space<vmem>>, vector<72x128xbf16>
    %c0_24 = arith.constant 0 : index
    %c0_25 = arith.constant 0 : index
    %9 = vector.load %arg3[%c0_24, %c0_25] : memref<1x128xf32, #tpu.memory_space<vmem>>, vector<1x128xf32>
    %cst_26 = arith.constant 0.000000e+00 : f32
    %10 = vector.broadcast %cst_26 : f32 to vector<1x128xf32>
    %c0_i32 = arith.constant 0 : i32
    %c16_i32 = arith.constant 16 : i32
    %11 = arith.muli %c0_i32, %c16_i32 : i32
    %12 = tpu.assume_multiple %11, 16 : i32
    %c0_27 = arith.constant 0 : index
    %13 = arith.index_cast %12 : i32 to index
    %c0_28 = arith.constant 0 : index
    %c0_29 = arith.constant 0 : index
    %14 = vector.load %arg8[%c0_27, %13, %c0_28, %c0_29] : memref<1x18x18x8xbf16, #tpu.memory_space<vmem>>, vector<1x18x18x8xbf16>
    %15 = vector.extract_strided_slice %14 {offsets = [0, 0, 0, 0], sizes = [1, 16, 16, 8], strides = [1, 1, 1, 1]} : vector<1x18x18x8xbf16> to vector<1x16x16x8xbf16>
    %16 = vector.extract_strided_slice %14 {offsets = [0, 0, 1, 0], sizes = [1, 16, 16, 8], strides = [1, 1, 1, 1]} : vector<1x18x18x8xbf16> to vector<1x16x16x8xbf16>
    %17 = vector.extract_strided_slice %14 {offsets = [0, 0, 2, 0], sizes = [1, 16, 16, 8], strides = [1, 1, 1, 1]} : vector<1x18x18x8xbf16> to vector<1x16x16x8xbf16>
    %18 = vector.extract_strided_slice %14 {offsets = [0, 1, 0, 0], sizes = [1, 16, 16, 8], strides = [1, 1, 1, 1]} : vector<1x18x18x8xbf16> to vector<1x16x16x8xbf16>
    %19 = vector.extract_strided_slice %14 {offsets = [0, 1, 1, 0], sizes = [1, 16, 16, 8], strides = [1, 1, 1, 1]} : vector<1x18x18x8xbf16> to vector<1x16x16x8xbf16>
    %20 = vector.extract_strided_slice %14 {offsets = [0, 1, 2, 0], sizes = [1, 16, 16, 8], strides = [1, 1, 1, 1]} : vector<1x18x18x8xbf16> to vector<1x16x16x8xbf16>
    %21 = vector.extract_strided_slice %14 {offsets = [0, 2, 0, 0], sizes = [1, 16, 16, 8], strides = [1, 1, 1, 1]} : vector<1x18x18x8xbf16> to vector<1x16x16x8xbf16>
    %22 = vector.extract_strided_slice %14 {offsets = [0, 2, 1, 0], sizes = [1, 16, 16, 8], strides = [1, 1, 1, 1]} : vector<1x18x18x8xbf16> to vector<1x16x16x8xbf16>
    %23 = vector.extract_strided_slice %14 {offsets = [0, 2, 2, 0], sizes = [1, 16, 16, 8], strides = [1, 1, 1, 1]} : vector<1x18x18x8xbf16> to vector<1x16x16x8xbf16>
    %24 = tpu.concatenate %15, %16, %17, %18, %19, %20, %21, %22, %23 in 3 : vector<1x16x16x8xbf16>, vector<1x16x16x8xbf16>, vector<1x16x16x8xbf16>, vector<1x16x16x8xbf16>, vector<1x16x16x8xbf16>, vector<1x16x16x8xbf16>, vector<1x16x16x8xbf16>, vector<1x16x16x8xbf16>, vector<1x16x16x8xbf16> -> vector<1x16x16x72xbf16>
    %25 = vector.shape_cast %24 : vector<1x16x16x72xbf16> to vector<256x72xbf16>
    %cst_30 = arith.constant dense<0.000000e+00> : vector<256x128xf32>
    %26 = tpu.matmul %25, %8, %cst_30 {dimension_numbers = #tpu.dot_dimension_numbers<[1], [0], [0], [1], [0, 0, 1, 1], [], []>} : vector<256x72xbf16>, vector<72x128xbf16>, vector<256x128xf32> -> vector<256x128xf32>
    %27 = vector.broadcast %9 : vector<1x128xf32> to vector<256x128xf32>
    %28 = arith.addf %26, %27 : vector<256x128xf32>
    %29 = vector.shape_cast %28 : vector<256x128xf32> to vector<1x256x128xf32>
    %c0_31 = arith.constant 0 : index
    %30 = arith.index_cast %c0_i32 : i32 to index
    %c0_32 = arith.constant 0 : index
    %c0_33 = arith.constant 0 : index
    %31 = vector.load %arg9[%c0_31, %30, %c0_32, %c0_33] : memref<1x1x256x128xf32, #tpu.memory_space<vmem>>, vector<1x1x256x128xf32>
    %32 = vector.shape_cast %31 : vector<1x1x256x128xf32> to vector<1x256x128xf32>
    %33 = vector.shape_cast %29 : vector<1x256x128xf32> to vector<1x1x256x128xf32>
    tpu.vector_store %arg9[%c0_31, %30, %c0_32, %c0_33], %33 {strides = array<i32>} : memref<1x1x256x128xf32, #tpu.memory_space<vmem>>, vector<1x1x256x128xf32>,
    %cst_34 = arith.constant dense<0.000000e+00> : vector<1x128xf32>
    %34 = vector.multi_reduction <add>, %29, %cst_34 [1] : vector<1x256x128xf32> to vector<1x128xf32>
    %35 = arith.addf %10, %34 : vector<1x128xf32>
    %36 = arith.mulf %29, %29 : vector<1x256x128xf32>
    %cst_35 = arith.constant dense<0.000000e+00> : vector<1x128xf32>
    %37 = vector.multi_reduction <add>, %36, %cst_35 [1] : vector<1x256x128xf32> to vector<1x128xf32>
    %38 = arith.addf %10, %37 : vector<1x128xf32>
    %c1_i32 = arith.constant 1 : i32
    %c0_36 = arith.constant 0 : index
    %c0_37 = arith.constant 0 : index
    %39 = vector.load %arg6[%c0_36, %c0_37] : memref<128x128xf32, #tpu.memory_space<vmem>>, vector<128x128xf32>
    %cst_38 = arith.constant dense<0.000000e+00> : vector<1x128xf32>
    %40 = tpu.matmul %35, %39, %cst_38 {dimension_numbers = #tpu.dot_dimension_numbers<[1], [0], [0], [1], [0, 0, 1, 1], [], []>} : vector<1x128xf32>, vector<128x128xf32>, vector<1x128xf32> -> vector<1x128xf32>
    %cst_39 = arith.constant 5.120000e+02 : f32
    %41 = vector.broadcast %cst_39 : f32 to vector<1x128xf32>
    %42 = arith.divf %40, %41 : vector<1x128xf32>
    %cst_40 = arith.constant dense<0.000000e+00> : vector<1x128xf32>
    %43 = tpu.matmul %38, %39, %cst_40 {dimension_numbers = #tpu.dot_dimension_numbers<[1], [0], [0], [1], [0, 0, 1, 1], [], []>} : vector<1x128xf32>, vector<128x128xf32>, vector<1x128xf32> -> vector<1x128xf32>
    %cst_41 = arith.constant 5.120000e+02 : f32
    %44 = vector.broadcast %cst_41 : f32 to vector<1x128xf32>
    %45 = arith.divf %43, %44 : vector<1x128xf32>
    %46 = arith.mulf %42, %42 : vector<1x128xf32>
    %47 = arith.subf %45, %46 : vector<1x128xf32>
    %cst_42 = arith.constant 0.000000e+00 : f32
    %48 = vector.broadcast %cst_42 : f32 to vector<1x128xf32>
    %49 = arith.maximumf %47, %48 : vector<1x128xf32>
    %cst_43 = arith.constant 9.99999974E-6 : f32
    %50 = vector.broadcast %cst_43 : f32 to vector<1x128xf32>
    %51 = arith.addf %49, %50 : vector<1x128xf32>
    %52 = math.rsqrt %51 : vector<1x128xf32>
    %53 = vector.shape_cast %42 : vector<1x128xf32> to vector<1x1x128xf32>
    %54 = vector.shape_cast %52 : vector<1x128xf32> to vector<1x1x128xf32>
    %c0_44 = arith.constant 0 : index
    %c0_45 = arith.constant 0 : index
    %55 = vector.load %arg4[%c0_44, %c0_45] : memref<1x128xf32, #tpu.memory_space<vmem>>, vector<1x128xf32>
    %56 = vector.shape_cast %55 : vector<1x128xf32> to vector<1x1x128xf32>
    %c0_46 = arith.constant 0 : index
    %c0_47 = arith.constant 0 : index
    %57 = vector.load %arg5[%c0_46, %c0_47] : memref<1x128xf32, #tpu.memory_space<vmem>>, vector<1x128xf32>
    %58 = vector.shape_cast %57 : vector<1x128xf32> to vector<1x1x128xf32>
    %c0_i32_48 = arith.constant 0 : i32
    %c0_49 = arith.constant 0 : index
    %59 = arith.index_cast %c0_i32_48 : i32 to index
    %c0_50 = arith.constant 0 : index
    %c0_51 = arith.constant 0 : index
    %60 = vector.load %arg9[%c0_49, %59, %c0_50, %c0_51] : memref<1x1x256x128xf32, #tpu.memory_space<vmem>>, vector<1x1x256x128xf32>
    %61 = vector.shape_cast %60 : vector<1x1x256x128xf32> to vector<1x256x128xf32>
    %62 = vector.broadcast %53 : vector<1x1x128xf32> to vector<1x256x128xf32>
    %63 = arith.subf %61, %62 : vector<1x256x128xf32>
    %64 = vector.broadcast %54 : vector<1x1x128xf32> to vector<1x256x128xf32>
    %65 = arith.mulf %63, %64 : vector<1x256x128xf32>
    %66 = vector.broadcast %56 : vector<1x1x128xf32> to vector<1x256x128xf32>
    %67 = arith.mulf %65, %66 : vector<1x256x128xf32>
    %68 = vector.broadcast %58 : vector<1x1x128xf32> to vector<1x256x128xf32>
    %69 = arith.addf %67, %68 : vector<1x256x128xf32>
    %cst_52 = arith.constant 0.000000e+00 : f32
    %70 = vector.broadcast %cst_52 : f32 to vector<1x256x128xf32>
    %71 = arith.subf %70, %69 : vector<1x256x128xf32>
    %72 = math.exp %71 : vector<1x256x128xf32>
    %cst_53 = arith.constant 1.000000e+00 : f32
    %73 = vector.broadcast %cst_53 : f32 to vector<1x256x128xf32>
    %74 = arith.addf %73, %72 : vector<1x256x128xf32>
    %75 = tpu.reciprocal %74 {approx = true} : vector<1x256x128xf32> -> vector<1x256x128xf32>
    %76 = arith.mulf %69, %75 : vector<1x256x128xf32>
    %77 = tpu.transpose %76, [0, 2, 1] : vector<1x256x128xf32> -> vector<1x128x256xf32>
    %78 = vector.extract_strided_slice %77 {offsets = [0, 0, 0], sizes = [1, 16, 256], strides = [1, 1, 1]} : vector<1x128x256xf32> to vector<1x16x256xf32>
    %c0_54 = arith.constant 0 : index
    %c0_55 = arith.constant 0 : index
    %79 = arith.index_cast %c0_i32_48 : i32 to index
    %c0_56 = arith.constant 0 : index
    %80 = vector.load %arg7[%c0_54, %c0_55, %79, %c0_56] : memref<1x16x1x256xf32, #tpu.memory_space<vmem>>, vector<1x16x1x256xf32>
    %81 = vector.shape_cast %80 : vector<1x16x1x256xf32> to vector<1x16x256xf32>
    %82 = vector.shape_cast %78 : vector<1x16x256xf32> to vector<1x16x1x256xf32>
    tpu.vector_store %arg7[%c0_54, %c0_55, %79, %c0_56], %82 {strides = array<i32>} : memref<1x16x1x256xf32, #tpu.memory_space<vmem>>, vector<1x16x1x256xf32>,
    %c1_i32_57 = arith.constant 1 : i32
    return
  }
  func.func @transform_0(%arg0: i32) -> (i32, i32, i32, i32) {
    %c0_i32 = arith.constant 0 : i32
    %c0_i32_0 = arith.constant 0 : i32
    %c0_i32_1 = arith.constant 0 : i32
    %c0_i32_2 = arith.constant 0 : i32
    return %arg0, %c0_i32, %c0_i32_0, %c0_i32_1 : i32, i32, i32, i32
  }
  func.func @transform_1(%arg0: i32) -> (i32, i32) {
    %c0_i32 = arith.constant 0 : i32
    %c0_i32_0 = arith.constant 0 : i32
    %c0_i32_1 = arith.constant 0 : i32
    return %c0_i32, %c0_i32_0 : i32, i32
  }
  func.func @transform_2(%arg0: i32) -> (i32, i32) {
    %c0_i32 = arith.constant 0 : i32
    %c0_i32_0 = arith.constant 0 : i32
    %c0_i32_1 = arith.constant 0 : i32
    return %c0_i32, %c0_i32_0 : i32, i32
  }
  func.func @transform_3(%arg0: i32) -> (i32, i32) {
    %c0_i32 = arith.constant 0 : i32
    %c0_i32_0 = arith.constant 0 : i32
    %c0_i32_1 = arith.constant 0 : i32
    return %c0_i32, %c0_i32_0 : i32, i32
  }
  func.func @transform_4(%arg0: i32) -> (i32, i32) {
    %c0_i32 = arith.constant 0 : i32
    %c0_i32_0 = arith.constant 0 : i32
    %c0_i32_1 = arith.constant 0 : i32
    return %c0_i32, %c0_i32_0 : i32, i32
  }
  func.func @transform_5(%arg0: i32) -> (i32, i32) {
    %c0_i32 = arith.constant 0 : i32
    %c0_i32_0 = arith.constant 0 : i32
    %c0_i32_1 = arith.constant 0 : i32
    return %c0_i32, %c0_i32_0 : i32, i32
  }
  func.func @transform_6(%arg0: i32) -> (i32, i32, i32, i32) {
    %c0_i32 = arith.constant 0 : i32
    %c0_i32_0 = arith.constant 0 : i32
    %c0_i32_1 = arith.constant 0 : i32
    %c0_i32_2 = arith.constant 0 : i32
    return %arg0, %c0_i32, %c0_i32_0, %c0_i32_1 : i32, i32, i32, i32
  }
}

module attributes {stable_mosaic.version = 11 : i64} {
  func.func @conv_block_kernel(%arg0: i32, %arg1: memref<1x16x16x8xbf16, #tpu.memory_space<vmem>>, %arg2: memref<72x128xbf16, #tpu.memory_space<vmem>>, %arg3: memref<1x128xf32, #tpu.memory_space<vmem>>, %arg4: memref<1x128xf32, #tpu.memory_space<vmem>>, %arg5: memref<1x128xf32, #tpu.memory_space<vmem>>, %arg6: memref<128x128xf32, #tpu.memory_space<vmem>>, %arg7: memref<1x1x256x128xf32, #tpu.memory_space<vmem>>, %arg8: memref<1x18x18x8xbf16, #tpu.memory_space<vmem>>, %arg9: memref<1x1x256x128xf32, #tpu.memory_space<vmem>>) attributes {dimension_semantics = [#tpu.dimension_semantics<parallel>], iteration_bounds = array<i64: 2>, scalar_prefetch = 0 : i64, scratch_operands = 2 : i64, tpu.core_type = #tpu.core_type<tc>, window_params = [{transform_indices = @transform_0, window_bounds = array<i64: 1, 16, 16, 8>}, {pipeline_mode = #tpu.pipeline_mode<synchronous>, transform_indices = @transform_1, window_bounds = array<i64: 72, 128>}, {pipeline_mode = #tpu.pipeline_mode<synchronous>, transform_indices = @transform_2, window_bounds = array<i64: 1, 128>}, {pipeline_mode = #tpu.pipeline_mode<synchronous>, transform_indices = @transform_3, window_bounds = array<i64: 1, 128>}, {pipeline_mode = #tpu.pipeline_mode<synchronous>, transform_indices = @transform_4, window_bounds = array<i64: 1, 128>}, {pipeline_mode = #tpu.pipeline_mode<synchronous>, transform_indices = @transform_5, window_bounds = array<i64: 128, 128>}, {transform_indices = @transform_6, window_bounds = array<i64: 1, 1, 256, 128>}]} {
    %cst = arith.constant 0.000000e+00 : bf16
    %0 = vector.broadcast %cst : bf16 to vector<1x1x18x8xbf16>
    %cst_0 = arith.constant 0.000000e+00 : bf16
    %1 = vector.broadcast %cst_0 : bf16 to vector<1x18x1x8xbf16>
    %c0 = arith.constant 0 : index
    %c0_1 = arith.constant 0 : index
    %c0_2 = arith.constant 0 : index
    %c0_3 = arith.constant 0 : index
    %2 = vector.load %arg8[%c0, %c0_1, %c0_2, %c0_3] : memref<1x18x18x8xbf16, #tpu.memory_space<vmem>>, vector<1x1x18x8xbf16>
    tpu.vector_store %arg8[%c0, %c0_1, %c0_2, %c0_3], %0 {strides = array<i32>} : memref<1x18x18x8xbf16, #tpu.memory_space<vmem>>, vector<1x1x18x8xbf16>,
    %c0_4 = arith.constant 0 : index
    %c17 = arith.constant 17 : index
    %c0_5 = arith.constant 0 : index
    %c0_6 = arith.constant 0 : index
    %3 = vector.load %arg8[%c0_4, %c17, %c0_5, %c0_6] : memref<1x18x18x8xbf16, #tpu.memory_space<vmem>>, vector<1x1x18x8xbf16>
    tpu.vector_store %arg8[%c0_4, %c17, %c0_5, %c0_6], %0 {strides = array<i32>} : memref<1x18x18x8xbf16, #tpu.memory_space<vmem>>, vector<1x1x18x8xbf16>,
    %c0_7 = arith.constant 0 : index
    %c0_8 = arith.constant 0 : index
    %c0_9 = arith.constant 0 : index
    %c0_10 = arith.constant 0 : index
    %4 = vector.load %arg8[%c0_7, %c0_8, %c0_9, %c0_10] : memref<1x18x18x8xbf16, #tpu.memory_space<vmem>>, vector<1x18x1x8xbf16>
    tpu.vector_store %arg8[%c0_7, %c0_8, %c0_9, %c0_10], %1 {strides = array<i32>} : memref<1x18x18x8xbf16, #tpu.memory_space<vmem>>, vector<1x18x1x8xbf16>,
    %c0_11 = arith.constant 0 : index
    %c0_12 = arith.constant 0 : index
    %c17_13 = arith.constant 17 : index
    %c0_14 = arith.constant 0 : index
    %5 = vector.load %arg8[%c0_11, %c0_12, %c17_13, %c0_14] : memref<1x18x18x8xbf16, #tpu.memory_space<vmem>>, vector<1x18x1x8xbf16>
    tpu.vector_store %arg8[%c0_11, %c0_12, %c17_13, %c0_14], %1 {strides = array<i32>} : memref<1x18x18x8xbf16, #tpu.memory_space<vmem>>, vector<1x18x1x8xbf16>,
    %c0_15 = arith.constant 0 : index
    %c0_16 = arith.constant 0 : index
    %c0_17 = arith.constant 0 : index
    %c0_18 = arith.constant 0 : index
    %6 = vector.load %arg1[%c0_15, %c0_16, %c0_17, %c0_18] : memref<1x16x16x8xbf16, #tpu.memory_space<vmem>>, vector<1x16x16x8xbf16>
    %c0_19 = arith.constant 0 : index
    %c1 = arith.constant 1 : index
    %c1_20 = arith.constant 1 : index
    %c0_21 = arith.constant 0 : index
    %7 = vector.load %arg8[%c0_19, %c1, %c1_20, %c0_21] : memref<1x18x18x8xbf16, #tpu.memory_space<vmem>>, vector<1x16x16x8xbf16>
    tpu.vector_store %arg8[%c0_19, %c1, %c1_20, %c0_21], %6 {strides = array<i32>} : memref<1x18x18x8xbf16, #tpu.memory_space<vmem>>, vector<1x16x16x8xbf16>,
    %c0_22 = arith.constant 0 : index
    %c0_23 = arith.constant 0 : index
    %8 = vector.load %arg2[%c0_22, %c0_23] : memref<72x128xbf16, #tpu.memory_space<vmem>>, vector<72x128xbf16>
    %c0_24 = arith.constant 0 : index
    %c0_25 = arith.constant 0 : index
    %9 = vector.load %arg3[%c0_24, %c0_25] : memref<1x128xf32, #tpu.memory_space<vmem>>, vector<1x128xf32>
    %cst_26 = arith.constant 0.000000e+00 : f32
    %10 = vector.broadcast %cst_26 : f32 to vector<1x128xf32>
    %c0_i32 = arith.constant 0 : i32
    %c16_i32 = arith.constant 16 : i32
    %11 = arith.muli %c0_i32, %c16_i32 : i32
    %12 = tpu.assume_multiple %11, 16 : i32
    %c0_27 = arith.constant 0 : index
    %13 = arith.index_cast %12 : i32 to index
    %c0_28 = arith.constant 0 : index
    %c0_29 = arith.constant 0 : index
    %14 = vector.load %arg8[%c0_27, %13, %c0_28, %c0_29] : memref<1x18x18x8xbf16, #tpu.memory_space<vmem>>, vector<1x18x18x8xbf16>
    %15 = vector.extract_strided_slice %14 {offsets = [0, 0, 0, 0], sizes = [1, 16, 16, 8], strides = [1, 1, 1, 1]} : vector<1x18x18x8xbf16> to vector<1x16x16x8xbf16>
    %16 = vector.extract_strided_slice %14 {offsets = [0, 0, 1, 0], sizes = [1, 16, 16, 8], strides = [1, 1, 1, 1]} : vector<1x18x18x8xbf16> to vector<1x16x16x8xbf16>
    %17 = vector.extract_strided_slice %14 {offsets = [0, 0, 2, 0], sizes = [1, 16, 16, 8], strides = [1, 1, 1, 1]} : vector<1x18x18x8xbf16> to vector<1x16x16x8xbf16>
    %18 = vector.extract_strided_slice %14 {offsets = [0, 1, 0, 0], sizes = [1, 16, 16, 8], strides = [1, 1, 1, 1]} : vector<1x18x18x8xbf16> to vector<1x16x16x8xbf16>
    %19 = vector.extract_strided_slice %14 {offsets = [0, 1, 1, 0], sizes = [1, 16, 16, 8], strides = [1, 1, 1, 1]} : vector<1x18x18x8xbf16> to vector<1x16x16x8xbf16>
    %20 = vector.extract_strided_slice %14 {offsets = [0, 1, 2, 0], sizes = [1, 16, 16, 8], strides = [1, 1, 1, 1]} : vector<1x18x18x8xbf16> to vector<1x16x16x8xbf16>
    %21 = vector.extract_strided_slice %14 {offsets = [0, 2, 0, 0], sizes = [1, 16, 16, 8], strides = [1, 1, 1, 1]} : vector<1x18x18x8xbf16> to vector<1x16x16x8xbf16>
    %22 = vector.extract_strided_slice %14 {offsets = [0, 2, 1, 0], sizes = [1, 16, 16, 8], strides = [1, 1, 1, 1]} : vector<1x18x18x8xbf16> to vector<1x16x16x8xbf16>
    %23 = vector.extract_strided_slice %14 {offsets = [0, 2, 2, 0], sizes = [1, 16, 16, 8], strides = [1, 1, 1, 1]} : vector<1x18x18x8xbf16> to vector<1x16x16x8xbf16>
    %24 = tpu.concatenate %15, %16, %17, %18, %19, %20, %21, %22, %23 in 3 : vector<1x16x16x8xbf16>, vector<1x16x16x8xbf16>, vector<1x16x16x8xbf16>, vector<1x16x16x8xbf16>, vector<1x16x16x8xbf16>, vector<1x16x16x8xbf16>, vector<1x16x16x8xbf16>, vector<1x16x16x8xbf16>, vector<1x16x16x8xbf16> -> vector<1x16x16x72xbf16>
    %25 = vector.shape_cast %24 : vector<1x16x16x72xbf16> to vector<256x72xbf16>
    %cst_30 = arith.constant dense<0.000000e+00> : vector<256x128xf32>
    %26 = tpu.matmul %25, %8, %cst_30 {dimension_numbers = #tpu.dot_dimension_numbers<[1], [0], [0], [1], [0, 0, 1, 1], [], []>} : vector<256x72xbf16>, vector<72x128xbf16>, vector<256x128xf32> -> vector<256x128xf32>
    %27 = vector.broadcast %9 : vector<1x128xf32> to vector<256x128xf32>
    %28 = arith.addf %26, %27 : vector<256x128xf32>
    %29 = vector.shape_cast %28 : vector<256x128xf32> to vector<1x256x128xf32>
    %c0_31 = arith.constant 0 : index
    %30 = arith.index_cast %c0_i32 : i32 to index
    %c0_32 = arith.constant 0 : index
    %c0_33 = arith.constant 0 : index
    %31 = vector.load %arg9[%c0_31, %30, %c0_32, %c0_33] : memref<1x1x256x128xf32, #tpu.memory_space<vmem>>, vector<1x1x256x128xf32>
    %32 = vector.shape_cast %31 : vector<1x1x256x128xf32> to vector<1x256x128xf32>
    %33 = vector.shape_cast %29 : vector<1x256x128xf32> to vector<1x1x256x128xf32>
    tpu.vector_store %arg9[%c0_31, %30, %c0_32, %c0_33], %33 {strides = array<i32>} : memref<1x1x256x128xf32, #tpu.memory_space<vmem>>, vector<1x1x256x128xf32>,
    %cst_34 = arith.constant dense<0.000000e+00> : vector<1x128xf32>
    %34 = vector.multi_reduction <add>, %29, %cst_34 [1] : vector<1x256x128xf32> to vector<1x128xf32>
    %35 = arith.addf %10, %34 : vector<1x128xf32>
    %36 = arith.mulf %29, %29 : vector<1x256x128xf32>
    %cst_35 = arith.constant dense<0.000000e+00> : vector<1x128xf32>
    %37 = vector.multi_reduction <add>, %36, %cst_35 [1] : vector<1x256x128xf32> to vector<1x128xf32>
    %38 = arith.addf %10, %37 : vector<1x128xf32>
    %c1_i32 = arith.constant 1 : i32
    %c0_36 = arith.constant 0 : index
    %c0_37 = arith.constant 0 : index
    %39 = vector.load %arg6[%c0_36, %c0_37] : memref<128x128xf32, #tpu.memory_space<vmem>>, vector<128x128xf32>
    %cst_38 = arith.constant dense<0.000000e+00> : vector<1x128xf32>
    %40 = tpu.matmul %35, %39, %cst_38 {dimension_numbers = #tpu.dot_dimension_numbers<[1], [0], [0], [1], [0, 0, 1, 1], [], []>} : vector<1x128xf32>, vector<128x128xf32>, vector<1x128xf32> -> vector<1x128xf32>
    %cst_39 = arith.constant 5.120000e+02 : f32
    %41 = vector.broadcast %cst_39 : f32 to vector<1x128xf32>
    %42 = arith.divf %40, %41 : vector<1x128xf32>
    %cst_40 = arith.constant dense<0.000000e+00> : vector<1x128xf32>
    %43 = tpu.matmul %38, %39, %cst_40 {dimension_numbers = #tpu.dot_dimension_numbers<[1], [0], [0], [1], [0, 0, 1, 1], [], []>} : vector<1x128xf32>, vector<128x128xf32>, vector<1x128xf32> -> vector<1x128xf32>
    %cst_41 = arith.constant 5.120000e+02 : f32
    %44 = vector.broadcast %cst_41 : f32 to vector<1x128xf32>
    %45 = arith.divf %43, %44 : vector<1x128xf32>
    %46 = arith.mulf %42, %42 : vector<1x128xf32>
    %47 = arith.subf %45, %46 : vector<1x128xf32>
    %cst_42 = arith.constant 0.000000e+00 : f32
    %48 = vector.broadcast %cst_42 : f32 to vector<1x128xf32>
    %49 = arith.maximumf %47, %48 : vector<1x128xf32>
    %cst_43 = arith.constant 9.99999974E-6 : f32
    %50 = vector.broadcast %cst_43 : f32 to vector<1x128xf32>
    %51 = arith.addf %49, %50 : vector<1x128xf32>
    %52 = math.rsqrt %51 : vector<1x128xf32>
    %53 = vector.shape_cast %42 : vector<1x128xf32> to vector<1x1x128xf32>
    %54 = vector.shape_cast %52 : vector<1x128xf32> to vector<1x1x128xf32>
    %c0_44 = arith.constant 0 : index
    %c0_45 = arith.constant 0 : index
    %55 = vector.load %arg4[%c0_44, %c0_45] : memref<1x128xf32, #tpu.memory_space<vmem>>, vector<1x128xf32>
    %56 = vector.shape_cast %55 : vector<1x128xf32> to vector<1x1x128xf32>
    %c0_46 = arith.constant 0 : index
    %c0_47 = arith.constant 0 : index
    %57 = vector.load %arg5[%c0_46, %c0_47] : memref<1x128xf32, #tpu.memory_space<vmem>>, vector<1x128xf32>
    %58 = vector.shape_cast %57 : vector<1x128xf32> to vector<1x1x128xf32>
    %c0_i32_48 = arith.constant 0 : i32
    %c0_49 = arith.constant 0 : index
    %59 = arith.index_cast %c0_i32_48 : i32 to index
    %c0_50 = arith.constant 0 : index
    %c0_51 = arith.constant 0 : index
    %60 = vector.load %arg9[%c0_49, %59, %c0_50, %c0_51] : memref<1x1x256x128xf32, #tpu.memory_space<vmem>>, vector<1x1x256x128xf32>
    %61 = vector.shape_cast %60 : vector<1x1x256x128xf32> to vector<1x256x128xf32>
    %62 = vector.broadcast %53 : vector<1x1x128xf32> to vector<1x256x128xf32>
    %63 = arith.subf %61, %62 : vector<1x256x128xf32>
    %64 = vector.broadcast %54 : vector<1x1x128xf32> to vector<1x256x128xf32>
    %65 = arith.mulf %63, %64 : vector<1x256x128xf32>
    %66 = vector.broadcast %56 : vector<1x1x128xf32> to vector<1x256x128xf32>
    %67 = arith.mulf %65, %66 : vector<1x256x128xf32>
    %68 = vector.broadcast %58 : vector<1x1x128xf32> to vector<1x256x128xf32>
    %69 = arith.addf %67, %68 : vector<1x256x128xf32>
    %cst_52 = arith.constant 0.000000e+00 : f32
    %70 = vector.broadcast %cst_52 : f32 to vector<1x256x128xf32>
    %71 = arith.subf %70, %69 : vector<1x256x128xf32>
    %72 = math.exp %71 : vector<1x256x128xf32>
    %cst_53 = arith.constant 1.000000e+00 : f32
    %73 = vector.broadcast %cst_53 : f32 to vector<1x256x128xf32>
    %74 = arith.addf %73, %72 : vector<1x256x128xf32>
    %75 = tpu.reciprocal %74 {approx = true} : vector<1x256x128xf32> -> vector<1x256x128xf32>
    %76 = arith.mulf %69, %75 : vector<1x256x128xf32>
    %c0_54 = arith.constant 0 : index
    %77 = arith.index_cast %c0_i32_48 : i32 to index
    %c0_55 = arith.constant 0 : index
    %c0_56 = arith.constant 0 : index
    %78 = vector.load %arg7[%c0_54, %77, %c0_55, %c0_56] : memref<1x1x256x128xf32, #tpu.memory_space<vmem>>, vector<1x1x256x128xf32>
    %79 = vector.shape_cast %78 : vector<1x1x256x128xf32> to vector<1x256x128xf32>
    %80 = vector.shape_cast %76 : vector<1x256x128xf32> to vector<1x1x256x128xf32>
    tpu.vector_store %arg7[%c0_54, %77, %c0_55, %c0_56], %80 {strides = array<i32>} : memref<1x1x256x128xf32, #tpu.memory_space<vmem>>, vector<1x1x256x128xf32>,
    %c1_i32_57 = arith.constant 1 : i32
    return
  }
  func.func @transform_0(%arg0: i32) -> (i32, i32, i32, i32) {
    %c0_i32 = arith.constant 0 : i32
    %c0_i32_0 = arith.constant 0 : i32
    %c0_i32_1 = arith.constant 0 : i32
    %c0_i32_2 = arith.constant 0 : i32
    return %arg0, %c0_i32, %c0_i32_0, %c0_i32_1 : i32, i32, i32, i32
  }
  func.func @transform_1(%arg0: i32) -> (i32, i32) {
    %c0_i32 = arith.constant 0 : i32
    %c0_i32_0 = arith.constant 0 : i32
    %c0_i32_1 = arith.constant 0 : i32
    return %c0_i32, %c0_i32_0 : i32, i32
  }
  func.func @transform_2(%arg0: i32) -> (i32, i32) {
    %c0_i32 = arith.constant 0 : i32
    %c0_i32_0 = arith.constant 0 : i32
    %c0_i32_1 = arith.constant 0 : i32
    return %c0_i32, %c0_i32_0 : i32, i32
  }
  func.func @transform_3(%arg0: i32) -> (i32, i32) {
    %c0_i32 = arith.constant 0 : i32
    %c0_i32_0 = arith.constant 0 : i32
    %c0_i32_1 = arith.constant 0 : i32
    return %c0_i32, %c0_i32_0 : i32, i32
  }
  func.func @transform_4(%arg0: i32) -> (i32, i32) {
    %c0_i32 = arith.constant 0 : i32
    %c0_i32_0 = arith.constant 0 : i32
    %c0_i32_1 = arith.constant 0 : i32
    return %c0_i32, %c0_i32_0 : i32, i32
  }
  func.func @transform_5(%arg0: i32) -> (i32, i32) {
    %c0_i32 = arith.constant 0 : i32
    %c0_i32_0 = arith.constant 0 : i32
    %c0_i32_1 = arith.constant 0 : i32
    return %c0_i32, %c0_i32_0 : i32, i32
  }
  func.func @transform_6(%arg0: i32) -> (i32, i32, i32, i32) {
    %c0_i32 = arith.constant 0 : i32
    %c0_i32_0 = arith.constant 0 : i32
    %c0_i32_1 = arith.constant 0 : i32
    %c0_i32_2 = arith.constant 0 : i32
    return %arg0, %c0_i32, %c0_i32_0, %c0_i32_1 : i32, i32, i32, i32
  }
}

</mosaic_0001>

<bundles_post_ra>
// kernel: tpu_custom_call.1
= control target key start
LH: loop header
LB: loop body
LE: loop exit
PB: predicated region body
PF: predicated region fallthrough
CT: control target
= control target key end

     0   :  { %11 = vsyncpa [#allocation5], 0  ;;  %s4992_s0 = inlined_call_operand.vmem [shape: bf16[2,16,16,8], index: 0, kind: input, shape index: {}]   ;;  %s4993_s1 = inlined_call_operand.vmem [shape: bf16[72,128], index: 1, kind: input, shape index: {}]   ;;  %s4994_s2 = inlined_call_operand.vmem [shape: f32[1,128], index: 2, kind: input, shape index: {}]   ;;  %s4995_s3 = inlined_call_operand.vmem [shape: f32[1,128], index: 3, kind: input, shape index: {}]   ;;  %s4996_s4 = inlined_call_operand.vmem [shape: f32[1,128], index: 4, kind: input, shape index: {}]   ;;  %s4997_s5 = inlined_call_operand.vmem [shape: f32[128,128], index: 5, kind: input, shape index: {}]   ;;  %s4998_s6 = inlined_call_operand.hbm [shape: f32[2,16,1,256], index: 6, kind: output, shape index: {}]  }
   0x1   :  { %13 = vsyncpa [#allocation5 + $0x1], 0  ;;  %s3262_s21 = smov 0   ;;  %s3264_s22 = smov 0  }
   0x2   :  { %s3266_s23 = smov 0   ;;  %s3268_s24 = smov 0  }
   0x3 LB: > { %s3283_s25 = sadd.s32 4294967295, %s3214_s24   ;;  %s2803_s26 = sadd.s32 4294967294, %s3214_s24   ;;  %s3214_s24 = sphi %s3268_s24, %s5014_s24   ;;  %s3210_s23 = sphi %s3266_s23, %s5013_s23   ;;  %s3206_s22 = sphi %s3264_s22, %s5012_s22   ;;  %s3202_s21 = sphi %s3262_s21, %s5011_s21  }
   0x4   : > { %s3287_s27 = sadd.s32 1, %s3214_s24   ;;  %s157_s28 = sadd.s32 1, %s3210_s23 }
   0x5   : > { %s154_s29 = ssub.s32 %s3214_s24, %s3287_s27  ;;  %p167_p0 = scmp.ne.s32.totalorder %s3210_s23, %s3206_s22 }
   0x6   : > { %p155_p1 = scmp.eq.s32.totalorder %s154_s29, 0  ;;  %p168_p2 = scmp.eq.s32.totalorder %s3283_s25, 1 }
   0x7   : > { %p173_p3 = scmp.ne.s32.totalorder %s3206_s22, %s3202_s21  ;;  %p174_p4 = scmp.eq.s32.totalorder %s2803_s26, 1 }
   0x8   : > { %s3298_s30 = scalar_select %p155_p1, %s3210_s23, %s157_s28  }
   0x9   : > { %p3300_p5 = por %p168_p2, %p167_p0  ;;  %p3304_p6 = por %p174_p4, %p173_p3 }
   0xa   : > { %p2806_p7 = scmp.ge.s32.totalorder %s3214_s24, 1  ;;  %p215_p8 = scmp.lt.s32.totalorder %s3214_s24, 3 }
   0xc   : > { %p216_p9 = pnand %p2806_p7, %p215_p8 }
   0xd   : > { %p245_p10 = scmp.lt.s32.totalorder (!%p216_p9), %s3283_s25, 1  ;;  %s3217_s14 = smov (!%p216_p9), 24  }
   0xe   : > { %219 = sbr.rel (%p216_p9) target bundleno = 1039 (0x40f), region = 44  ;;  %s3218_s15 = smov (!%p216_p9), 48  }
   0xf   : > { %s3219_s16 = smov (!%p216_p9), 16   ;;  %s3220_s17 = smov (!%p216_p9), 8  }
  0x10   : > { %s3221_s18 = smov (!%p216_p9), 40   ;;  %s3222_s19 = smov (!%p216_p9), 64  }
  0x11   : > { %s3223_s20 = smov (!%p216_p9), 32   ;;  %s3224_s26 = smov (!%p216_p9), 56  }
  0x12   : > { %s242_s28 = sand.u32 (!%p216_p9), 1, %s3206_s22   ;;  %s3172_s12 = scalar_lea.hbm (!%p216_p9), %s4998_s6, 64 }
  0x13   : > { %vm254_vm0 = vcmask 57344   ;;  %vm261_vm1 = vsmask.f32 256  ;;  %vm251_vm2 = vcmask 60416   ;;  %v266_v1 = vld [vmem:[#allocation2 + $0xc] sm:$0x1] }
  0x14   : > { %vm3313_vm3 = vmand %vm254_vm0, %vm261_vm1  ;;  %s246_s9 = scalar_select %p245_p10, %s3283_s25, 1  ;;  %v269_v3 = vld [vmem:[#allocation2 + $0x18] sm:$0x1]  ;;  %vm317_vm4 = vsmask.f32 7938  ;;  %v3216_v4 = vmov 0  }
  0x15   : > { %v267_v2 = vsel %vm3313_vm3, 0, %v266_v1  ;;  %252 = vst.msk [vmem:[#allocation2] sm:$0xf] %vm251_vm2, %v3216_v4  ;;  %vm405_vm5 = vsmask.f32 4368  ;;  %v270_v5 = vsel %vm3313_vm3, 0, %v269_v3  ;;  %vm3346_vm7 = vmand %vm251_vm2, %vm317_vm4 }
  0x16   : > { %268 = vst [vmem:[#allocation2 + $0xc] sm:$0x1] %v267_v2  ;;  %s2918_s10 = sshll.u32 %s246_s9, 7  ;;  %vm3337_vm6 = vmor %vm261_vm1, %vm405_vm5  ;;  %v322_v29 = vld [vmem:[#allocation2 + $0x14] sm:$0x1]  ;;  %vm1262_vm9 = vcmask 1046528  }
  0x17   : > { %s3324_s13 = scalar_lea.vmem %s4992_s0, %s2918_s10  ;;  %253 = vst.msk [vmem:[#allocation2 + $0x4] sm:$0xf] %vm251_vm2, %v3216_v4  ;;  %vm3352_vm8 = vmand %vm254_vm0, %vm317_vm4  ;;  %v325_v32 = vld [vmem:[#allocation2 + $0x20] sm:$0x1]  ;;  %v272_v41 = vld [vmem:[#allocation2 + $0x24] sm:$0x1] }
  0x18   : > { %v373_v6 = vld [vmem:[%s3324_s13] sm:$0xf]  ;;  %v374_v7 = vld [vmem:[%s3324_s13 + $0x4] sm:$0xf]  ;;  %255 = vst.msk [vmem:[#allocation2 + $0x8] sm:$0x1] %vm254_vm0, %v3216_v4 }
  0x19   : > { %v408_v8 = vshrl.u32 %v373_v6, 16  ;;  %v411_v9 = vshll.u32 %v373_v6, 16  ;;  %v416_v10 = vshrl.u32 %v374_v7, 16  ;;  %v419_v11 = vshll.u32 %v374_v7, 16  ;;  %257 = vst.msk [vmem:[#allocation2 + $0xcc] sm:$0xf] %vm251_vm2, %v3216_v4 }
  0x1a   : > { %258 = vst.msk [vmem:[#allocation2 + $0xd0] sm:$0xf] %vm251_vm2, %v3216_v4  ;;  %v375_v12 = vld [vmem:[%s3324_s13 + $0x8] sm:$0xf]  ;;  %v376_v13 = vld [vmem:[%s3324_s13 + $0xc] sm:$0xf] }
  0x1b   : > { %v410_v15 = vrot.slane %v408_v8, 7  ;;  %v3341_v16 = vrot.slane %v416_v10, 7  ;;  %259 = vst.msk [vmem:[#allocation2 + $0xd4] sm:$0x1] %vm254_vm0, %v3216_v4  ;;  %v425_v17 = vshrl.u32 %v375_v12, 16  ;;  %v428_v18 = vshll.u32 %v375_v12, 16 }
  0x1c   : > { %271 = vst [vmem:[#allocation2 + $0x18] sm:$0x1] %v270_v5  ;;  %v433_v21 = vshrl.u32 %v376_v13, 16  ;;  %v436_v22 = vshll.u32 %v376_v13, 16  ;;  %v263_v27 = vld [vmem:[#allocation2] sm:$0x1] }
  0x1d   : > { %v730_v20 = vld [vmem:[#allocation2 + $0xc] sm:$0xf]  ;;  %v413_v24 = vor.u32 %v411_v9, %v410_v15  ;;  %v414_v25 = vrot.slane %v410_v15, 4  ;;  %v421_v26 = vor.u32 %v419_v11, %v3341_v16  ;;  %v427_v28 = vrot.slane %v425_v17, 7  ;;  %v377_v42 = vld [vmem:[%s3324_s13 + $0x10] sm:$0xf] }
  0x1e   : > { %v264_v30 = vsel %vm3313_vm3, 0, %v263_v27  ;;  %v3359_v31 = vrot.slane %v433_v21, 7  ;;  %v323_v40 = vsel %vm3352_vm8, 0, %v322_v29  ;;  %v326_v44 = vsel %vm3352_vm8, 0, %v325_v32  ;;  %v378_v45 = vld [vmem:[%s3324_s13 + $0x14] sm:$0xf] }
  0x1f   : > { %v422_v33 = vsel %vm3337_vm6, %v414_v25, %v421_v26  ;;  %v731_v34 = vsel %vm3346_vm7, %v413_v24, %v730_v20  ;;  %265 = vst [vmem:[#allocation2] sm:$0x1] %v264_v30  ;;  %v319_v35 = vld [vmem:[#allocation2 + $0x8] sm:$0x1]  ;;  %v431_v36 = vrot.slane %v427_v28, 4  ;;  %v430_v38 = vor.u32 %v428_v18, %v427_v28  ;;  %s2807_s29 = sshll.u32 %s242_s28, 5 }
  0x20   : > { %732 = vst [vmem:[#allocation2 + $0xc] sm:$0xf] %v731_v34  ;;  %v320_v37 = vsel %vm3352_vm8, 0, %v319_v35  ;;  %v438_v39 = vor.u32 %v436_v22, %v3359_v31  ;;  %v442_v46 = vshrl.u32 %v377_v42, 16  ;;  %v273_v48 = vsel %vm3313_vm3, 0, %v272_v41  ;;  %s4895_s9 = scalar_lea.vmem [#allocation4], %s2807_s29 }
  0x21   : > { %733 = vst.msk [vmem:[#allocation2 + $0x10] sm:$0xf] %vm251_vm2, %v422_v33  ;;  %v450_v49 = vshrl.u32 %v378_v45, 16  ;;  %v453_v52 = vshll.u32 %v378_v45, 16  ;;  %v328_v53 = vld [vmem:[#allocation2 + $0x2c] sm:$0x1] }
  0x22   : > { %321 = vst [vmem:[#allocation2 + $0x8] sm:$0x1] %v320_v37  ;;  %v439_v43 = vsel %vm3337_vm6, %v431_v36, %v438_v39  ;;  %v444_v51 = vrot.slane %v442_v46, 7  ;;  %v329_v55 = vsel %vm3352_vm8, 0, %v328_v53  ;;  %v445_v57 = vshll.u32 %v377_v42, 16  ;;  %s2915_s10 = sshll.u32 %s3283_s25, 5 }
  0x23   : > { %v737_v47 = vld [vmem:[#allocation2 + $0x18] sm:$0xf]  ;;  %740 = vst.msk [vmem:[#allocation2 + $0x1c] sm:$0xf] %vm251_vm2, %v439_v43  ;;  %v452_v54 = vrot.slane %v450_v49, 7  ;;  %v423_v62 = vrot.slane %v3341_v16, 4 }
  0x24   : > { %v738_v50 = vsel %vm3346_vm7, %v430_v38, %v737_v47  ;;  %324 = vst [vmem:[#allocation2 + $0x14] sm:$0x1] %v323_v40  ;;  %v448_v56 = vrot.slane %v444_v51, 4  ;;  %v340_v59 = vld [vmem:[#allocation2 + $0x5c] sm:$0x1]  ;;  %v440_v6 = vrot.slane %v3359_v31, 4  ;;  %v447_v8 = vor.u32 %v445_v57, %v444_v51 }
  0x25   : > { %739 = vst [vmem:[#allocation2 + $0x18] sm:$0xf] %v738_v50  ;;  %v455_v58 = vor.u32 %v453_v52, %v452_v54  ;;  %v284_v2 = vld [vmem:[#allocation2 + $0x54] sm:$0x1]  ;;  %v341_v3 = vsel %vm3352_vm8, 0, %v340_v59  ;;  %v457_v9 = vrot.slane %v452_v54, 4 }
  0x26   : > { %327 = vst [vmem:[#allocation2 + $0x20] sm:$0x1] %v326_v44  ;;  %v2923_v61 = vld [vmem:[#allocation2] sm:$0xff]  ;;  %v285_v10 = vsel %vm3313_vm3, 0, %v284_v2  ;;  %v385_v16 = vld [vmem:[%s3324_s13 + $0x30] sm:$0xf] }
  0x27   : > { %274 = vst [vmem:[#allocation2 + $0x24] sm:$0x1] %v273_v48  ;;  %v456_v1 = vsel %vm3337_vm6, %v448_v56, %v455_v58  ;;  %v1041_v5 = vshll.u32 %v2923_v61, 16  ;;  %v1263_v12 = vrot.slane %v2923_v61, 1  ;;  %v1039_v17 = vshrl.u32 %v2923_v61, 16 }
  0x28   : > { %v3384_v60 = vld [vmem:[#allocation2 + $0xc] sm:$0xff]  ;;  %330 = vst [vmem:[#allocation2 + $0x2c] sm:$0x1] %v329_v55  ;;  %v510_v20 = vshrl.u32 %v385_v16, 16  ;;  %v386_v31 = vld [vmem:[%s3324_s13 + $0x34] sm:$0xf] }
  0x29   : > { %v857_v63 = vld [vmem:[#allocation2 + $0x8] sm:$0x1]  ;;  %1348 = vrot.lane.b32.xlu1 %v3384_v60, %s3217_s14  ;;  %747 = vst.msk [vmem:[#allocation2 + $0x28] sm:$0xf] %vm251_vm2, %v456_v1  ;;  %v1043_v22 = vrot.slane %v1041_v5, 1  ;;  %v513_v33 = vshll.u32 %v385_v16, 16 }
  0x2a   : > { %v1005_v4 = vunpack.c.l.b16 %v857_v63  ;;  %342 = vst [vmem:[#allocation2 + $0x5c] sm:$0x1] %v341_v3  ;;  %v512_v32 = vrot.slane %v510_v20, 7  ;;  %v518_v34 = vshrl.u32 %v386_v31, 16  ;;  %v521_v35 = vshll.u32 %v386_v31, 16 }
  0x2b   : > { %v734_v7 = vld [vmem:[#allocation2 + $0x14] sm:$0x1]  ;;  %286 = vst [vmem:[#allocation2 + $0x54] sm:$0x1] %v285_v10  ;;  %v1044_v36 = vor.u32 %v1043_v22, %v1039_v17  ;;  %v1053_v38 = vshll.u32 %v3384_v60, 16  ;;  %v1266_v44 = vrot.slane %v3384_v60, 1 }
  0x2c   : > { %v1021_v11 = vpack.c.b16 %v1005_v4, %v1005_v4  ;;  %v3397_v13 = vld [vmem:[#allocation2 + $0x18] sm:$0xff]  ;;  %v735_v15 = vsel %vm3313_vm3, %v423_v62, %v734_v7  ;;  %vm1037_vm10 = vsmask.f32 7424  ;;  %v515_v39 = vor.u32 %v513_v33, %v512_v32  ;;  %v287_v51 = vld [vmem:[#allocation2 + $0x60] sm:$0x1] }
  0x2d   : > { %736 = vst [vmem:[#allocation2 + $0x14] sm:$0x1] %v735_v15  ;;  %v741_v18 = vld [vmem:[#allocation2 + $0x20] sm:$0x1]  ;;  %1467 = vrot.lane.b32.xlu2 %v3397_v13, %s3218_s15  ;;  %v516_v40 = vrot.slane %v512_v32, 4  ;;  %v520_v41 = vrot.slane %v518_v34, 7 }
  0x2e   : > { %v1264_v21 = vrot.slane %v1021_v11, 1  ;;  %v1046_v24 = vshll.u32 %v1021_v11, 16  ;;  %v742_v25 = vsel %vm3313_vm3, %v440_v6, %v741_v18  ;;  %v744_v26 = vld [vmem:[#allocation2 + $0x24] sm:$0xf]  ;;  %v1051_v45 = vshrl.u32 %v3384_v60, 16 }
  0x2f   : > { %743 = vst [vmem:[#allocation2 + $0x20] sm:$0x1] %v742_v25  ;;  %v745_v27 = vsel %vm3346_vm7, %v447_v8, %v744_v26  ;;  %v748_v28 = vld [vmem:[#allocation2 + $0x2c] sm:$0x1]  ;;  %v523_v48 = vor.u32 %v521_v35, %v520_v41  ;;  %v525_v49 = vrot.slane %v520_v41, 4  ;;  %v1055_v54 = vrot.slane %v1053_v38, 1 }
  0x30   : > { %v1265_v29 = vsel %vm1262_vm9, %v1263_v12, %v1264_v21  ;;  %746 = vst [vmem:[#allocation2 + $0x24] sm:$0xf] %v745_v27  ;;  %v749_v30 = vsel %vm3313_vm3, %v457_v9, %v748_v28  ;;  %v1048_v37 = vrot.slane %v1046_v24, 1  ;;  %v288_v55 = vsel %vm3313_vm3, 0, %v287_v51  ;;  %v387_v61 = vld [vmem:[%s3324_s13 + $0x38] sm:$0xf] }
  0x31   : > { %1311 = vrot.lane.b32.xlu0 %v1265_v29, %s3219_s16  ;;  %750 = vst [vmem:[#allocation2 + $0x2c] sm:$0x1] %v749_v30  ;;  %1350 = vrot.lane.b32.xlu1 %v3397_v13, %s3217_s14  ;;  %v776_v46 = vld [vmem:[#allocation2 + $0x5c] sm:$0x1]  ;;  %v524_v58 = vsel %vm3337_vm6, %v516_v40, %v523_v48  ;;  %v1065_v60 = vshll.u32 %v3397_v13, 16  ;;  %v1269_v1 = vrot.slane %v3397_v13, 1  ;;  %v1056_v7 = vor.u32 %v1055_v54, %v1051_v45 }
  0x32   : > { %v772_v42 = vld [vmem:[#allocation2 + $0x54] sm:$0xf]  ;;  %v1049_v52 = vsel %vm1037_vm10, %v1044_v36, %v1048_v37  ;;  %v777_v59 = vsel %vm3313_vm3, %v525_v49, %v776_v46  ;;  %289 = vst [vmem:[#allocation2 + $0x60] sm:$0x1] %v288_v55  ;;  %v388_v3 = vld [vmem:[%s3324_s13 + $0x3c] sm:$0xf] }
  0x33   : > { %v773_v50 = vsel %vm3346_vm7, %v515_v39, %v772_v42  ;;  %775 = vst.msk [vmem:[#allocation2 + $0x58] sm:$0xf] %vm251_vm2, %v524_v58  ;;  %v527_v4 = vshrl.u32 %v387_v61, 16  ;;  %v1063_v8 = vshrl.u32 %v3397_v13, 16  ;;  %v1067_v9 = vrot.slane %v1065_v60, 1 }
  0x34   : > { %v860_v43 = vld [vmem:[#allocation2 + $0x14] sm:$0x1]  ;;  %774 = vst [vmem:[#allocation2 + $0x54] sm:$0xf] %v773_v50  ;;  %v530_v11 = vshll.u32 %v387_v61, 16  ;;  %v535_v18 = vshrl.u32 %v388_v3, 16 }
  0x35   : > { %v1006_v47 = vunpack.c.l.b16 %v860_v43  ;;  %778 = vst [vmem:[#allocation2 + $0x5c] sm:$0x1] %v777_v59  ;;  %v529_v10 = vrot.slane %v527_v4, 7  ;;  %v275_v20 = vld [vmem:[#allocation2 + $0x30] sm:$0x1]  ;;  %v538_v25 = vshll.u32 %v388_v3, 16  ;;  %v1068_v27 = vor.u32 %v1067_v9, %v1063_v8 }
  0x36   : > { %v863_v53 = vld [vmem:[#allocation2 + $0x20] sm:$0x1]  ;;  %v3443_v24 = vrot.slane %v535_v18, 7  ;;  %v343_v26 = vld [vmem:[#allocation2 + $0x68] sm:$0x1]  ;;  %v276_v30 = vsel %vm3313_vm3, 0, %v275_v20 }
  0x37   : > { %v1022_v56 = vpack.c.b16 %v1006_v47, %v1006_v47  ;;  %v1007_v57 = vunpack.c.l.b16 %v863_v53  ;;  %v3439_v17 = vld [vmem:[#allocation2 + $0x24] sm:$0xff]  ;;  %v532_v22 = vor.u32 %v530_v11, %v529_v10  ;;  %v533_v28 = vrot.slane %v529_v10, 4  ;;  %v379_v31 = vld [vmem:[%s3324_s13 + $0x18] sm:$0xf]  ;;  %277 = vst [vmem:[#allocation2 + $0x30] sm:$0x1] %v276_v30 }
  0x38   : > { %v866_v21 = vld [vmem:[#allocation2 + $0x2c] sm:$0x1]  ;;  %v1077_v35 = vshll.u32 %v3439_v17, 16  ;;  %v296_v36 = vld [vmem:[#allocation2 + $0x84] sm:$0x1]  ;;  %v540_v37 = vor.u32 %v538_v25, %v3443_v24  ;;  %v459_v39 = vshrl.u32 %v379_v31, 16 }
  0x39   : > { %1230 = vrot.lane.b32.xlu0 %v1049_v52, %s3220_s17  ;;  %v1267_v62 = vrot.slane %v1022_v56, 1  ;;  %v1023_v63 = vpack.c.b16 %v1007_v57, %v1007_v57  ;;  %v1058_v2 = vshll.u32 %v1022_v56, 16  ;;  %v779_v13 = vld [vmem:[#allocation2 + $0x60] sm:$0xf]  ;;  %v1008_v34 = vunpack.c.l.b16 %v866_v21  ;;  %v380_v38 = vld [vmem:[%s3324_s13 + $0x1c] sm:$0xf] }
  0x3a   : > { %v780_v29 = vsel %vm3346_vm7, %v532_v22, %v779_v13  ;;  %v344_v40 = vsel %vm3352_vm8, 0, %v343_v26  ;;  %v462_v41 = vshll.u32 %v379_v31, 16  ;;  %v467_v42 = vshrl.u32 %v380_v38, 16  ;;  %v352_v43 = vld [vmem:[#allocation2 + $0x8c] sm:$0x1] }
  0x3b   : > { %v1268_v5 = vsel %vm1262_vm9, %v1266_v44, %v1267_v62  ;;  %v1270_v6 = vrot.slane %v1023_v63, 1  ;;  %v1060_v15 = vrot.slane %v1058_v2, 1  ;;  %v1070_v16 = vshll.u32 %v1023_v63, 16  ;;  %781 = vst [vmem:[#allocation2 + $0x60] sm:$0xf] %v780_v29  ;;  %v3492_v13 = vld [vmem:[#allocation2 + $0x54] sm:$0xff] }
  0x3c   : > { %1430 = vrot.lane.b32.xlu2 %v1268_v5, %s3221_s18  ;;  %345 = vst [vmem:[#allocation2 + $0x68] sm:$0x1] %v344_v40  ;;  %v541_v44 = vsel %vm3337_vm6, %v533_v28, %v540_v37  ;;  %v461_v45 = vrot.slane %v459_v39, 7  ;;  %v470_v46 = vshll.u32 %v380_v38, 16  ;;  %v393_v47 = vld [vmem:[%s3324_s13 + $0x50] sm:$0xf]  ;;  %v3465_v50 = vpack.c.b16 %v1008_v34, %v1008_v34 }
  0x3d   : > { %v3437_v12 = vsel %vm1262_vm9, %v1269_v1, %v1270_v6  ;;  %v1061_v32 = vsel %vm1037_vm10, %v1056_v7, %v1060_v15  ;;  %v1072_v33 = vrot.slane %v1070_v16, 1  ;;  %v394_v48 = vld [vmem:[%s3324_s13 + $0x54] sm:$0xf]  ;;  %v1075_v51 = vshrl.u32 %v3439_v17, 16  ;;  %782 = vst.msk [vmem:[#allocation2 + $0x64] sm:$0xf] %vm251_vm2, %v541_v44 }
  0x3e   : > { %1549 = vrot.lane.b32.xlu1 %v3437_v12, %s3222_s19  ;;  %v3469_v52 = vrot.slane %v467_v42, 7  ;;  %v331_v53 = vld [vmem:[#allocation2 + $0x38] sm:$0x1]  ;;  %v464_v54 = vor.u32 %v462_v41, %v461_v45  ;;  %v465_v55 = vrot.slane %v461_v45, 4  ;;  %v297_v56 = vsel %vm3313_vm3, 0, %v296_v36 }
  0x3f   : > { %v3463_v49 = vsel %vm1037_vm10, %v1068_v27, %v1072_v33  ;;  %v353_v57 = vsel %vm3352_vm8, 0, %v352_v43  ;;  %v1079_v58 = vrot.slane %v1077_v35, 1  ;;  %v542_v60 = vrot.slane %v3443_v24, 4  ;;  %298 = vst [vmem:[#allocation2 + $0x84] sm:$0x1] %v297_v56 }
  0x40   : > { %v472_v59 = vor.u32 %v470_v46, %v3469_v52  ;;  %v578_v61 = vshrl.u32 %v393_v47, 16  ;;  %v878_v62 = vld [vmem:[#allocation2 + $0x5c] sm:$0x1]  ;;  %354 = vst [vmem:[#allocation2 + $0x8c] sm:$0x1] %v353_v57  ;;  %v581_v63 = vshll.u32 %v393_v47, 16 }
  0x41   : > { %1313 = vrot.lane.b32.xlu0 %v1268_v5, %s3219_s16  ;;  %v586_v1 = vshrl.u32 %v394_v48, 16  ;;  %v589_v2 = vshll.u32 %v394_v48, 16  ;;  %v332_v3 = vsel %vm3352_vm8, 0, %v331_v53  ;;  %v1082_v4 = vshll.u32 %v3465_v50, 16  ;;  %v751_v6 = vld [vmem:[#allocation2 + $0x30] sm:$0xf] }
  0x42   : > { %v473_v5 = vsel %vm3337_vm6, %v465_v55, %v472_v59  ;;  %v580_v7 = vrot.slane %v578_v61, 7  ;;  %333 = vst [vmem:[#allocation2 + $0x38] sm:$0x1] %v332_v3  ;;  %v752_v8 = vsel %vm3346_vm7, %v464_v54, %v751_v6  ;;  %v1080_v21 = vor.u32 %v1079_v58, %v1075_v51  ;;  %v299_v28 = vld [vmem:[#allocation2 + $0x90] sm:$0x1] }
  0x43   : > { %754 = vst.msk [vmem:[#allocation2 + $0x34] sm:$0xf] %vm251_vm2, %v473_v5  ;;  %v783_v9 = vld [vmem:[#allocation2 + $0x68] sm:$0x1]  ;;  %v588_v10 = vrot.slane %v586_v1, 7  ;;  %v1084_v22 = vrot.slane %v1082_v4, 1  ;;  %v1012_v24 = vunpack.c.l.b16 %v878_v62 }
  0x44   : > { %1232 = vrot.lane.b32.xlu2 %v1061_v32, %s3220_s17  ;;  %753 = vst [vmem:[#allocation2 + $0x30] sm:$0xf] %v752_v8  ;;  %v784_v11 = vsel %vm3313_vm3, %v542_v60, %v783_v9  ;;  %v583_v15 = vor.u32 %v581_v63, %v580_v7  ;;  %v584_v16 = vrot.slane %v580_v7, 4  ;;  %v474_v25 = vrot.slane %v3469_v52, 4  ;;  %v355_v29 = vld [vmem:[#allocation2 + $0x98] sm:$0x1] }
  0x45   : > { %785 = vst [vmem:[#allocation2 + $0x68] sm:$0x1] %v784_v11  ;;  %v591_v18 = vor.u32 %v589_v2, %v588_v10  ;;  %v593_v20 = vrot.slane %v588_v10, 4  ;;  %v1272_v33 = vrot.slane %v3439_v17, 1  ;;  %v3510_v37 = vsel %vm1037_vm10, %v1080_v21, %v1084_v22  ;;  %v395_v41 = vld [vmem:[%s3324_s13 + $0x58] sm:$0xf] }
  0x46   : > { %1395 = vrot.lane.b32.xlu1 %v1061_v32, %s3223_s20  ;;  %v800_v27 = vld [vmem:[#allocation2 + $0x84] sm:$0xf]  ;;  %v290_v32 = vld [vmem:[#allocation2 + $0x6c] sm:$0x1]  ;;  %v3512_v38 = vpack.c.b16 %v1012_v24, %v1012_v24  ;;  %v300_v40 = vsel %vm3313_vm3, 0, %v299_v28  ;;  %v1273_v42 = vrot.slane %v3465_v50, 1 }
  0x47   : > { %v592_v26 = vsel %vm3337_vm6, %v584_v16, %v591_v18  ;;  %v801_v30 = vsel %vm3346_vm7, %v583_v15, %v800_v27  ;;  %v804_v31 = vld [vmem:[#allocation2 + $0x8c] sm:$0x1]  ;;  %v291_v36 = vsel %vm3313_vm3, 0, %v290_v32  ;;  %v1125_v43 = vshll.u32 %v3492_v13, 16  ;;  %v389_v44 = vld [vmem:[%s3324_s13 + $0x40] sm:$0xf] }
  0x48   : > { %803 = vst.msk [vmem:[#allocation2 + $0x88] sm:$0xf] %vm251_vm2, %v592_v26  ;;  %v805_v34 = vsel %vm3313_vm3, %v593_v20, %v804_v31  ;;  %v390_v45 = vld [vmem:[%s3324_s13 + $0x44] sm:$0xf]  ;;  %v595_v46 = vshrl.u32 %v395_v41, 16  ;;  %v356_v47 = vsel %vm3352_vm8, 0, %v355_v29  ;;  %v3531_v53 = vsel %vm1262_vm9, %v1272_v33, %v1273_v42 }
  0x49   : > { %1514 = vrot.lane.b32.xlu0 %v3463_v49, %s3224_s26  ;;  %802 = vst [vmem:[#allocation2 + $0x84] sm:$0xf] %v801_v30  ;;  %v755_v35 = vld [vmem:[#allocation2 + $0x38] sm:$0x1]  ;;  %v544_v48 = vshrl.u32 %v389_v44, 16  ;;  %v1130_v51 = vshll.u32 %v3512_v38, 16 }
  0x4a   : > { %806 = vst [vmem:[#allocation2 + $0x8c] sm:$0x1] %v805_v34  ;;  %v756_v39 = vsel %vm3313_vm3, %v474_v25, %v755_v35  ;;  %v547_v52 = vshll.u32 %v389_v44, 16  ;;  %v552_v50 = vshrl.u32 %v390_v45, 16  ;;  %v1123_v54 = vshrl.u32 %v3492_v13, 16  ;;  %v3541_v7 = vld [vmem:[#allocation2 + $0x60] sm:$0xff] }
  0x4b   : > { %757 = vst [vmem:[#allocation2 + $0x38] sm:$0x1] %v756_v39  ;;  %v1127_v55 = vrot.slane %v1125_v43, 1  ;;  %v546_v56 = vrot.slane %v544_v48, 7  ;;  %v555_v58 = vshll.u32 %v390_v45, 16  ;;  %v597_v60 = vrot.slane %v595_v46, 7 }
  0x4c   : > { %1397 = vrot.lane.b32.xlu2 %v3463_v49, %s3223_s20  ;;  %292 = vst [vmem:[#allocation2 + $0x6c] sm:$0x1] %v291_v36  ;;  %v3534_v57 = vrot.slane %v552_v50, 7  ;;  %v396_v59 = vld [vmem:[%s3324_s13 + $0x5c] sm:$0xf]  ;;  %v598_v62 = vshll.u32 %v395_v41, 16 }
  0x4d   : > { %301 = vst [vmem:[#allocation2 + $0x90] sm:$0x1] %v300_v40  ;;  %v549_v61 = vor.u32 %v547_v52, %v546_v56  ;;  %v1132_v63 = vrot.slane %v1130_v51, 1  ;;  %v1128_v1 = vor.u32 %v1127_v55, %v1123_v54  ;;  %v881_v2 = vld [vmem:[#allocation2 + $0x68] sm:$0x1]  ;;  %v550_v3 = vrot.slane %v546_v56, 4 }
  0x4e   : > { %1469 = vrot.lane.b32.xlu1 %v3439_v17, %s3218_s15  ;;  %357 = vst [vmem:[#allocation2 + $0x98] sm:$0x1] %v356_v47  ;;  %v603_v5 = vshrl.u32 %v396_v59, 16  ;;  %v1285_v6 = vrot.slane %v3512_v38, 1  ;;  %v557_v8 = vor.u32 %v555_v58, %v3534_v57  ;;  %v601_v10 = vrot.slane %v597_v60, 4  ;;  %v3574_v42 = vld [vmem:[#allocation2 + $0x30] sm:$0xff] }
  0x4f   : > { %v600_v11 = vor.u32 %v598_v62, %v597_v60  ;;  %v346_v16 = vld [vmem:[#allocation2 + $0x74] sm:$0x1]  ;;  %v1013_v18 = vunpack.c.l.b16 %v881_v2  ;;  %v302_v24 = vld [vmem:[#allocation2 + $0x9c] sm:$0x1]  ;;  %v3553_v25 = vsel %vm1037_vm10, %v1128_v1, %v1132_v63  ;;  %v606_v26 = vshll.u32 %v396_v59, 16 }
  0x50   : > { %v558_v22 = vsel %vm3337_vm6, %v550_v3, %v557_v8  ;;  %v397_v27 = vld [vmem:[%s3324_s13 + $0x60] sm:$0xf]  ;;  %v1137_v28 = vshll.u32 %v3541_v7, 16  ;;  %v347_v31 = vsel %vm3352_vm8, 0, %v346_v16  ;;  %v398_v32 = vld [vmem:[%s3324_s13 + $0x64] sm:$0xf] }
  0x51   : > { %1432 = vrot.lane.b32.xlu0 %v3437_v12, %s3221_s18  ;;  %v890_v20 = vld [vmem:[#allocation2 + $0x8c] sm:$0x1]  ;;  %789 = vst.msk [vmem:[#allocation2 + $0x70] sm:$0xf] %vm251_vm2, %v558_v22  ;;  %v3566_v33 = vld [vmem:[#allocation2 + $0x84] sm:$0xff]  ;;  %v3570_v38 = vpack.c.b16 %v1013_v18, %v1013_v18  ;;  %v303_v40 = vsel %vm3313_vm3, 0, %v302_v24 }
  0x52   : > { %v869_v21 = vld [vmem:[#allocation2 + $0x38] sm:$0x1]  ;;  %v358_v36 = vld [vmem:[#allocation2 + $0xa4] sm:$0x1]  ;;  %v1016_v39 = vunpack.c.l.b16 %v890_v20  ;;  %348 = vst [vmem:[#allocation2 + $0x74] sm:$0x1] %v347_v31 }
  0x53   : > { %v786_v4 = vld [vmem:[#allocation2 + $0x6c] sm:$0xf]  ;;  %v612_v41 = vshrl.u32 %v397_v27, 16  ;;  %v1009_v43 = vunpack.c.l.b16 %v869_v21  ;;  %304 = vst [vmem:[#allocation2 + $0x9c] sm:$0x1] %v303_v40  ;;  %v615_v46 = vshll.u32 %v397_v27, 16 }
  0x54   : > { %1516 = vrot.lane.b32.xlu2 %v3510_v37, %s3224_s26  ;;  %v787_v9 = vsel %vm3346_vm7, %v549_v61, %v786_v4  ;;  %v807_v15 = vld [vmem:[#allocation2 + $0x90] sm:$0xf]  ;;  %v620_v48 = vshrl.u32 %v398_v32, 16  ;;  %v623_v51 = vshll.u32 %v398_v32, 16  ;;  %v359_v52 = vsel %vm3352_vm8, 0, %v358_v36 }
  0x55   : > { %788 = vst [vmem:[#allocation2 + $0x6c] sm:$0xf] %v787_v9  ;;  %v808_v29 = vsel %vm3346_vm7, %v600_v11, %v807_v15  ;;  %v811_v30 = vld [vmem:[#allocation2 + $0x98] sm:$0x1]  ;;  %v614_v47 = vrot.slane %v612_v41, 7  ;;  %v1173_v50 = vshll.u32 %v3566_v33, 16  ;;  %v3586_v54 = vpack.c.b16 %v1016_v39, %v1016_v39 }
  0x56   : > { %1234 = vrot.lane.b32.xlu1 %v3463_v49, %s3220_s17  ;;  %v1284_v49 = vrot.slane %v3492_v13, 1  ;;  %809 = vst [vmem:[#allocation2 + $0x90] sm:$0xf] %v808_v29  ;;  %v559_v55 = vrot.slane %v3534_v57, 4  ;;  %v622_v58 = vrot.slane %v620_v48, 7  ;;  %v1135_v59 = vshrl.u32 %v3541_v7, 16 }
  0x57   : > { %v618_v56 = vrot.slane %v614_v47, 4  ;;  %360 = vst [vmem:[#allocation2 + $0xa4] sm:$0x1] %v359_v52  ;;  %v1139_v60 = vrot.slane %v1137_v28, 1  ;;  %v1142_v61 = vshll.u32 %v3570_v38, 16  ;;  %v617_v62 = vor.u32 %v615_v46, %v614_v47 }
  0x58   : > { %v1025_v63 = vpack.c.b16 %v1009_v43, %v1009_v43  ;;  %v625_v1 = vor.u32 %v623_v51, %v622_v58  ;;  %v1171_v2 = vshrl.u32 %v3566_v33, 16  ;;  %v1175_v3 = vrot.slane %v1173_v50, 1 }
  0x59   : > { %1551 = vrot.lane.b32.xlu0 %v3531_v53, %s3222_s19  ;;  %v790_v57 = vld [vmem:[#allocation2 + $0x74] sm:$0x1]  ;;  %v1178_v4 = vshll.u32 %v3586_v54, 16  ;;  %v627_v9 = vrot.slane %v622_v58, 4  ;;  %v1144_v11 = vrot.slane %v1142_v61, 1  ;;  %v1087_v16 = vshrl.u32 %v3574_v42, 16 }
  0x5a   : > { %v814_v8 = vld [vmem:[#allocation2 + $0x9c] sm:$0xf]  ;;  %v1094_v20 = vshll.u32 %v1025_v63, 16  ;;  %v1176_v22 = vor.u32 %v1175_v3, %v1171_v2  ;;  %v1287_v32 = vrot.slane %v3541_v7, 1  ;;  %v1296_v41 = vrot.slane %v3566_v33, 1 }
  0x5b   : > { %v815_v15 = vsel %vm3346_vm7, %v617_v62, %v814_v8  ;;  %v1180_v24 = vrot.slane %v1178_v4, 1  ;;  %v1297_v43 = vrot.slane %v3586_v54, 1  ;;  %v1275_v46 = vrot.slane %v3574_v42, 1  ;;  %v278_v62 = vld [vmem:[#allocation2 + $0x3c] sm:$0x1] }
  0x5c   : > { %1315 = vrot.lane.b32.xlu2 %v3437_v12, %s3219_s16  ;;  %v605_v12 = vrot.slane %v603_v5, 7  ;;  %v791_v5 = vsel %vm3313_vm3, %v559_v55, %v790_v57  ;;  %816 = vst [vmem:[#allocation2 + $0x9c] sm:$0xf] %v815_v15  ;;  %v1096_v28 = vrot.slane %v1094_v20, 1  ;;  %v3629_v40 = vld [vmem:[#allocation2 + $0x6c] sm:$0xff]  ;;  %v1276_v47 = vrot.slane %v1025_v63, 1 }
  0x5d   : > { %792 = vst [vmem:[#allocation2 + $0x74] sm:$0x1] %v791_v5  ;;  %v1149_v48 = vshll.u32 %v3629_v40, 16  ;;  %v3646_v51 = vsel %vm1262_vm9, %v1296_v41, %v1297_v43  ;;  %v1147_v58 = vshrl.u32 %v3629_v40, 16  ;;  %v334_v63 = vld [vmem:[#allocation2 + $0x44] sm:$0x1] }
  0x5e   : > { %1352 = vrot.lane.b32.xlu1 %v3439_v17, %s3217_s14  ;;  %v3564_v17 = vsel %vm1262_vm9, %v1284_v49, %v1285_v6  ;;  %v608_v34 = vor.u32 %v606_v26, %v605_v12  ;;  %v610_v35 = vrot.slane %v605_v12, 4  ;;  %v1089_v49 = vshll.u32 %v3574_v42, 16  ;;  %v818_v21 = vld [vmem:[#allocation2 + $0xa4] sm:$0x1]  ;;  %v381_v5 = vld [vmem:[%s3324_s13 + $0x20] sm:$0xf] }
  0x5f   : > { %v626_v6 = vsel %vm3337_vm6, %v618_v56, %v625_v1  ;;  %v819_v12 = vsel %vm3313_vm3, %v627_v9, %v818_v21  ;;  %v3651_v56 = vsel %vm1262_vm9, %v1275_v46, %v1276_v47  ;;  %v279_v2 = vsel %vm3313_vm3, 0, %v278_v62  ;;  %v850_v46 = vld [vmem:[%s4993_s1 + $0x20] sm:$0xf] }
  0x60   : > { %v609_v44 = vsel %vm3337_vm6, %v601_v10, %v608_v34  ;;  %v812_v45 = vsel %vm3313_vm3, %v610_v35, %v811_v30  ;;  %v1140_v10 = vor.u32 %v1139_v60, %v1135_v59  ;;  %v1091_v18 = vrot.slane %v1089_v49, 1  ;;  %817 = vst.msk [vmem:[#allocation2 + $0xa0] sm:$0xf] %vm251_vm2, %v626_v6  ;;  %v382_v6 = vld [vmem:[%s3324_s13 + $0x24] sm:$0xf] }
  0x61   : > { %1244 = vrot.lane.b32.xlu0 %v3553_v25, %s3220_s17  ;;  %810 = vst.msk [vmem:[#allocation2 + $0x94] sm:$0xf] %vm251_vm2, %v609_v44  ;;  %v3618_v30 = vsel %vm1037_vm10, %v1176_v22, %v1180_v24  ;;  %v1288_v34 = vrot.slane %v3570_v38, 1  ;;  %v1151_v59 = vrot.slane %v1149_v48, 1  ;;  %v335_v3 = vsel %vm3352_vm8, 0, %v334_v63 }
  0x62   : > { %813 = vst [vmem:[#allocation2 + $0x98] sm:$0x1] %v812_v45  ;;  %v3613_v26 = vsel %vm1037_vm10, %v1140_v10, %v1144_v11  ;;  %v1092_v27 = vor.u32 %v1091_v18, %v1087_v16  ;;  %v476_v8 = vshrl.u32 %v381_v5, 16  ;;  %v484_v9 = vshrl.u32 %v382_v6, 16 }
  0x63   : > { %820 = vst [vmem:[#allocation2 + $0xa4] sm:$0x1] %v819_v12  ;;  %v1152_v11 = vor.u32 %v1151_v59, %v1147_v58  ;;  %v479_v18 = vshll.u32 %v381_v5, 16  ;;  %v487_v21 = vshll.u32 %v382_v6, 16  ;;  %v1290_v22 = vrot.slane %v3629_v40, 1 }
  0x64   : > { %1325 = vrot.lane.b32.xlu2 %v3564_v17, %s3219_s16  ;;  %v3625_v36 = vsel %vm1037_vm10, %v1092_v27, %v1096_v28  ;;  %v884_v39 = vld [vmem:[#allocation2 + $0x74] sm:$0x1]  ;;  %280 = vst [vmem:[#allocation2 + $0x3c] sm:$0x1] %v279_v2  ;;  %v478_v16 = vrot.slane %v476_v8, 7  ;;  %v486_v20 = vrot.slane %v484_v9, 7 }
  0x65   : > { %v1014_v45 = vunpack.c.l.b16 %v884_v39  ;;  %336 = vst [vmem:[#allocation2 + $0x44] sm:$0x1] %v335_v3  ;;  %vm1908_vm11 = vcmask 1043456   ;;  %v391_v6 = vld [vmem:[%s3324_s13 + $0x48] sm:$0xf]  ;;  %vm1581_vm12 = vcmask 64512  }
  0x66   : > { %1362 = vrot.lane.b32.xlu1 %v3541_v7, %s3217_s14  ;;  %v3637_v7 = vsel %vm1262_vm9, %v1287_v32, %v1288_v34  ;;  %v481_v28 = vor.u32 %v479_v18, %v478_v16  ;;  %v489_v32 = vor.u32 %v487_v21, %v486_v20  ;;  %v491_v34 = vrot.slane %v486_v20, 4  ;;  %v2921_v18 = vld [vmem:[%s4993_s1 + $0x10] sm:$0xff] }
  0x67   : > { %v1030_v55 = vpack.c.b16 %v1014_v45, %v1014_v45  ;;  %v3662_v57 = vld [vmem:[#allocation2 + $0x9c] sm:$0xff]  ;;  %v564_v21 = vshll.u32 %v391_v6, 16  ;;  %vm1614_vm13 = vcmask 130048   ;;  %vm1647_vm14 = vcmask 195584  }
  0x68   : > { %v3620_v31 = vld [vmem:[#allocation2 + $0x90] sm:$0xff]  ;;  %v1197_v27 = vshll.u32 %v3662_v57, 16  ;;  %v1195_v45 = vshrl.u32 %v3662_v57, 16  ;;  %v1302_v9 = vrot.slane %v3662_v57, 1  ;;  %vm1713_vm15 = vcmask 326656  }
  0x69   : > { %1399 = vrot.lane.b32.xlu0 %v3510_v37, %s3223_s20  ;;  %v893_v29 = vld [vmem:[#allocation2 + $0x98] sm:$0x1]  ;;  %v1185_v44 = vshll.u32 %v3620_v31, 16  ;;  %v1183_v52 = vshrl.u32 %v3620_v31, 16  ;;  %v1154_v1 = vshll.u32 %v1030_v55, 16  ;;  %v1291_v24 = vrot.slane %v1030_v55, 1 }
  0x6a   : > { %v1017_v35 = vunpack.c.l.b16 %v893_v29  ;;  %v896_v61 = vld [vmem:[#allocation2 + $0xa4] sm:$0x1]  ;;  %v482_v29 = vrot.slane %v478_v16, 4  ;;  %v1299_v55 = vrot.slane %v3620_v31, 1  ;;  %vm1680_vm0 = vcmask 261120  }
  0x6b   : > { %v1187_v50 = vrot.slane %v1185_v44, 1  ;;  %v1018_v4 = vunpack.c.l.b16 %v896_v61  ;;  %v1156_v15 = vrot.slane %v1154_v1, 1  ;;  %v758_v39 = vld [vmem:[#allocation2 + $0x3c] sm:$0xf]  ;;  %v3695_v48 = vsel %vm1262_vm9, %v1290_v22, %v1291_v24  ;;  %v293_v1 = vld [vmem:[#allocation2 + $0x78] sm:$0x1] }
  0x6c   : > { %1434 = vrot.lane.b32.xlu2 %v3531_v53, %s3221_s18  ;;  %v3639_v38 = vpack.c.b16 %v1017_v35, %v1017_v35  ;;  %v490_v41 = vsel %vm3337_vm6, %v482_v29, %v489_v32  ;;  %v759_v43 = vsel %vm3346_vm7, %v481_v28, %v758_v39  ;;  %v762_v44 = vld [vmem:[#allocation2 + $0x44] sm:$0x1]  ;;  %v294_v3 = vsel %vm3313_vm3, 0, %v293_v1  ;;  %v2920_v28 = vld [vmem:[%s4993_s1 + $0x8] sm:$0xff] }
  0x6d   : > { %v1188_v60 = vor.u32 %v1187_v50, %v1183_v52  ;;  %v3674_v12 = vpack.c.b16 %v1018_v4, %v1018_v4  ;;  %v3680_v35 = vsel %vm1037_vm10, %v1152_v11, %v1156_v15  ;;  %760 = vst [vmem:[#allocation2 + $0x3c] sm:$0xf] %v759_v43  ;;  %v763_v47 = vsel %vm3313_vm3, %v491_v34, %v762_v44  ;;  %v392_v4 = vld [vmem:[%s3324_s13 + $0x4c] sm:$0xf] }
  0x6e   : > { %1471 = vrot.lane.b32.xlu1 %v3574_v42, %s3218_s15  ;;  %v1190_v54 = vshll.u32 %v3639_v38, 16  ;;  %v1199_v52 = vrot.slane %v1197_v27, 1  ;;  %761 = vst.msk [vmem:[#allocation2 + $0x40] sm:$0xf] %vm251_vm2, %v490_v41  ;;  %v1300_v58 = vrot.slane %v3639_v38, 1  ;;  %v2922_v38 = vld [vmem:[%s4993_s1 + $0x18] sm:$0xff] }
  0x6f   : > { %v1202_v50 = vshll.u32 %v3674_v12, 16  ;;  %764 = vst [vmem:[#allocation2 + $0x44] sm:$0x1] %v763_v47  ;;  %v569_v8 = vshrl.u32 %v392_v4, 16  ;;  %v1303_v11 = vrot.slane %v3674_v12, 1  ;;  %v561_v15 = vshrl.u32 %v391_v6, 16 }
  0x70   : > { %v1192_v49 = vrot.slane %v1190_v54, 1  ;;  %v1865_v54 = vunpack.c.l.b16 %v850_v46  ;;  %v1200_v61 = vor.u32 %v1199_v52, %v1195_v45  ;;  %295 = vst [vmem:[#allocation2 + $0x78] sm:$0x1] %v294_v3  ;;  %v572_v22 = vshll.u32 %v392_v4, 16  ;;  %v2919_v46 = vld [vmem:[%s4993_s1] sm:$0xff] }
  0x71   : > { %1409 = vrot.lane.b32.xlu0 %v3613_v26, %s3223_s20  ;;  %v1204_v62 = vrot.slane %v1202_v50, 1  ;;  %v571_v16 = vrot.slane %v569_v8, 7  ;;  %v563_v20 = vrot.slane %v561_v15, 7  ;;  %v3736_v12 = vsel %vm1262_vm9, %v1302_v9, %v1303_v11  ;;  %v337_v47 = vld [vmem:[#allocation2 + $0x50] sm:$0x1] }
  0x72   : > { %v3669_v10 = vsel %vm1037_vm10, %v1188_v60, %v1192_v49  ;;  %v1870_v59 = vpack.c.b16 %v1865_v54, %v1865_v54  ;;  %v349_v49 = vld [vmem:[#allocation2 + $0x80] sm:$0x1]  ;;  %v281_v50 = vld [vmem:[#allocation2 + $0x48] sm:$0x1]  ;;  %v361_v6 = vld [vmem:[#allocation2 + $0xb0] sm:$0x1] }
  0x73   : > { %v350_v2 = vsel %vm3352_vm8, 0, %v349_v49  ;;  %v3721_v5 = vsel %vm1037_vm10, %v1200_v61, %v1204_v62  ;;  %v576_v24 = vrot.slane %v571_v16, 4  ;;  %v567_v29 = vrot.slane %v563_v20, 4 }
  0x74   : > { %1252 = vrot.lane.b32.xlu2 %v3618_v30, %s3220_s17  ;;  %v1910_v63 = vsel %vm1908_vm11, %v1870_v59, 0  ;;  %351 = vst [vmem:[#allocation2 + $0x80] sm:$0x1] %v350_v2  ;;  %v566_v34 = vor.u32 %v564_v21, %v563_v20  ;;  %v574_v39 = vor.u32 %v572_v22, %v571_v16  ;;  %v282_v54 = vsel %vm3313_vm3, 0, %v281_v50  ;;  %v383_v59 = vld [vmem:[%s3324_s13 + $0x28] sm:$0xf] }
  0x75   : > { %1915 = vmatpush.bf16.msra.mxu0 %v1910_v63  ;;  %2942 = vmatpush.bf16.msra.mxu2 %v1910_v63  ;;  %283 = vst [vmem:[#allocation2 + $0x48] sm:$0x1] %v282_v54  ;;  %v493_v62 = vshrl.u32 %v383_v59, 16  ;;  %v496_v2 = vshll.u32 %v383_v59, 16  ;;  %v305_v16 = vld [vmem:[#allocation2 + $0xa8] sm:$0x1] }
  0x76   : > { %1518 = vrot.lane.b32.xlu1 %v3625_v36, %s3224_s26  ;;  %2943 = vmatpush.bf16.msra.mxu3 %v1910_v63  ;;  %vm1746_vm1 = vcmask 392192   ;;  %vm1779_vm4 = vcmask 457728   ;;  %vm1812_vm5 = vcmask 523264   ;;  %vm1875_vm11 = vcmask 588800  }
  0x77   : > { %2941 = vmatpush.bf16.msra.mxu1 %v1910_v63  ;;  %v793_v41 = vld [vmem:[#allocation2 + $0x78] sm:$0xf]  ;;  %v495_v1 = vrot.slane %v493_v62, 7 }
  0x78   : > { %v794_v44 = vsel %vm3346_vm7, %v566_v34, %v793_v41  ;;  %v399_v41 = vld [vmem:[%s3324_s13 + $0x68] sm:$0xf] }
  0x79   : > { %1444 = vrot.lane.b32.xlu0 %v3637_v7, %s3221_s18  ;;  %1916 = vmatpush.bf16.msra.mxu0 %v2922_v38  ;;  %795 = vst [vmem:[#allocation2 + $0x78] sm:$0xf] %v794_v44  ;;  %v499_v15 = vrot.slane %v495_v1, 4  ;;  %v498_v21 = vor.u32 %v496_v2, %v495_v1 }
  0x7a   : > { %2945 = vmatpush.bf16.msra.mxu2 %v2922_v38  ;;  %2946 = vmatpush.bf16.msra.mxu3 %v2922_v38 }
  0x7b   : > { %2944 = vmatpush.bf16.msra.mxu1 %v2922_v38  ;;  %v797_v32 = vld [vmem:[#allocation2 + $0x80] sm:$0x1] }
  0x7c   : > { %1333 = vrot.lane.b32.xlu2 %v3646_v51, %s3219_s16  ;;  %v798_v43 = vsel %vm3313_vm3, %v576_v24, %v797_v32  ;;  %v765_v24 = vld [vmem:[#allocation2 + $0x48] sm:$0xf] }
  0x7d   : > { %1917 = vmatpush.bf16.msra.mxu0 %v2921_v18  ;;  %799 = vst [vmem:[#allocation2 + $0x80] sm:$0x1] %v798_v43  ;;  %v766_v34 = vsel %vm3346_vm7, %v498_v21, %v765_v24  ;;  %v3141_v21 = vld [vmem:[#allocation2] sm:$0xff] }
  0x7e   : > { %1553 = vrot.lane.b32.xlu1 %v3651_v56, %s3222_s19  ;;  %2948 = vmatpush.bf16.msra.mxu2 %v2921_v18  ;;  %767 = vst [vmem:[#allocation2 + $0x48] sm:$0xf] %v766_v34 }
  0x7f   : > { %2949 = vmatpush.bf16.msra.mxu3 %v2921_v18  ;;  %2947 = vmatpush.bf16.msra.mxu1 %v2921_v18  ;;  %v362_v18 = vsel %vm3352_vm8, 0, %v361_v6 }
  0x80   : > { %363 = vst [vmem:[#allocation2 + $0xb0] sm:$0x1] %v362_v18 }
  0x81   : > { %1481 = vrot.lane.b32.xlu0 %v3629_v40, %s3218_s15  ;;  %1918 = vmatpush.bf16.msra.mxu0 %v2920_v28 }
  0x82   : > { %2951 = vmatpush.bf16.msra.mxu2 %v2920_v28 }
  0x83   : > { %2952 = vmatpush.bf16.msra.mxu3 %v2920_v28  ;;  %2950 = vmatpush.bf16.msra.mxu1 %v2920_v28  ;;  %v306_v28 = vsel %vm3313_vm3, 0, %v305_v16 }
  0x84   : > { %1370 = vrot.lane.b32.xlu2 %v3620_v31, %s3217_s14  ;;  %v3708_v31 = vsel %vm1262_vm9, %v1299_v55, %v1300_v58  ;;  %v872_v55 = vld [vmem:[#allocation2 + $0x44] sm:$0x1]  ;;  %v384_v58 = vld [vmem:[%s3324_s13 + $0x2c] sm:$0xf]  ;;  %307 = vst [vmem:[#allocation2 + $0xa8] sm:$0x1] %v306_v28 }
  0x85   : > { %1919 = vmatpush.bf16.msra.mxu0 %v2919_v46  ;;  %v501_v61 = vshrl.u32 %v384_v58, 16  ;;  %v1010_v49 = vunpack.c.l.b16 %v872_v55  ;;  %v504_v3 = vshll.u32 %v384_v58, 16  ;;  %v632_v55 = vshll.u32 %v399_v41, 16 }
  0x86   : > { %1417 = vrot.lane.b32.xlu1 %v3669_v10, %s3223_s20  ;;  %2954 = vmatpush.bf16.msra.mxu2 %v2919_v46 }
  0x87   : > { %v3703_v60 = vpop.permute.xlu2 %1467  ;;  %2955 = vmatpush.bf16.msra.mxu3 %v2919_v46  ;;  %2953 = vmatpush.bf16.msra.mxu1 %v2919_v46  ;;  %v503_v38 = vrot.slane %v501_v61, 7  ;;  %v3784_v20 = vpack.c.b16 %v1010_v49, %v1010_v49  ;;  %v629_v46 = vshrl.u32 %v399_v41, 16 }
  0x89   : > { %1528 = vrot.lane.b32.xlu0 %v3680_v35, %s3224_s26  ;;  %v508_v4 = vrot.slane %v503_v38, 4  ;;  %v506_v22 = vor.u32 %v504_v3, %v503_v38  ;;  %v1106_v50 = vshll.u32 %v3784_v20, 16  ;;  %v825_v38 = vld [vmem:[#allocation2 + $0xb0] sm:$0x1]  ;;  %v1279_v41 = vrot.slane %v3784_v20, 1 }
  0x8b   : > { %v507_v32 = vsel %vm3337_vm6, %v499_v15, %v506_v22  ;;  %v1108_v1 = vrot.slane %v1106_v50, 1  ;;  %v887_v15 = vld [vmem:[#allocation2 + $0x80] sm:$0x1] }
  0x8c   : > { %1563 = vrot.lane.b32.xlu2 %v3695_v48, %s3222_s19  ;;  %768 = vst.msk [vmem:[#allocation2 + $0x4c] sm:$0xf] %vm251_vm2, %v507_v32 }
  0x8e   : > { %1489 = vrot.lane.b32.xlu1 %v3662_v57, %s3218_s15 }
  0x91   : > { %1452 = vrot.lane.b32.xlu0 %v3708_v31, %s3221_s18 }
  0x94   : > { %1536 = vrot.lane.b32.xlu2 %v3721_v5, %s3224_s26 }
  0x96   : > { %v3731_v27 = vpop.permute.xlu2 %1430  ;;  %1236 = vrot.lane.b32.xlu1 %v3510_v37, %s3220_s17  ;;  %v575_v37 = vsel %vm3337_vm6, %v567_v29, %v574_v39  ;;  %v400_v29 = vld [vmem:[%s3324_s13 + $0x6c] sm:$0xf] }
  0x97   : > { %796 = vst.msk [vmem:[#allocation2 + $0x7c] sm:$0xf] %vm251_vm2, %v575_v37  ;;  %v637_v43 = vshrl.u32 %v400_v29, 16  ;;  %v640_v58 = vshll.u32 %v400_v29, 16  ;;  %v1015_v29 = vunpack.c.l.b16 %v887_v15 }
  0x99   : > { %1571 = vrot.lane.b32.xlu0 %v3736_v12, %s3222_s19  ;;  %v639_v54 = vrot.slane %v637_v43, 7  ;;  %v1031_v43 = vpack.c.b16 %v1015_v29, %v1015_v29 }
  0x9b   : > { %v3752_v45 = vpop.permute.xlu1 %1348  ;;  %v644_v59 = vrot.slane %v639_v54, 4  ;;  %v642_v3 = vor.u32 %v640_v58, %v639_v54  ;;  %v3142_v58 = vld [vmem:[#allocation2 + $0xc] sm:$0xff] }
  0x9c   : > { %1317 = vrot.lane.b32.xlu2 %v3531_v53, %s3219_s16  ;;  %v338_v53 = vsel %vm3352_vm8, 0, %v337_v47 }
  0x9d   : > { %339 = vst [vmem:[#allocation2 + $0x50] sm:$0x1] %v338_v53  ;;  %v631_v53 = vrot.slane %v629_v46, 7  ;;  %v826_v6 = vsel %vm3313_vm3, %v644_v59, %v825_v38 }
  0x9e   : > { %v3757_v52 = vpop.permute.xlu2 %1232  ;;  %1354 = vrot.lane.b32.xlu1 %v3574_v42, %s3217_s14  ;;  %v3769_v42 = vld [vmem:[#allocation2 + $0x3c] sm:$0xff]  ;;  %827 = vst [vmem:[#allocation2 + $0xb0] sm:$0x1] %v826_v6 }
  0x9f   : > { %v1101_v11 = vshll.u32 %v3769_v42, 16  ;;  %v1099_v37 = vshrl.u32 %v3769_v42, 16  ;;  %v634_v49 = vor.u32 %v632_v55, %v631_v53  ;;  %v635_v2 = vrot.slane %v631_v53, 4 }
  0xa0   : > { %v1166_v55 = vshll.u32 %v1031_v43, 16  ;;  %v1585_v59 = vsel %vm1581_vm12, %v3142_v58, %v3757_v52 }
  0xa1   : > { %1246 = vrot.lane.b32.xlu0 %v3613_v26, %s3220_s17  ;;  %v1103_v44 = vrot.slane %v1101_v11, 1  ;;  %v643_v18 = vsel %vm3337_vm6, %v635_v2, %v642_v3 }
  0xa2   : > { %824 = vst.msk [vmem:[#allocation2 + $0xac] sm:$0xf] %vm251_vm2, %v643_v18 }
  0xa3   : > { %v3771_v63 = vpop.permute.xlu0 %1311  ;;  %v3779_v9 = vpop.permute.xlu1 %1350  ;;  %v1104_v62 = vor.u32 %v1103_v44, %v1099_v37 }
  0xa4   : > { %1327 = vrot.lane.b32.xlu2 %v3637_v7, %s3219_s16 }
  0xa5   : > { %v3818_v28 = vsel %vm1037_vm10, %v1104_v62, %v1108_v1  ;;  %v1168_v1 = vrot.slane %v1166_v55, 1 }
  0xa6   : > { %v3775_v8 = vpop.permute.xlu2 %1397  ;;  %1364 = vrot.lane.b32.xlu1 %v3629_v40, %s3217_s14  ;;  %v769_v40 = vld [vmem:[#allocation2 + $0x50] sm:$0x1] }
  0xa7   : > { %v770_v39 = vsel %vm3313_vm3, %v508_v4, %v769_v40  ;;  %v821_v4 = vld [vmem:[#allocation2 + $0xa8] sm:$0xf]  ;;  %v3820_v40 = vld [vmem:[#allocation2 + $0x78] sm:$0xff] }
  0xa8   : > { %771 = vst [vmem:[#allocation2 + $0x50] sm:$0x1] %v770_v39  ;;  %v822_v16 = vsel %vm3346_vm7, %v634_v49, %v821_v4  ;;  %v1278_v39 = vrot.slane %v3769_v42, 1  ;;  %v1161_v37 = vshll.u32 %v3820_v40, 16  ;;  %v1159_v54 = vshrl.u32 %v3820_v40, 16 }
  0xa9   : > { %1401 = vrot.lane.b32.xlu0 %v3625_v36, %s3223_s20  ;;  %823 = vst [vmem:[#allocation2 + $0xa8] sm:$0xf] %v822_v16 }
  0xaa   : > { %v3841_v20 = vsel %vm1262_vm9, %v1278_v39, %v1279_v41  ;;  %v1163_v53 = vrot.slane %v1161_v37, 1  ;;  %v899_v39 = vld [vmem:[#allocation2 + $0xb0] sm:$0x1] }
  0xab   : > { %v1231_v47 = vpop.permute.xlu0 %1230 }
  0xac   : > { %1436 = vrot.lane.b32.xlu2 %v3651_v56, %s3221_s18  ;;  %v1583_v22 = vsel %vm1581_vm12, %v3141_v21, %v1231_v47  ;;  %v1164_v38 = vor.u32 %v1163_v53, %v1159_v54 }
  0xad   : > { %v1616_v32 = vsel %vm1614_vm13, %v1583_v22, %v3771_v63  ;;  %v1294_v22 = vrot.slane %v1031_v43, 1  ;;  %v1019_v43 = vunpack.c.l.b16 %v899_v39 }
  0xae   : > { %v3803_v61 = vpop.permute.xlu2 %1516  ;;  %1473 = vrot.lane.b32.xlu1 %v3769_v42, %s3218_s15  ;;  %v1649_v44 = vsel %vm1647_vm14, %v1616_v32, %v3752_v45  ;;  %v3863_v6 = vsel %vm1037_vm10, %v1164_v38, %v1168_v1 }
  0xaf   : > { %v875_v52 = vld [vmem:[#allocation2 + $0x50] sm:$0x1]  ;;  %v1035_v55 = vpack.c.b16 %v1019_v43, %v1019_v43 }
  0xb0   : > { %v1550_v11 = vpop.permute.xlu1 %1549  ;;  %v1011_v15 = vunpack.c.l.b16 %v875_v52 }
  0xb1   : > { %1411 = vrot.lane.b32.xlu0 %v3680_v35, %s3223_s20  ;;  %v1214_v38 = vshll.u32 %v1035_v55, 16  ;;  %v1306_v39 = vrot.slane %v1035_v55, 1 }
  0xb3   : > { %v1314_v24 = vpop.permute.xlu0 %1313  ;;  %v1216_v52 = vrot.slane %v1214_v38, 1 }
  0xb4   : > { %1254 = vrot.lane.b32.xlu2 %v3669_v10, %s3220_s17 }
  0xb6   : > { %v3826_v34 = vpop.permute.xlu2 %1315  ;;  %1520 = vrot.lane.b32.xlu1 %v3818_v28, %s3224_s26 }
  0xb8   : > { %v1396_v46 = vpop.permute.xlu1 %1395 }
  0xb9   : > { %1446 = vrot.lane.b32.xlu0 %v3695_v48, %s3221_s18  ;;  %v1682_v63 = vsel %vm1680_vm0, %v1649_v44, %v1396_v46 }
  0xba   : > { %v1715_v47 = vsel %vm1713_vm15, %v1682_v63, %v3731_v27 }
  0xbb   : > { %v1515_v50 = vpop.permute.xlu0 %1514  ;;  %v1748_v45 = vsel %vm1746_vm1, %v1715_v47, %v3703_v60  ;;  %v1618_v60 = vsel %vm1614_vm13, %v1585_v59, %v1314_v24  ;;  %v1027_v24 = vpack.c.b16 %v1011_v15, %v1011_v15  ;;  %v3885_v47 = vld [vmem:[#allocation2 + $0xa8] sm:$0xff] }
  0xbc   : > { %v1781_v62 = vsel %vm1779_vm4, %v1748_v45, %v1515_v50  ;;  %1335 = vrot.lane.b32.xlu2 %v3708_v31, %s3219_s16  ;;  %v1651_v3 = vsel %vm1647_vm14, %v1618_v60, %v3779_v9  ;;  %v1293_v9 = vrot.slane %v3820_v40, 1  ;;  %v1209_v58 = vshll.u32 %v3885_v47, 16 }
  0xbd   : > { %v1814_v27 = vsel %vm1812_vm5, %v1781_v62, %v1550_v11  ;;  %v3865_v11 = vld [vmem:[#allocation2 + $0x48] sm:$0xff]  ;;  %v1684_v16 = vsel %vm1680_vm0, %v1651_v3, %v3775_v8  ;;  %v1118_v63 = vshll.u32 %v1027_v24, 16  ;;  %v1282_v15 = vrot.slane %v1027_v24, 1 }
  0xbe   : > { %v3852_v49 = vpop.permute.xlu2 %1325  ;;  %1555 = vrot.lane.b32.xlu1 %v3841_v20, %s3222_s19  ;;  %2898 = vmatmul.msk.bf16.vlgmr.msra.gmra.mxu0 %vm1875_vm11, %v1814_v27  ;;  %v1113_v29 = vshll.u32 %v3865_v11, 16  ;;  %v3882_v8 = vsel %vm1262_vm9, %v1293_v9, %v1294_v22  ;;  %v1111_v44 = vshrl.u32 %v3865_v11, 16  ;;  %v1207_v27 = vshrl.u32 %v3885_v47, 16 }
  0xbf   : > { %v1120_v53 = vrot.slane %v1118_v63, 1  ;;  %v1211_v60 = vrot.slane %v1209_v58, 1  ;;  %v1305_v24 = vrot.slane %v3885_v47, 1 }
  0xc0   : > { %v1470_v2 = vpop.permute.xlu1 %1469  ;;  %v1115_v46 = vrot.slane %v1113_v29, 1 }
  0xc1   : > { %1483 = vrot.lane.b32.xlu0 %v3820_v40, %s3218_s15  ;;  %v3934_v63 = vsel %vm1262_vm9, %v1305_v24, %v1306_v39  ;;  %v364_v24 = vld [vmem:[#allocation2 + $0xbc] sm:$0x1] }
  0xc2   : > { %v1116_v54 = vor.u32 %v1115_v46, %v1111_v44 }
  0xc3   : > { %v1433_v4 = vpop.permute.xlu0 %1432 }
  0xc4   : > { %1240 = vrot.lane.b32.xlu2 %v3818_v28, %s3220_s17  ;;  %v1717_v18 = vsel %vm1713_vm15, %v1684_v16, %v1433_v4  ;;  %v1281_v4 = vrot.slane %v3865_v11, 1 }
  0xc5   : > { %v1750_v41 = vsel %vm1746_vm1, %v1717_v18, %v1470_v2  ;;  %v1212_v2 = vor.u32 %v1211_v60, %v1207_v27  ;;  %v3956_v60 = vld [vmem:[#allocation2 + $0x54] sm:$0xff] }
  0xc6   : > { %v3872_v21 = vpop.permute.xlu2 %1434  ;;  %1530 = vrot.lane.b32.xlu1 %v3863_v6, %s3224_s26  ;;  %v1783_v50 = vsel %vm1779_vm4, %v1750_v41, %v3803_v61  ;;  %v3901_v61 = vsel %vm1037_vm10, %v1116_v54, %v1120_v53  ;;  %v3923_v22 = vsel %vm1262_vm9, %v1281_v4, %v1282_v15  ;;  %v308_v15 = vld [vmem:[#allocation2 + $0xb4] sm:$0x1] }
  0xc7   : > { %v3914_v18 = vsel %vm1037_vm10, %v1212_v2, %v1216_v52 }
  0xc8   : > { %v1235_v32 = vpop.permute.xlu1 %1234 }
  0xc9   : > { %1372 = vrot.lane.b32.xlu0 %v3662_v57, %s3217_s14 }
  0xcb   : > { %v1552_v37 = vpop.permute.xlu0 %1551 }
  0xcc   : > { %1321 = vrot.lane.b32.xlu2 %v3841_v20, %s3219_s16  ;;  %v1816_v45 = vsel %vm1812_vm5, %v1783_v50, %v1552_v37  ;;  %v3143_v37 = vld [vmem:[#allocation2 + $0x18] sm:$0xff] }
  0xcd   : > { %v1587_v44 = vsel %vm1581_vm12, %v3143_v37, %v1235_v32  ;;  %v365_v37 = vsel %vm3352_vm8, 0, %v364_v24  ;;  %v3145_v24 = vld [vmem:[#allocation2 + $0x24] sm:$0xff] }
  0xce   : > { %v3892_v57 = vpop.permute.xlu2 %1252  ;;  %1565 = vrot.lane.b32.xlu1 %v3882_v8, %s3222_s19  ;;  %2899 = vmatmul.msk.bf16.gmra.mxu0 %vm1875_vm11, %v1816_v45  ;;  %v1620_v50 = vsel %vm1614_vm13, %v1587_v44, %v3826_v34  ;;  %366 = vst [vmem:[#allocation2 + $0xbc] sm:$0x1] %v365_v37 }
  0xd0   : > { %v1353_v59 = vpop.permute.xlu1 %1352 }
  0xd1   : > { %1419 = vrot.lane.b32.xlu0 %v3721_v5, %s3223_s20  ;;  %v1653_v45 = vsel %vm1647_vm14, %v1620_v50, %v1353_v59 }
  0xd3   : > { %v1245_v62 = vpop.permute.xlu0 %1244 }
  0xd4   : > { %1358 = vrot.lane.b32.xlu2 %v3865_v11, %s3217_s14 }
  0xd6   : > { %v3906_v1 = vpop.permute.xlu2 %1333  ;;  %1405 = vrot.lane.b32.xlu1 %v3901_v61, %s3223_s20 }
  0xd8   : > { %v1363_v3 = vpop.permute.xlu1 %1362 }
  0xd9   : > { %1454 = vrot.lane.b32.xlu0 %v3736_v12, %s3221_s18 }
  0xdb   : > { %v1400_v16 = vpop.permute.xlu0 %1399 }
  0xdc   : > { %1491 = vrot.lane.b32.xlu2 %v3885_v47, %s3218_s15 }
  0xde   : > { %v3918_v9 = vpop.permute.xlu2 %1370  ;;  %1538 = vrot.lane.b32.xlu1 %v3914_v18, %s3224_s26 }
  0xe0   : > { %v1472_v29 = vpop.permute.xlu1 %1471 }
  0xe1   : > { %1440 = vrot.lane.b32.xlu0 %v3923_v22, %s3221_s18 }
  0xe3   : > { %v1410_v41 = vpop.permute.xlu0 %1409 }
  0xe4   : > { %1477 = vrot.lane.b32.xlu2 %v3492_v13, %s3218_s15  ;;  %v1686_v13 = vsel %vm1680_vm0, %v1653_v45, %v1400_v16 }
  0xe5   : > { %v1719_v32 = vsel %vm1713_vm15, %v1686_v13, %v3872_v21  ;;  %v1597_v21 = vsel %vm1581_vm12, %v3956_v60, %v1245_v62 }
  0xe6   : > { %v1564_v46 = vpop.permute.xlu2 %1563  ;;  %1524 = vrot.lane.b32.xlu1 %v3553_v25, %s3224_s26  ;;  %v1752_v34 = vsel %vm1746_vm1, %v1719_v32, %v1472_v29  ;;  %v309_v29 = vsel %vm3313_vm3, 0, %v308_v15 }
  0xe7   : > { %310 = vst [vmem:[#allocation2 + $0xb4] sm:$0x1] %v309_v29 }
  0xe8   : > { %v1519_v43 = vpop.permute.xlu1 %1518 }
  0xe9   : > { %1573 = vrot.lane.b32.xlu0 %v3934_v63, %s3222_s19  ;;  %v1785_v55 = vsel %vm1779_vm4, %v1752_v34, %v1519_v43 }
  0xeb   : > { %v1445_v54 = vpop.permute.xlu0 %1444 }
  0xec   : > { %1559 = vrot.lane.b32.xlu2 %v3564_v17, %s3222_s19 }
  0xee   : > { %v3946_v53 = vpop.permute.xlu2 %1536  ;;  %1319 = vrot.lane.b32.xlu1 %v3651_v56, %s3219_s16 }
  0xf0   : > { %v1554_v58 = vpop.permute.xlu1 %1553 }
  0xf1   : > { %1238 = vrot.lane.b32.xlu0 %v3625_v36, %s3220_s17  ;;  %v1818_v59 = vsel %vm1812_vm5, %v1785_v55, %v1554_v58  ;;  %v1630_v36 = vsel %vm1614_vm13, %v1597_v21, %v3852_v49 }
  0xf2   : > { %2900 = vmatmul.msk.bf16.gmra.mxu0 %vm1875_vm11, %v1818_v59  ;;  %v1663_v38 = vsel %vm1647_vm14, %v1630_v36, %v1363_v3 }
  0xf3   : > { %v1482_v27 = vpop.permute.xlu0 %1481  ;;  %v1696_v52 = vsel %vm1680_vm0, %v1663_v38, %v1410_v41  ;;  %v402_v41 = vld [vmem:[%s3324_s13 + $0x74] sm:$0xf] }
  0xf4   : > { %1248 = vrot.lane.b32.xlu2 %v3680_v35, %s3220_s17  ;;  %v1729_v62 = vsel %vm1713_vm15, %v1696_v52, %v1445_v54  ;;  %v657_v13 = vshll.u32 %v402_v41, 16  ;;  %v832_v52 = vld [vmem:[#allocation2 + $0xbc] sm:$0x1] }
  0xf5   : > { %v1762_v35 = vsel %vm1746_vm1, %v1729_v62, %v1482_v27 }
  0xf6   : > { %v3962_v56 = vpop.permute.xlu2 %1317  ;;  %1329 = vrot.lane.b32.xlu1 %v3695_v48, %s3219_s16  ;;  %v1605_v48 = vsel %vm1581_vm12, %v3566_v33, %v3892_v57 }
  0xf7   : > { %v1638_v57 = vsel %vm1614_vm13, %v1605_v48, %v3906_v1 }
  0xf8   : > { %v1418_v2 = vpop.permute.xlu1 %1417 }
  0xf9   : > { %1356 = vrot.lane.b32.xlu0 %v3769_v42, %s3217_s14 }
  0xfb   : > { %v1529_v4 = vpop.permute.xlu0 %1528 }
  0xfc   : > { %v1795_v49 = vsel %vm1779_vm4, %v1762_v35, %v1529_v4  ;;  %1403 = vrot.lane.b32.xlu2 %v3818_v28, %s3223_s20  ;;  %v401_v28 = vld [vmem:[%s3324_s13 + $0x70] sm:$0xf] }
  0xfd   : > { %v1828_v3 = vsel %vm1812_vm5, %v1795_v49, %v1564_v46  ;;  %v646_v44 = vshrl.u32 %v401_v28, 16  ;;  %v654_v46 = vshrl.u32 %v402_v41, 16  ;;  %v649_v1 = vshll.u32 %v401_v28, 16 }
  0xfe   : > { %v3981_v16 = vpop.permute.xlu2 %1327  ;;  %2905 = vmatmul.msk.bf16.vlgmr.msra.gmra.mxu2 %vm1875_vm11, %v1828_v3  ;;  %1438 = vrot.lane.b32.xlu1 %v3841_v20, %s3221_s18  ;;  %v1671_v20 = vsel %vm1647_vm14, %v1638_v57, %v3918_v9  ;;  %v828_v9 = vld [vmem:[#allocation2 + $0xb4] sm:$0xf] }
  0xff   : > { %v648_v50 = vrot.slane %v646_v44, 7  ;;  %v656_v45 = vrot.slane %v654_v46, 7  ;;  %v1704_v54 = vsel %vm1680_vm0, %v1671_v20, %v1418_v2 }
 0x100   : > { %v1490_v39 = vpop.permute.xlu1 %1489 }
 0x101   : > { %1366 = vrot.lane.b32.xlu0 %v3820_v40, %s3217_s14  ;;  %v651_v34 = vor.u32 %v649_v1, %v648_v50  ;;  %v652_v55 = vrot.slane %v648_v50, 4  ;;  %v659_v58 = vor.u32 %v657_v13, %v656_v45  ;;  %v661_v36 = vrot.slane %v656_v45, 4 }
 0x103   : > { %v1453_v43 = vpop.permute.xlu0 %1452  ;;  %v660_v27 = vsel %vm3337_vm6, %v652_v55, %v659_v58  ;;  %v829_v21 = vsel %vm3346_vm7, %v651_v34, %v828_v9  ;;  %v367_v58 = vld [vmem:[#allocation2 + $0xc8] sm:$0x1]  ;;  %v311_v9 = vld [vmem:[#allocation2 + $0xc0] sm:$0x1] }
 0x104   : > { %1413 = vrot.lane.b32.xlu2 %v3863_v6, %s3223_s20  ;;  %v1737_v32 = vsel %vm1713_vm15, %v1704_v54, %v1453_v43  ;;  %830 = vst [vmem:[#allocation2 + $0xb4] sm:$0xf] %v829_v21 }
 0x105   : > { %v1770_v38 = vsel %vm1746_vm1, %v1737_v32, %v1490_v39  ;;  %831 = vst.msk [vmem:[#allocation2 + $0xb8] sm:$0xf] %vm251_vm2, %v660_v27  ;;  %v368_v27 = vsel %vm3352_vm8, 0, %v367_v58 }
 0x106   : > { %v1437_v59 = vpop.permute.xlu2 %1436  ;;  %1256 = vrot.lane.b32.xlu1 %v3721_v5, %s3220_s17  ;;  %v833_v5 = vsel %vm3313_vm3, %v661_v36, %v832_v52  ;;  %v1803_v35 = vsel %vm1779_vm4, %v1770_v38, %v3946_v53  ;;  %v312_v38 = vsel %vm3313_vm3, 0, %v311_v9  ;;  %369 = vst [vmem:[#allocation2 + $0xc8] sm:$0x1] %v368_v27  ;;  %v404_v52 = vld [vmem:[%s3324_s13 + $0x7c] sm:$0xf]  ;;  %v3147_v27 = vld [vmem:[#allocation2 + $0x84] sm:$0xff] }
 0x107   : > { %834 = vst [vmem:[#allocation2 + $0xbc] sm:$0x1] %v833_v5  ;;  %v671_v5 = vshrl.u32 %v404_v52, 16 }
 0x108   : > { %v1237_v2 = vpop.permute.xlu1 %1236  ;;  %313 = vst [vmem:[#allocation2 + $0xc0] sm:$0x1] %v312_v38 }
 0x109   : > { %1475 = vrot.lane.b32.xlu0 %v3865_v11, %s3218_s15  ;;  %v1589_v39 = vsel %vm1581_vm12, %v3145_v24, %v1237_v2 }
 0x10a   : > { %v1622_v44 = vsel %vm1614_vm13, %v1589_v39, %v3962_v56 }
 0x10b   : > { %v1572_v62 = vpop.permute.xlu0 %1571 }
 0x10c   : > { %1448 = vrot.lane.b32.xlu2 %v3882_v8, %s3221_s18  ;;  %v1836_v4 = vsel %vm1812_vm5, %v1803_v35, %v1572_v62  ;;  %v4055_v37 = vld [vmem:[#allocation2 + $0xb4] sm:$0xff] }
 0x10d   : > { %2909 = vmatmul.msk.bf16.vlgmr.msra.gmra.mxu3 %vm1875_vm11, %v1836_v4  ;;  %v1221_v43 = vshll.u32 %v4055_v37, 16  ;;  %v1219_v56 = vshrl.u32 %v4055_v37, 16  ;;  %v1308_v62 = vrot.slane %v4055_v37, 1 }
 0x10e   : > { %v4020_v48 = vpop.permute.xlu2 %1254  ;;  %1337 = vrot.lane.b32.xlu1 %v3736_v12, %s3219_s16 }
 0x10f   : > { %v1223_v13 = vrot.slane %v1221_v43, 1 }
 0x110   : > { %v1355_v49 = vpop.permute.xlu1 %1354 }
 0x111   : > { %1522 = vrot.lane.b32.xlu0 %v3901_v61, %s3224_s26  ;;  %v1655_v46 = vsel %vm1647_vm14, %v1622_v44, %v1355_v49  ;;  %v1224_v21 = vor.u32 %v1223_v13, %v1219_v56  ;;  %v835_v56 = vld [vmem:[#allocation2 + $0xc0] sm:$0xf] }
 0x113   : > { %v4026_v3 = vpop.permute.xlu0 %1246 }
 0x114   : > { %1485 = vrot.lane.b32.xlu2 %v3566_v33, %s3218_s15 }
 0x116   : > { %v4030_v53 = vpop.permute.xlu2 %1335  ;;  %1242 = vrot.lane.b32.xlu1 %v3901_v61, %s3220_s17  ;;  %v902_v61 = vld [vmem:[#allocation2 + $0xbc] sm:$0x1] }
 0x117   : > { %v1020_v41 = vunpack.c.l.b16 %v902_v61  ;;  %v673_v61 = vrot.slane %v671_v5, 7 }
 0x118   : > { %v4034_v15 = vpop.permute.xlu1 %1364 }
 0x119   : > { %1557 = vrot.lane.b32.xlu0 %v3923_v22, %s3222_s19  ;;  %v1036_v20 = vpack.c.b16 %v1020_v41, %v1020_v41  ;;  %v674_v41 = vshll.u32 %v404_v52, 16  ;;  %v678_v44 = vrot.slane %v673_v61, 4  ;;  %v370_v52 = vld [vmem:[#allocation2 + $0xd4] sm:$0x1] }
 0x11b   : > { %v1402_v12 = vpop.permute.xlu0 %1401  ;;  %v1226_v54 = vshll.u32 %v1036_v20, 16  ;;  %v1309_v35 = vrot.slane %v1036_v20, 1 }
 0x11c   : > { %1374 = vrot.lane.b32.xlu2 %v3885_v47, %s3217_s14  ;;  %v1688_v50 = vsel %vm1680_vm0, %v1655_v46, %v1402_v12  ;;  %v3146_v12 = vld [vmem:[#allocation2 + $0x60] sm:$0xff] }
 0x11d   : > { %v1228_v36 = vrot.slane %v1226_v54, 1  ;;  %v4098_v46 = vsel %vm1262_vm9, %v1308_v62, %v1309_v35 }
 0x11e   : > { %v4040_v29 = vpop.permute.xlu2 %1240  ;;  %1323 = vrot.lane.b32.xlu1 %v3923_v22, %s3219_s16 }
 0x120   : > { %v1474_v33 = vpop.permute.xlu1 %1473 }
 0x121   : > { %1532 = vrot.lane.b32.xlu0 %v3618_v30, %s3224_s26 }
 0x123   : > { %v4046_v57 = vpop.permute.xlu0 %1411 }
 0x124   : > { %1421 = vrot.lane.b32.xlu2 %v3914_v18, %s3223_s20 }
 0x126   : > { %v4051_v28 = vpop.permute.xlu2 %1321  ;;  %1360 = vrot.lane.b32.xlu1 %v3956_v60, %s3217_s14  ;;  %v1721_v60 = vsel %vm1713_vm15, %v1688_v50, %v1437_v59  ;;  %v676_v50 = vor.u32 %v674_v41, %v673_v61 }
 0x127   : > { %v1754_v32 = vsel %vm1746_vm1, %v1721_v60, %v1474_v33  ;;  %v4091_v33 = vsel %vm1037_vm10, %v1224_v21, %v1228_v36  ;;  %v839_v60 = vld [vmem:[#allocation2 + $0xc8] sm:$0x1] }
 0x128   : > { %v1521_v22 = vpop.permute.xlu1 %1520  ;;  %v840_v13 = vsel %vm3313_vm3, %v678_v44, %v839_v60 }
 0x129   : > { %1567 = vrot.lane.b32.xlu0 %v3646_v51, %s3222_s19  ;;  %v1787_v34 = vsel %vm1779_vm4, %v1754_v32, %v1521_v22  ;;  %841 = vst [vmem:[#allocation2 + $0xc8] sm:$0x1] %v840_v13 }
 0x12b   : > { %v1447_v1 = vpop.permute.xlu0 %1446 }
 0x12c   : > { %1456 = vrot.lane.b32.xlu2 %v3934_v63, %s3221_s18 }
 0x12e   : > { %v4067_v45 = vpop.permute.xlu2 %1358  ;;  %1493 = vrot.lane.b32.xlu1 %v4055_v37, %s3218_s15 }
 0x130   : > { %v1556_v55 = vpop.permute.xlu1 %1555 }
 0x131   : > { %1407 = vrot.lane.b32.xlu0 %v3553_v25, %s3223_s20  ;;  %v1820_v59 = vsel %vm1812_vm5, %v1787_v34, %v1556_v55  ;;  %v403_v25 = vld [vmem:[%s3324_s13 + $0x78] sm:$0xf] }
 0x132   : > { %2901 = vmatmul.msk.bf16.gmra.mxu0 %vm1875_vm11, %v1820_v59  ;;  %v663_v4 = vshrl.u32 %v403_v25, 16  ;;  %v666_v39 = vshll.u32 %v403_v25, 16 }
 0x133   : > { %v1484_v2 = vpop.permute.xlu0 %1483 }
 0x134   : > { %1442 = vrot.lane.b32.xlu2 %v3564_v17, %s3221_s18  ;;  %v665_v24 = vrot.slane %v663_v4, 7  ;;  %v1599_v17 = vsel %vm1581_vm12, %v3146_v12, %v4026_v3 }
 0x135   : > { %v1632_v54 = vsel %vm1614_vm13, %v1599_v17, %v3981_v16 }
 0x136   : > { %v4087_v49 = vpop.permute.xlu2 %1491  ;;  %1479 = vrot.lane.b32.xlu1 %v3146_v12, %s3218_s15  ;;  %v668_v20 = vor.u32 %v666_v39, %v665_v24  ;;  %v669_v43 = vrot.slane %v665_v24, 4  ;;  %v1665_v55 = vsel %vm1647_vm14, %v1632_v54, %v4034_v15 }
 0x137   : > { %v1698_v58 = vsel %vm1680_vm0, %v1665_v55, %v4046_v57 }
 0x138   : > { %v1531_v22 = vpop.permute.xlu1 %1530  ;;  %v677_v32 = vsel %vm3337_vm6, %v669_v43, %v676_v50  ;;  %v836_v34 = vsel %vm3346_vm7, %v668_v20, %v835_v56  ;;  %v1731_v16 = vsel %vm1713_vm15, %v1698_v58, %v1447_v1 }
 0x139   : > { %1540 = vrot.lane.b32.xlu0 %v4091_v33, %s3224_s26  ;;  %837 = vst [vmem:[#allocation2 + $0xc0] sm:$0xf] %v836_v34  ;;  %v1764_v19 = vsel %vm1746_vm1, %v1731_v16, %v1484_v2  ;;  %v905_v2 = vld [vmem:[#allocation2 + $0xc8] sm:$0x1] }
 0x13a   : > { %838 = vst.msk [vmem:[#allocation2 + $0xc4] sm:$0xf] %vm251_vm2, %v677_v32  ;;  %v1797_v59 = vsel %vm1779_vm4, %v1764_v19, %v1531_v22  ;;  %v1381_v62 = vunpack.c.l.b16 %v905_v2 }
 0x13b   : > { %v1373_v3 = vpop.permute.xlu0 %1372 }
 0x13c   : > { %1575 = vrot.lane.b32.xlu2 %v4098_v46, %s3222_s19  ;;  %v1382_v12 = vpack.c.b16 %v1381_v62, %v1381_v62 }
 0x13e   : > { %v1478_v14 = vpop.permute.xlu2 %1477  ;;  %1561 = vrot.lane.b32.xlu1 %v3637_v7, %s3222_s19  ;;  %v1391_v43 = vshll.u32 %v1382_v12, 16  ;;  %v1428_v34 = vrot.slane %v1382_v12, 1 }
 0x140   : > { %v1566_v15 = vpop.permute.xlu1 %1565  ;;  %v1393_v56 = vrot.slane %v1391_v43, 1 }
 0x141   : > { %1526 = vrot.lane.b32.xlu0 %v3613_v26, %s3224_s26  ;;  %v1830_v9 = vsel %vm1812_vm5, %v1797_v59, %v1566_v15  ;;  %v1593_v26 = vsel %vm1581_vm12, %v3769_v42, %v4040_v29  ;;  %v371_v42 = vsel %vm3352_vm8, 0, %v370_v52  ;;  %v2939_v5 = vld [vmem:[#allocation2 + $0xc0] sm:$0xff]  ;;  %vm2652_vm8 = vcmask 1040384  }
 0x142   : > { %2906 = vmatmul.msk.bf16.gmra.mxu2 %vm1875_vm11, %v1830_v9  ;;  %372 = vst [vmem:[#allocation2 + $0xd4] sm:$0x1] %v371_v42  ;;  %v1384_v44 = vshrl.u32 %v2939_v5, 16  ;;  %v1427_v32 = vrot.slane %v2939_v5, 1  ;;  %v3149_v42 = vld [vmem:[#allocation2 + $0x30] sm:$0xff] }
 0x143   : > { %v1420_v57 = vpop.permute.xlu0 %1419 }
 0x144   : > { %1250 = vrot.lane.b32.xlu2 %v3863_v6, %s3220_s17  ;;  %v1626_v6 = vsel %vm1614_vm13, %v1593_v26, %v4051_v28  ;;  %v1429_v58 = vsel %vm1262_vm9, %v1427_v32, %v1428_v34 }
 0x145   : > { %v1659_v29 = vsel %vm1647_vm14, %v1626_v6, %v4067_v45 }
 0x146   : > { %v1560_v1 = vpop.permute.xlu2 %1559  ;;  %1368 = vrot.lane.b32.xlu1 %v3147_v27, %s3217_s14 }
 0x148   : > { %v1406_v7 = vpop.permute.xlu1 %1405 }
 0x149   : > { %1331 = vrot.lane.b32.xlu0 %v3882_v8, %s3219_s16  ;;  %v3148_v8 = vld [vmem:[#allocation2 + $0x90] sm:$0xff] }
 0x14a   : > { %v1607_v25 = vsel %vm1581_vm12, %v3148_v8, %v4020_v48  ;;  %v908_v16 = vld [vmem:[#allocation2 + $0xd4] sm:$0x1] }
 0x14b   : > { %v1455_v21 = vpop.permute.xlu0 %1454  ;;  %v1640_v48 = vsel %vm1614_vm13, %v1607_v25, %v4030_v53  ;;  %v1386_v53 = vshll.u32 %v2939_v5, 16  ;;  %v1500_v19 = vunpack.c.l.b16 %v908_v16 }
 0x14c   : > { %1415 = vrot.lane.b32.xlu2 %v3618_v30, %s3223_s20  ;;  %v314_v30 = vld [vmem:[#allocation2 + $0xcc] sm:$0x1]  ;;  %v1673_v23 = vsel %vm1647_vm14, %v1640_v48, %v1373_v3 }
 0x14d   : > { %v1706_v35 = vsel %vm1680_vm0, %v1673_v23, %v1420_v57  ;;  %v1388_v20 = vrot.slane %v1386_v53, 1  ;;  %v1501_v9 = vpack.c.b16 %v1500_v19, %v1500_v19  ;;  %v3150_v53 = vld [vmem:[#allocation2 + $0x6c] sm:$0xff] }
 0x14e   : > { %v4134_v36 = vpop.permute.xlu2 %1248  ;;  %1450 = vrot.lane.b32.xlu1 %v3646_v51, %s3221_s18  ;;  %v315_v51 = vsel %vm3313_vm3, 0, %v314_v30  ;;  %v1739_v45 = vsel %vm1713_vm15, %v1706_v35, %v1455_v21 }
 0x14f   : > { %316 = vst [vmem:[#allocation2 + $0xcc] sm:$0x1] %v315_v51  ;;  %v1772_v39 = vsel %vm1746_vm1, %v1739_v45, %v4087_v49  ;;  %v1389_v49 = vor.u32 %v1388_v20, %v1384_v44  ;;  %v1510_v21 = vshll.u32 %v1501_v9, 16  ;;  %v1547_v6 = vrot.slane %v1501_v9, 1 }
 0x150   : > { %v1539_v38 = vpop.permute.xlu1 %1538 }
 0x151   : > { %1258 = vrot.lane.b32.xlu0 %v3914_v18, %s3220_s17  ;;  %v1692_v18 = vsel %vm1680_vm0, %v1659_v29, %v1406_v7  ;;  %v1805_v17 = vsel %vm1779_vm4, %v1772_v39, %v1539_v38  ;;  %v1394_v3 = vsel %vm1037_vm10, %v1389_v49, %v1393_v56  ;;  %v1512_v52 = vrot.slane %v1510_v21, 1 }
 0x153   : > { %v1441_v28 = vpop.permute.xlu0 %1440 }
 0x154   : > { %1339 = vrot.lane.b32.xlu2 %v3934_v63, %s3219_s16  ;;  %v1725_v0 = vsel %vm1713_vm15, %v1692_v18, %v1441_v28 }
 0x155   : > { %v1758_v61 = vsel %vm1746_vm1, %v1725_v0, %v1478_v14 }
 0x156   : > { %v4158_v4 = vpop.permute.xlu2 %1403  ;;  %1376 = vrot.lane.b32.xlu1 %v4055_v37, %s3217_s14  ;;  %v2940_v14 = vld [vmem:[#allocation2 + $0xcc] sm:$0xff] }
 0x157   : > { %v1505_v57 = vshll.u32 %v2940_v14, 16  ;;  %v1503_v27 = vshrl.u32 %v2940_v14, 16  ;;  %v1546_v26 = vrot.slane %v2940_v14, 1 }
 0x158   : > { %v1525_v24 = vpop.permute.xlu1 %1524 }
 0x159   : > { %1487 = vrot.lane.b32.xlu0 %v3148_v8, %s3218_s15  ;;  %v1791_v63 = vsel %vm1779_vm4, %v1758_v61, %v1525_v24  ;;  %v1507_v7 = vrot.slane %v1505_v57, 1  ;;  %v1601_v61 = vsel %vm1581_vm12, %v3150_v53, %v4134_v36 }
 0x15a   : > { %v1824_v41 = vsel %vm1812_vm5, %v1791_v63, %v1560_v1 }
 0x15b   : > { %v1574_v22 = vpop.permute.xlu0 %1573  ;;  %2903 = vmatmul.msk.bf16.vlgmr.msra.gmra.mxu1 %vm1875_vm11, %v1824_v41  ;;  %v1508_v2 = vor.u32 %v1507_v7, %v1503_v27 }
 0x15c   : > { %v1838_v50 = vsel %vm1812_vm5, %v1805_v17, %v1574_v22  ;;  %1534 = vrot.lane.b32.xlu2 %v3669_v10, %s3224_s26 }
 0x15d   : > { %2910 = vmatmul.msk.bf16.gmra.mxu3 %vm1875_vm11, %v1838_v50  ;;  %v1513_v25 = vsel %vm1037_vm10, %v1508_v2, %v1512_v52  ;;  %vm2654_vm10 = vcmask 1041409  }
 0x15e   : > { %v4175_v60 = vpop.permute.xlu2 %1413  ;;  %1569 = vrot.lane.b32.xlu1 %v3708_v31, %s3222_s19 }
 0x160   : > { %v1320_v13 = vpop.permute.xlu1 %1319 }
 0x161   : > { %1423 = vrot.lane.b32.xlu0 %v4091_v33, %s3223_s20 }
 0x163   : > { %v1239_v54 = vpop.permute.xlu0 %1238 }
 0x164   : > { %1458 = vrot.lane.b32.xlu2 %v4098_v46, %s3221_s18  ;;  %v1591_v51 = vsel %vm1581_vm12, %v3149_v42, %v1239_v54 }
 0x166   : > { %v1449_v10 = vpop.permute.xlu2 %1448  ;;  %1542 = vrot.lane.b32.xlu1 %v1394_v3, %s3224_s26 }
 0x168   : > { %v1330_v55 = vpop.permute.xlu1 %1329 }
 0x169   : > { %1495 = vrot.lane.b32.xlu0 %v2939_v5, %s3218_s15  ;;  %v1634_v63 = vsel %vm1614_vm13, %v1601_v61, %v1330_v55 }
 0x16b   : > { %v1357_v31 = vpop.permute.xlu0 %1356 }
 0x16c   : > { %1577 = vrot.lane.b32.xlu2 %v1429_v58, %s3222_s19 }
 0x16e   : > { %1341 = vrot.lane.b32.xlu1 %v4098_v46, %s3219_s16  ;;  %v1486_v59 = vpop.permute.xlu2 %1485 }
 0x170   : > { %v1439_v15 = vpop.permute.xlu1 %1438 }
 0x171   : > { %1260 = vrot.lane.b32.xlu0 %v4091_v33, %s3220_s17  ;;  %v1548_v33 = vsel %vm1262_vm9, %v1546_v26, %v1547_v6  ;;  %s2727_s17 = scalar_lea.sflag [#allocation5], %s242_s28 }
 0x173   : > { %v1367_v1 = vpop.permute.xlu0 %1366 }
 0x174   : > { %1378 = vrot.lane.b32.xlu2 %v2939_v5, %s3217_s14  ;;  %v1624_v5 = vsel %vm1614_vm13, %v1591_v51, %v1320_v13  ;;  %v1667_v39 = vsel %vm1647_vm14, %v1634_v63, %v1367_v1  ;;  %v3151_v13 = vld [vmem:[#allocation2 + $0x9c] sm:$0xff]  ;;  %v1921_v63 = vpop.f32.mrf.mxu0  ;;  %s2737_s14 = scalar_lea.hbm %s4998_s6, %s2915_s10 }
 0x175   : > { %v1657_v62 = vsel %vm1647_vm14, %v1624_v5, %v1357_v31  ;;  %v1700_v17 = vsel %vm1680_vm0, %v1667_v39, %v4175_v60  ;;  %s2740_s16 = sshll.u32 %s2737_s14, 4  ;;  %s2741_s16 = int_to_ptr.hbm [resolvable:$true] %s2740_s16 }
 0x176   : > { %1460 = vrot.lane.b32.xlu1 %v1429_v58, %s3221_s18  ;;  %v1375_v38 = vpop.permute.xlu2 %1374  ;;  %v1690_v48 = vsel %vm1680_vm0, %v1657_v62, %v4158_v4  ;;  %v1733_v44 = vsel %vm1713_vm15, %v1700_v17, %v1449_v10  ;;  %s3166_s18 = sshra.s32 %s2741_s16, 4  ;;  %s3167_s18 = int_to_ptr.hbm [resolvable:$true] %s3166_s18 }
 0x177   : > { %v1723_v23 = vsel %vm1713_vm15, %v1690_v48, %v1439_v15  ;;  %v1766_v43 = vsel %vm1746_vm1, %v1733_v44, %v1486_v59  ;;  %p3173_p0 = scmp.lt.s32.totalorder %s3167_s18, %s4998_s6 }
 0x178   : > { %v1257_v46 = vpop.permute.xlu1 %1256 }
 0x179   : > { %1425 = vrot.lane.b32.xlu0 %v1394_v3, %s3223_s20  ;;  %v1609_v54 = vsel %vm1581_vm12, %v3151_v13, %v1257_v46 }
 0x17b   : > { %v1476_v8 = vpop.permute.xlu0 %1475 }
 0x17c   : > { %1497 = vrot.lane.b32.xlu2 %v2940_v14, %s3218_s15  ;;  %v1756_v0 = vsel %vm1746_vm1, %v1723_v23, %v1476_v8  ;;  %s2738_s15 = sshll.u32 %s4895_s9, 4  ;;  %s2739_s15 = int_to_ptr.vmem [resolvable:$true] %s2738_s15 }
 0x17e   : > { %1579 = vrot.lane.b32.xlu1 %v1548_v33, %s3222_s19  ;;  %v1422_v29 = vpop.permute.xlu2 %1421  ;;  %s3168_s19 = scalar_lea.hbm %s3167_s18, 32 }
 0x17f   : > { %p3169_p11 = scmp.ne.s32.totalorder %s3167_s18, %s3168_s19  ;;  %p3174_p1 = scmp.lt.s32.totalorder %s3172_s12, %s3168_s19 }
 0x180   : > { %v1338_v30 = vpop.permute.xlu1 %1337 }
 0x181   : > { %1544 = vrot.lane.b32.xlu0 %v1513_v25, %s3224_s26  ;;  %v1642_v60 = vsel %vm1614_vm13, %v1609_v54, %v1338_v30  ;;  %p3170_p12 = pnand %p3169_p11, %p3300_p5  ;;  %p3175_p2 = por %p3174_p1, %p3173_p0 }
 0x182   : > { %v1675_v10 = vsel %vm1647_vm14, %v1642_v60, %v1375_v38 }
 0x183   : > { %v1523_v28 = vpop.permute.xlu0 %1522  ;;  %v1708_v34 = vsel %vm1680_vm0, %v1675_v10, %v1422_v29  ;;  %p3171_p13 = pneg %p3170_p12 }
 0x184   : > { %v1789_v35 = vsel %vm1779_vm4, %v1756_v0, %v1523_v28 }
 0x185   : > { %p3176_p3 = pnand %p3175_p2, %p3171_p13 }
 0x186   : > { %v1457_v24 = vpop.permute.xlu2 %1456 }
 0x187   : > { %v1741_v58 = vsel %vm1713_vm15, %v1708_v34, %v1457_v24 }
 0x188   : > { %v1243_v18 = vpop.permute.xlu1 %1242 }
 0x189   : > { %v1595_v19 = vsel %vm1581_vm12, %v3865_v11, %v1243_v18 }
 0x18b   : > { %v1558_v45 = vpop.permute.xlu0 %1557 }
 0x18c   : > { %v1822_v12 = vsel %vm1812_vm5, %v1789_v35, %v1558_v45 }
 0x18d   : > { %2902 = vmatmul.msk.bf16.gmra.mxu0 %vm1875_vm11, %v1822_v12 }
 0x18e   : > { %v1443_v22 = vpop.permute.xlu2 %1442 }
 0x190   : > { %v1324_v4 = vpop.permute.xlu1 %1323 }
 0x191   : > { %v1628_v15 = vsel %vm1614_vm13, %v1595_v19, %v1324_v4 }
 0x193   : > { %v1533_v41 = vpop.permute.xlu0 %1532 }
 0x194   : > { %v1799_v36 = vsel %vm1779_vm4, %v1766_v43, %v1533_v41  ;;  %v1923_v43 = vpop.f32.mrf.mxu0 }
 0x196   : > { %v1576_v56 = vpop.permute.xlu2 %1575 }
 0x198   : > { %v1361_v20 = vpop.permute.xlu1 %1360 }
 0x199   : > { %v1661_v57 = vsel %vm1647_vm14, %v1628_v15, %v1361_v20 }
 0x19b   : > { %v1568_v50 = vpop.permute.xlu0 %1567 }
 0x19c   : > { %v1832_v49 = vsel %vm1812_vm5, %v1799_v36, %v1568_v50  ;;  %v1926_v60 = vpop.f32.mrf.mxu0 }
 0x19d   : > { %2907 = vmatmul.msk.bf16.gmra.mxu2 %vm1875_vm11, %v1832_v49 }
 0x19e   : > { %v1251_v31 = vpop.permute.xlu2 %1250 }
 0x19f   : > { %v1603_v33 = vsel %vm1581_vm12, %v3820_v40, %v1251_v31 }
 0x1a0   : > { %v1494_v3 = vpop.permute.xlu1 %1493 }
 0x1a1   : > { %v1774_v16 = vsel %vm1746_vm1, %v1741_v58, %v1494_v3 }
 0x1a3   : > { %v1408_v32 = vpop.permute.xlu0 %1407 }
 0x1a4   : > { %v1694_v1 = vsel %vm1680_vm0, %v1661_v57, %v1408_v32  ;;  %v4275_v57 = vld [vmem:[%s4994_s2] ss:$0 sm:$0xff] }
 0x1a5   : > { %v1727_v7 = vsel %vm1713_vm15, %v1694_v1, %v1443_v22 }
 0x1a6   : > { %v1416_v6 = vpop.permute.xlu2 %1415 }
 0x1a8   : > { %v1480_v55 = vpop.permute.xlu1 %1479 }
 0x1a9   : > { %v1760_v21 = vsel %vm1746_vm1, %v1727_v7, %v1480_v55  ;;  %v4281_v7 = vadd.f32 %v4275_v57, %v1921_v63 }
 0x1ab   : > { %v1541_v14 = vpop.permute.xlu0 %1540 }
 0x1ac   : > { %v1807_v59 = vsel %vm1779_vm4, %v1774_v16, %v1541_v14  ;;  %v1928_v16 = vpop.f32.mrf.mxu0 }
 0x1ad   : > { %v1840_v9 = vsel %vm1812_vm5, %v1807_v59, %v1576_v56 }
 0x1ae   : > { %2911 = vmatmul.msk.bf16.gmra.mxu3 %vm1875_vm11, %v1840_v9  ;;  %v1340_v52 = vpop.permute.xlu2 %1339  ;;  %v4270_v9 = vpop.f32.mrf.mxu2 }
 0x1b0   : > { %v1562_v27 = vpop.permute.xlu1 %1561 }
 0x1b3   : > { %v1527_v26 = vpop.permute.xlu0 %1526 }
 0x1b4   : > { %v1793_v11 = vsel %vm1779_vm4, %v1760_v21, %v1527_v26  ;;  %v1931_v14 = vpop.f32.mrf.mxu0  ;;  %v4284_v21 = vadd.f32 %v4275_v57, %v1926_v60  ;;  %v2155_v60 = vld [vmem:[%s4997_s5 + $0x70] sm:$0xff] }
 0x1b5   : > { %v1826_v46 = vsel %vm1812_vm5, %v1793_v11, %v1562_v27  ;;  %v4278_v27 = vadd.f32 %v4275_v57, %v1923_v43  ;;  %v4289_v11 = vadd.f32 %v4275_v57, %v1928_v16 }
 0x1b6   : > { %2904 = vmatmul.msk.bf16.gmra.mxu1 %vm1875_vm11, %v1826_v46  ;;  %v1535_v42 = vpop.permute.xlu2 %1534  ;;  %v2156_v46 = vld [vmem:[%s4997_s5 + $0x78] sm:$0xff] }
 0x1b7   : > { %2185 = vmatpush.msrb.mxu2 %v2156_v46  ;;  %2157 = vmatpush.msrb.mxu1 %v2156_v46 }
 0x1b8   : > { %v1369_v38 = vpop.permute.xlu1 %1368 }
 0x1b9   : > { %2186 = vmatpush.msrb.mxu2 %v2155_v60  ;;  %2158 = vmatpush.msrb.mxu1 %v2155_v60 }
 0x1bb   : > { %v1332_v2 = vpop.permute.xlu0 %1331 }
 0x1bc   : > { %v1636_v30 = vsel %vm1614_vm13, %v1603_v33, %v1332_v2  ;;  %v1933_v19 = vpop.f32.mrf.mxu0  ;;  %v2033_v2 = vadd.f32 %v4278_v27, %v4281_v7  ;;  %v4303_v33 = vpop.f32.mrf.mxu2 }
 0x1bd   : > { %v1669_v51 = vsel %vm1647_vm14, %v1636_v30, %v1369_v38  ;;  %v2071_v38 = vmul.f32 %v4281_v7, %v4281_v7 }
 0x1be   : > { %v1702_v28 = vsel %vm1680_vm0, %v1669_v51, %v1416_v6  ;;  %v1459_v0 = vpop.permute.xlu2 %1458  ;;  %v2072_v6 = vmul.f32 %v4278_v27, %v4278_v27  ;;  %v2034_v30 = vadd.f32 %v2033_v2, %v4284_v21  ;;  %v4309_v51 = vadd.f32 %v4275_v57, %v1933_v19 }
 0x1bf   : > { %v4379_v2 = vadd.f32 %v4275_v57, %v4270_v9 }
 0x1c0   : > { %v1451_v8 = vpop.permute.xlu1 %1450 }
 0x1c1   : > { %v1735_v62 = vsel %vm1713_vm15, %v1702_v28, %v1451_v8  ;;  %v4301_v8 = vadd.f32 %v4275_v57, %v1931_v14 }
 0x1c3   : > { %v1259_v25 = vpop.permute.xlu0 %1258 }
 0x1c4   : > { %v1611_v35 = vsel %vm1581_vm12, %v3885_v47, %v1259_v25  ;;  %v1936_v59 = vpop.f32.mrf.mxu0  ;;  %v2103_v25 = vadd.f32 %v2072_v6, %v2071_v38 }
 0x1c5   : > { %v1644_v12 = vsel %vm1614_vm13, %v1611_v35, %v1340_v52  ;;  %v2073_v52 = vmul.f32 %v4284_v21, %v4284_v21  ;;  %v1961_v63 = vpop.f32.mrf.mxu2 }
 0x1c6   : > { %v1578_v41 = vpop.permute.xlu2 %1577 }
 0x1c7   : > { %v2104_v28 = vadd.f32 %v2103_v25, %v2073_v52 }
 0x1c8   : > { %v1377_v29 = vpop.permute.xlu1 %1376 }
 0x1c9   : > { %v1677_v53 = vsel %vm1647_vm14, %v1644_v12, %v1377_v29 }
 0x1cb   : > { %v1488_v5 = vpop.permute.xlu0 %1487 }
 0x1cc   : > { %v1768_v48 = vsel %vm1746_vm1, %v1735_v62, %v1488_v5  ;;  %v1938_v15 = vpop.f32.mrf.mxu0  ;;  %v2035_v5 = vadd.f32 %v2034_v30, %v4289_v11  ;;  %v2075_v62 = vmul.f32 %v4301_v8, %v4301_v8 }
 0x1cd   : > { %v1801_v18 = vsel %vm1779_vm4, %v1768_v48, %v1535_v42  ;;  %v2074_v42 = vmul.f32 %v4289_v11, %v4289_v11  ;;  %v4315_v48 = vadd.f32 %v4275_v57, %v1936_v59 }
 0x1ce   : > { %v1379_v50 = vpop.permute.xlu2 %1378 }
 0x1d0   : > { %v1570_v23 = vpop.permute.xlu1 %1569 }
 0x1d1   : > { %v1834_v40 = vsel %vm1812_vm5, %v1801_v18, %v1570_v23  ;;  %v2105_v18 = vadd.f32 %v2104_v28, %v2074_v42  ;;  %v2036_v23 = vadd.f32 %v2035_v5, %v4301_v8  ;;  %v2085_v42 = vmul.f32 %v4379_v2, %v4379_v2  ;;  %v2153_v5 = vld [vmem:[%s4997_s5 + $0x60] sm:$0xff] }
 0x1d2   : > { %2908 = vmatmul.msk.bf16.gmra.mxu2 %vm1875_vm11, %v1834_v40  ;;  %v4321_v40 = vadd.f32 %v4275_v57, %v1938_v15 }
 0x1d3   : > { %v1424_v45 = vpop.permute.xlu0 %1423  ;;  %v2037_v12 = vadd.f32 %v2036_v23, %v4309_v51 }
 0x1d4   : > { %v1710_v61 = vsel %vm1680_vm0, %v1677_v53, %v1424_v45  ;;  %v2106_v45 = vadd.f32 %v2105_v18, %v2075_v62  ;;  %v4324_v53 = vpop.f32.mrf.mxu3  ;;  %v4395_v18 = vadd.f32 %v4275_v57, %v1961_v63  ;;  %v2151_v63 = vld [vmem:[%s4997_s5 + $0x50] sm:$0xff] }
 0x1d5   : > { %v1743_v4 = vsel %vm1713_vm15, %v1710_v61, %v1459_v0  ;;  %v2076_v0 = vmul.f32 %v4309_v51, %v4309_v51  ;;  %v2077_v61 = vmul.f32 %v4315_v48, %v4315_v48 }
 0x1d6   : > { %v1498_v10 = vpop.permute.xlu2 %1497 }
 0x1d8   : > { %v1543_v24 = vpop.permute.xlu1 %1542  ;;  %v1946_v1 = vpop.f32.mrf.mxu1 }
 0x1db   : > { %v1496_v39 = vpop.permute.xlu0 %1495 }
 0x1dc   : > { %v1776_v17 = vsel %vm1746_vm1, %v1743_v4, %v1496_v39  ;;  %v2107_v4 = vadd.f32 %v2106_v45, %v2076_v0  ;;  %v2038_v39 = vadd.f32 %v2037_v12, %v4315_v48  ;;  %v2087_v45 = vmul.f32 %v4395_v18, %v4395_v18 }
 0x1dd   : > { %v1809_v22 = vsel %vm1779_vm4, %v1776_v17, %v1543_v24 }
 0x1de   : > { %v1842_v44 = vsel %vm1812_vm5, %v1809_v22, %v1578_v41  ;;  %v2078_v41 = vmul.f32 %v4321_v40, %v4321_v40 }
 0x1df   : > { %2912 = vmatmul.msk.bf16.gmra.mxu3 %vm1875_vm11, %v1842_v44  ;;  %v2108_v44 = vadd.f32 %v2107_v4, %v2077_v61  ;;  %v2152_v4 = vld [vmem:[%s4997_s5 + $0x58] sm:$0xff] }
 0x1e0   : > { %v1342_v47 = vpop.permute.xlu1 %1341  ;;  %v1948_v29 = vpop.f32.mrf.mxu1 }
 0x1e1   : > { %v2109_v43 = vadd.f32 %v2108_v44, %v2078_v41  ;;  %v2150_v41 = vld [vmem:[%s4997_s5 + $0x48] sm:$0xff] }
 0x1e3   : > { %v1261_v20 = vpop.permute.xlu0 %1260 }
 0x1e4   : > { %v1613_v36 = vsel %vm1581_vm12, %v4055_v37, %v1261_v20  ;;  %vm2657_vm12 = vcmask 1042434  }
 0x1e5   : > { %v1646_v49 = vsel %vm1614_vm13, %v1613_v36, %v1342_v47  ;;  %v2039_v47 = vadd.f32 %v2038_v39, %v4321_v40 }
 0x1e6   : > { %v1679_v54 = vsel %vm1647_vm14, %v1646_v49, %v1379_v50  ;;  %v4344_v49 = vadd.f32 %v4275_v57, %v1946_v1  ;;  %vm2660_vm14 = vcmask 1043459  }
 0x1e8   : > { %v1461_v56 = vpop.permute.xlu1 %1460 }
 0x1eb   : > { %v1426_v13 = vpop.permute.xlu0 %1425 }
 0x1ec   : > { %v1712_v3 = vsel %vm1680_vm0, %v1679_v54, %v1426_v13  ;;  %v4347_v54 = vpop.f32.mrf.mxu3  ;;  %vm2666_vm0 = vcmask 1045509  }
 0x1ed   : > { %v1745_v32 = vsel %vm1713_vm15, %v1712_v3, %v1461_v56  ;;  %vm2663_vm15 = vcmask 1044484  }
 0x1ee   : > { %v1778_v55 = vsel %vm1746_vm1, %v1745_v32, %v1498_v10  ;;  %v2154_v32 = vld [vmem:[%s4997_s5 + $0x68] sm:$0xff]  ;;  %v1963_v10 = vpop.f32.mrf.mxu2  ;;  %vm2669_vm1 = vcmask 1046534  }
 0x1ef   : > { %2187 = vmatpush.msrb.mxu2 %v2154_v32  ;;  %2159 = vmatpush.msrb.mxu1 %v2154_v32  ;;  %v4403_v12 = vadd.f32 %v4275_v57, %v1963_v10  ;;  %v2147_v10 = vld [vmem:[%s4997_s5 + $0x30] sm:$0xff] }
 0x1f0   : > { %v1580_v34 = vpop.permute.xlu1 %1579 }
 0x1f1   : > { %2188 = vmatpush.msrb.mxu2 %v2153_v5  ;;  %2160 = vmatpush.msrb.mxu1 %v2153_v5 }
 0x1f3   : > { %v1545_v31 = vpop.permute.xlu0 %1544  ;;  %2189 = vmatpush.msrb.mxu2 %v2152_v4  ;;  %2161 = vmatpush.msrb.mxu1 %v2152_v4 }
 0x1f4   : > { %v1811_v58 = vsel %vm1779_vm4, %v1778_v55, %v1545_v31  ;;  %v2081_v55 = vmul.f32 %v4344_v49, %v4344_v49  ;;  %v4358_v31 = vadd.f32 %v4275_v57, %v1948_v29  ;;  %v4375_v46 = vpop.f32.mrf.mxu3  ;;  %v4386_v29 = vadd.f32 %v4275_v57, %v4303_v33 }
 0x1f5   : > { %v1844_v37 = vsel %vm1812_vm5, %v1811_v58, %v1580_v34  ;;  %2190 = vmatpush.msrb.mxu2 %v2151_v63  ;;  %2162 = vmatpush.msrb.mxu1 %v2151_v63  ;;  %v2142_v63 = vld [vmem:[%s4997_s5 + $0x8] sm:$0xff] }
 0x1f6   : > { %2913 = vmatmul.msk.bf16.gmra.mxu3 %vm1875_vm11, %v1844_v37  ;;  %v2082_v19 = vmul.f32 %v4358_v31, %v4358_v31  ;;  %v2086_v62 = vmul.f32 %v4386_v29, %v4386_v29 }
 0x1f7   : > { %2191 = vmatpush.msrb.mxu2 %v2150_v41  ;;  %2163 = vmatpush.msrb.mxu1 %v2150_v41 }
 0x1fc   : > { %v4398_v0 = vpop.f32.mrf.mxu3 }
 0x20a   : > { %v1941_v26 = vpop.f32.mrf.mxu0 }
 0x20b   : > { %v4329_v24 = vadd.f32 %v4275_v57, %v1941_v26 }
 0x20d   : > { %v2079_v20 = vmul.f32 %v4329_v24, %v4329_v24  ;;  %v2040_v36 = vadd.f32 %v2039_v47, %v4329_v24 }
 0x20f   : > { %v2110_v56 = vadd.f32 %v2109_v43, %v2079_v20  ;;  %v2149_v20 = vld [vmem:[%s4997_s5 + $0x40] sm:$0xff] }
 0x210   : > { %2192 = vmatpush.msrb.mxu2 %v2149_v20  ;;  %2164 = vmatpush.msrb.mxu1 %v2149_v20 }
 0x212   : > { %v1943_v35 = vpop.f32.mrf.mxu0 }
 0x213   : > { %v4335_v17 = vadd.f32 %v4275_v57, %v1943_v35 }
 0x215   : > { %v2080_v50 = vmul.f32 %v4335_v17, %v4335_v17  ;;  %v2041_v13 = vadd.f32 %v2040_v36, %v4335_v17 }
 0x217   : > { %v2111_v3 = vadd.f32 %v2110_v56, %v2080_v50  ;;  %v2042_v58 = vadd.f32 %v2041_v13, %v4344_v49  ;;  %v2148_v56 = vld [vmem:[%s4997_s5 + $0x38] sm:$0xff] }
 0x218   : > { %2193 = vmatpush.msrb.mxu2 %v2148_v56  ;;  %2165 = vmatpush.msrb.mxu1 %v2148_v56 }
 0x219   : > { %v2112_v16 = vadd.f32 %v2111_v3, %v2081_v55  ;;  %v2043_v59 = vadd.f32 %v2042_v58, %v4358_v31 }
 0x21a   : > { %2194 = vmatpush.msrb.mxu2 %v2147_v10  ;;  %2166 = vmatpush.msrb.mxu1 %v2147_v10 }
 0x21b   : > { %v2113_v26 = vadd.f32 %v2112_v16, %v2082_v19 }
 0x220   : > { %v1966_v38 = vpop.f32.mrf.mxu2 }
 0x221   : > { %v4418_v44 = vadd.f32 %v4275_v57, %v1966_v38 }
 0x223   : > { %v2089_v13 = vmul.f32 %v4418_v44, %v4418_v44 }
 0x228   : > { %v1968_v33 = vpop.f32.mrf.mxu2 }
 0x229   : > { %v4432_v3 = vadd.f32 %v4275_v57, %v1968_v33 }
 0x22b   : > { %v2090_v55 = vmul.f32 %v4432_v3, %v4432_v3 }
 0x231   : > { %v4424_v43 = vpop.f32.mrf.mxu3 }
 0x233   : > { %v1951_v22 = vpop.f32.mrf.mxu1 }
 0x234   : > { %v4362_v37 = vadd.f32 %v4275_v57, %v1951_v22  ;;  %v2088_v22 = vmul.f32 %v4403_v12, %v4403_v12 }
 0x236   : > { %v2083_v15 = vmul.f32 %v4362_v37, %v4362_v37  ;;  %v2044_v1 = vadd.f32 %v2043_v59, %v4362_v37 }
 0x238   : > { %v2114_v52 = vadd.f32 %v2113_v26, %v2083_v15  ;;  %v2146_v26 = vld [vmem:[%s4997_s5 + $0x28] sm:$0xff] }
 0x239   : > { %v1988_v38 = vpop.f32.mrf.mxu3  ;;  %2195 = vmatpush.msrb.mxu2 %v2146_v26  ;;  %2167 = vmatpush.msrb.mxu1 %v2146_v26 }
 0x23b   : > { %v1953_v34 = vpop.f32.mrf.mxu1 }
 0x23c   : > { %v4365_v14 = vadd.f32 %v4275_v57, %v1953_v34 }
 0x23e   : > { %v2084_v6 = vmul.f32 %v4365_v14, %v4365_v14  ;;  %v2045_v25 = vadd.f32 %v2044_v1, %v4365_v14 }
 0x240   : > { %v2115_v30 = vadd.f32 %v2114_v52, %v2084_v6  ;;  %v2046_v28 = vadd.f32 %v2045_v25, %v4379_v2  ;;  %v2145_v6 = vld [vmem:[%s4997_s5 + $0x20] sm:$0xff]  ;;  %v4458_v52 = vadd.f32 %v4275_v57, %v4324_v53 }
 0x241   : > { %2196 = vmatpush.msrb.mxu2 %v2145_v6  ;;  %2168 = vmatpush.msrb.mxu1 %v2145_v6 }
 0x242   : > { %v2116_v9 = vadd.f32 %v2115_v30, %v2085_v42  ;;  %v2047_v23 = vadd.f32 %v2046_v28, %v4386_v29  ;;  %v2093_v5 = vmul.f32 %v4458_v52, %v4458_v52 }
 0x244   : > { %v2117_v35 = vadd.f32 %v2116_v9, %v2086_v62  ;;  %v2048_v61 = vadd.f32 %v2047_v23, %v4395_v18  ;;  %v4467_v9 = vadd.f32 %v4275_v57, %v4347_v54  ;;  %v2143_v54 = vld [vmem:[%s4997_s5 + $0x10] sm:$0xff] }
 0x246   : > { %v2118_v39 = vadd.f32 %v2117_v35, %v2087_v45  ;;  %v2049_v47 = vadd.f32 %v2048_v61, %v4403_v12  ;;  %v2094_v33 = vmul.f32 %v4467_v9, %v4467_v9  ;;  %v4474_v35 = vadd.f32 %v4275_v57, %v4375_v46  ;;  %v2144_v61 = vld [vmem:[%s4997_s5 + $0x18] sm:$0xff] }
 0x247   : > { %2197 = vmatpush.msrb.mxu2 %v2144_v61  ;;  %2169 = vmatpush.msrb.mxu1 %v2144_v61 }
 0x248   : > { %v2119_v50 = vadd.f32 %v2118_v39, %v2088_v22  ;;  %v2050_v32 = vadd.f32 %v2049_v47, %v4418_v44  ;;  %v2095_v46 = vmul.f32 %v4474_v35, %v4474_v35  ;;  %v4490_v39 = vadd.f32 %v4275_v57, %v4398_v0  ;;  %v2141_v22 = vld [vmem:[%s4997_s5] sm:$0xff] }
 0x249   : > { %2198 = vmatpush.msrb.mxu2 %v2143_v54  ;;  %2170 = vmatpush.msrb.mxu1 %v2143_v54 }
 0x24a   : > { %v2120_v34 = vadd.f32 %v2119_v50, %v2089_v13  ;;  %v2051_v58 = vadd.f32 %v2050_v32, %v4432_v3  ;;  %v2096_v20 = vmul.f32 %v4490_v39, %v4490_v39  ;;  %v4506_v32 = vadd.f32 %v4275_v57, %v1988_v38 }
 0x24b   : > { %2199 = vmatpush.msrb.mxu2 %v2142_v63  ;;  %2171 = vmatpush.msrb.mxu1 %v2142_v63 }
 0x24c   : > { %v2121_v15 = vadd.f32 %v2120_v34, %v2090_v55  ;;  %v2098_v55 = vmul.f32 %v4506_v32, %v4506_v32 }
 0x24d   : > { %2200 = vmatpush.msrb.mxu2 %v2141_v22  ;;  %2172 = vmatpush.msrb.mxu1 %v2141_v22 }
 0x255   : > { %v1971_v36 = vpop.f32.mrf.mxu2 }
 0x256   : > { %v4435_v60 = vadd.f32 %v4275_v57, %v1971_v36  ;;  %v4500_v36 = vadd.f32 %v4275_v57, %v4424_v43 }
 0x258   : > { %v2091_v16 = vmul.f32 %v4435_v60, %v4435_v60  ;;  %v2052_v59 = vadd.f32 %v2051_v58, %v4435_v60  ;;  %v2097_v13 = vmul.f32 %v4500_v36, %v4500_v36 }
 0x25a   : > { %v2122_v25 = vadd.f32 %v2121_v15, %v2091_v16 }
 0x25d   : > { %v1973_v19 = vpop.f32.mrf.mxu2 }
 0x25e   : > { %v4448_v1 = vadd.f32 %v4275_v57, %v1973_v19 }
 0x260   : > { %v2053_v30 = vadd.f32 %v2052_v59, %v4448_v1  ;;  %v2092_v42 = vmul.f32 %v4448_v1, %v4448_v1 }
 0x262   : > { %v2123_v28 = vadd.f32 %v2122_v25, %v2092_v42  ;;  %v2054_v62 = vadd.f32 %v2053_v30, %v4458_v52  ;;  %v1991_v23 = vpop.f32.mrf.mxu3 }
 0x263   : > { %v4512_v58 = vadd.f32 %v4275_v57, %v1991_v23 }
 0x264   : > { %v2124_v53 = vadd.f32 %v2123_v28, %v2093_v5  ;;  %v2055_v45 = vadd.f32 %v2054_v62, %v4467_v9 }
 0x265   : > { %v2099_v15 = vmul.f32 %v4512_v58, %v4512_v58 }
 0x266   : > { %v2125_v4 = vadd.f32 %v2124_v53, %v2094_v33  ;;  %v2056_v41 = vadd.f32 %v2055_v45, %v4474_v35 }
 0x268   : > { %v2126_v47 = vadd.f32 %v2125_v4, %v2095_v46  ;;  %v2057_v0 = vadd.f32 %v2056_v41, %v4490_v39 }
 0x26a   : > { %v1993_v50 = vpop.f32.mrf.mxu3  ;;  %v2127_v56 = vadd.f32 %v2126_v47, %v2096_v20  ;;  %v2058_v10 = vadd.f32 %v2057_v0, %v4500_v36 }
 0x26b   : > { %v4519_v26 = vadd.f32 %v4275_v57, %v1993_v50 }
 0x26c   : > { %v2128_v34 = vadd.f32 %v2127_v56, %v2097_v13  ;;  %v2059_v43 = vadd.f32 %v2058_v10, %v4506_v32  ;;  %v3225_v13 = vmov 512.0  }
 0x26d   : > { %v2100_v30 = vmul.f32 %v4519_v26, %v4519_v26  ;;  %3009 = vrcp.f32 %v3225_v13 }
 0x26e   : > { %v2129_v19 = vadd.f32 %v2128_v34, %v2098_v55  ;;  %v2060_v59 = vadd.f32 %v2059_v43, %v4512_v58 }
 0x270   : > { %v2130_v38 = vadd.f32 %v2129_v19, %v2099_v15  ;;  %v2061_v25 = vadd.f32 %v2060_v59, %v4519_v26 }
 0x272   : > { %v2131_v5 = vadd.f32 %v2130_v38, %v2100_v30 }
 0x273   : > { %v3010_v10 = vpop.eup %3009 }
 0x274   : > { %v2178_v34 = vmul.f32 512.0, %v3010_v10  ;;  %vm2182_vm2 = vweird.f32 %v3010_v10 }
 0x276   : > { %v2179_v55 = vsub.f32 1.0, %v2178_v34 }
 0x278   : > { %v2180_v43 = vmul.f32 %v3010_v10, %v2179_v55 }
 0x279   : > { %v1996_v16 = vpop.f32.mrf.mxu3 }
 0x27a   : > { %v4522_v6 = vadd.f32 %v4275_v57, %v1996_v16  ;;  %v2181_v16 = vadd.f32 %v3010_v10, %v2180_v43  ;;  %v4611_v43 = vld [vmem:[%s4995_s3] ss:$0 sm:$0xff] }
 0x27c   : > { %v2101_v42 = vmul.f32 %v4522_v6, %v4522_v6  ;;  %v2062_v62 = vadd.f32 %v2061_v25, %v4522_v6  ;;  %v2183_v59 = vsel %vm2182_vm2, %v3010_v10, %v2181_v16 }
 0x27e   : > { %v2132_v23 = vadd.f32 %v2131_v5, %v2101_v42 }
 0x281   : > { %v1998_v28 = vpop.f32.mrf.mxu3 }
 0x282   : > { %v4531_v53 = vadd.f32 %v4275_v57, %v1998_v28 }
 0x284   : > { %v2063_v33 = vadd.f32 %v2062_v62, %v4531_v53  ;;  %v2102_v45 = vmul.f32 %v4531_v53, %v4531_v53 }
 0x286   : > { %v2064_v61 = vrot.slane %v2063_v33, 4  ;;  %v2133_v54 = vadd.f32 %v2132_v23, %v2102_v45 }
 0x288   : > { %v2065_v4 = vadd.f32 %v2064_v61, %v2063_v33  ;;  %v2134_v63 = vrot.slane %v2133_v54, 4 }
 0x28a   : > { %v2066_v46 = vrot.slane %v2065_v4, 2  ;;  %v2135_v41 = vadd.f32 %v2134_v63, %v2133_v54 }
 0x28c   : > { %v2067_v22 = vadd.f32 %v2066_v46, %v2065_v4  ;;  %v2136_v47 = vrot.slane %v2135_v41, 2 }
 0x28e   : > { %v2068_v20 = vrot.slane %v2067_v22, 1  ;;  %v2137_v0 = vadd.f32 %v2136_v47, %v2135_v41 }
 0x290   : > { %v2069_v50 = vadd.f32 %v2068_v20, %v2067_v22  ;;  %v2138_v56 = vrot.slane %v2137_v0, 1 }
 0x292   : > { %2173 = vmatmul.f32.vlgmr.msrb.gmra.mxu1 %v2069_v50  ;;  %v2139_v57 = vadd.f32 %v2138_v56, %v2137_v0 }
 0x294   : > { %2201 = vmatmul.f32.vlgmr.msrb.gmra.mxu2 %v2139_v57 }
 0x30f   : > { %v2174_v19 = vpop.f32.mrf.mxu1 }
 0x310   : > { %v2184_v15 = vmul.f32 %v2183_v59, %v2174_v19 }
 0x312   : > { %v2206_v25 = vmul.f32 %v2184_v15, %v2184_v15  ;;  %v4536_v61 = vperm.slane %v2184_v15, 0 }
 0x314   : > { %v2255_v63 = vsub.f32 %v4281_v7, %v4536_v61  ;;  %v2256_v46 = vsub.f32 %v4278_v27, %v4536_v61  ;;  %v2257_v41 = vsub.f32 %v4284_v21, %v4536_v61  ;;  %v2263_v22 = vsub.f32 %v4329_v24, %v4536_v61 }
 0x315   : > { %v2264_v47 = vsub.f32 %v4335_v17, %v4536_v61  ;;  %v2265_v0 = vsub.f32 %v4344_v49, %v4536_v61  ;;  %v2266_v7 = vsub.f32 %v4358_v31, %v4536_v61  ;;  %v2267_v27 = vsub.f32 %v4362_v37, %v4536_v61 }
 0x316   : > { %v2268_v21 = vsub.f32 %v4365_v14, %v4536_v61  ;;  %v2269_v24 = vsub.f32 %v4379_v2, %v4536_v61  ;;  %v2270_v17 = vsub.f32 %v4386_v29, %v4536_v61  ;;  %v2271_v49 = vsub.f32 %v4395_v18, %v4536_v61 }
 0x317   : > { %v2202_v38 = vpop.f32.mrf.mxu2  ;;  %v2272_v31 = vsub.f32 %v4403_v12, %v4536_v61  ;;  %v2273_v37 = vsub.f32 %v4418_v44, %v4536_v61  ;;  %v2279_v56 = vsub.f32 %v4474_v35, %v4536_v61  ;;  %v2280_v14 = vsub.f32 %v4490_v39, %v4536_v61 }
 0x318   : > { %v2205_v30 = vmul.f32 %v2202_v38, %v2183_v59  ;;  %v2281_v2 = vsub.f32 %v4500_v36, %v4536_v61  ;;  %v2282_v29 = vsub.f32 %v4506_v32, %v4536_v61  ;;  %v2283_v18 = vsub.f32 %v4512_v58, %v4536_v61 }
 0x319   : > { %v2284_v12 = vsub.f32 %v4519_v26, %v4536_v61  ;;  %v2285_v16 = vsub.f32 %v4522_v6, %v4536_v61  ;;  %v2286_v19 = vsub.f32 %v4531_v53, %v4536_v61  ;;  %v4632_v6 = vld [vmem:[%s4996_s4] ss:$0 sm:$0xff] }
 0x31a   : > { %v2207_v42 = vsub.f32 %v2205_v30, %v2206_v25 }
 0x31c   : > { %v2208_v28 = vmax.f32 %v2207_v42, 0.0 }
 0x31e   : > { %v2209_v5 = vadd.f32 1e-05, %v2208_v28 }
 0x320   : > { %3011 = vrsqrt.f32 %v2209_v5  ;;  %vm2216_vm6 = vweird.f32 %v2209_v5 }
 0x326   : > { %v3012_v62 = vpop.eup %3011 }
 0x327   : > { %v2211_v23 = vmul.f32 %v3012_v62, %v2209_v5  ;;  %vm2217_vm3 = vweird.f32 %v3012_v62 }
 0x328   : > { %vm2218_vm7 = vmor %vm2216_vm6, %vm2217_vm3 }
 0x329   : > { %v2212_v33 = vmul.f32 %v3012_v62, %v2211_v23 }
 0x32b   : > { %v2213_v45 = vmul.f32 0.5, %v2212_v33 }
 0x32d   : > { %v2214_v54 = vsub.f32 1.5, %v2213_v45 }
 0x32f   : > { %v2215_v4 = vmul.f32 %v3012_v62, %v2214_v54 }
 0x331   : > { %v2219_v20 = vsel %vm2218_vm7, %v3012_v62, %v2215_v4 }
 0x332   : > { %v4554_v50 = vperm.slane %v2219_v20, 0 }
 0x334   : > { %v4581_v44 = vmul.f32 %v4554_v50, %v2263_v22  ;;  %v4584_v35 = vmul.f32 %v4554_v50, %v2264_v47  ;;  %v4587_v39 = vmul.f32 %v4554_v50, %v2265_v0  ;;  %v4590_v36 = vmul.f32 %v4554_v50, %v2266_v7 }
 0x335   : > { %v4593_v32 = vmul.f32 %v4554_v50, %v2267_v27  ;;  %v4596_v58 = vmul.f32 %v4554_v50, %v2268_v21  ;;  %v4599_v26 = vmul.f32 %v4554_v50, %v2269_v24  ;;  %v4602_v57 = vmul.f32 %v4554_v50, %v2270_v17 }
 0x336   : > { %v2288_v13 = vmul.f32 %v4554_v50, %v2255_v63  ;;  %v2289_v10 = vmul.f32 %v4554_v50, %v2256_v46  ;;  %v2304_v34 = vmul.f32 %v4554_v50, %v2271_v49  ;;  %v2305_v55 = vmul.f32 %v4554_v50, %v2272_v31 }
 0x337   : > { %v2290_v59 = vmul.f32 %v4554_v50, %v2257_v41  ;;  %v2306_v15 = vmul.f32 %v4554_v50, %v2273_v37  ;;  %v2312_v38 = vmul.f32 %v4554_v50, %v2279_v56  ;;  %v4621_v25 = vmul.f32 %v4554_v50, %v2280_v14 }
 0x338   : > { %v4624_v30 = vmul.f32 %v4554_v50, %v2281_v2  ;;  %v4627_v42 = vmul.f32 %v4554_v50, %v2282_v29  ;;  %v4635_v53 = vmul.f32 %v4554_v50, %v2283_v18  ;;  %v4638_v28 = vmul.f32 %v4554_v50, %v2284_v12 }
 0x339   : > { %v4641_v5 = vmul.f32 %v4554_v50, %v2285_v16  ;;  %v4644_v62 = vmul.f32 %v4554_v50, %v2286_v19  ;;  %v2339_v23 = vmul.f32 %v4611_v43, %v2304_v34  ;;  %v2323_v33 = vmul.f32 %v4611_v43, %v2288_v13 }
 0x33a   : > { %v2340_v45 = vmul.f32 %v4611_v43, %v2305_v55  ;;  %v2324_v54 = vmul.f32 %v4611_v43, %v2289_v10  ;;  %v2341_v4 = vmul.f32 %v4611_v43, %v2306_v15  ;;  %v2274_v47 = vsub.f32 %v4432_v3, %v4536_v61 }
 0x33b   : > { %v4652_v63 = vadd.f32 %v4632_v6, %v2339_v23  ;;  %v4655_v46 = vadd.f32 %v4632_v6, %v2323_v33  ;;  %v2325_v0 = vmul.f32 %v4611_v43, %v2290_v59  ;;  %v2258_v17 = vsub.f32 %v4289_v11, %v4536_v61 }
 0x33c   : > { %v4658_v41 = vadd.f32 %v4632_v6, %v2340_v45  ;;  %v4661_v22 = vadd.f32 %v4632_v6, %v2324_v54  ;;  %v4666_v20 = vadd.f32 %v4632_v6, %v2341_v4  ;;  %v2307_v49 = vmul.f32 %v4554_v50, %v2274_v47 }
 0x33d   : > { %v2406_v7 = vsub.f32 0.0, %v4652_v63  ;;  %v2390_v27 = vsub.f32 0.0, %v4655_v46  ;;  %v2291_v56 = vmul.f32 %v4554_v50, %v2258_v17  ;;  %v4678_v2 = vadd.f32 %v4632_v6, %v2325_v0 }
 0x33e   : > { %v2407_v21 = vsub.f32 0.0, %v4658_v41  ;;  %v2391_v24 = vsub.f32 0.0, %v4661_v22  ;;  %v2408_v29 = vsub.f32 0.0, %v4666_v20  ;;  %v2342_v18 = vmul.f32 %v4611_v43, %v2307_v49 }
 0x33f   : > { %v2454_v31 = vmul.f32 1.442695, %v2406_v7  ;;  %v2422_v3 = vmul.f32 1.442695, %v2390_v27  ;;  %v2392_v11 = vsub.f32 0.0, %v4678_v2  ;;  %v2326_v12 = vmul.f32 %v4611_v43, %v2291_v56 }
 0x340   : > { %v2456_v37 = vmul.f32 1.442695, %v2407_v21  ;;  %v2424_v14 = vmul.f32 1.442695, %v2391_v24  ;;  %v2275_v13 = vsub.f32 %v4435_v60, %v4536_v61  ;;  %v2458_v10 = vmul.f32 1.442695, %v2408_v29 }
 0x341   : > { %3013 = vpow2.f32 %v2454_v31  ;;  %v2259_v34 = vsub.f32 %v4301_v8, %v4536_v61  ;;  %v4689_v55 = vadd.f32 %v4632_v6, %v2342_v18  ;;  %v2426_v33 = vmul.f32 1.442695, %v2392_v11 }
 0x342   : > { %3015 = vpow2.f32 %v2422_v3  ;;  %v2308_v19 = vmul.f32 %v4554_v50, %v2275_v13  ;;  %v4694_v45 = vadd.f32 %v4632_v6, %v2326_v12  ;;  %v2260_v8 = vsub.f32 %v4309_v51, %v4536_v61 }
 0x343   : > { %3017 = vpow2.f32 %v2456_v37  ;;  %v2292_v15 = vmul.f32 %v4554_v50, %v2259_v34  ;;  %v2276_v47 = vsub.f32 %v4448_v1, %v4536_v61  ;;  %v2409_v0 = vsub.f32 0.0, %v4689_v55 }
 0x344   : > { %3019 = vpow2.f32 %v2424_v14  ;;  %v2343_v7 = vmul.f32 %v4611_v43, %v2308_v19  ;;  %v2347_v27 = vmul.f32 %v4611_v43, %v2312_v38  ;;  %v2331_v21 = vmul.f32 %v4611_v43, %v4581_v44 }
 0x345   : > { %3021 = vpow2.f32 %v2458_v10  ;;  %v2393_v17 = vsub.f32 0.0, %v4694_v45  ;;  %v2327_v51 = vmul.f32 %v4611_v43, %v2292_v15  ;;  %v2309_v49 = vmul.f32 %v4554_v50, %v2276_v47 }
 0x346   : > { %v4709_v31 = vadd.f32 %v4632_v6, %v2347_v27  ;;  %v4712_v3 = vadd.f32 %v4632_v6, %v2331_v21  ;;  %v2293_v38 = vmul.f32 %v4554_v50, %v2260_v8  ;;  %v2261_v44 = vsub.f32 %v4315_v48, %v4536_v61 }
 0x347   : > { %v3014_v16 = vpop.eup %3013  ;;  %v2460_v56 = vmul.f32 1.442695, %v2409_v0  ;;  %v4718_v14 = vadd.f32 %v4632_v6, %v2343_v7  ;;  %v2428_v18 = vmul.f32 1.442695, %v2393_v17  ;;  %v4721_v11 = vadd.f32 %v4632_v6, %v2327_v51 }
 0x348   : > { %v3016_v59 = vpop.eup %3015  ;;  %v2502_v23 = vadd.f32 1.0, %v3014_v16  ;;  %v2348_v12 = vmul.f32 %v4611_v43, %v4621_v25  ;;  %v2277_v10 = vsub.f32 %v4458_v52, %v4536_v61  ;;  %v2344_v48 = vmul.f32 %v4611_v43, %v2309_v49 }
 0x349   : > { %v3018_v54 = vpop.eup %3017  ;;  %v2486_v60 = vadd.f32 1.0, %v3016_v59  ;;  %v2328_v59 = vmul.f32 %v4611_v43, %v2293_v38  ;;  %v2332_v25 = vmul.f32 %v4611_v43, %v4584_v35  ;;  %v2410_v52 = vsub.f32 0.0, %v4718_v14 }
 0x34a   : > { %v3020_v4 = vpop.eup %3019  ;;  %3023 = vrcp.f32 %v2502_v23  ;;  %v2503_v24 = vadd.f32 1.0, %v3018_v54  ;;  %v4732_v15 = vadd.f32 %v4632_v6, %v2348_v12  ;;  %v2333_v23 = vmul.f32 %v4611_v43, %v4587_v39 }
 0x34b   : > { %3025 = vrcp.f32 %v2486_v60  ;;  %v2487_v1 = vadd.f32 1.0, %v3020_v4  ;;  %v3022_v37 = vpop.eup %3021  ;;  %v4743_v54 = vadd.f32 %v4632_v6, %v2332_v25  ;;  %v2310_v35 = vmul.f32 %v4554_v50, %v2277_v10 }
 0x34c   : > { %3027 = vpow2.f32 %v2426_v33  ;;  %v2394_v33 = vsub.f32 0.0, %v4721_v11  ;;  %v4750_v8 = vadd.f32 %v4632_v6, %v2333_v23  ;;  %v2294_v39 = vmul.f32 %v4554_v50, %v2261_v44 }
 0x34d   : > { %3029 = vrcp.f32 %v2503_v24  ;;  %v2462_v0 = vmul.f32 1.442695, %v2410_v52  ;;  %v4754_v7 = vadd.f32 %v4632_v6, %v2344_v48  ;;  %v4757_v21 = vadd.f32 %v4632_v6, %v2328_v59 }
 0x34e   : > { %3031 = vrcp.f32 %v2487_v1  ;;  %v2430_v27 = vmul.f32 1.442695, %v2394_v33  ;;  %v2350_v24 = vmul.f32 %v4611_v43, %v4627_v42  ;;  %v2278_v51 = vsub.f32 %v4467_v9, %v4536_v61 }
 0x34f   : > { %3033 = vpow2.f32 %v2460_v56  ;;  %v2345_v1 = vmul.f32 %v4611_v43, %v2310_v35  ;;  %v2329_v44 = vmul.f32 %v4611_v43, %v2294_v39  ;;  %v2334_v42 = vmul.f32 %v4611_v43, %v4590_v36 }
 0x350   : > { %v3024_v29 = vpop.eup %3023  ;;  %3035 = vpow2.f32 %v2428_v18  ;;  %v4768_v56 = vadd.f32 %v4632_v6, %v2350_v24  ;;  %v2411_v9 = vsub.f32 0.0, %v4754_v7  ;;  %v2395_v18 = vsub.f32 0.0, %v4757_v21 }
 0x351   : > { %v3026_v13 = vpop.eup %3025  ;;  %v2566_v34 = vmul.f32 %v3024_v29, %v4652_v63  ;;  %v2349_v63 = vmul.f32 %v4611_v43, %v4624_v30  ;;  %v2335_v29 = vmul.f32 %v4611_v43, %v4593_v32  ;;  %v4779_v12 = vadd.f32 %v4632_v6, %v2334_v42 }
 0x352   : > { %v3028_v16 = vpop.eup %3027  ;;  %v2550_v19 = vmul.f32 %v3026_v13, %v4655_v46  ;;  %v2504_v46 = vadd.f32 1.0, %v3022_v37  ;;  %v4782_v36 = vadd.f32 %v4632_v6, %v2345_v1  ;;  %v2262_v32 = vsub.f32 %v4321_v40, %v4536_v61 }
 0x353   : > { %2614 = vxpose.xlu0.b32.start [1/16] (narrow) %v2566_v34, 16  ;;  %v2488_v60 = vadd.f32 1.0, %v3028_v16  ;;  %v4747_v4 = vadd.f32 %v4632_v6, %v2349_v63  ;;  %v3030_v30 = vpop.eup %3029  ;;  %v4793_v48 = vadd.f32 %v4632_v6, %v2329_v44  ;;  %v2464_v59 = vmul.f32 1.442695, %v2411_v9 }
 0x354   : > { %2582 = vxpose.xlu2.b32.start [1/16] (narrow) %v2550_v19, 16  ;;  %v3032_v47 = vpop.eup %3031  ;;  %3037 = vrcp.f32 %v2504_v46  ;;  %v2567_v49 = vmul.f32 %v3030_v30, %v4658_v41  ;;  %v2351_v41 = vmul.f32 %v4611_v43, %v4635_v53  ;;  %v4788_v53 = vadd.f32 %v4632_v6, %v2335_v29 }
 0x355   : > { %v3034_v17 = vpop.eup %3033  ;;  %3039 = vrcp.f32 %v2488_v60  ;;  %v2551_v37 = vmul.f32 %v3032_v47, %v4661_v22  ;;  %v2311_v19 = vmul.f32 %v4554_v50, %v2278_v51  ;;  %v2295_v25 = vmul.f32 %v4554_v50, %v2262_v32 }
 0x356   : > { %v3036_v38 = vpop.eup %3035  ;;  %3041 = vpow2.f32 %v2462_v0  ;;  %v2505_v22 = vadd.f32 1.0, %v3034_v17  ;;  %v4785_v10 = vadd.f32 %v4632_v6, %v2351_v41  ;;  %v2432_v52 = vmul.f32 1.442695, %v2395_v18 }
 0x357   : > { %3043 = vpow2.f32 %v2430_v27  ;;  %v2489_v13 = vadd.f32 1.0, %v3036_v38  ;;  %v2352_v63 = vmul.f32 %v4611_v43, %v4638_v28  ;;  %v2412_v40 = vsub.f32 0.0, %v4782_v36 }
 0x358   : > { %3045 = vrcp.f32 %v2505_v22  ;;  %v2396_v35 = vsub.f32 0.0, %v4793_v48  ;;  %v2336_v50 = vmul.f32 %v4611_v43, %v4596_v58  ;;  %v2346_v28 = vmul.f32 %v4611_v43, %v2311_v19 }
 0x359   : > { %3047 = vrcp.f32 %v2489_v13  ;;  %v4804_v60 = vadd.f32 %v4632_v6, %v2352_v63  ;;  %v2337_v30 = vmul.f32 %v4611_v43, %v4599_v26  ;;  %v2330_v39 = vmul.f32 %v4611_v43, %v2295_v25 }
 0x35a   : > { %v3038_v34 = vpop.eup %3037  ;;  %3049 = vpow2.f32 %v2464_v59  ;;  %v4815_v47 = vadd.f32 %v4632_v6, %v2336_v50  ;;  %v2466_v17 = vmul.f32 1.442695, %v2412_v40  ;;  %v4824_v26 = vadd.f32 %v4632_v6, %v2346_v28 }
 0x35b   : > { %2615 = vxpose.xlu0.b32.cont [2/16] (narrow) %v2567_v49, 16  ;;  %v3040_v16 = vpop.eup %3039  ;;  %v2568_v46 = vmul.f32 %v3038_v34, %v4666_v20  ;;  %v2353_v20 = vmul.f32 %v4611_v43, %v4641_v5  ;;  %3051 = vpow2.f32 %v2432_v52  ;;  %v4821_v27 = vadd.f32 %v4632_v6, %v2337_v30 }
 0x35c   : > { %2583 = vxpose.xlu2.b32.cont [2/16] (narrow) %v2551_v37, 16  ;;  %v3042_v23 = vpop.eup %3041  ;;  %v2552_v33 = vmul.f32 %v3040_v16, %v4678_v2  ;;  %v2434_v51 = vmul.f32 1.442695, %v2396_v35  ;;  %v4827_v49 = vadd.f32 %v4632_v6, %v2330_v39  ;;  %v2354_v1 = vmul.f32 %v4611_v43, %v4644_v62 }
 0x35d   : > { %v3044_v61 = vpop.eup %3043  ;;  %v2506_v2 = vadd.f32 1.0, %v3042_v23  ;;  %v4818_v58 = vadd.f32 %v4632_v6, %v2353_v20  ;;  %v2338_v41 = vmul.f32 %v4611_v43, %v4602_v57  ;;  %v2413_v29 = vsub.f32 0.0, %v4824_v26 }
 0x35e   : > { %v2490_v0 = vadd.f32 1.0, %v3044_v61  ;;  %v3046_v24 = vpop.eup %3045  ;;  %v4834_v9 = vadd.f32 %v4632_v6, %v2354_v1  ;;  %v2397_v62 = vsub.f32 0.0, %v4827_v49  ;;  %v2414_v59 = vsub.f32 0.0, %v4709_v31 }
 0x35f   : > { %v3048_v5 = vpop.eup %3047  ;;  %3053 = vrcp.f32 %v2506_v2  ;;  %v2569_v37 = vmul.f32 %v3046_v24, %v4689_v55  ;;  %v4841_v55 = vadd.f32 %v4632_v6, %v2338_v41  ;;  %v2468_v34 = vmul.f32 1.442695, %v2413_v29 }
 0x360   : > { %v3050_v38 = vpop.eup %3049  ;;  %3055 = vrcp.f32 %v2490_v0  ;;  %v2553_v42 = vmul.f32 %v3048_v5, %v4694_v45  ;;  %v2436_v32 = vmul.f32 1.442695, %v2397_v62  ;;  %v2398_v25 = vsub.f32 0.0, %v4712_v3 }
 0x361   : > { %v3052_v44 = vpop.eup %3051  ;;  %3057 = vpow2.f32 %v2466_v17  ;;  %v2507_v22 = vadd.f32 1.0, %v3050_v38  ;;  %v2415_v35 = vsub.f32 0.0, %v4732_v15  ;;  %v2399_v28 = vsub.f32 0.0, %v4743_v54 }
 0x362   : > { %3059 = vpow2.f32 %v2434_v51  ;;  %v2491_v18 = vadd.f32 1.0, %v3052_v44  ;;  %v2438_v40 = vmul.f32 1.442695, %v2398_v25  ;;  %v2416_v17 = vsub.f32 0.0, %v4747_v4 }
 0x363   : > { %2616 = vxpose.xlu0.b32.cont [3/16] (narrow) %v2568_v46, 16  ;;  %3061 = vrcp.f32 %v2507_v22  ;;  %v2470_v46 = vmul.f32 1.442695, %v2414_v59  ;;  %v2472_v39 = vmul.f32 1.442695, %v2415_v35  ;;  %v2400_v1 = vsub.f32 0.0, %v4750_v8 }
 0x364   : > { %2584 = vxpose.xlu2.b32.cont [3/16] (narrow) %v2552_v33, 16  ;;  %3063 = vrcp.f32 %v2491_v18  ;;  %v2440_v0 = vmul.f32 1.442695, %v2399_v28  ;;  %v2417_v62 = vsub.f32 0.0, %v4768_v56  ;;  %v2418_v59 = vsub.f32 0.0, %v4785_v10 }
 0x365   : > { %v3054_v45 = vpop.eup %3053  ;;  %3065 = vpow2.f32 %v2468_v34  ;;  %v2442_v41 = vmul.f32 1.442695, %v2400_v1  ;;  %v2402_v25 = vsub.f32 0.0, %v4788_v53  ;;  %v2403_v35 = vsub.f32 0.0, %v4815_v47 }
 0x366   : > { %v3056_v13 = vpop.eup %3055  ;;  %v2570_v57 = vmul.f32 %v3054_v45, %v4718_v14  ;;  %3067 = vpow2.f32 %v2436_v32  ;;  %v2401_v45 = vsub.f32 0.0, %v4779_v12 }
 0x367   : > { %v3058_v16 = vpop.eup %3057  ;;  %v2554_v19 = vmul.f32 %v3056_v13, %v4721_v11 }
 0x368   : > { %v3060_v43 = vpop.eup %3059  ;;  %v2508_v6 = vadd.f32 1.0, %v3058_v16  ;;  %v2476_v16 = vmul.f32 1.442695, %v2417_v62 }
 0x369   : > { %v2492_v52 = vadd.f32 1.0, %v3060_v43  ;;  %v3062_v63 = vpop.eup %3061 }
 0x36a   : > { %v3064_v23 = vpop.eup %3063  ;;  %3069 = vrcp.f32 %v2508_v6  ;;  %v2571_v61 = vmul.f32 %v3062_v63, %v4754_v7 }
 0x36b   : > { %2617 = vxpose.xlu0.b32.cont [4/16] (narrow) %v2569_v37, 16  ;;  %v3066_v14 = vpop.eup %3065  ;;  %3071 = vrcp.f32 %v2492_v52  ;;  %v2555_v33 = vmul.f32 %v3064_v23, %v4757_v21 }
 0x36c   : > { %2585 = vxpose.xlu2.b32.cont [4/16] (narrow) %v2553_v42, 16  ;;  %v3068_v11 = vpop.eup %3067  ;;  %3073 = vpow2.f32 %v2470_v46  ;;  %v2509_v50 = vadd.f32 1.0, %v3066_v14  ;;  %v2474_v42 = vmul.f32 1.442695, %v2416_v17  ;;  %v2478_v46 = vmul.f32 1.442695, %v2418_v59 }
 0x36d   : > { %3075 = vpow2.f32 %v2438_v40  ;;  %v2493_v20 = vadd.f32 1.0, %v3068_v11  ;;  %v2446_v40 = vmul.f32 1.442695, %v2402_v25  ;;  %v2419_v11 = vsub.f32 0.0, %v4804_v60 }
 0x36e   : > { %3077 = vrcp.f32 %v2509_v50 }
 0x36f   : > { %3079 = vrcp.f32 %v2493_v20 }
 0x370   : > { %v3070_v30 = vpop.eup %3069  ;;  %3081 = vpow2.f32 %v2472_v39 }
 0x371   : > { %v3072_v2 = vpop.eup %3071  ;;  %v2572_v24 = vmul.f32 %v3070_v30, %v4782_v36  ;;  %3083 = vpow2.f32 %v2440_v0  ;;  %v2480_v30 = vmul.f32 1.442695, %v2419_v11 }
 0x372   : > { %v3074_v7 = vpop.eup %3073  ;;  %v2556_v5 = vmul.f32 %v3072_v2, %v4793_v48  ;;  %v2448_v2 = vmul.f32 1.442695, %v2403_v35 }
 0x373   : > { %2618 = vxpose.xlu0.b32.cont [5/16] (narrow) %v2570_v57, 16  ;;  %v3076_v21 = vpop.eup %3075  ;;  %v2510_v51 = vadd.f32 1.0, %v3074_v7  ;;  %v2444_v57 = vmul.f32 1.442695, %v2401_v45  ;;  %v2420_v7 = vsub.f32 0.0, %v4818_v58 }
 0x374   : > { %2586 = vxpose.xlu2.b32.cont [5/16] (narrow) %v2554_v19, 16  ;;  %v2494_v38 = vadd.f32 1.0, %v3076_v21  ;;  %v3078_v37 = vpop.eup %3077  ;;  %v2404_v21 = vsub.f32 0.0, %v4821_v27 }
 0x375   : > { %v3080_v44 = vpop.eup %3079  ;;  %3085 = vrcp.f32 %v2510_v51  ;;  %v2573_v29 = vmul.f32 %v3078_v37, %v4824_v26  ;;  %v2482_v1 = vmul.f32 1.442695, %v2420_v7 }
 0x376   : > { %v3082_v36 = vpop.eup %3081  ;;  %3087 = vrcp.f32 %v2494_v38  ;;  %v2557_v22 = vmul.f32 %v3080_v44, %v4827_v49  ;;  %v2450_v38 = vmul.f32 1.442695, %v2404_v21 }
 0x377   : > { %v3084_v48 = vpop.eup %3083  ;;  %3089 = vpow2.f32 %v2474_v42  ;;  %v2511_v18 = vadd.f32 1.0, %v3082_v36  ;;  %v2421_v42 = vsub.f32 0.0, %v4834_v9  ;;  %v2405_v36 = vsub.f32 0.0, %v4841_v55 }
 0x378   : > { %3091 = vpow2.f32 %v2442_v41  ;;  %v2495_v13 = vadd.f32 1.0, %v3084_v48 }
 0x379   : > { %3093 = vrcp.f32 %v2511_v18  ;;  %v2484_v62 = vmul.f32 1.442695, %v2421_v42  ;;  %v2452_v18 = vmul.f32 1.442695, %v2405_v36 }
 0x37a   : > { %3095 = vrcp.f32 %v2495_v13 }
 0x37b   : > { %2619 = vxpose.xlu0.b32.cont [6/16] (narrow) %v2571_v61, 16  ;;  %v3086_v34 = vpop.eup %3085  ;;  %3097 = vpow2.f32 %v2476_v16 }
 0x37c   : > { %2587 = vxpose.xlu2.b32.cont [6/16] (narrow) %v2555_v33, 16  ;;  %v3088_v32 = vpop.eup %3087  ;;  %v2574_v43 = vmul.f32 %v3086_v34, %v4709_v31  ;;  %3099 = vpow2.f32 %v2444_v57 }
 0x37d   : > { %v3090_v26 = vpop.eup %3089  ;;  %v2558_v19 = vmul.f32 %v3088_v32, %v4712_v3 }
 0x37e   : > { %v3092_v49 = vpop.eup %3091  ;;  %v2512_v6 = vadd.f32 1.0, %v3090_v26 }
 0x37f   : > { %v2496_v52 = vadd.f32 1.0, %v3092_v49  ;;  %v3094_v63 = vpop.eup %3093 }
 0x380   : > { %v3096_v23 = vpop.eup %3095  ;;  %3101 = vrcp.f32 %v2512_v6  ;;  %v2575_v14 = vmul.f32 %v3094_v63, %v4732_v15 }
 0x381   : > { %v3098_v31 = vpop.eup %3097  ;;  %3103 = vrcp.f32 %v2496_v52  ;;  %v2559_v61 = vmul.f32 %v3096_v23, %v4743_v54 }
 0x382   : > { %v3100_v3 = vpop.eup %3099  ;;  %3105 = vpow2.f32 %v2478_v46  ;;  %v2513_v33 = vadd.f32 1.0, %v3098_v31  ;;  %v2706_v46 = vlaneseq }
 0x383   : > { %2620 = vxpose.xlu0.b32.cont [7/16] (narrow) %v2572_v24, 16  ;;  %3107 = vpow2.f32 %v2446_v40  ;;  %v2497_v50 = vadd.f32 1.0, %v3100_v3 }
 0x384   : > { %2588 = vxpose.xlu2.b32.cont [7/16] (narrow) %v2556_v5, 16  ;;  %3109 = vrcp.f32 %v2513_v33  ;;  %vm4886_vm13 = vcmp.lt.s32.totalorder %v2706_v46, 256 }
 0x385   : > { %3111 = vrcp.f32 %v2497_v50 }
 0x386   : > { %v3102_v28 = vpop.eup %3101  ;;  %3113 = vpow2.f32 %v2480_v30 }
 0x387   : > { %v3104_v20 = vpop.eup %3103  ;;  %v2576_v39 = vmul.f32 %v3102_v28, %v4747_v4  ;;  %3115 = vpow2.f32 %v2448_v2 }
 0x388   : > { %v3106_v15 = vpop.eup %3105  ;;  %v2560_v0 = vmul.f32 %v3104_v20, %v4750_v8 }
 0x389   : > { %v3108_v54 = vpop.eup %3107  ;;  %v2514_v24 = vadd.f32 1.0, %v3106_v15 }
 0x38a   : > { %v2498_v5 = vadd.f32 1.0, %v3108_v54  ;;  %v3110_v17 = vpop.eup %3109 }
 0x38b   : > { %2621 = vxpose.xlu0.b32.cont [8/16] (narrow) %v2573_v29, 16  ;;  %v3112_v51 = vpop.eup %3111  ;;  %3117 = vrcp.f32 %v2514_v24  ;;  %v2577_v37 = vmul.f32 %v3110_v17, %v4768_v56 }
 0x38c   : > { %2589 = vxpose.xlu2.b32.cont [8/16] (narrow) %v2557_v22, 16  ;;  %v3114_v4 = vpop.eup %3113  ;;  %3119 = vrcp.f32 %v2498_v5  ;;  %v2561_v44 = vmul.f32 %v3112_v51, %v4779_v12 }
 0x38d   : > { %v3116_v8 = vpop.eup %3115  ;;  %3121 = vpow2.f32 %v2482_v1  ;;  %v2515_v41 = vadd.f32 1.0, %v3114_v4 }
 0x38e   : > { %3123 = vpow2.f32 %v2450_v38  ;;  %v2499_v29 = vadd.f32 1.0, %v3116_v8 }
 0x38f   : > { %3125 = vrcp.f32 %v2515_v41 }
 0x390   : > { %3127 = vrcp.f32 %v2499_v29 }
 0x391   : > { %v3118_v48 = vpop.eup %3117  ;;  %3129 = vpow2.f32 %v2484_v62 }
 0x392   : > { %v3120_v22 = vpop.eup %3119  ;;  %v2578_v45 = vmul.f32 %v3118_v48, %v4785_v10  ;;  %3131 = vpow2.f32 %v2452_v18 }
 0x393   : > { %2622 = vxpose.xlu0.b32.cont [9/16] (narrow) %v2574_v43, 16  ;;  %v3122_v56 = vpop.eup %3121  ;;  %v2562_v13 = vmul.f32 %v3120_v22, %v4788_v53 }
 0x394   : > { %2590 = vxpose.xlu2.b32.cont [9/16] (narrow) %v2558_v19, 16  ;;  %v3124_v12 = vpop.eup %3123  ;;  %v2516_v34 = vadd.f32 1.0, %v3122_v56 }
 0x395   : > { %v2500_v32 = vadd.f32 1.0, %v3124_v12  ;;  %v3126_v16 = vpop.eup %3125 }
 0x396   : > { %v3128_v57 = vpop.eup %3127  ;;  %3133 = vrcp.f32 %v2516_v34  ;;  %v2579_v43 = vmul.f32 %v3126_v16, %v4804_v60 }
 0x397   : > { %v3130_v26 = vpop.eup %3129  ;;  %3135 = vrcp.f32 %v2500_v32  ;;  %v2563_v10 = vmul.f32 %v3128_v57, %v4815_v47 }
 0x398   : > { %v3132_v49 = vpop.eup %3131  ;;  %v2517_v19 = vadd.f32 1.0, %v3130_v26 }
 0x399   : > { %v2501_v53 = vadd.f32 1.0, %v3132_v49 }
 0x39a   : > { %3137 = vrcp.f32 %v2517_v19 }
 0x39b   : > { %2623 = vxpose.xlu0.b32.cont [10/16] (narrow) %v2575_v14, 16  ;;  %3139 = vrcp.f32 %v2501_v53 }
 0x39c   : > { %2591 = vxpose.xlu2.b32.cont [10/16] (narrow) %v2559_v61, 16  ;;  %v3134_v59 = vpop.eup %3133 }
 0x39d   : > { %v3136_v6 = vpop.eup %3135  ;;  %v2580_v25 = vmul.f32 %v3134_v59, %v4818_v58 }
 0x39e   : > { %v2564_v52 = vmul.f32 %v3136_v6, %v4821_v27 }
 0x3a0   : > { %v3138_v60 = vpop.eup %3137 }
 0x3a1   : > { %v3140_v63 = vpop.eup %3139  ;;  %v2581_v47 = vmul.f32 %v3138_v60, %v4834_v9 }
 0x3a2   : > { %v2565_v23 = vmul.f32 %v3140_v63, %v4841_v55 }
 0x3a3   : > { %2624 = vxpose.xlu0.b32.cont [11/16] (narrow) %v2576_v39, 16 }
 0x3a4   : > { %2592 = vxpose.xlu2.b32.cont [11/16] (narrow) %v2560_v0, 16 }
 0x3ab   : > { %2625 = vxpose.xlu0.b32.cont [12/16] (narrow) %v2577_v37, 16 }
 0x3ac   : > { %2593 = vxpose.xlu2.b32.cont [12/16] (narrow) %v2561_v44, 16 }
 0x3b3   : > { %2626 = vxpose.xlu0.b32.cont [13/16] (narrow) %v2578_v45, 16 }
 0x3b4   : > { %2594 = vxpose.xlu2.b32.cont [13/16] (narrow) %v2562_v13, 16 }
 0x3bb   : > { %2627 = vxpose.xlu0.b32.cont [14/16] (narrow) %v2579_v43, 16 }
 0x3bc   : > { %2595 = vxpose.xlu2.b32.cont [14/16] (narrow) %v2563_v10, 16 }
 0x3c3   : > { %2628 = vxpose.xlu0.b32.cont [15/16] (narrow) %v2580_v25, 16 }
 0x3c4   : > { %2596 = vxpose.xlu2.b32.cont [15/16] (narrow) %v2564_v52, 16 }
 0x3cb   : > { %2629 = vxpose.xlu0.b32.end [16/16] (narrow) %v2581_v47, 16 }
 0x3cc   : > { %2597 = vxpose.xlu2.b32.end [16/16] (narrow) %v2565_v23, 16 }
 0x3ed   : > { %v2598_v40 = vpop.trf.xlu2 }
 0x3f5   : > { %v2599_v0 = vpop.trf.xlu2 }
 0x3f7   : > { %v2630_v31 = vpop.trf.xlu0 }
 0x3f8   : > { %v2650_v58 = vrot.slane %v2630_v31, 7 }
 0x3fa   : > { %v2673_v9 = vsel %vm1262_vm9, %v2650_v58, %v2598_v40  ;;  %v2653_v55 = vsel %vm2652_vm8, %v2598_v40, %v2650_v58  ;;  %v2655_v14 = vsel %vm2654_vm10, %v2598_v40, %v2650_v58  ;;  %v2658_v3 = vsel %vm2657_vm12, %v2598_v40, %v2650_v58 }
 0x3fb   : > { %v2674_v61 = vrot.slane %v2673_v9, 7  ;;  %v2656_v11 = vrot.slane %v2655_v14, 1  ;;  %v2659_v33 = vrot.slane %v2658_v3, 2  ;;  %v2661_v35 = vsel %vm2660_vm14, %v2598_v40, %v2650_v58  ;;  %2710 = vst.msk [vmem:[%s4895_s9] sm:$0x3] %vm4886_vm13, %v2653_v55 }
 0x3fc   : > { %v2662_v50 = vrot.slane %v2661_v35, 3  ;;  %v2664_v28 = vsel %vm2663_vm15, %v2598_v40, %v2650_v58  ;;  %v2667_v20 = vsel %vm2666_vm0, %v2598_v40, %v2650_v58  ;;  %v2670_v30 = vsel %vm2669_vm1, %v2598_v40, %v2650_v58 }
 0x3fd   : > { %2717 = vst.msk [vmem:[%s4895_s9 + $0xe] sm:$0x3] %vm4886_vm13, %v2674_v61  ;;  %v2665_v2 = vrot.slane %v2664_v28, 4  ;;  %v2668_v15 = vrot.slane %v2667_v20, 5  ;;  %v2671_v54 = vrot.slane %v2670_v30, 6 }
 0x3fe   : > { %2711 = vst.msk [vmem:[%s4895_s9 + $0x2] sm:$0x3] %vm4886_vm13, %v2656_v11 }
 0x3ff   : > { %v2631_v39 = vpop.trf.xlu0  ;;  %2712 = vst.msk [vmem:[%s4895_s9 + $0x4] sm:$0x3] %vm4886_vm13, %v2659_v33 }
 0x400   : > { %v2651_v7 = vrot.slane %v2631_v39, 7  ;;  %2713 = vst.msk [vmem:[%s4895_s9 + $0x6] sm:$0x3] %vm4886_vm13, %v2662_v50 }
 0x401   : > { %2714 = vst.msk [vmem:[%s4895_s9 + $0x8] sm:$0x3] %vm4886_vm13, %v2665_v2 }
 0x402   : > { %v2675_v24 = vsel %vm2652_vm8, %v2599_v0, %v2651_v7  ;;  %v2676_v21 = vsel %vm2654_vm10, %v2599_v0, %v2651_v7  ;;  %v2678_v5 = vsel %vm2657_vm12, %v2599_v0, %v2651_v7  ;;  %v2680_v17 = vsel %vm2660_vm14, %v2599_v0, %v2651_v7  ;;  %2715 = vst.msk [vmem:[%s4895_s9 + $0xa] sm:$0x3] %vm4886_vm13, %v2668_v15 }
 0x403   : > { %v2677_v51 = vrot.slane %v2676_v21, 1  ;;  %v2679_v1 = vrot.slane %v2678_v5, 2  ;;  %v2681_v38 = vrot.slane %v2680_v17, 3  ;;  %v2682_v4 = vsel %vm2663_vm15, %v2599_v0, %v2651_v7  ;;  %2716 = vst.msk [vmem:[%s4895_s9 + $0xc] sm:$0x3] %vm4886_vm13, %v2671_v54 }
 0x404   : > { %v2683_v37 = vrot.slane %v2682_v4, 4  ;;  %v2684_v8 = vsel %vm2666_vm0, %v2599_v0, %v2651_v7  ;;  %v2686_v44 = vsel %vm2669_vm1, %v2599_v0, %v2651_v7  ;;  %v2688_v42 = vsel %vm1262_vm9, %v2651_v7, %v2599_v0  ;;  %2718 = vst.msk [vmem:[%s4895_s9 + $0x10] sm:$0x3] %vm4886_vm13, %v2675_v24 }
 0x405   : > { %v2685_v41 = vrot.slane %v2684_v8, 5  ;;  %2719 = vst.msk [vmem:[%s4895_s9 + $0x12] sm:$0x3] %vm4886_vm13, %v2677_v51  ;;  %v2687_v36 = vrot.slane %v2686_v44, 6  ;;  %v2689_v29 = vrot.slane %v2688_v42, 7 }
 0x406   : > { %2720 = vst.msk [vmem:[%s4895_s9 + $0x14] sm:$0x3] %vm4886_vm13, %v2679_v1 }
 0x407   : > { %2721 = vst.msk [vmem:[%s4895_s9 + $0x16] sm:$0x3] %vm4886_vm13, %v2681_v38 }
 0x408   : > { %2722 = vst.msk [vmem:[%s4895_s9 + $0x18] sm:$0x3] %vm4886_vm13, %v2683_v37 }
 0x409   : > { %2723 = vst.msk [vmem:[%s4895_s9 + $0x1a] sm:$0x3] %vm4886_vm13, %v2685_v41 }
 0x40a   : > { %2724 = vst.msk [vmem:[%s4895_s9 + $0x1c] sm:$0x3] %vm4886_vm13, %v2687_v36 }
 0x40b   : > { %2725 = vst.msk [vmem:[%s4895_s9 + $0x1e] sm:$0x3] %vm4886_vm13, %v2689_v29 }
 0x40c   : > { %3179 = shalt.err (!%p3176_p3)
}
 0x40d   : > { %s3226_s28 = smov 2  }
 0x40e   : > { %2956 = dma.vmem_to_hbm [thread:$0]  (%p3300_p5), %s2739_s15, 512, %s2741_s16, %s2727_s17, %s3223_s20, %s3223_s20, %s3226_s28  }
 0x40f PF: > { %p2962_p4 = scmp.ge.s32.totalorder %s3214_s24, 2  ;;  %s2755_s9 = sand.u32 1, %s3202_s21  }
 0x410   : > { %s2756_s25 = scalar_lea.sflag [#allocation5], %s2755_s9 }
 0x411   : > { %p2959_p7 = pnand %p2962_p4, %p3304_p6 }
 0x413   : > { %p2960_p8 = pneg %p2959_p7 }
 0x415   : > { %3197 = dma.done.wait (%p2960_p8), %s2756_s25, 512  }
 0x416   : > { %3199 = vsyncadd (%p2960_p8), %s2756_s25, 4294966784  ;;  %p16_p9 = scmp.ge.s32.totalorder %s3287_s27, 4   ;;  %s5011_s21 = smov %s3206_s22 }
 0x417   : > { %s5012_s22 = smov %s3210_s23  ;;  %s5013_s23 = smov %s3298_s30 }
 0x418   : > { %s5014_s24 = smov %s3287_s27  ;;  %18 = sbr.rel (!%p16_p9) target bundleno = 3 (0x3), region = 82 }
 0x41d   :  { %2762 = vsyncpa [#allocation5], 1 }
 0x41e   :  { %2764 = vsyncpa [#allocation5 + $0x1], 1 }

// kernel: tpu_custom_call.1
= control target key start
LH: loop header
LB: loop body
LE: loop exit
PB: predicated region body
PF: predicated region fallthrough
CT: control target
= control target key end

     0   :  { %11 = vsyncpa [#allocation5], 0  ;;  %s4992_s0 = inlined_call_operand.vmem [shape: bf16[2,16,16,8], index: 0, kind: input, shape index: {}]   ;;  %s4993_s1 = inlined_call_operand.vmem [shape: bf16[72,128], index: 1, kind: input, shape index: {}]   ;;  %s4994_s2 = inlined_call_operand.vmem [shape: f32[1,128], index: 2, kind: input, shape index: {}]   ;;  %s4995_s3 = inlined_call_operand.vmem [shape: f32[1,128], index: 3, kind: input, shape index: {}]   ;;  %s4996_s4 = inlined_call_operand.vmem [shape: f32[1,128], index: 4, kind: input, shape index: {}]   ;;  %s4997_s5 = inlined_call_operand.vmem [shape: f32[128,128], index: 5, kind: input, shape index: {}]   ;;  %s4998_s6 = inlined_call_operand.hbm [shape: f32[2,16,1,256], index: 6, kind: output, shape index: {}]  }
   0x1   :  { %13 = vsyncpa [#allocation5 + $0x1], 0  ;;  %s3262_s21 = smov 0   ;;  %s3264_s22 = smov 0  }
   0x2   :  { %s3266_s23 = smov 0   ;;  %s3268_s24 = smov 0  }
   0x3 LB: > { %s3283_s25 = sadd.s32 4294967295, %s3214_s24   ;;  %s2803_s26 = sadd.s32 4294967294, %s3214_s24   ;;  %s3214_s24 = sphi %s3268_s24, %s5014_s24   ;;  %s3210_s23 = sphi %s3266_s23, %s5013_s23   ;;  %s3206_s22 = sphi %s3264_s22, %s5012_s22   ;;  %s3202_s21 = sphi %s3262_s21, %s5011_s21  }
   0x4   : > { %s3287_s27 = sadd.s32 1, %s3214_s24   ;;  %s157_s28 = sadd.s32 1, %s3210_s23 }
   0x5   : > { %s154_s29 = ssub.s32 %s3214_s24, %s3287_s27  ;;  %p167_p0 = scmp.ne.s32.totalorder %s3210_s23, %s3206_s22 }
   0x6   : > { %p155_p1 = scmp.eq.s32.totalorder %s154_s29, 0  ;;  %p168_p2 = scmp.eq.s32.totalorder %s3283_s25, 1 }
   0x7   : > { %p173_p3 = scmp.ne.s32.totalorder %s3206_s22, %s3202_s21  ;;  %p174_p4 = scmp.eq.s32.totalorder %s2803_s26, 1 }
   0x8   : > { %s3298_s30 = scalar_select %p155_p1, %s3210_s23, %s157_s28  }
   0x9   : > { %p3300_p5 = por %p168_p2, %p167_p0  ;;  %p3304_p6 = por %p174_p4, %p173_p3 }
   0xa   : > { %p2806_p7 = scmp.ge.s32.totalorder %s3214_s24, 1  ;;  %p215_p8 = scmp.lt.s32.totalorder %s3214_s24, 3 }
   0xc   : > { %p216_p9 = pnand %p2806_p7, %p215_p8 }
   0xd   : > { %p245_p10 = scmp.lt.s32.totalorder (!%p216_p9), %s3283_s25, 1  ;;  %s3217_s14 = smov (!%p216_p9), 24  }
   0xe   : > { %219 = sbr.rel (%p216_p9) target bundleno = 1039 (0x40f), region = 44  ;;  %s3218_s15 = smov (!%p216_p9), 48  }
   0xf   : > { %s3219_s16 = smov (!%p216_p9), 16   ;;  %s3220_s17 = smov (!%p216_p9), 8  }
  0x10   : > { %s3221_s18 = smov (!%p216_p9), 40   ;;  %s3222_s19 = smov (!%p216_p9), 64  }
  0x11   : > { %s3223_s20 = smov (!%p216_p9), 32   ;;  %s3224_s26 = smov (!%p216_p9), 56  }
  0x12   : > { %s242_s28 = sand.u32 (!%p216_p9), 1, %s3206_s22   ;;  %s3172_s12 = scalar_lea.hbm (!%p216_p9), %s4998_s6, 64 }
  0x13   : > { %vm254_vm0 = vcmask 57344   ;;  %vm261_vm1 = vsmask.f32 256  ;;  %vm251_vm2 = vcmask 60416   ;;  %v266_v1 = vld [vmem:[#allocation2 + $0xc] sm:$0x1] }
  0x14   : > { %vm3313_vm3 = vmand %vm254_vm0, %vm261_vm1  ;;  %s246_s9 = scalar_select %p245_p10, %s3283_s25, 1  ;;  %v269_v3 = vld [vmem:[#allocation2 + $0x18] sm:$0x1]  ;;  %vm317_vm4 = vsmask.f32 7938  ;;  %v3216_v4 = vmov 0  }
  0x15   : > { %v267_v2 = vsel %vm3313_vm3, 0, %v266_v1  ;;  %252 = vst.msk [vmem:[#allocation2] sm:$0xf] %vm251_vm2, %v3216_v4  ;;  %vm405_vm5 = vsmask.f32 4368  ;;  %v270_v5 = vsel %vm3313_vm3, 0, %v269_v3  ;;  %vm3346_vm7 = vmand %vm251_vm2, %vm317_vm4 }
  0x16   : > { %268 = vst [vmem:[#allocation2 + $0xc] sm:$0x1] %v267_v2  ;;  %s2918_s10 = sshll.u32 %s246_s9, 7  ;;  %vm3337_vm6 = vmor %vm261_vm1, %vm405_vm5  ;;  %v322_v29 = vld [vmem:[#allocation2 + $0x14] sm:$0x1]  ;;  %vm1262_vm9 = vcmask 1046528  }
  0x17   : > { %s3324_s13 = scalar_lea.vmem %s4992_s0, %s2918_s10  ;;  %253 = vst.msk [vmem:[#allocation2 + $0x4] sm:$0xf] %vm251_vm2, %v3216_v4  ;;  %vm3352_vm8 = vmand %vm254_vm0, %vm317_vm4  ;;  %v325_v32 = vld [vmem:[#allocation2 + $0x20] sm:$0x1]  ;;  %v272_v41 = vld [vmem:[#allocation2 + $0x24] sm:$0x1] }
  0x18   : > { %v373_v6 = vld [vmem:[%s3324_s13] sm:$0xf]  ;;  %v374_v7 = vld [vmem:[%s3324_s13 + $0x4] sm:$0xf]  ;;  %255 = vst.msk [vmem:[#allocation2 + $0x8] sm:$0x1] %vm254_vm0, %v3216_v4 }
  0x19   : > { %v408_v8 = vshrl.u32 %v373_v6, 16  ;;  %v411_v9 = vshll.u32 %v373_v6, 16  ;;  %v416_v10 = vshrl.u32 %v374_v7, 16  ;;  %v419_v11 = vshll.u32 %v374_v7, 16  ;;  %257 = vst.msk [vmem:[#allocation2 + $0xcc] sm:$0xf] %vm251_vm2, %v3216_v4 }
  0x1a   : > { %258 = vst.msk [vmem:[#allocation2 + $0xd0] sm:$0xf] %vm251_vm2, %v3216_v4  ;;  %v375_v12 = vld [vmem:[%s3324_s13 + $0x8] sm:$0xf]  ;;  %v376_v13 = vld [vmem:[%s3324_s13 + $0xc] sm:$0xf] }
  0x1b   : > { %v410_v15 = vrot.slane %v408_v8, 7  ;;  %v3341_v16 = vrot.slane %v416_v10, 7  ;;  %259 = vst.msk [vmem:[#allocation2 + $0xd4] sm:$0x1] %vm254_vm0, %v3216_v4  ;;  %v425_v17 = vshrl.u32 %v375_v12, 16  ;;  %v428_v18 = vshll.u32 %v375_v12, 16 }
  0x1c   : > { %271 = vst [vmem:[#allocation2 + $0x18] sm:$0x1] %v270_v5  ;;  %v433_v21 = vshrl.u32 %v376_v13, 16  ;;  %v436_v22 = vshll.u32 %v376_v13, 16  ;;  %v263_v27 = vld [vmem:[#allocation2] sm:$0x1] }
  0x1d   : > { %v730_v20 = vld [vmem:[#allocation2 + $0xc] sm:$0xf]  ;;  %v413_v24 = vor.u32 %v411_v9, %v410_v15  ;;  %v414_v25 = vrot.slane %v410_v15, 4  ;;  %v421_v26 = vor.u32 %v419_v11, %v3341_v16  ;;  %v427_v28 = vrot.slane %v425_v17, 7  ;;  %v377_v42 = vld [vmem:[%s3324_s13 + $0x10] sm:$0xf] }
  0x1e   : > { %v264_v30 = vsel %vm3313_vm3, 0, %v263_v27  ;;  %v3359_v31 = vrot.slane %v433_v21, 7  ;;  %v323_v40 = vsel %vm3352_vm8, 0, %v322_v29  ;;  %v326_v44 = vsel %vm3352_vm8, 0, %v325_v32  ;;  %v378_v45 = vld [vmem:[%s3324_s13 + $0x14] sm:$0xf] }
  0x1f   : > { %v422_v33 = vsel %vm3337_vm6, %v414_v25, %v421_v26  ;;  %v731_v34 = vsel %vm3346_vm7, %v413_v24, %v730_v20  ;;  %265 = vst [vmem:[#allocation2] sm:$0x1] %v264_v30  ;;  %v319_v35 = vld [vmem:[#allocation2 + $0x8] sm:$0x1]  ;;  %v431_v36 = vrot.slane %v427_v28, 4  ;;  %v430_v38 = vor.u32 %v428_v18, %v427_v28  ;;  %s2807_s29 = sshll.u32 %s242_s28, 5 }
  0x20   : > { %732 = vst [vmem:[#allocation2 + $0xc] sm:$0xf] %v731_v34  ;;  %v320_v37 = vsel %vm3352_vm8, 0, %v319_v35  ;;  %v438_v39 = vor.u32 %v436_v22, %v3359_v31  ;;  %v442_v46 = vshrl.u32 %v377_v42, 16  ;;  %v273_v48 = vsel %vm3313_vm3, 0, %v272_v41  ;;  %s4895_s9 = scalar_lea.vmem [#allocation4], %s2807_s29 }
  0x21   : > { %733 = vst.msk [vmem:[#allocation2 + $0x10] sm:$0xf] %vm251_vm2, %v422_v33  ;;  %v450_v49 = vshrl.u32 %v378_v45, 16  ;;  %v453_v52 = vshll.u32 %v378_v45, 16  ;;  %v328_v53 = vld [vmem:[#allocation2 + $0x2c] sm:$0x1] }
  0x22   : > { %321 = vst [vmem:[#allocation2 + $0x8] sm:$0x1] %v320_v37  ;;  %v439_v43 = vsel %vm3337_vm6, %v431_v36, %v438_v39  ;;  %v444_v51 = vrot.slane %v442_v46, 7  ;;  %v329_v55 = vsel %vm3352_vm8, 0, %v328_v53  ;;  %v445_v57 = vshll.u32 %v377_v42, 16  ;;  %s2915_s10 = sshll.u32 %s3283_s25, 5 }
  0x23   : > { %v737_v47 = vld [vmem:[#allocation2 + $0x18] sm:$0xf]  ;;  %740 = vst.msk [vmem:[#allocation2 + $0x1c] sm:$0xf] %vm251_vm2, %v439_v43  ;;  %v452_v54 = vrot.slane %v450_v49, 7  ;;  %v423_v62 = vrot.slane %v3341_v16, 4 }
  0x24   : > { %v738_v50 = vsel %vm3346_vm7, %v430_v38, %v737_v47  ;;  %324 = vst [vmem:[#allocation2 + $0x14] sm:$0x1] %v323_v40  ;;  %v448_v56 = vrot.slane %v444_v51, 4  ;;  %v340_v59 = vld [vmem:[#allocation2 + $0x5c] sm:$0x1]  ;;  %v440_v6 = vrot.slane %v3359_v31, 4  ;;  %v447_v8 = vor.u32 %v445_v57, %v444_v51 }
  0x25   : > { %739 = vst [vmem:[#allocation2 + $0x18] sm:$0xf] %v738_v50  ;;  %v455_v58 = vor.u32 %v453_v52, %v452_v54  ;;  %v284_v2 = vld [vmem:[#allocation2 + $0x54] sm:$0x1]  ;;  %v341_v3 = vsel %vm3352_vm8, 0, %v340_v59  ;;  %v457_v9 = vrot.slane %v452_v54, 4 }
  0x26   : > { %327 = vst [vmem:[#allocation2 + $0x20] sm:$0x1] %v326_v44  ;;  %v2923_v61 = vld [vmem:[#allocation2] sm:$0xff]  ;;  %v285_v10 = vsel %vm3313_vm3, 0, %v284_v2  ;;  %v385_v16 = vld [vmem:[%s3324_s13 + $0x30] sm:$0xf] }
  0x27   : > { %274 = vst [vmem:[#allocation2 + $0x24] sm:$0x1] %v273_v48  ;;  %v456_v1 = vsel %vm3337_vm6, %v448_v56, %v455_v58  ;;  %v1041_v5 = vshll.u32 %v2923_v61, 16  ;;  %v1263_v12 = vrot.slane %v2923_v61, 1  ;;  %v1039_v17 = vshrl.u32 %v2923_v61, 16 }
  0x28   : > { %v3384_v60 = vld [vmem:[#allocation2 + $0xc] sm:$0xff]  ;;  %330 = vst [vmem:[#allocation2 + $0x2c] sm:$0x1] %v329_v55  ;;  %v510_v20 = vshrl.u32 %v385_v16, 16  ;;  %v386_v31 = vld [vmem:[%s3324_s13 + $0x34] sm:$0xf] }
  0x29   : > { %v857_v63 = vld [vmem:[#allocation2 + $0x8] sm:$0x1]  ;;  %1348 = vrot.lane.b32.xlu1 %v3384_v60, %s3217_s14  ;;  %747 = vst.msk [vmem:[#allocation2 + $0x28] sm:$0xf] %vm251_vm2, %v456_v1  ;;  %v1043_v22 = vrot.slane %v1041_v5, 1  ;;  %v513_v33 = vshll.u32 %v385_v16, 16 }
  0x2a   : > { %v1005_v4 = vunpack.c.l.b16 %v857_v63  ;;  %342 = vst [vmem:[#allocation2 + $0x5c] sm:$0x1] %v341_v3  ;;  %v512_v32 = vrot.slane %v510_v20, 7  ;;  %v518_v34 = vshrl.u32 %v386_v31, 16  ;;  %v521_v35 = vshll.u32 %v386_v31, 16 }
  0x2b   : > { %v734_v7 = vld [vmem:[#allocation2 + $0x14] sm:$0x1]  ;;  %286 = vst [vmem:[#allocation2 + $0x54] sm:$0x1] %v285_v10  ;;  %v1044_v36 = vor.u32 %v1043_v22, %v1039_v17  ;;  %v1053_v38 = vshll.u32 %v3384_v60, 16  ;;  %v1266_v44 = vrot.slane %v3384_v60, 1 }
  0x2c   : > { %v1021_v11 = vpack.c.b16 %v1005_v4, %v1005_v4  ;;  %v3397_v13 = vld [vmem:[#allocation2 + $0x18] sm:$0xff]  ;;  %v735_v15 = vsel %vm3313_vm3, %v423_v62, %v734_v7  ;;  %vm1037_vm10 = vsmask.f32 7424  ;;  %v515_v39 = vor.u32 %v513_v33, %v512_v32  ;;  %v287_v51 = vld [vmem:[#allocation2 + $0x60] sm:$0x1] }
  0x2d   : > { %736 = vst [vmem:[#allocation2 + $0x14] sm:$0x1] %v735_v15  ;;  %v741_v18 = vld [vmem:[#allocation2 + $0x20] sm:$0x1]  ;;  %1467 = vrot.lane.b32.xlu2 %v3397_v13, %s3218_s15  ;;  %v516_v40 = vrot.slane %v512_v32, 4  ;;  %v520_v41 = vrot.slane %v518_v34, 7 }
  0x2e   : > { %v1264_v21 = vrot.slane %v1021_v11, 1  ;;  %v1046_v24 = vshll.u32 %v1021_v11, 16  ;;  %v742_v25 = vsel %vm3313_vm3, %v440_v6, %v741_v18  ;;  %v744_v26 = vld [vmem:[#allocation2 + $0x24] sm:$0xf]  ;;  %v1051_v45 = vshrl.u32 %v3384_v60, 16 }
  0x2f   : > { %743 = vst [vmem:[#allocation2 + $0x20] sm:$0x1] %v742_v25  ;;  %v745_v27 = vsel %vm3346_vm7, %v447_v8, %v744_v26  ;;  %v748_v28 = vld [vmem:[#allocation2 + $0x2c] sm:$0x1]  ;;  %v523_v48 = vor.u32 %v521_v35, %v520_v41  ;;  %v525_v49 = vrot.slane %v520_v41, 4  ;;  %v1055_v54 = vrot.slane %v1053_v38, 1 }
  0x30   : > { %v1265_v29 = vsel %vm1262_vm9, %v1263_v12, %v1264_v21  ;;  %746 = vst [vmem:[#allocation2 + $0x24] sm:$0xf] %v745_v27  ;;  %v749_v30 = vsel %vm3313_vm3, %v457_v9, %v748_v28  ;;  %v1048_v37 = vrot.slane %v1046_v24, 1  ;;  %v288_v55 = vsel %vm3313_vm3, 0, %v287_v51  ;;  %v387_v61 = vld [vmem:[%s3324_s13 + $0x38] sm:$0xf] }
  0x31   : > { %1311 = vrot.lane.b32.xlu0 %v1265_v29, %s3219_s16  ;;  %750 = vst [vmem:[#allocation2 + $0x2c] sm:$0x1] %v749_v30  ;;  %1350 = vrot.lane.b32.xlu1 %v3397_v13, %s3217_s14  ;;  %v776_v46 = vld [vmem:[#allocation2 + $0x5c] sm:$0x1]  ;;  %v524_v58 = vsel %vm3337_vm6, %v516_v40, %v523_v48  ;;  %v1065_v60 = vshll.u32 %v3397_v13, 16  ;;  %v1269_v1 = vrot.slane %v3397_v13, 1  ;;  %v1056_v7 = vor.u32 %v1055_v54, %v1051_v45 }
  0x32   : > { %v772_v42 = vld [vmem:[#allocation2 + $0x54] sm:$0xf]  ;;  %v1049_v52 = vsel %vm1037_vm10, %v1044_v36, %v1048_v37  ;;  %v777_v59 = vsel %vm3313_vm3, %v525_v49, %v776_v46  ;;  %289 = vst [vmem:[#allocation2 + $0x60] sm:$0x1] %v288_v55  ;;  %v388_v3 = vld [vmem:[%s3324_s13 + $0x3c] sm:$0xf] }
  0x33   : > { %v773_v50 = vsel %vm3346_vm7, %v515_v39, %v772_v42  ;;  %775 = vst.msk [vmem:[#allocation2 + $0x58] sm:$0xf] %vm251_vm2, %v524_v58  ;;  %v527_v4 = vshrl.u32 %v387_v61, 16  ;;  %v1063_v8 = vshrl.u32 %v3397_v13, 16  ;;  %v1067_v9 = vrot.slane %v1065_v60, 1 }
  0x34   : > { %v860_v43 = vld [vmem:[#allocation2 + $0x14] sm:$0x1]  ;;  %774 = vst [vmem:[#allocation2 + $0x54] sm:$0xf] %v773_v50  ;;  %v530_v11 = vshll.u32 %v387_v61, 16  ;;  %v535_v18 = vshrl.u32 %v388_v3, 16 }
  0x35   : > { %v1006_v47 = vunpack.c.l.b16 %v860_v43  ;;  %778 = vst [vmem:[#allocation2 + $0x5c] sm:$0x1] %v777_v59  ;;  %v529_v10 = vrot.slane %v527_v4, 7  ;;  %v275_v20 = vld [vmem:[#allocation2 + $0x30] sm:$0x1]  ;;  %v538_v25 = vshll.u32 %v388_v3, 16  ;;  %v1068_v27 = vor.u32 %v1067_v9, %v1063_v8 }
  0x36   : > { %v863_v53 = vld [vmem:[#allocation2 + $0x20] sm:$0x1]  ;;  %v3443_v24 = vrot.slane %v535_v18, 7  ;;  %v343_v26 = vld [vmem:[#allocation2 + $0x68] sm:$0x1]  ;;  %v276_v30 = vsel %vm3313_vm3, 0, %v275_v20 }
  0x37   : > { %v1022_v56 = vpack.c.b16 %v1006_v47, %v1006_v47  ;;  %v1007_v57 = vunpack.c.l.b16 %v863_v53  ;;  %v3439_v17 = vld [vmem:[#allocation2 + $0x24] sm:$0xff]  ;;  %v532_v22 = vor.u32 %v530_v11, %v529_v10  ;;  %v533_v28 = vrot.slane %v529_v10, 4  ;;  %v379_v31 = vld [vmem:[%s3324_s13 + $0x18] sm:$0xf]  ;;  %277 = vst [vmem:[#allocation2 + $0x30] sm:$0x1] %v276_v30 }
  0x38   : > { %v866_v21 = vld [vmem:[#allocation2 + $0x2c] sm:$0x1]  ;;  %v1077_v35 = vshll.u32 %v3439_v17, 16  ;;  %v296_v36 = vld [vmem:[#allocation2 + $0x84] sm:$0x1]  ;;  %v540_v37 = vor.u32 %v538_v25, %v3443_v24  ;;  %v459_v39 = vshrl.u32 %v379_v31, 16 }
  0x39   : > { %1230 = vrot.lane.b32.xlu0 %v1049_v52, %s3220_s17  ;;  %v1267_v62 = vrot.slane %v1022_v56, 1  ;;  %v1023_v63 = vpack.c.b16 %v1007_v57, %v1007_v57  ;;  %v1058_v2 = vshll.u32 %v1022_v56, 16  ;;  %v779_v13 = vld [vmem:[#allocation2 + $0x60] sm:$0xf]  ;;  %v1008_v34 = vunpack.c.l.b16 %v866_v21  ;;  %v380_v38 = vld [vmem:[%s3324_s13 + $0x1c] sm:$0xf] }
  0x3a   : > { %v780_v29 = vsel %vm3346_vm7, %v532_v22, %v779_v13  ;;  %v344_v40 = vsel %vm3352_vm8, 0, %v343_v26  ;;  %v462_v41 = vshll.u32 %v379_v31, 16  ;;  %v467_v42 = vshrl.u32 %v380_v38, 16  ;;  %v352_v43 = vld [vmem:[#allocation2 + $0x8c] sm:$0x1] }
  0x3b   : > { %v1268_v5 = vsel %vm1262_vm9, %v1266_v44, %v1267_v62  ;;  %v1270_v6 = vrot.slane %v1023_v63, 1  ;;  %v1060_v15 = vrot.slane %v1058_v2, 1  ;;  %v1070_v16 = vshll.u32 %v1023_v63, 16  ;;  %781 = vst [vmem:[#allocation2 + $0x60] sm:$0xf] %v780_v29  ;;  %v3492_v13 = vld [vmem:[#allocation2 + $0x54] sm:$0xff] }
  0x3c   : > { %1430 = vrot.lane.b32.xlu2 %v1268_v5, %s3221_s18  ;;  %345 = vst [vmem:[#allocation2 + $0x68] sm:$0x1] %v344_v40  ;;  %v541_v44 = vsel %vm3337_vm6, %v533_v28, %v540_v37  ;;  %v461_v45 = vrot.slane %v459_v39, 7  ;;  %v470_v46 = vshll.u32 %v380_v38, 16  ;;  %v393_v47 = vld [vmem:[%s3324_s13 + $0x50] sm:$0xf]  ;;  %v3465_v50 = vpack.c.b16 %v1008_v34, %v1008_v34 }
  0x3d   : > { %v3437_v12 = vsel %vm1262_vm9, %v1269_v1, %v1270_v6  ;;  %v1061_v32 = vsel %vm1037_vm10, %v1056_v7, %v1060_v15  ;;  %v1072_v33 = vrot.slane %v1070_v16, 1  ;;  %v394_v48 = vld [vmem:[%s3324_s13 + $0x54] sm:$0xf]  ;;  %v1075_v51 = vshrl.u32 %v3439_v17, 16  ;;  %782 = vst.msk [vmem:[#allocation2 + $0x64] sm:$0xf] %vm251_vm2, %v541_v44 }
  0x3e   : > { %1549 = vrot.lane.b32.xlu1 %v3437_v12, %s3222_s19  ;;  %v3469_v52 = vrot.slane %v467_v42, 7  ;;  %v331_v53 = vld [vmem:[#allocation2 + $0x38] sm:$0x1]  ;;  %v464_v54 = vor.u32 %v462_v41, %v461_v45  ;;  %v465_v55 = vrot.slane %v461_v45, 4  ;;  %v297_v56 = vsel %vm3313_vm3, 0, %v296_v36 }
  0x3f   : > { %v3463_v49 = vsel %vm1037_vm10, %v1068_v27, %v1072_v33  ;;  %v353_v57 = vsel %vm3352_vm8, 0, %v352_v43  ;;  %v1079_v58 = vrot.slane %v1077_v35, 1  ;;  %v542_v60 = vrot.slane %v3443_v24, 4  ;;  %298 = vst [vmem:[#allocation2 + $0x84] sm:$0x1] %v297_v56 }
  0x40   : > { %v472_v59 = vor.u32 %v470_v46, %v3469_v52  ;;  %v578_v61 = vshrl.u32 %v393_v47, 16  ;;  %v878_v62 = vld [vmem:[#allocation2 + $0x5c] sm:$0x1]  ;;  %354 = vst [vmem:[#allocation2 + $0x8c] sm:$0x1] %v353_v57  ;;  %v581_v63 = vshll.u32 %v393_v47, 16 }
  0x41   : > { %1313 = vrot.lane.b32.xlu0 %v1268_v5, %s3219_s16  ;;  %v586_v1 = vshrl.u32 %v394_v48, 16  ;;  %v589_v2 = vshll.u32 %v394_v48, 16  ;;  %v332_v3 = vsel %vm3352_vm8, 0, %v331_v53  ;;  %v1082_v4 = vshll.u32 %v3465_v50, 16  ;;  %v751_v6 = vld [vmem:[#allocation2 + $0x30] sm:$0xf] }
  0x42   : > { %v473_v5 = vsel %vm3337_vm6, %v465_v55, %v472_v59  ;;  %v580_v7 = vrot.slane %v578_v61, 7  ;;  %333 = vst [vmem:[#allocation2 + $0x38] sm:$0x1] %v332_v3  ;;  %v752_v8 = vsel %vm3346_vm7, %v464_v54, %v751_v6  ;;  %v1080_v21 = vor.u32 %v1079_v58, %v1075_v51  ;;  %v299_v28 = vld [vmem:[#allocation2 + $0x90] sm:$0x1] }
  0x43   : > { %754 = vst.msk [vmem:[#allocation2 + $0x34] sm:$0xf] %vm251_vm2, %v473_v5  ;;  %v783_v9 = vld [vmem:[#allocation2 + $0x68] sm:$0x1]  ;;  %v588_v10 = vrot.slane %v586_v1, 7  ;;  %v1084_v22 = vrot.slane %v1082_v4, 1  ;;  %v1012_v24 = vunpack.c.l.b16 %v878_v62 }
  0x44   : > { %1232 = vrot.lane.b32.xlu2 %v1061_v32, %s3220_s17  ;;  %753 = vst [vmem:[#allocation2 + $0x30] sm:$0xf] %v752_v8  ;;  %v784_v11 = vsel %vm3313_vm3, %v542_v60, %v783_v9  ;;  %v583_v15 = vor.u32 %v581_v63, %v580_v7  ;;  %v584_v16 = vrot.slane %v580_v7, 4  ;;  %v474_v25 = vrot.slane %v3469_v52, 4  ;;  %v355_v29 = vld [vmem:[#allocation2 + $0x98] sm:$0x1] }
  0x45   : > { %785 = vst [vmem:[#allocation2 + $0x68] sm:$0x1] %v784_v11  ;;  %v591_v18 = vor.u32 %v589_v2, %v588_v10  ;;  %v593_v20 = vrot.slane %v588_v10, 4  ;;  %v1272_v33 = vrot.slane %v3439_v17, 1  ;;  %v3510_v37 = vsel %vm1037_vm10, %v1080_v21, %v1084_v22  ;;  %v395_v41 = vld [vmem:[%s3324_s13 + $0x58] sm:$0xf] }
  0x46   : > { %1395 = vrot.lane.b32.xlu1 %v1061_v32, %s3223_s20  ;;  %v800_v27 = vld [vmem:[#allocation2 + $0x84] sm:$0xf]  ;;  %v290_v32 = vld [vmem:[#allocation2 + $0x6c] sm:$0x1]  ;;  %v3512_v38 = vpack.c.b16 %v1012_v24, %v1012_v24  ;;  %v300_v40 = vsel %vm3313_vm3, 0, %v299_v28  ;;  %v1273_v42 = vrot.slane %v3465_v50, 1 }
  0x47   : > { %v592_v26 = vsel %vm3337_vm6, %v584_v16, %v591_v18  ;;  %v801_v30 = vsel %vm3346_vm7, %v583_v15, %v800_v27  ;;  %v804_v31 = vld [vmem:[#allocation2 + $0x8c] sm:$0x1]  ;;  %v291_v36 = vsel %vm3313_vm3, 0, %v290_v32  ;;  %v1125_v43 = vshll.u32 %v3492_v13, 16  ;;  %v389_v44 = vld [vmem:[%s3324_s13 + $0x40] sm:$0xf] }
  0x48   : > { %803 = vst.msk [vmem:[#allocation2 + $0x88] sm:$0xf] %vm251_vm2, %v592_v26  ;;  %v805_v34 = vsel %vm3313_vm3, %v593_v20, %v804_v31  ;;  %v390_v45 = vld [vmem:[%s3324_s13 + $0x44] sm:$0xf]  ;;  %v595_v46 = vshrl.u32 %v395_v41, 16  ;;  %v356_v47 = vsel %vm3352_vm8, 0, %v355_v29  ;;  %v3531_v53 = vsel %vm1262_vm9, %v1272_v33, %v1273_v42 }
  0x49   : > { %1514 = vrot.lane.b32.xlu0 %v3463_v49, %s3224_s26  ;;  %802 = vst [vmem:[#allocation2 + $0x84] sm:$0xf] %v801_v30  ;;  %v755_v35 = vld [vmem:[#allocation2 + $0x38] sm:$0x1]  ;;  %v544_v48 = vshrl.u32 %v389_v44, 16  ;;  %v1130_v51 = vshll.u32 %v3512_v38, 16 }
  0x4a   : > { %806 = vst [vmem:[#allocation2 + $0x8c] sm:$0x1] %v805_v34  ;;  %v756_v39 = vsel %vm3313_vm3, %v474_v25, %v755_v35  ;;  %v547_v52 = vshll.u32 %v389_v44, 16  ;;  %v552_v50 = vshrl.u32 %v390_v45, 16  ;;  %v1123_v54 = vshrl.u32 %v3492_v13, 16  ;;  %v3541_v7 = vld [vmem:[#allocation2 + $0x60] sm:$0xff] }
  0x4b   : > { %757 = vst [vmem:[#allocation2 + $0x38] sm:$0x1] %v756_v39  ;;  %v1127_v55 = vrot.slane %v1125_v43, 1  ;;  %v546_v56 = vrot.slane %v544_v48, 7  ;;  %v555_v58 = vshll.u32 %v390_v45, 16  ;;  %v597_v60 = vrot.slane %v595_v46, 7 }
  0x4c   : > { %1397 = vrot.lane.b32.xlu2 %v3463_v49, %s3223_s20  ;;  %292 = vst [vmem:[#allocation2 + $0x6c] sm:$0x1] %v291_v36  ;;  %v3534_v57 = vrot.slane %v552_v50, 7  ;;  %v396_v59 = vld [vmem:[%s3324_s13 + $0x5c] sm:$0xf]  ;;  %v598_v62 = vshll.u32 %v395_v41, 16 }
  0x4d   : > { %301 = vst [vmem:[#allocation2 + $0x90] sm:$0x1] %v300_v40  ;;  %v549_v61 = vor.u32 %v547_v52, %v546_v56  ;;  %v1132_v63 = vrot.slane %v1130_v51, 1  ;;  %v1128_v1 = vor.u32 %v1127_v55, %v1123_v54  ;;  %v881_v2 = vld [vmem:[#allocation2 + $0x68] sm:$0x1]  ;;  %v550_v3 = vrot.slane %v546_v56, 4 }
  0x4e   : > { %1469 = vrot.lane.b32.xlu1 %v3439_v17, %s3218_s15  ;;  %357 = vst [vmem:[#allocation2 + $0x98] sm:$0x1] %v356_v47  ;;  %v603_v5 = vshrl.u32 %v396_v59, 16  ;;  %v1285_v6 = vrot.slane %v3512_v38, 1  ;;  %v557_v8 = vor.u32 %v555_v58, %v3534_v57  ;;  %v601_v10 = vrot.slane %v597_v60, 4  ;;  %v3574_v42 = vld [vmem:[#allocation2 + $0x30] sm:$0xff] }
  0x4f   : > { %v600_v11 = vor.u32 %v598_v62, %v597_v60  ;;  %v346_v16 = vld [vmem:[#allocation2 + $0x74] sm:$0x1]  ;;  %v1013_v18 = vunpack.c.l.b16 %v881_v2  ;;  %v302_v24 = vld [vmem:[#allocation2 + $0x9c] sm:$0x1]  ;;  %v3553_v25 = vsel %vm1037_vm10, %v1128_v1, %v1132_v63  ;;  %v606_v26 = vshll.u32 %v396_v59, 16 }
  0x50   : > { %v558_v22 = vsel %vm3337_vm6, %v550_v3, %v557_v8  ;;  %v397_v27 = vld [vmem:[%s3324_s13 + $0x60] sm:$0xf]  ;;  %v1137_v28 = vshll.u32 %v3541_v7, 16  ;;  %v347_v31 = vsel %vm3352_vm8, 0, %v346_v16  ;;  %v398_v32 = vld [vmem:[%s3324_s13 + $0x64] sm:$0xf] }
  0x51   : > { %1432 = vrot.lane.b32.xlu0 %v3437_v12, %s3221_s18  ;;  %v890_v20 = vld [vmem:[#allocation2 + $0x8c] sm:$0x1]  ;;  %789 = vst.msk [vmem:[#allocation2 + $0x70] sm:$0xf] %vm251_vm2, %v558_v22  ;;  %v3566_v33 = vld [vmem:[#allocation2 + $0x84] sm:$0xff]  ;;  %v3570_v38 = vpack.c.b16 %v1013_v18, %v1013_v18  ;;  %v303_v40 = vsel %vm3313_vm3, 0, %v302_v24 }
  0x52   : > { %v869_v21 = vld [vmem:[#allocation2 + $0x38] sm:$0x1]  ;;  %v358_v36 = vld [vmem:[#allocation2 + $0xa4] sm:$0x1]  ;;  %v1016_v39 = vunpack.c.l.b16 %v890_v20  ;;  %348 = vst [vmem:[#allocation2 + $0x74] sm:$0x1] %v347_v31 }
  0x53   : > { %v786_v4 = vld [vmem:[#allocation2 + $0x6c] sm:$0xf]  ;;  %v612_v41 = vshrl.u32 %v397_v27, 16  ;;  %v1009_v43 = vunpack.c.l.b16 %v869_v21  ;;  %304 = vst [vmem:[#allocation2 + $0x9c] sm:$0x1] %v303_v40  ;;  %v615_v46 = vshll.u32 %v397_v27, 16 }
  0x54   : > { %1516 = vrot.lane.b32.xlu2 %v3510_v37, %s3224_s26  ;;  %v787_v9 = vsel %vm3346_vm7, %v549_v61, %v786_v4  ;;  %v807_v15 = vld [vmem:[#allocation2 + $0x90] sm:$0xf]  ;;  %v620_v48 = vshrl.u32 %v398_v32, 16  ;;  %v623_v51 = vshll.u32 %v398_v32, 16  ;;  %v359_v52 = vsel %vm3352_vm8, 0, %v358_v36 }
  0x55   : > { %788 = vst [vmem:[#allocation2 + $0x6c] sm:$0xf] %v787_v9  ;;  %v808_v29 = vsel %vm3346_vm7, %v600_v11, %v807_v15  ;;  %v811_v30 = vld [vmem:[#allocation2 + $0x98] sm:$0x1]  ;;  %v614_v47 = vrot.slane %v612_v41, 7  ;;  %v1173_v50 = vshll.u32 %v3566_v33, 16  ;;  %v3586_v54 = vpack.c.b16 %v1016_v39, %v1016_v39 }
  0x56   : > { %1234 = vrot.lane.b32.xlu1 %v3463_v49, %s3220_s17  ;;  %v1284_v49 = vrot.slane %v3492_v13, 1  ;;  %809 = vst [vmem:[#allocation2 + $0x90] sm:$0xf] %v808_v29  ;;  %v559_v55 = vrot.slane %v3534_v57, 4  ;;  %v622_v58 = vrot.slane %v620_v48, 7  ;;  %v1135_v59 = vshrl.u32 %v3541_v7, 16 }
  0x57   : > { %v618_v56 = vrot.slane %v614_v47, 4  ;;  %360 = vst [vmem:[#allocation2 + $0xa4] sm:$0x1] %v359_v52  ;;  %v1139_v60 = vrot.slane %v1137_v28, 1  ;;  %v1142_v61 = vshll.u32 %v3570_v38, 16  ;;  %v617_v62 = vor.u32 %v615_v46, %v614_v47 }
  0x58   : > { %v1025_v63 = vpack.c.b16 %v1009_v43, %v1009_v43  ;;  %v625_v1 = vor.u32 %v623_v51, %v622_v58  ;;  %v1171_v2 = vshrl.u32 %v3566_v33, 16  ;;  %v1175_v3 = vrot.slane %v1173_v50, 1 }
  0x59   : > { %1551 = vrot.lane.b32.xlu0 %v3531_v53, %s3222_s19  ;;  %v790_v57 = vld [vmem:[#allocation2 + $0x74] sm:$0x1]  ;;  %v1178_v4 = vshll.u32 %v3586_v54, 16  ;;  %v627_v9 = vrot.slane %v622_v58, 4  ;;  %v1144_v11 = vrot.slane %v1142_v61, 1  ;;  %v1087_v16 = vshrl.u32 %v3574_v42, 16 }
  0x5a   : > { %v814_v8 = vld [vmem:[#allocation2 + $0x9c] sm:$0xf]  ;;  %v1094_v20 = vshll.u32 %v1025_v63, 16  ;;  %v1176_v22 = vor.u32 %v1175_v3, %v1171_v2  ;;  %v1287_v32 = vrot.slane %v3541_v7, 1  ;;  %v1296_v41 = vrot.slane %v3566_v33, 1 }
  0x5b   : > { %v815_v15 = vsel %vm3346_vm7, %v617_v62, %v814_v8  ;;  %v1180_v24 = vrot.slane %v1178_v4, 1  ;;  %v1297_v43 = vrot.slane %v3586_v54, 1  ;;  %v1275_v46 = vrot.slane %v3574_v42, 1  ;;  %v278_v62 = vld [vmem:[#allocation2 + $0x3c] sm:$0x1] }
  0x5c   : > { %1315 = vrot.lane.b32.xlu2 %v3437_v12, %s3219_s16  ;;  %v605_v12 = vrot.slane %v603_v5, 7  ;;  %v791_v5 = vsel %vm3313_vm3, %v559_v55, %v790_v57  ;;  %816 = vst [vmem:[#allocation2 + $0x9c] sm:$0xf] %v815_v15  ;;  %v1096_v28 = vrot.slane %v1094_v20, 1  ;;  %v3629_v40 = vld [vmem:[#allocation2 + $0x6c] sm:$0xff]  ;;  %v1276_v47 = vrot.slane %v1025_v63, 1 }
  0x5d   : > { %792 = vst [vmem:[#allocation2 + $0x74] sm:$0x1] %v791_v5  ;;  %v1149_v48 = vshll.u32 %v3629_v40, 16  ;;  %v3646_v51 = vsel %vm1262_vm9, %v1296_v41, %v1297_v43  ;;  %v1147_v58 = vshrl.u32 %v3629_v40, 16  ;;  %v334_v63 = vld [vmem:[#allocation2 + $0x44] sm:$0x1] }
  0x5e   : > { %1352 = vrot.lane.b32.xlu1 %v3439_v17, %s3217_s14  ;;  %v3564_v17 = vsel %vm1262_vm9, %v1284_v49, %v1285_v6  ;;  %v608_v34 = vor.u32 %v606_v26, %v605_v12  ;;  %v610_v35 = vrot.slane %v605_v12, 4  ;;  %v1089_v49 = vshll.u32 %v3574_v42, 16  ;;  %v818_v21 = vld [vmem:[#allocation2 + $0xa4] sm:$0x1]  ;;  %v381_v5 = vld [vmem:[%s3324_s13 + $0x20] sm:$0xf] }
  0x5f   : > { %v626_v6 = vsel %vm3337_vm6, %v618_v56, %v625_v1  ;;  %v819_v12 = vsel %vm3313_vm3, %v627_v9, %v818_v21  ;;  %v3651_v56 = vsel %vm1262_vm9, %v1275_v46, %v1276_v47  ;;  %v279_v2 = vsel %vm3313_vm3, 0, %v278_v62  ;;  %v850_v46 = vld [vmem:[%s4993_s1 + $0x20] sm:$0xf] }
  0x60   : > { %v609_v44 = vsel %vm3337_vm6, %v601_v10, %v608_v34  ;;  %v812_v45 = vsel %vm3313_vm3, %v610_v35, %v811_v30  ;;  %v1140_v10 = vor.u32 %v1139_v60, %v1135_v59  ;;  %v1091_v18 = vrot.slane %v1089_v49, 1  ;;  %817 = vst.msk [vmem:[#allocation2 + $0xa0] sm:$0xf] %vm251_vm2, %v626_v6  ;;  %v382_v6 = vld [vmem:[%s3324_s13 + $0x24] sm:$0xf] }
  0x61   : > { %1244 = vrot.lane.b32.xlu0 %v3553_v25, %s3220_s17  ;;  %810 = vst.msk [vmem:[#allocation2 + $0x94] sm:$0xf] %vm251_vm2, %v609_v44  ;;  %v3618_v30 = vsel %vm1037_vm10, %v1176_v22, %v1180_v24  ;;  %v1288_v34 = vrot.slane %v3570_v38, 1  ;;  %v1151_v59 = vrot.slane %v1149_v48, 1  ;;  %v335_v3 = vsel %vm3352_vm8, 0, %v334_v63 }
  0x62   : > { %813 = vst [vmem:[#allocation2 + $0x98] sm:$0x1] %v812_v45  ;;  %v3613_v26 = vsel %vm1037_vm10, %v1140_v10, %v1144_v11  ;;  %v1092_v27 = vor.u32 %v1091_v18, %v1087_v16  ;;  %v476_v8 = vshrl.u32 %v381_v5, 16  ;;  %v484_v9 = vshrl.u32 %v382_v6, 16 }
  0x63   : > { %820 = vst [vmem:[#allocation2 + $0xa4] sm:$0x1] %v819_v12  ;;  %v1152_v11 = vor.u32 %v1151_v59, %v1147_v58  ;;  %v479_v18 = vshll.u32 %v381_v5, 16  ;;  %v487_v21 = vshll.u32 %v382_v6, 16  ;;  %v1290_v22 = vrot.slane %v3629_v40, 1 }
  0x64   : > { %1325 = vrot.lane.b32.xlu2 %v3564_v17, %s3219_s16  ;;  %v3625_v36 = vsel %vm1037_vm10, %v1092_v27, %v1096_v28  ;;  %v884_v39 = vld [vmem:[#allocation2 + $0x74] sm:$0x1]  ;;  %280 = vst [vmem:[#allocation2 + $0x3c] sm:$0x1] %v279_v2  ;;  %v478_v16 = vrot.slane %v476_v8, 7  ;;  %v486_v20 = vrot.slane %v484_v9, 7 }
  0x65   : > { %v1014_v45 = vunpack.c.l.b16 %v884_v39  ;;  %336 = vst [vmem:[#allocation2 + $0x44] sm:$0x1] %v335_v3  ;;  %vm1908_vm11 = vcmask 1043456   ;;  %v391_v6 = vld [vmem:[%s3324_s13 + $0x48] sm:$0xf]  ;;  %vm1581_vm12 = vcmask 64512  }
  0x66   : > { %1362 = vrot.lane.b32.xlu1 %v3541_v7, %s3217_s14  ;;  %v3637_v7 = vsel %vm1262_vm9, %v1287_v32, %v1288_v34  ;;  %v481_v28 = vor.u32 %v479_v18, %v478_v16  ;;  %v489_v32 = vor.u32 %v487_v21, %v486_v20  ;;  %v491_v34 = vrot.slane %v486_v20, 4  ;;  %v2921_v18 = vld [vmem:[%s4993_s1 + $0x10] sm:$0xff] }
  0x67   : > { %v1030_v55 = vpack.c.b16 %v1014_v45, %v1014_v45  ;;  %v3662_v57 = vld [vmem:[#allocation2 + $0x9c] sm:$0xff]  ;;  %v564_v21 = vshll.u32 %v391_v6, 16  ;;  %vm1614_vm13 = vcmask 130048   ;;  %vm1647_vm14 = vcmask 195584  }
  0x68   : > { %v3620_v31 = vld [vmem:[#allocation2 + $0x90] sm:$0xff]  ;;  %v1197_v27 = vshll.u32 %v3662_v57, 16  ;;  %v1195_v45 = vshrl.u32 %v3662_v57, 16  ;;  %v1302_v9 = vrot.slane %v3662_v57, 1  ;;  %vm1713_vm15 = vcmask 326656  }
  0x69   : > { %1399 = vrot.lane.b32.xlu0 %v3510_v37, %s3223_s20  ;;  %v893_v29 = vld [vmem:[#allocation2 + $0x98] sm:$0x1]  ;;  %v1185_v44 = vshll.u32 %v3620_v31, 16  ;;  %v1183_v52 = vshrl.u32 %v3620_v31, 16  ;;  %v1154_v1 = vshll.u32 %v1030_v55, 16  ;;  %v1291_v24 = vrot.slane %v1030_v55, 1 }
  0x6a   : > { %v1017_v35 = vunpack.c.l.b16 %v893_v29  ;;  %v896_v61 = vld [vmem:[#allocation2 + $0xa4] sm:$0x1]  ;;  %v482_v29 = vrot.slane %v478_v16, 4  ;;  %v1299_v55 = vrot.slane %v3620_v31, 1  ;;  %vm1680_vm0 = vcmask 261120  }
  0x6b   : > { %v1187_v50 = vrot.slane %v1185_v44, 1  ;;  %v1018_v4 = vunpack.c.l.b16 %v896_v61  ;;  %v1156_v15 = vrot.slane %v1154_v1, 1  ;;  %v758_v39 = vld [vmem:[#allocation2 + $0x3c] sm:$0xf]  ;;  %v3695_v48 = vsel %vm1262_vm9, %v1290_v22, %v1291_v24  ;;  %v293_v1 = vld [vmem:[#allocation2 + $0x78] sm:$0x1] }
  0x6c   : > { %1434 = vrot.lane.b32.xlu2 %v3531_v53, %s3221_s18  ;;  %v3639_v38 = vpack.c.b16 %v1017_v35, %v1017_v35  ;;  %v490_v41 = vsel %vm3337_vm6, %v482_v29, %v489_v32  ;;  %v759_v43 = vsel %vm3346_vm7, %v481_v28, %v758_v39  ;;  %v762_v44 = vld [vmem:[#allocation2 + $0x44] sm:$0x1]  ;;  %v294_v3 = vsel %vm3313_vm3, 0, %v293_v1  ;;  %v2920_v28 = vld [vmem:[%s4993_s1 + $0x8] sm:$0xff] }
  0x6d   : > { %v1188_v60 = vor.u32 %v1187_v50, %v1183_v52  ;;  %v3674_v12 = vpack.c.b16 %v1018_v4, %v1018_v4  ;;  %v3680_v35 = vsel %vm1037_vm10, %v1152_v11, %v1156_v15  ;;  %760 = vst [vmem:[#allocation2 + $0x3c] sm:$0xf] %v759_v43  ;;  %v763_v47 = vsel %vm3313_vm3, %v491_v34, %v762_v44  ;;  %v392_v4 = vld [vmem:[%s3324_s13 + $0x4c] sm:$0xf] }
  0x6e   : > { %1471 = vrot.lane.b32.xlu1 %v3574_v42, %s3218_s15  ;;  %v1190_v54 = vshll.u32 %v3639_v38, 16  ;;  %v1199_v52 = vrot.slane %v1197_v27, 1  ;;  %761 = vst.msk [vmem:[#allocation2 + $0x40] sm:$0xf] %vm251_vm2, %v490_v41  ;;  %v1300_v58 = vrot.slane %v3639_v38, 1  ;;  %v2922_v38 = vld [vmem:[%s4993_s1 + $0x18] sm:$0xff] }
  0x6f   : > { %v1202_v50 = vshll.u32 %v3674_v12, 16  ;;  %764 = vst [vmem:[#allocation2 + $0x44] sm:$0x1] %v763_v47  ;;  %v569_v8 = vshrl.u32 %v392_v4, 16  ;;  %v1303_v11 = vrot.slane %v3674_v12, 1  ;;  %v561_v15 = vshrl.u32 %v391_v6, 16 }
  0x70   : > { %v1192_v49 = vrot.slane %v1190_v54, 1  ;;  %v1865_v54 = vunpack.c.l.b16 %v850_v46  ;;  %v1200_v61 = vor.u32 %v1199_v52, %v1195_v45  ;;  %295 = vst [vmem:[#allocation2 + $0x78] sm:$0x1] %v294_v3  ;;  %v572_v22 = vshll.u32 %v392_v4, 16  ;;  %v2919_v46 = vld [vmem:[%s4993_s1] sm:$0xff] }
  0x71   : > { %1409 = vrot.lane.b32.xlu0 %v3613_v26, %s3223_s20  ;;  %v1204_v62 = vrot.slane %v1202_v50, 1  ;;  %v571_v16 = vrot.slane %v569_v8, 7  ;;  %v563_v20 = vrot.slane %v561_v15, 7  ;;  %v3736_v12 = vsel %vm1262_vm9, %v1302_v9, %v1303_v11  ;;  %v337_v47 = vld [vmem:[#allocation2 + $0x50] sm:$0x1] }
  0x72   : > { %v3669_v10 = vsel %vm1037_vm10, %v1188_v60, %v1192_v49  ;;  %v1870_v59 = vpack.c.b16 %v1865_v54, %v1865_v54  ;;  %v349_v49 = vld [vmem:[#allocation2 + $0x80] sm:$0x1]  ;;  %v281_v50 = vld [vmem:[#allocation2 + $0x48] sm:$0x1]  ;;  %v361_v6 = vld [vmem:[#allocation2 + $0xb0] sm:$0x1] }
  0x73   : > { %v350_v2 = vsel %vm3352_vm8, 0, %v349_v49  ;;  %v3721_v5 = vsel %vm1037_vm10, %v1200_v61, %v1204_v62  ;;  %v576_v24 = vrot.slane %v571_v16, 4  ;;  %v567_v29 = vrot.slane %v563_v20, 4 }
  0x74   : > { %1252 = vrot.lane.b32.xlu2 %v3618_v30, %s3220_s17  ;;  %v1910_v63 = vsel %vm1908_vm11, %v1870_v59, 0  ;;  %351 = vst [vmem:[#allocation2 + $0x80] sm:$0x1] %v350_v2  ;;  %v566_v34 = vor.u32 %v564_v21, %v563_v20  ;;  %v574_v39 = vor.u32 %v572_v22, %v571_v16  ;;  %v282_v54 = vsel %vm3313_vm3, 0, %v281_v50  ;;  %v383_v59 = vld [vmem:[%s3324_s13 + $0x28] sm:$0xf] }
  0x75   : > { %1915 = vmatpush.bf16.msra.mxu0 %v1910_v63  ;;  %2942 = vmatpush.bf16.msra.mxu2 %v1910_v63  ;;  %283 = vst [vmem:[#allocation2 + $0x48] sm:$0x1] %v282_v54  ;;  %v493_v62 = vshrl.u32 %v383_v59, 16  ;;  %v496_v2 = vshll.u32 %v383_v59, 16  ;;  %v305_v16 = vld [vmem:[#allocation2 + $0xa8] sm:$0x1] }
  0x76   : > { %1518 = vrot.lane.b32.xlu1 %v3625_v36, %s3224_s26  ;;  %2943 = vmatpush.bf16.msra.mxu3 %v1910_v63  ;;  %vm1746_vm1 = vcmask 392192   ;;  %vm1779_vm4 = vcmask 457728   ;;  %vm1812_vm5 = vcmask 523264   ;;  %vm1875_vm11 = vcmask 588800  }
  0x77   : > { %2941 = vmatpush.bf16.msra.mxu1 %v1910_v63  ;;  %v793_v41 = vld [vmem:[#allocation2 + $0x78] sm:$0xf]  ;;  %v495_v1 = vrot.slane %v493_v62, 7 }
  0x78   : > { %v794_v44 = vsel %vm3346_vm7, %v566_v34, %v793_v41  ;;  %v399_v41 = vld [vmem:[%s3324_s13 + $0x68] sm:$0xf] }
  0x79   : > { %1444 = vrot.lane.b32.xlu0 %v3637_v7, %s3221_s18  ;;  %1916 = vmatpush.bf16.msra.mxu0 %v2922_v38  ;;  %795 = vst [vmem:[#allocation2 + $0x78] sm:$0xf] %v794_v44  ;;  %v499_v15 = vrot.slane %v495_v1, 4  ;;  %v498_v21 = vor.u32 %v496_v2, %v495_v1 }
  0x7a   : > { %2945 = vmatpush.bf16.msra.mxu2 %v2922_v38  ;;  %2946 = vmatpush.bf16.msra.mxu3 %v2922_v38 }
  0x7b   : > { %2944 = vmatpush.bf16.msra.mxu1 %v2922_v38  ;;  %v797_v32 = vld [vmem:[#allocation2 + $0x80] sm:$0x1] }
  0x7c   : > { %1333 = vrot.lane.b32.xlu2 %v3646_v51, %s3219_s16  ;;  %v798_v43 = vsel %vm3313_vm3, %v576_v24, %v797_v32  ;;  %v765_v24 = vld [vmem:[#allocation2 + $0x48] sm:$0xf] }
  0x7d   : > { %1917 = vmatpush.bf16.msra.mxu0 %v2921_v18  ;;  %799 = vst [vmem:[#allocation2 + $0x80] sm:$0x1] %v798_v43  ;;  %v766_v34 = vsel %vm3346_vm7, %v498_v21, %v765_v24  ;;  %v3141_v21 = vld [vmem:[#allocation2] sm:$0xff] }
  0x7e   : > { %1553 = vrot.lane.b32.xlu1 %v3651_v56, %s3222_s19  ;;  %2948 = vmatpush.bf16.msra.mxu2 %v2921_v18  ;;  %767 = vst [vmem:[#allocation2 + $0x48] sm:$0xf] %v766_v34 }
  0x7f   : > { %2949 = vmatpush.bf16.msra.mxu3 %v2921_v18  ;;  %2947 = vmatpush.bf16.msra.mxu1 %v2921_v18  ;;  %v362_v18 = vsel %vm3352_vm8, 0, %v361_v6 }
  0x80   : > { %363 = vst [vmem:[#allocation2 + $0xb0] sm:$0x1] %v362_v18 }
  0x81   : > { %1481 = vrot.lane.b32.xlu0 %v3629_v40, %s3218_s15  ;;  %1918 = vmatpush.bf16.msra.mxu0 %v2920_v28 }
  0x82   : > { %2951 = vmatpush.bf16.msra.mxu2 %v2920_v28 }
  0x83   : > { %2952 = vmatpush.bf16.msra.mxu3 %v2920_v28  ;;  %2950 = vmatpush.bf16.msra.mxu1 %v2920_v28  ;;  %v306_v28 = vsel %vm3313_vm3, 0, %v305_v16 }
  0x84   : > { %1370 = vrot.lane.b32.xlu2 %v3620_v31, %s3217_s14  ;;  %v3708_v31 = vsel %vm1262_vm9, %v1299_v55, %v1300_v58  ;;  %v872_v55 = vld [vmem:[#allocation2 + $0x44] sm:$0x1]  ;;  %v384_v58 = vld [vmem:[%s3324_s13 + $0x2c] sm:$0xf]  ;;  %307 = vst [vmem:[#allocation2 + $0xa8] sm:$0x1] %v306_v28 }
  0x85   : > { %1919 = vmatpush.bf16.msra.mxu0 %v2919_v46  ;;  %v501_v61 = vshrl.u32 %v384_v58, 16  ;;  %v1010_v49 = vunpack.c.l.b16 %v872_v55  ;;  %v504_v3 = vshll.u32 %v384_v58, 16  ;;  %v632_v55 = vshll.u32 %v399_v41, 16 }
  0x86   : > { %1417 = vrot.lane.b32.xlu1 %v3669_v10, %s3223_s20  ;;  %2954 = vmatpush.bf16.msra.mxu2 %v2919_v46 }
  0x87   : > { %v3703_v60 = vpop.permute.xlu2 %1467  ;;  %2955 = vmatpush.bf16.msra.mxu3 %v2919_v46  ;;  %2953 = vmatpush.bf16.msra.mxu1 %v2919_v46  ;;  %v503_v38 = vrot.slane %v501_v61, 7  ;;  %v3784_v20 = vpack.c.b16 %v1010_v49, %v1010_v49  ;;  %v629_v46 = vshrl.u32 %v399_v41, 16 }
  0x89   : > { %1528 = vrot.lane.b32.xlu0 %v3680_v35, %s3224_s26  ;;  %v508_v4 = vrot.slane %v503_v38, 4  ;;  %v506_v22 = vor.u32 %v504_v3, %v503_v38  ;;  %v1106_v50 = vshll.u32 %v3784_v20, 16  ;;  %v825_v38 = vld [vmem:[#allocation2 + $0xb0] sm:$0x1]  ;;  %v1279_v41 = vrot.slane %v3784_v20, 1 }
  0x8b   : > { %v507_v32 = vsel %vm3337_vm6, %v499_v15, %v506_v22  ;;  %v1108_v1 = vrot.slane %v1106_v50, 1  ;;  %v887_v15 = vld [vmem:[#allocation2 + $0x80] sm:$0x1] }
  0x8c   : > { %1563 = vrot.lane.b32.xlu2 %v3695_v48, %s3222_s19  ;;  %768 = vst.msk [vmem:[#allocation2 + $0x4c] sm:$0xf] %vm251_vm2, %v507_v32 }
  0x8e   : > { %1489 = vrot.lane.b32.xlu1 %v3662_v57, %s3218_s15 }
  0x91   : > { %1452 = vrot.lane.b32.xlu0 %v3708_v31, %s3221_s18 }
  0x94   : > { %1536 = vrot.lane.b32.xlu2 %v3721_v5, %s3224_s26 }
  0x96   : > { %v3731_v27 = vpop.permute.xlu2 %1430  ;;  %1236 = vrot.lane.b32.xlu1 %v3510_v37, %s3220_s17  ;;  %v575_v37 = vsel %vm3337_vm6, %v567_v29, %v574_v39  ;;  %v400_v29 = vld [vmem:[%s3324_s13 + $0x6c] sm:$0xf] }
  0x97   : > { %796 = vst.msk [vmem:[#allocation2 + $0x7c] sm:$0xf] %vm251_vm2, %v575_v37  ;;  %v637_v43 = vshrl.u32 %v400_v29, 16  ;;  %v640_v58 = vshll.u32 %v400_v29, 16  ;;  %v1015_v29 = vunpack.c.l.b16 %v887_v15 }
  0x99   : > { %1571 = vrot.lane.b32.xlu0 %v3736_v12, %s3222_s19  ;;  %v639_v54 = vrot.slane %v637_v43, 7  ;;  %v1031_v43 = vpack.c.b16 %v1015_v29, %v1015_v29 }
  0x9b   : > { %v3752_v45 = vpop.permute.xlu1 %1348  ;;  %v644_v59 = vrot.slane %v639_v54, 4  ;;  %v642_v3 = vor.u32 %v640_v58, %v639_v54  ;;  %v3142_v58 = vld [vmem:[#allocation2 + $0xc] sm:$0xff] }
  0x9c   : > { %1317 = vrot.lane.b32.xlu2 %v3531_v53, %s3219_s16  ;;  %v338_v53 = vsel %vm3352_vm8, 0, %v337_v47 }
  0x9d   : > { %339 = vst [vmem:[#allocation2 + $0x50] sm:$0x1] %v338_v53  ;;  %v631_v53 = vrot.slane %v629_v46, 7  ;;  %v826_v6 = vsel %vm3313_vm3, %v644_v59, %v825_v38 }
  0x9e   : > { %v3757_v52 = vpop.permute.xlu2 %1232  ;;  %1354 = vrot.lane.b32.xlu1 %v3574_v42, %s3217_s14  ;;  %v3769_v42 = vld [vmem:[#allocation2 + $0x3c] sm:$0xff]  ;;  %827 = vst [vmem:[#allocation2 + $0xb0] sm:$0x1] %v826_v6 }
  0x9f   : > { %v1101_v11 = vshll.u32 %v3769_v42, 16  ;;  %v1099_v37 = vshrl.u32 %v3769_v42, 16  ;;  %v634_v49 = vor.u32 %v632_v55, %v631_v53  ;;  %v635_v2 = vrot.slane %v631_v53, 4 }
  0xa0   : > { %v1166_v55 = vshll.u32 %v1031_v43, 16  ;;  %v1585_v59 = vsel %vm1581_vm12, %v3142_v58, %v3757_v52 }
  0xa1   : > { %1246 = vrot.lane.b32.xlu0 %v3613_v26, %s3220_s17  ;;  %v1103_v44 = vrot.slane %v1101_v11, 1  ;;  %v643_v18 = vsel %vm3337_vm6, %v635_v2, %v642_v3 }
  0xa2   : > { %824 = vst.msk [vmem:[#allocation2 + $0xac] sm:$0xf] %vm251_vm2, %v643_v18 }
  0xa3   : > { %v3771_v63 = vpop.permute.xlu0 %1311  ;;  %v3779_v9 = vpop.permute.xlu1 %1350  ;;  %v1104_v62 = vor.u32 %v1103_v44, %v1099_v37 }
  0xa4   : > { %1327 = vrot.lane.b32.xlu2 %v3637_v7, %s3219_s16 }
  0xa5   : > { %v3818_v28 = vsel %vm1037_vm10, %v1104_v62, %v1108_v1  ;;  %v1168_v1 = vrot.slane %v1166_v55, 1 }
  0xa6   : > { %v3775_v8 = vpop.permute.xlu2 %1397  ;;  %1364 = vrot.lane.b32.xlu1 %v3629_v40, %s3217_s14  ;;  %v769_v40 = vld [vmem:[#allocation2 + $0x50] sm:$0x1] }
  0xa7   : > { %v770_v39 = vsel %vm3313_vm3, %v508_v4, %v769_v40  ;;  %v821_v4 = vld [vmem:[#allocation2 + $0xa8] sm:$0xf]  ;;  %v3820_v40 = vld [vmem:[#allocation2 + $0x78] sm:$0xff] }
  0xa8   : > { %771 = vst [vmem:[#allocation2 + $0x50] sm:$0x1] %v770_v39  ;;  %v822_v16 = vsel %vm3346_vm7, %v634_v49, %v821_v4  ;;  %v1278_v39 = vrot.slane %v3769_v42, 1  ;;  %v1161_v37 = vshll.u32 %v3820_v40, 16  ;;  %v1159_v54 = vshrl.u32 %v3820_v40, 16 }
  0xa9   : > { %1401 = vrot.lane.b32.xlu0 %v3625_v36, %s3223_s20  ;;  %823 = vst [vmem:[#allocation2 + $0xa8] sm:$0xf] %v822_v16 }
  0xaa   : > { %v3841_v20 = vsel %vm1262_vm9, %v1278_v39, %v1279_v41  ;;  %v1163_v53 = vrot.slane %v1161_v37, 1  ;;  %v899_v39 = vld [vmem:[#allocation2 + $0xb0] sm:$0x1] }
  0xab   : > { %v1231_v47 = vpop.permute.xlu0 %1230 }
  0xac   : > { %1436 = vrot.lane.b32.xlu2 %v3651_v56, %s3221_s18  ;;  %v1583_v22 = vsel %vm1581_vm12, %v3141_v21, %v1231_v47  ;;  %v1164_v38 = vor.u32 %v1163_v53, %v1159_v54 }
  0xad   : > { %v1616_v32 = vsel %vm1614_vm13, %v1583_v22, %v3771_v63  ;;  %v1294_v22 = vrot.slane %v1031_v43, 1  ;;  %v1019_v43 = vunpack.c.l.b16 %v899_v39 }
  0xae   : > { %v3803_v61 = vpop.permute.xlu2 %1516  ;;  %1473 = vrot.lane.b32.xlu1 %v3769_v42, %s3218_s15  ;;  %v1649_v44 = vsel %vm1647_vm14, %v1616_v32, %v3752_v45  ;;  %v3863_v6 = vsel %vm1037_vm10, %v1164_v38, %v1168_v1 }
  0xaf   : > { %v875_v52 = vld [vmem:[#allocation2 + $0x50] sm:$0x1]  ;;  %v1035_v55 = vpack.c.b16 %v1019_v43, %v1019_v43 }
  0xb0   : > { %v1550_v11 = vpop.permute.xlu1 %1549  ;;  %v1011_v15 = vunpack.c.l.b16 %v875_v52 }
  0xb1   : > { %1411 = vrot.lane.b32.xlu0 %v3680_v35, %s3223_s20  ;;  %v1214_v38 = vshll.u32 %v1035_v55, 16  ;;  %v1306_v39 = vrot.slane %v1035_v55, 1 }
  0xb3   : > { %v1314_v24 = vpop.permute.xlu0 %1313  ;;  %v1216_v52 = vrot.slane %v1214_v38, 1 }
  0xb4   : > { %1254 = vrot.lane.b32.xlu2 %v3669_v10, %s3220_s17 }
  0xb6   : > { %v3826_v34 = vpop.permute.xlu2 %1315  ;;  %1520 = vrot.lane.b32.xlu1 %v3818_v28, %s3224_s26 }
  0xb8   : > { %v1396_v46 = vpop.permute.xlu1 %1395 }
  0xb9   : > { %1446 = vrot.lane.b32.xlu0 %v3695_v48, %s3221_s18  ;;  %v1682_v63 = vsel %vm1680_vm0, %v1649_v44, %v1396_v46 }
  0xba   : > { %v1715_v47 = vsel %vm1713_vm15, %v1682_v63, %v3731_v27 }
  0xbb   : > { %v1515_v50 = vpop.permute.xlu0 %1514  ;;  %v1748_v45 = vsel %vm1746_vm1, %v1715_v47, %v3703_v60  ;;  %v1618_v60 = vsel %vm1614_vm13, %v1585_v59, %v1314_v24  ;;  %v1027_v24 = vpack.c.b16 %v1011_v15, %v1011_v15  ;;  %v3885_v47 = vld [vmem:[#allocation2 + $0xa8] sm:$0xff] }
  0xbc   : > { %v1781_v62 = vsel %vm1779_vm4, %v1748_v45, %v1515_v50  ;;  %1335 = vrot.lane.b32.xlu2 %v3708_v31, %s3219_s16  ;;  %v1651_v3 = vsel %vm1647_vm14, %v1618_v60, %v3779_v9  ;;  %v1293_v9 = vrot.slane %v3820_v40, 1  ;;  %v1209_v58 = vshll.u32 %v3885_v47, 16 }
  0xbd   : > { %v1814_v27 = vsel %vm1812_vm5, %v1781_v62, %v1550_v11  ;;  %v3865_v11 = vld [vmem:[#allocation2 + $0x48] sm:$0xff]  ;;  %v1684_v16 = vsel %vm1680_vm0, %v1651_v3, %v3775_v8  ;;  %v1118_v63 = vshll.u32 %v1027_v24, 16  ;;  %v1282_v15 = vrot.slane %v1027_v24, 1 }
  0xbe   : > { %v3852_v49 = vpop.permute.xlu2 %1325  ;;  %1555 = vrot.lane.b32.xlu1 %v3841_v20, %s3222_s19  ;;  %2898 = vmatmul.msk.bf16.vlgmr.msra.gmra.mxu0 %vm1875_vm11, %v1814_v27  ;;  %v1113_v29 = vshll.u32 %v3865_v11, 16  ;;  %v3882_v8 = vsel %vm1262_vm9, %v1293_v9, %v1294_v22  ;;  %v1111_v44 = vshrl.u32 %v3865_v11, 16  ;;  %v1207_v27 = vshrl.u32 %v3885_v47, 16 }
  0xbf   : > { %v1120_v53 = vrot.slane %v1118_v63, 1  ;;  %v1211_v60 = vrot.slane %v1209_v58, 1  ;;  %v1305_v24 = vrot.slane %v3885_v47, 1 }
  0xc0   : > { %v1470_v2 = vpop.permute.xlu1 %1469  ;;  %v1115_v46 = vrot.slane %v1113_v29, 1 }
  0xc1   : > { %1483 = vrot.lane.b32.xlu0 %v3820_v40, %s3218_s15  ;;  %v3934_v63 = vsel %vm1262_vm9, %v1305_v24, %v1306_v39  ;;  %v364_v24 = vld [vmem:[#allocation2 + $0xbc] sm:$0x1] }
  0xc2   : > { %v1116_v54 = vor.u32 %v1115_v46, %v1111_v44 }
  0xc3   : > { %v1433_v4 = vpop.permute.xlu0 %1432 }
  0xc4   : > { %1240 = vrot.lane.b32.xlu2 %v3818_v28, %s3220_s17  ;;  %v1717_v18 = vsel %vm1713_vm15, %v1684_v16, %v1433_v4  ;;  %v1281_v4 = vrot.slane %v3865_v11, 1 }
  0xc5   : > { %v1750_v41 = vsel %vm1746_vm1, %v1717_v18, %v1470_v2  ;;  %v1212_v2 = vor.u32 %v1211_v60, %v1207_v27  ;;  %v3956_v60 = vld [vmem:[#allocation2 + $0x54] sm:$0xff] }
  0xc6   : > { %v3872_v21 = vpop.permute.xlu2 %1434  ;;  %1530 = vrot.lane.b32.xlu1 %v3863_v6, %s3224_s26  ;;  %v1783_v50 = vsel %vm1779_vm4, %v1750_v41, %v3803_v61  ;;  %v3901_v61 = vsel %vm1037_vm10, %v1116_v54, %v1120_v53  ;;  %v3923_v22 = vsel %vm1262_vm9, %v1281_v4, %v1282_v15  ;;  %v308_v15 = vld [vmem:[#allocation2 + $0xb4] sm:$0x1] }
  0xc7   : > { %v3914_v18 = vsel %vm1037_vm10, %v1212_v2, %v1216_v52 }
  0xc8   : > { %v1235_v32 = vpop.permute.xlu1 %1234 }
  0xc9   : > { %1372 = vrot.lane.b32.xlu0 %v3662_v57, %s3217_s14 }
  0xcb   : > { %v1552_v37 = vpop.permute.xlu0 %1551 }
  0xcc   : > { %1321 = vrot.lane.b32.xlu2 %v3841_v20, %s3219_s16  ;;  %v1816_v45 = vsel %vm1812_vm5, %v1783_v50, %v1552_v37  ;;  %v3143_v37 = vld [vmem:[#allocation2 + $0x18] sm:$0xff] }
  0xcd   : > { %v1587_v44 = vsel %vm1581_vm12, %v3143_v37, %v1235_v32  ;;  %v365_v37 = vsel %vm3352_vm8, 0, %v364_v24  ;;  %v3145_v24 = vld [vmem:[#allocation2 + $0x24] sm:$0xff] }
  0xce   : > { %v3892_v57 = vpop.permute.xlu2 %1252  ;;  %1565 = vrot.lane.b32.xlu1 %v3882_v8, %s3222_s19  ;;  %2899 = vmatmul.msk.bf16.gmra.mxu0 %vm1875_vm11, %v1816_v45  ;;  %v1620_v50 = vsel %vm1614_vm13, %v1587_v44, %v3826_v34  ;;  %366 = vst [vmem:[#allocation2 + $0xbc] sm:$0x1] %v365_v37 }
  0xd0   : > { %v1353_v59 = vpop.permute.xlu1 %1352 }
  0xd1   : > { %1419 = vrot.lane.b32.xlu0 %v3721_v5, %s3223_s20  ;;  %v1653_v45 = vsel %vm1647_vm14, %v1620_v50, %v1353_v59 }
  0xd3   : > { %v1245_v62 = vpop.permute.xlu0 %1244 }
  0xd4   : > { %1358 = vrot.lane.b32.xlu2 %v3865_v11, %s3217_s14 }
  0xd6   : > { %v3906_v1 = vpop.permute.xlu2 %1333  ;;  %1405 = vrot.lane.b32.xlu1 %v3901_v61, %s3223_s20 }
  0xd8   : > { %v1363_v3 = vpop.permute.xlu1 %1362 }
  0xd9   : > { %1454 = vrot.lane.b32.xlu0 %v3736_v12, %s3221_s18 }
  0xdb   : > { %v1400_v16 = vpop.permute.xlu0 %1399 }
  0xdc   : > { %1491 = vrot.lane.b32.xlu2 %v3885_v47, %s3218_s15 }
  0xde   : > { %v3918_v9 = vpop.permute.xlu2 %1370  ;;  %1538 = vrot.lane.b32.xlu1 %v3914_v18, %s3224_s26 }
  0xe0   : > { %v1472_v29 = vpop.permute.xlu1 %1471 }
  0xe1   : > { %1440 = vrot.lane.b32.xlu0 %v3923_v22, %s3221_s18 }
  0xe3   : > { %v1410_v41 = vpop.permute.xlu0 %1409 }
  0xe4   : > { %1477 = vrot.lane.b32.xlu2 %v3492_v13, %s3218_s15  ;;  %v1686_v13 = vsel %vm1680_vm0, %v1653_v45, %v1400_v16 }
  0xe5   : > { %v1719_v32 = vsel %vm1713_vm15, %v1686_v13, %v3872_v21  ;;  %v1597_v21 = vsel %vm1581_vm12, %v3956_v60, %v1245_v62 }
  0xe6   : > { %v1564_v46 = vpop.permute.xlu2 %1563  ;;  %1524 = vrot.lane.b32.xlu1 %v3553_v25, %s3224_s26  ;;  %v1752_v34 = vsel %vm1746_vm1, %v1719_v32, %v1472_v29  ;;  %v309_v29 = vsel %vm3313_vm3, 0, %v308_v15 }
  0xe7   : > { %310 = vst [vmem:[#allocation2 + $0xb4] sm:$0x1] %v309_v29 }
  0xe8   : > { %v1519_v43 = vpop.permute.xlu1 %1518 }
  0xe9   : > { %1573 = vrot.lane.b32.xlu0 %v3934_v63, %s3222_s19  ;;  %v1785_v55 = vsel %vm1779_vm4, %v1752_v34, %v1519_v43 }
  0xeb   : > { %v1445_v54 = vpop.permute.xlu0 %1444 }
  0xec   : > { %1559 = vrot.lane.b32.xlu2 %v3564_v17, %s3222_s19 }
  0xee   : > { %v3946_v53 = vpop.permute.xlu2 %1536  ;;  %1319 = vrot.lane.b32.xlu1 %v3651_v56, %s3219_s16 }
  0xf0   : > { %v1554_v58 = vpop.permute.xlu1 %1553 }
  0xf1   : > { %1238 = vrot.lane.b32.xlu0 %v3625_v36, %s3220_s17  ;;  %v1818_v59 = vsel %vm1812_vm5, %v1785_v55, %v1554_v58  ;;  %v1630_v36 = vsel %vm1614_vm13, %v1597_v21, %v3852_v49 }
  0xf2   : > { %2900 = vmatmul.msk.bf16.gmra.mxu0 %vm1875_vm11, %v1818_v59  ;;  %v1663_v38 = vsel %vm1647_vm14, %v1630_v36, %v1363_v3 }
  0xf3   : > { %v1482_v27 = vpop.permute.xlu0 %1481  ;;  %v1696_v52 = vsel %vm1680_vm0, %v1663_v38, %v1410_v41  ;;  %v402_v41 = vld [vmem:[%s3324_s13 + $0x74] sm:$0xf] }
  0xf4   : > { %1248 = vrot.lane.b32.xlu2 %v3680_v35, %s3220_s17  ;;  %v1729_v62 = vsel %vm1713_vm15, %v1696_v52, %v1445_v54  ;;  %v657_v13 = vshll.u32 %v402_v41, 16  ;;  %v832_v52 = vld [vmem:[#allocation2 + $0xbc] sm:$0x1] }
  0xf5   : > { %v1762_v35 = vsel %vm1746_vm1, %v1729_v62, %v1482_v27 }
  0xf6   : > { %v3962_v56 = vpop.permute.xlu2 %1317  ;;  %1329 = vrot.lane.b32.xlu1 %v3695_v48, %s3219_s16  ;;  %v1605_v48 = vsel %vm1581_vm12, %v3566_v33, %v3892_v57 }
  0xf7   : > { %v1638_v57 = vsel %vm1614_vm13, %v1605_v48, %v3906_v1 }
  0xf8   : > { %v1418_v2 = vpop.permute.xlu1 %1417 }
  0xf9   : > { %1356 = vrot.lane.b32.xlu0 %v3769_v42, %s3217_s14 }
  0xfb   : > { %v1529_v4 = vpop.permute.xlu0 %1528 }
  0xfc   : > { %v1795_v49 = vsel %vm1779_vm4, %v1762_v35, %v1529_v4  ;;  %1403 = vrot.lane.b32.xlu2 %v3818_v28, %s3223_s20  ;;  %v401_v28 = vld [vmem:[%s3324_s13 + $0x70] sm:$0xf] }
  0xfd   : > { %v1828_v3 = vsel %vm1812_vm5, %v1795_v49, %v1564_v46  ;;  %v646_v44 = vshrl.u32 %v401_v28, 16  ;;  %v654_v46 = vshrl.u32 %v402_v41, 16  ;;  %v649_v1 = vshll.u32 %v401_v28, 16 }
  0xfe   : > { %v3981_v16 = vpop.permute.xlu2 %1327  ;;  %2905 = vmatmul.msk.bf16.vlgmr.msra.gmra.mxu2 %vm1875_vm11, %v1828_v3  ;;  %1438 = vrot.lane.b32.xlu1 %v3841_v20, %s3221_s18  ;;  %v1671_v20 = vsel %vm1647_vm14, %v1638_v57, %v3918_v9  ;;  %v828_v9 = vld [vmem:[#allocation2 + $0xb4] sm:$0xf] }
  0xff   : > { %v648_v50 = vrot.slane %v646_v44, 7  ;;  %v656_v45 = vrot.slane %v654_v46, 7  ;;  %v1704_v54 = vsel %vm1680_vm0, %v1671_v20, %v1418_v2 }
 0x100   : > { %v1490_v39 = vpop.permute.xlu1 %1489 }
 0x101   : > { %1366 = vrot.lane.b32.xlu0 %v3820_v40, %s3217_s14  ;;  %v651_v34 = vor.u32 %v649_v1, %v648_v50  ;;  %v652_v55 = vrot.slane %v648_v50, 4  ;;  %v659_v58 = vor.u32 %v657_v13, %v656_v45  ;;  %v661_v36 = vrot.slane %v656_v45, 4 }
 0x103   : > { %v1453_v43 = vpop.permute.xlu0 %1452  ;;  %v660_v27 = vsel %vm3337_vm6, %v652_v55, %v659_v58  ;;  %v829_v21 = vsel %vm3346_vm7, %v651_v34, %v828_v9  ;;  %v367_v58 = vld [vmem:[#allocation2 + $0xc8] sm:$0x1]  ;;  %v311_v9 = vld [vmem:[#allocation2 + $0xc0] sm:$0x1] }
 0x104   : > { %1413 = vrot.lane.b32.xlu2 %v3863_v6, %s3223_s20  ;;  %v1737_v32 = vsel %vm1713_vm15, %v1704_v54, %v1453_v43  ;;  %830 = vst [vmem:[#allocation2 + $0xb4] sm:$0xf] %v829_v21 }
 0x105   : > { %v1770_v38 = vsel %vm1746_vm1, %v1737_v32, %v1490_v39  ;;  %831 = vst.msk [vmem:[#allocation2 + $0xb8] sm:$0xf] %vm251_vm2, %v660_v27  ;;  %v368_v27 = vsel %vm3352_vm8, 0, %v367_v58 }
 0x106   : > { %v1437_v59 = vpop.permute.xlu2 %1436  ;;  %1256 = vrot.lane.b32.xlu1 %v3721_v5, %s3220_s17  ;;  %v833_v5 = vsel %vm3313_vm3, %v661_v36, %v832_v52  ;;  %v1803_v35 = vsel %vm1779_vm4, %v1770_v38, %v3946_v53  ;;  %v312_v38 = vsel %vm3313_vm3, 0, %v311_v9  ;;  %369 = vst [vmem:[#allocation2 + $0xc8] sm:$0x1] %v368_v27  ;;  %v404_v52 = vld [vmem:[%s3324_s13 + $0x7c] sm:$0xf]  ;;  %v3147_v27 = vld [vmem:[#allocation2 + $0x84] sm:$0xff] }
 0x107   : > { %834 = vst [vmem:[#allocation2 + $0xbc] sm:$0x1] %v833_v5  ;;  %v671_v5 = vshrl.u32 %v404_v52, 16 }
 0x108   : > { %v1237_v2 = vpop.permute.xlu1 %1236  ;;  %313 = vst [vmem:[#allocation2 + $0xc0] sm:$0x1] %v312_v38 }
 0x109   : > { %1475 = vrot.lane.b32.xlu0 %v3865_v11, %s3218_s15  ;;  %v1589_v39 = vsel %vm1581_vm12, %v3145_v24, %v1237_v2 }
 0x10a   : > { %v1622_v44 = vsel %vm1614_vm13, %v1589_v39, %v3962_v56 }
 0x10b   : > { %v1572_v62 = vpop.permute.xlu0 %1571 }
 0x10c   : > { %1448 = vrot.lane.b32.xlu2 %v3882_v8, %s3221_s18  ;;  %v1836_v4 = vsel %vm1812_vm5, %v1803_v35, %v1572_v62  ;;  %v4055_v37 = vld [vmem:[#allocation2 + $0xb4] sm:$0xff] }
 0x10d   : > { %2909 = vmatmul.msk.bf16.vlgmr.msra.gmra.mxu3 %vm1875_vm11, %v1836_v4  ;;  %v1221_v43 = vshll.u32 %v4055_v37, 16  ;;  %v1219_v56 = vshrl.u32 %v4055_v37, 16  ;;  %v1308_v62 = vrot.slane %v4055_v37, 1 }
 0x10e   : > { %v4020_v48 = vpop.permute.xlu2 %1254  ;;  %1337 = vrot.lane.b32.xlu1 %v3736_v12, %s3219_s16 }
 0x10f   : > { %v1223_v13 = vrot.slane %v1221_v43, 1 }
 0x110   : > { %v1355_v49 = vpop.permute.xlu1 %1354 }
 0x111   : > { %1522 = vrot.lane.b32.xlu0 %v3901_v61, %s3224_s26  ;;  %v1655_v46 = vsel %vm1647_vm14, %v1622_v44, %v1355_v49  ;;  %v1224_v21 = vor.u32 %v1223_v13, %v1219_v56  ;;  %v835_v56 = vld [vmem:[#allocation2 + $0xc0] sm:$0xf] }
 0x113   : > { %v4026_v3 = vpop.permute.xlu0 %1246 }
 0x114   : > { %1485 = vrot.lane.b32.xlu2 %v3566_v33, %s3218_s15 }
 0x116   : > { %v4030_v53 = vpop.permute.xlu2 %1335  ;;  %1242 = vrot.lane.b32.xlu1 %v3901_v61, %s3220_s17  ;;  %v902_v61 = vld [vmem:[#allocation2 + $0xbc] sm:$0x1] }
 0x117   : > { %v1020_v41 = vunpack.c.l.b16 %v902_v61  ;;  %v673_v61 = vrot.slane %v671_v5, 7 }
 0x118   : > { %v4034_v15 = vpop.permute.xlu1 %1364 }
 0x119   : > { %1557 = vrot.lane.b32.xlu0 %v3923_v22, %s3222_s19  ;;  %v1036_v20 = vpack.c.b16 %v1020_v41, %v1020_v41  ;;  %v674_v41 = vshll.u32 %v404_v52, 16  ;;  %v678_v44 = vrot.slane %v673_v61, 4  ;;  %v370_v52 = vld [vmem:[#allocation2 + $0xd4] sm:$0x1] }
 0x11b   : > { %v1402_v12 = vpop.permute.xlu0 %1401  ;;  %v1226_v54 = vshll.u32 %v1036_v20, 16  ;;  %v1309_v35 = vrot.slane %v1036_v20, 1 }
 0x11c   : > { %1374 = vrot.lane.b32.xlu2 %v3885_v47, %s3217_s14  ;;  %v1688_v50 = vsel %vm1680_vm0, %v1655_v46, %v1402_v12  ;;  %v3146_v12 = vld [vmem:[#allocation2 + $0x60] sm:$0xff] }
 0x11d   : > { %v1228_v36 = vrot.slane %v1226_v54, 1  ;;  %v4098_v46 = vsel %vm1262_vm9, %v1308_v62, %v1309_v35 }
 0x11e   : > { %v4040_v29 = vpop.permute.xlu2 %1240  ;;  %1323 = vrot.lane.b32.xlu1 %v3923_v22, %s3219_s16 }
 0x120   : > { %v1474_v33 = vpop.permute.xlu1 %1473 }
 0x121   : > { %1532 = vrot.lane.b32.xlu0 %v3618_v30, %s3224_s26 }
 0x123   : > { %v4046_v57 = vpop.permute.xlu0 %1411 }
 0x124   : > { %1421 = vrot.lane.b32.xlu2 %v3914_v18, %s3223_s20 }
 0x126   : > { %v4051_v28 = vpop.permute.xlu2 %1321  ;;  %1360 = vrot.lane.b32.xlu1 %v3956_v60, %s3217_s14  ;;  %v1721_v60 = vsel %vm1713_vm15, %v1688_v50, %v1437_v59  ;;  %v676_v50 = vor.u32 %v674_v41, %v673_v61 }
 0x127   : > { %v1754_v32 = vsel %vm1746_vm1, %v1721_v60, %v1474_v33  ;;  %v4091_v33 = vsel %vm1037_vm10, %v1224_v21, %v1228_v36  ;;  %v839_v60 = vld [vmem:[#allocation2 + $0xc8] sm:$0x1] }
 0x128   : > { %v1521_v22 = vpop.permute.xlu1 %1520  ;;  %v840_v13 = vsel %vm3313_vm3, %v678_v44, %v839_v60 }
 0x129   : > { %1567 = vrot.lane.b32.xlu0 %v3646_v51, %s3222_s19  ;;  %v1787_v34 = vsel %vm1779_vm4, %v1754_v32, %v1521_v22  ;;  %841 = vst [vmem:[#allocation2 + $0xc8] sm:$0x1] %v840_v13 }
 0x12b   : > { %v1447_v1 = vpop.permute.xlu0 %1446 }
 0x12c   : > { %1456 = vrot.lane.b32.xlu2 %v3934_v63, %s3221_s18 }
 0x12e   : > { %v4067_v45 = vpop.permute.xlu2 %1358  ;;  %1493 = vrot.lane.b32.xlu1 %v4055_v37, %s3218_s15 }
 0x130   : > { %v1556_v55 = vpop.permute.xlu1 %1555 }
 0x131   : > { %1407 = vrot.lane.b32.xlu0 %v3553_v25, %s3223_s20  ;;  %v1820_v59 = vsel %vm1812_vm5, %v1787_v34, %v1556_v55  ;;  %v403_v25 = vld [vmem:[%s3324_s13 + $0x78] sm:$0xf] }
 0x132   : > { %2901 = vmatmul.msk.bf16.gmra.mxu0 %vm1875_vm11, %v1820_v59  ;;  %v663_v4 = vshrl.u32 %v403_v25, 16  ;;  %v666_v39 = vshll.u32 %v403_v25, 16 }
 0x133   : > { %v1484_v2 = vpop.permute.xlu0 %1483 }
 0x134   : > { %1442 = vrot.lane.b32.xlu2 %v3564_v17, %s3221_s18  ;;  %v665_v24 = vrot.slane %v663_v4, 7  ;;  %v1599_v17 = vsel %vm1581_vm12, %v3146_v12, %v4026_v3 }
 0x135   : > { %v1632_v54 = vsel %vm1614_vm13, %v1599_v17, %v3981_v16 }
 0x136   : > { %v4087_v49 = vpop.permute.xlu2 %1491  ;;  %1479 = vrot.lane.b32.xlu1 %v3146_v12, %s3218_s15  ;;  %v668_v20 = vor.u32 %v666_v39, %v665_v24  ;;  %v669_v43 = vrot.slane %v665_v24, 4  ;;  %v1665_v55 = vsel %vm1647_vm14, %v1632_v54, %v4034_v15 }
 0x137   : > { %v1698_v58 = vsel %vm1680_vm0, %v1665_v55, %v4046_v57 }
 0x138   : > { %v1531_v22 = vpop.permute.xlu1 %1530  ;;  %v677_v32 = vsel %vm3337_vm6, %v669_v43, %v676_v50  ;;  %v836_v34 = vsel %vm3346_vm7, %v668_v20, %v835_v56  ;;  %v1731_v16 = vsel %vm1713_vm15, %v1698_v58, %v1447_v1 }
 0x139   : > { %1540 = vrot.lane.b32.xlu0 %v4091_v33, %s3224_s26  ;;  %837 = vst [vmem:[#allocation2 + $0xc0] sm:$0xf] %v836_v34  ;;  %v1764_v19 = vsel %vm1746_vm1, %v1731_v16, %v1484_v2  ;;  %v905_v2 = vld [vmem:[#allocation2 + $0xc8] sm:$0x1] }
 0x13a   : > { %838 = vst.msk [vmem:[#allocation2 + $0xc4] sm:$0xf] %vm251_vm2, %v677_v32  ;;  %v1797_v59 = vsel %vm1779_vm4, %v1764_v19, %v1531_v22  ;;  %v1381_v62 = vunpack.c.l.b16 %v905_v2 }
 0x13b   : > { %v1373_v3 = vpop.permute.xlu0 %1372 }
 0x13c   : > { %1575 = vrot.lane.b32.xlu2 %v4098_v46, %s3222_s19  ;;  %v1382_v12 = vpack.c.b16 %v1381_v62, %v1381_v62 }
 0x13e   : > { %v1478_v14 = vpop.permute.xlu2 %1477  ;;  %1561 = vrot.lane.b32.xlu1 %v3637_v7, %s3222_s19  ;;  %v1391_v43 = vshll.u32 %v1382_v12, 16  ;;  %v1428_v34 = vrot.slane %v1382_v12, 1 }
 0x140   : > { %v1566_v15 = vpop.permute.xlu1 %1565  ;;  %v1393_v56 = vrot.slane %v1391_v43, 1 }
 0x141   : > { %1526 = vrot.lane.b32.xlu0 %v3613_v26, %s3224_s26  ;;  %v1830_v9 = vsel %vm1812_vm5, %v1797_v59, %v1566_v15  ;;  %v1593_v26 = vsel %vm1581_vm12, %v3769_v42, %v4040_v29  ;;  %v371_v42 = vsel %vm3352_vm8, 0, %v370_v52  ;;  %v2939_v5 = vld [vmem:[#allocation2 + $0xc0] sm:$0xff]  ;;  %vm2652_vm8 = vcmask 1040384  }
 0x142   : > { %2906 = vmatmul.msk.bf16.gmra.mxu2 %vm1875_vm11, %v1830_v9  ;;  %372 = vst [vmem:[#allocation2 + $0xd4] sm:$0x1] %v371_v42  ;;  %v1384_v44 = vshrl.u32 %v2939_v5, 16  ;;  %v1427_v32 = vrot.slane %v2939_v5, 1  ;;  %v3149_v42 = vld [vmem:[#allocation2 + $0x30] sm:$0xff] }
 0x143   : > { %v1420_v57 = vpop.permute.xlu0 %1419 }
 0x144   : > { %1250 = vrot.lane.b32.xlu2 %v3863_v6, %s3220_s17  ;;  %v1626_v6 = vsel %vm1614_vm13, %v1593_v26, %v4051_v28  ;;  %v1429_v58 = vsel %vm1262_vm9, %v1427_v32, %v1428_v34 }
 0x145   : > { %v1659_v29 = vsel %vm1647_vm14, %v1626_v6, %v4067_v45 }
 0x146   : > { %v1560_v1 = vpop.permute.xlu2 %1559  ;;  %1368 = vrot.lane.b32.xlu1 %v3147_v27, %s3217_s14 }
 0x148   : > { %v1406_v7 = vpop.permute.xlu1 %1405 }
 0x149   : > { %1331 = vrot.lane.b32.xlu0 %v3882_v8, %s3219_s16  ;;  %v3148_v8 = vld [vmem:[#allocation2 + $0x90] sm:$0xff] }
 0x14a   : > { %v1607_v25 = vsel %vm1581_vm12, %v3148_v8, %v4020_v48  ;;  %v908_v16 = vld [vmem:[#allocation2 + $0xd4] sm:$0x1] }
 0x14b   : > { %v1455_v21 = vpop.permute.xlu0 %1454  ;;  %v1640_v48 = vsel %vm1614_vm13, %v1607_v25, %v4030_v53  ;;  %v1386_v53 = vshll.u32 %v2939_v5, 16  ;;  %v1500_v19 = vunpack.c.l.b16 %v908_v16 }
 0x14c   : > { %1415 = vrot.lane.b32.xlu2 %v3618_v30, %s3223_s20  ;;  %v314_v30 = vld [vmem:[#allocation2 + $0xcc] sm:$0x1]  ;;  %v1673_v23 = vsel %vm1647_vm14, %v1640_v48, %v1373_v3 }
 0x14d   : > { %v1706_v35 = vsel %vm1680_vm0, %v1673_v23, %v1420_v57  ;;  %v1388_v20 = vrot.slane %v1386_v53, 1  ;;  %v1501_v9 = vpack.c.b16 %v1500_v19, %v1500_v19  ;;  %v3150_v53 = vld [vmem:[#allocation2 + $0x6c] sm:$0xff] }
 0x14e   : > { %v4134_v36 = vpop.permute.xlu2 %1248  ;;  %1450 = vrot.lane.b32.xlu1 %v3646_v51, %s3221_s18  ;;  %v315_v51 = vsel %vm3313_vm3, 0, %v314_v30  ;;  %v1739_v45 = vsel %vm1713_vm15, %v1706_v35, %v1455_v21 }
 0x14f   : > { %316 = vst [vmem:[#allocation2 + $0xcc] sm:$0x1] %v315_v51  ;;  %v1772_v39 = vsel %vm1746_vm1, %v1739_v45, %v4087_v49  ;;  %v1389_v49 = vor.u32 %v1388_v20, %v1384_v44  ;;  %v1510_v21 = vshll.u32 %v1501_v9, 16  ;;  %v1547_v6 = vrot.slane %v1501_v9, 1 }
 0x150   : > { %v1539_v38 = vpop.permute.xlu1 %1538 }
 0x151   : > { %1258 = vrot.lane.b32.xlu0 %v3914_v18, %s3220_s17  ;;  %v1692_v18 = vsel %vm1680_vm0, %v1659_v29, %v1406_v7  ;;  %v1805_v17 = vsel %vm1779_vm4, %v1772_v39, %v1539_v38  ;;  %v1394_v3 = vsel %vm1037_vm10, %v1389_v49, %v1393_v56  ;;  %v1512_v52 = vrot.slane %v1510_v21, 1 }
 0x153   : > { %v1441_v28 = vpop.permute.xlu0 %1440 }
 0x154   : > { %1339 = vrot.lane.b32.xlu2 %v3934_v63, %s3219_s16  ;;  %v1725_v0 = vsel %vm1713_vm15, %v1692_v18, %v1441_v28 }
 0x155   : > { %v1758_v61 = vsel %vm1746_vm1, %v1725_v0, %v1478_v14 }
 0x156   : > { %v4158_v4 = vpop.permute.xlu2 %1403  ;;  %1376 = vrot.lane.b32.xlu1 %v4055_v37, %s3217_s14  ;;  %v2940_v14 = vld [vmem:[#allocation2 + $0xcc] sm:$0xff] }
 0x157   : > { %v1505_v57 = vshll.u32 %v2940_v14, 16  ;;  %v1503_v27 = vshrl.u32 %v2940_v14, 16  ;;  %v1546_v26 = vrot.slane %v2940_v14, 1 }
 0x158   : > { %v1525_v24 = vpop.permute.xlu1 %1524 }
 0x159   : > { %1487 = vrot.lane.b32.xlu0 %v3148_v8, %s3218_s15  ;;  %v1791_v63 = vsel %vm1779_vm4, %v1758_v61, %v1525_v24  ;;  %v1507_v7 = vrot.slane %v1505_v57, 1  ;;  %v1601_v61 = vsel %vm1581_vm12, %v3150_v53, %v4134_v36 }
 0x15a   : > { %v1824_v41 = vsel %vm1812_vm5, %v1791_v63, %v1560_v1 }
 0x15b   : > { %v1574_v22 = vpop.permute.xlu0 %1573  ;;  %2903 = vmatmul.msk.bf16.vlgmr.msra.gmra.mxu1 %vm1875_vm11, %v1824_v41  ;;  %v1508_v2 = vor.u32 %v1507_v7, %v1503_v27 }
 0x15c   : > { %v1838_v50 = vsel %vm1812_vm5, %v1805_v17, %v1574_v22  ;;  %1534 = vrot.lane.b32.xlu2 %v3669_v10, %s3224_s26 }
 0x15d   : > { %2910 = vmatmul.msk.bf16.gmra.mxu3 %vm1875_vm11, %v1838_v50  ;;  %v1513_v25 = vsel %vm1037_vm10, %v1508_v2, %v1512_v52  ;;  %vm2654_vm10 = vcmask 1041409  }
 0x15e   : > { %v4175_v60 = vpop.permute.xlu2 %1413  ;;  %1569 = vrot.lane.b32.xlu1 %v3708_v31, %s3222_s19 }
 0x160   : > { %v1320_v13 = vpop.permute.xlu1 %1319 }
 0x161   : > { %1423 = vrot.lane.b32.xlu0 %v4091_v33, %s3223_s20 }
 0x163   : > { %v1239_v54 = vpop.permute.xlu0 %1238 }
 0x164   : > { %1458 = vrot.lane.b32.xlu2 %v4098_v46, %s3221_s18  ;;  %v1591_v51 = vsel %vm1581_vm12, %v3149_v42, %v1239_v54 }
 0x166   : > { %v1449_v10 = vpop.permute.xlu2 %1448  ;;  %1542 = vrot.lane.b32.xlu1 %v1394_v3, %s3224_s26 }
 0x168   : > { %v1330_v55 = vpop.permute.xlu1 %1329 }
 0x169   : > { %1495 = vrot.lane.b32.xlu0 %v2939_v5, %s3218_s15  ;;  %v1634_v63 = vsel %vm1614_vm13, %v1601_v61, %v1330_v55 }
 0x16b   : > { %v1357_v31 = vpop.permute.xlu0 %1356 }
 0x16c   : > { %1577 = vrot.lane.b32.xlu2 %v1429_v58, %s3222_s19 }
 0x16e   : > { %1341 = vrot.lane.b32.xlu1 %v4098_v46, %s3219_s16  ;;  %v1486_v59 = vpop.permute.xlu2 %1485 }
 0x170   : > { %v1439_v15 = vpop.permute.xlu1 %1438 }
 0x171   : > { %1260 = vrot.lane.b32.xlu0 %v4091_v33, %s3220_s17  ;;  %v1548_v33 = vsel %vm1262_vm9, %v1546_v26, %v1547_v6  ;;  %s2727_s17 = scalar_lea.sflag [#allocation5], %s242_s28 }
 0x173   : > { %v1367_v1 = vpop.permute.xlu0 %1366 }
 0x174   : > { %1378 = vrot.lane.b32.xlu2 %v2939_v5, %s3217_s14  ;;  %v1624_v5 = vsel %vm1614_vm13, %v1591_v51, %v1320_v13  ;;  %v1667_v39 = vsel %vm1647_vm14, %v1634_v63, %v1367_v1  ;;  %v3151_v13 = vld [vmem:[#allocation2 + $0x9c] sm:$0xff]  ;;  %v1921_v63 = vpop.f32.mrf.mxu0  ;;  %s2737_s14 = scalar_lea.hbm %s4998_s6, %s2915_s10 }
 0x175   : > { %v1657_v62 = vsel %vm1647_vm14, %v1624_v5, %v1357_v31  ;;  %v1700_v17 = vsel %vm1680_vm0, %v1667_v39, %v4175_v60  ;;  %s2740_s16 = sshll.u32 %s2737_s14, 4  ;;  %s2741_s16 = int_to_ptr.hbm [resolvable:$true] %s2740_s16 }
 0x176   : > { %1460 = vrot.lane.b32.xlu1 %v1429_v58, %s3221_s18  ;;  %v1375_v38 = vpop.permute.xlu2 %1374  ;;  %v1690_v48 = vsel %vm1680_vm0, %v1657_v62, %v4158_v4  ;;  %v1733_v44 = vsel %vm1713_vm15, %v1700_v17, %v1449_v10  ;;  %s3166_s18 = sshra.s32 %s2741_s16, 4  ;;  %s3167_s18 = int_to_ptr.hbm [resolvable:$true] %s3166_s18 }
 0x177   : > { %v1723_v23 = vsel %vm1713_vm15, %v1690_v48, %v1439_v15  ;;  %v1766_v43 = vsel %vm1746_vm1, %v1733_v44, %v1486_v59  ;;  %p3173_p0 = scmp.lt.s32.totalorder %s3167_s18, %s4998_s6 }
 0x178   : > { %v1257_v46 = vpop.permute.xlu1 %1256 }
 0x179   : > { %1425 = vrot.lane.b32.xlu0 %v1394_v3, %s3223_s20  ;;  %v1609_v54 = vsel %vm1581_vm12, %v3151_v13, %v1257_v46 }
 0x17b   : > { %v1476_v8 = vpop.permute.xlu0 %1475 }
 0x17c   : > { %1497 = vrot.lane.b32.xlu2 %v2940_v14, %s3218_s15  ;;  %v1756_v0 = vsel %vm1746_vm1, %v1723_v23, %v1476_v8  ;;  %s2738_s15 = sshll.u32 %s4895_s9, 4  ;;  %s2739_s15 = int_to_ptr.vmem [resolvable:$true] %s2738_s15 }
 0x17e   : > { %1579 = vrot.lane.b32.xlu1 %v1548_v33, %s3222_s19  ;;  %v1422_v29 = vpop.permute.xlu2 %1421  ;;  %s3168_s19 = scalar_lea.hbm %s3167_s18, 32 }
 0x17f   : > { %p3169_p11 = scmp.ne.s32.totalorder %s3167_s18, %s3168_s19  ;;  %p3174_p1 = scmp.lt.s32.totalorder %s3172_s12, %s3168_s19 }
 0x180   : > { %v1338_v30 = vpop.permute.xlu1 %1337 }
 0x181   : > { %1544 = vrot.lane.b32.xlu0 %v1513_v25, %s3224_s26  ;;  %v1642_v60 = vsel %vm1614_vm13, %v1609_v54, %v1338_v30  ;;  %p3170_p12 = pnand %p3169_p11, %p3300_p5  ;;  %p3175_p2 = por %p3174_p1, %p3173_p0 }
 0x182   : > { %v1675_v10 = vsel %vm1647_vm14, %v1642_v60, %v1375_v38 }
 0x183   : > { %v1523_v28 = vpop.permute.xlu0 %1522  ;;  %v1708_v34 = vsel %vm1680_vm0, %v1675_v10, %v1422_v29  ;;  %p3171_p13 = pneg %p3170_p12 }
 0x184   : > { %v1789_v35 = vsel %vm1779_vm4, %v1756_v0, %v1523_v28 }
 0x185   : > { %p3176_p3 = pnand %p3175_p2, %p3171_p13 }
 0x186   : > { %v1457_v24 = vpop.permute.xlu2 %1456 }
 0x187   : > { %v1741_v58 = vsel %vm1713_vm15, %v1708_v34, %v1457_v24 }
 0x188   : > { %v1243_v18 = vpop.permute.xlu1 %1242 }
 0x189   : > { %v1595_v19 = vsel %vm1581_vm12, %v3865_v11, %v1243_v18 }
 0x18b   : > { %v1558_v45 = vpop.permute.xlu0 %1557 }
 0x18c   : > { %v1822_v12 = vsel %vm1812_vm5, %v1789_v35, %v1558_v45 }
 0x18d   : > { %2902 = vmatmul.msk.bf16.gmra.mxu0 %vm1875_vm11, %v1822_v12 }
 0x18e   : > { %v1443_v22 = vpop.permute.xlu2 %1442 }
 0x190   : > { %v1324_v4 = vpop.permute.xlu1 %1323 }
 0x191   : > { %v1628_v15 = vsel %vm1614_vm13, %v1595_v19, %v1324_v4 }
 0x193   : > { %v1533_v41 = vpop.permute.xlu0 %1532 }
 0x194   : > { %v1799_v36 = vsel %vm1779_vm4, %v1766_v43, %v1533_v41  ;;  %v1923_v43 = vpop.f32.mrf.mxu0 }
 0x196   : > { %v1576_v56 = vpop.permute.xlu2 %1575 }
 0x198   : > { %v1361_v20 = vpop.permute.xlu1 %1360 }
 0x199   : > { %v1661_v57 = vsel %vm1647_vm14, %v1628_v15, %v1361_v20 }
 0x19b   : > { %v1568_v50 = vpop.permute.xlu0 %1567 }
 0x19c   : > { %v1832_v49 = vsel %vm1812_vm5, %v1799_v36, %v1568_v50  ;;  %v1926_v60 = vpop.f32.mrf.mxu0 }
 0x19d   : > { %2907 = vmatmul.msk.bf16.gmra.mxu2 %vm1875_vm11, %v1832_v49 }
 0x19e   : > { %v1251_v31 = vpop.permute.xlu2 %1250 }
 0x19f   : > { %v1603_v33 = vsel %vm1581_vm12, %v3820_v40, %v1251_v31 }
 0x1a0   : > { %v1494_v3 = vpop.permute.xlu1 %1493 }
 0x1a1   : > { %v1774_v16 = vsel %vm1746_vm1, %v1741_v58, %v1494_v3 }
 0x1a3   : > { %v1408_v32 = vpop.permute.xlu0 %1407 }
 0x1a4   : > { %v1694_v1 = vsel %vm1680_vm0, %v1661_v57, %v1408_v32  ;;  %v4275_v57 = vld [vmem:[%s4994_s2] ss:$0 sm:$0xff] }
 0x1a5   : > { %v1727_v7 = vsel %vm1713_vm15, %v1694_v1, %v1443_v22 }
 0x1a6   : > { %v1416_v6 = vpop.permute.xlu2 %1415 }
 0x1a8   : > { %v1480_v55 = vpop.permute.xlu1 %1479 }
 0x1a9   : > { %v1760_v21 = vsel %vm1746_vm1, %v1727_v7, %v1480_v55  ;;  %v4281_v7 = vadd.f32 %v4275_v57, %v1921_v63 }
 0x1ab   : > { %v1541_v14 = vpop.permute.xlu0 %1540 }
 0x1ac   : > { %v1807_v59 = vsel %vm1779_vm4, %v1774_v16, %v1541_v14  ;;  %v1928_v16 = vpop.f32.mrf.mxu0 }
 0x1ad   : > { %v1840_v9 = vsel %vm1812_vm5, %v1807_v59, %v1576_v56 }
 0x1ae   : > { %2911 = vmatmul.msk.bf16.gmra.mxu3 %vm1875_vm11, %v1840_v9  ;;  %v1340_v52 = vpop.permute.xlu2 %1339  ;;  %v4270_v9 = vpop.f32.mrf.mxu2 }
 0x1b0   : > { %v1562_v27 = vpop.permute.xlu1 %1561 }
 0x1b3   : > { %v1527_v26 = vpop.permute.xlu0 %1526 }
 0x1b4   : > { %v1793_v11 = vsel %vm1779_vm4, %v1760_v21, %v1527_v26  ;;  %v1931_v14 = vpop.f32.mrf.mxu0  ;;  %v4284_v21 = vadd.f32 %v4275_v57, %v1926_v60  ;;  %v2155_v60 = vld [vmem:[%s4997_s5 + $0x70] sm:$0xff] }
 0x1b5   : > { %v1826_v46 = vsel %vm1812_vm5, %v1793_v11, %v1562_v27  ;;  %v4278_v27 = vadd.f32 %v4275_v57, %v1923_v43  ;;  %v4289_v11 = vadd.f32 %v4275_v57, %v1928_v16 }
 0x1b6   : > { %2904 = vmatmul.msk.bf16.gmra.mxu1 %vm1875_vm11, %v1826_v46  ;;  %v1535_v42 = vpop.permute.xlu2 %1534  ;;  %v2156_v46 = vld [vmem:[%s4997_s5 + $0x78] sm:$0xff] }
 0x1b7   : > { %2185 = vmatpush.msrb.mxu2 %v2156_v46  ;;  %2157 = vmatpush.msrb.mxu1 %v2156_v46 }
 0x1b8   : > { %v1369_v38 = vpop.permute.xlu1 %1368 }
 0x1b9   : > { %2186 = vmatpush.msrb.mxu2 %v2155_v60  ;;  %2158 = vmatpush.msrb.mxu1 %v2155_v60 }
 0x1bb   : > { %v1332_v2 = vpop.permute.xlu0 %1331 }
 0x1bc   : > { %v1636_v30 = vsel %vm1614_vm13, %v1603_v33, %v1332_v2  ;;  %v1933_v19 = vpop.f32.mrf.mxu0  ;;  %v2033_v2 = vadd.f32 %v4278_v27, %v4281_v7  ;;  %v4303_v33 = vpop.f32.mrf.mxu2 }
 0x1bd   : > { %v1669_v51 = vsel %vm1647_vm14, %v1636_v30, %v1369_v38  ;;  %v2071_v38 = vmul.f32 %v4281_v7, %v4281_v7 }
 0x1be   : > { %v1702_v28 = vsel %vm1680_vm0, %v1669_v51, %v1416_v6  ;;  %v1459_v0 = vpop.permute.xlu2 %1458  ;;  %v2072_v6 = vmul.f32 %v4278_v27, %v4278_v27  ;;  %v2034_v30 = vadd.f32 %v2033_v2, %v4284_v21  ;;  %v4309_v51 = vadd.f32 %v4275_v57, %v1933_v19 }
 0x1bf   : > { %v4379_v2 = vadd.f32 %v4275_v57, %v4270_v9 }
 0x1c0   : > { %v1451_v8 = vpop.permute.xlu1 %1450 }
 0x1c1   : > { %v1735_v62 = vsel %vm1713_vm15, %v1702_v28, %v1451_v8  ;;  %v4301_v8 = vadd.f32 %v4275_v57, %v1931_v14 }
 0x1c3   : > { %v1259_v25 = vpop.permute.xlu0 %1258 }
 0x1c4   : > { %v1611_v35 = vsel %vm1581_vm12, %v3885_v47, %v1259_v25  ;;  %v1936_v59 = vpop.f32.mrf.mxu0  ;;  %v2103_v25 = vadd.f32 %v2072_v6, %v2071_v38 }
 0x1c5   : > { %v1644_v12 = vsel %vm1614_vm13, %v1611_v35, %v1340_v52  ;;  %v2073_v52 = vmul.f32 %v4284_v21, %v4284_v21  ;;  %v1961_v63 = vpop.f32.mrf.mxu2 }
 0x1c6   : > { %v1578_v41 = vpop.permute.xlu2 %1577 }
 0x1c7   : > { %v2104_v28 = vadd.f32 %v2103_v25, %v2073_v52 }
 0x1c8   : > { %v1377_v29 = vpop.permute.xlu1 %1376 }
 0x1c9   : > { %v1677_v53 = vsel %vm1647_vm14, %v1644_v12, %v1377_v29 }
 0x1cb   : > { %v1488_v5 = vpop.permute.xlu0 %1487 }
 0x1cc   : > { %v1768_v48 = vsel %vm1746_vm1, %v1735_v62, %v1488_v5  ;;  %v1938_v15 = vpop.f32.mrf.mxu0  ;;  %v2035_v5 = vadd.f32 %v2034_v30, %v4289_v11  ;;  %v2075_v62 = vmul.f32 %v4301_v8, %v4301_v8 }
 0x1cd   : > { %v1801_v18 = vsel %vm1779_vm4, %v1768_v48, %v1535_v42  ;;  %v2074_v42 = vmul.f32 %v4289_v11, %v4289_v11  ;;  %v4315_v48 = vadd.f32 %v4275_v57, %v1936_v59 }
 0x1ce   : > { %v1379_v50 = vpop.permute.xlu2 %1378 }
 0x1d0   : > { %v1570_v23 = vpop.permute.xlu1 %1569 }
 0x1d1   : > { %v1834_v40 = vsel %vm1812_vm5, %v1801_v18, %v1570_v23  ;;  %v2105_v18 = vadd.f32 %v2104_v28, %v2074_v42  ;;  %v2036_v23 = vadd.f32 %v2035_v5, %v4301_v8  ;;  %v2085_v42 = vmul.f32 %v4379_v2, %v4379_v2  ;;  %v2153_v5 = vld [vmem:[%s4997_s5 + $0x60] sm:$0xff] }
 0x1d2   : > { %2908 = vmatmul.msk.bf16.gmra.mxu2 %vm1875_vm11, %v1834_v40  ;;  %v4321_v40 = vadd.f32 %v4275_v57, %v1938_v15 }
 0x1d3   : > { %v1424_v45 = vpop.permute.xlu0 %1423  ;;  %v2037_v12 = vadd.f32 %v2036_v23, %v4309_v51 }
 0x1d4   : > { %v1710_v61 = vsel %vm1680_vm0, %v1677_v53, %v1424_v45  ;;  %v2106_v45 = vadd.f32 %v2105_v18, %v2075_v62  ;;  %v4324_v53 = vpop.f32.mrf.mxu3  ;;  %v4395_v18 = vadd.f32 %v4275_v57, %v1961_v63  ;;  %v2151_v63 = vld [vmem:[%s4997_s5 + $0x50] sm:$0xff] }
 0x1d5   : > { %v1743_v4 = vsel %vm1713_vm15, %v1710_v61, %v1459_v0  ;;  %v2076_v0 = vmul.f32 %v4309_v51, %v4309_v51  ;;  %v2077_v61 = vmul.f32 %v4315_v48, %v4315_v48 }
 0x1d6   : > { %v1498_v10 = vpop.permute.xlu2 %1497 }
 0x1d8   : > { %v1543_v24 = vpop.permute.xlu1 %1542  ;;  %v1946_v1 = vpop.f32.mrf.mxu1 }
 0x1db   : > { %v1496_v39 = vpop.permute.xlu0 %1495 }
 0x1dc   : > { %v1776_v17 = vsel %vm1746_vm1, %v1743_v4, %v1496_v39  ;;  %v2107_v4 = vadd.f32 %v2106_v45, %v2076_v0  ;;  %v2038_v39 = vadd.f32 %v2037_v12, %v4315_v48  ;;  %v2087_v45 = vmul.f32 %v4395_v18, %v4395_v18 }
 0x1dd   : > { %v1809_v22 = vsel %vm1779_vm4, %v1776_v17, %v1543_v24 }
 0x1de   : > { %v1842_v44 = vsel %vm1812_vm5, %v1809_v22, %v1578_v41  ;;  %v2078_v41 = vmul.f32 %v4321_v40, %v4321_v40 }
 0x1df   : > { %2912 = vmatmul.msk.bf16.gmra.mxu3 %vm1875_vm11, %v1842_v44  ;;  %v2108_v44 = vadd.f32 %v2107_v4, %v2077_v61  ;;  %v2152_v4 = vld [vmem:[%s4997_s5 + $0x58] sm:$0xff] }
 0x1e0   : > { %v1342_v47 = vpop.permute.xlu1 %1341  ;;  %v1948_v29 = vpop.f32.mrf.mxu1 }
 0x1e1   : > { %v2109_v43 = vadd.f32 %v2108_v44, %v2078_v41  ;;  %v2150_v41 = vld [vmem:[%s4997_s5 + $0x48] sm:$0xff] }
 0x1e3   : > { %v1261_v20 = vpop.permute.xlu0 %1260 }
 0x1e4   : > { %v1613_v36 = vsel %vm1581_vm12, %v4055_v37, %v1261_v20  ;;  %vm2657_vm12 = vcmask 1042434  }
 0x1e5   : > { %v1646_v49 = vsel %vm1614_vm13, %v1613_v36, %v1342_v47  ;;  %v2039_v47 = vadd.f32 %v2038_v39, %v4321_v40 }
 0x1e6   : > { %v1679_v54 = vsel %vm1647_vm14, %v1646_v49, %v1379_v50  ;;  %v4344_v49 = vadd.f32 %v4275_v57, %v1946_v1  ;;  %vm2660_vm14 = vcmask 1043459  }
 0x1e8   : > { %v1461_v56 = vpop.permute.xlu1 %1460 }
 0x1eb   : > { %v1426_v13 = vpop.permute.xlu0 %1425 }
 0x1ec   : > { %v1712_v3 = vsel %vm1680_vm0, %v1679_v54, %v1426_v13  ;;  %v4347_v54 = vpop.f32.mrf.mxu3  ;;  %vm2666_vm0 = vcmask 1045509  }
 0x1ed   : > { %v1745_v32 = vsel %vm1713_vm15, %v1712_v3, %v1461_v56  ;;  %vm2663_vm15 = vcmask 1044484  }
 0x1ee   : > { %v1778_v55 = vsel %vm1746_vm1, %v1745_v32, %v1498_v10  ;;  %v2154_v32 = vld [vmem:[%s4997_s5 + $0x68] sm:$0xff]  ;;  %v1963_v10 = vpop.f32.mrf.mxu2  ;;  %vm2669_vm1 = vcmask 1046534  }
 0x1ef   : > { %2187 = vmatpush.msrb.mxu2 %v2154_v32  ;;  %2159 = vmatpush.msrb.mxu1 %v2154_v32  ;;  %v4403_v12 = vadd.f32 %v4275_v57, %v1963_v10  ;;  %v2147_v10 = vld [vmem:[%s4997_s5 + $0x30] sm:$0xff] }
 0x1f0   : > { %v1580_v34 = vpop.permute.xlu1 %1579 }
 0x1f1   : > { %2188 = vmatpush.msrb.mxu2 %v2153_v5  ;;  %2160 = vmatpush.msrb.mxu1 %v2153_v5 }
 0x1f3   : > { %v1545_v31 = vpop.permute.xlu0 %1544  ;;  %2189 = vmatpush.msrb.mxu2 %v2152_v4  ;;  %2161 = vmatpush.msrb.mxu1 %v2152_v4 }
 0x1f4   : > { %v1811_v58 = vsel %vm1779_vm4, %v1778_v55, %v1545_v31  ;;  %v2081_v55 = vmul.f32 %v4344_v49, %v4344_v49  ;;  %v4358_v31 = vadd.f32 %v4275_v57, %v1948_v29  ;;  %v4375_v46 = vpop.f32.mrf.mxu3  ;;  %v4386_v29 = vadd.f32 %v4275_v57, %v4303_v33 }
 0x1f5   : > { %v1844_v37 = vsel %vm1812_vm5, %v1811_v58, %v1580_v34  ;;  %2190 = vmatpush.msrb.mxu2 %v2151_v63  ;;  %2162 = vmatpush.msrb.mxu1 %v2151_v63  ;;  %v2142_v63 = vld [vmem:[%s4997_s5 + $0x8] sm:$0xff] }
 0x1f6   : > { %2913 = vmatmul.msk.bf16.gmra.mxu3 %vm1875_vm11, %v1844_v37  ;;  %v2082_v19 = vmul.f32 %v4358_v31, %v4358_v31  ;;  %v2086_v62 = vmul.f32 %v4386_v29, %v4386_v29 }
 0x1f7   : > { %2191 = vmatpush.msrb.mxu2 %v2150_v41  ;;  %2163 = vmatpush.msrb.mxu1 %v2150_v41 }
 0x1fc   : > { %v4398_v0 = vpop.f32.mrf.mxu3 }
 0x20a   : > { %v1941_v26 = vpop.f32.mrf.mxu0 }
 0x20b   : > { %v4329_v24 = vadd.f32 %v4275_v57, %v1941_v26 }
 0x20d   : > { %v2079_v20 = vmul.f32 %v4329_v24, %v4329_v24  ;;  %v2040_v36 = vadd.f32 %v2039_v47, %v4329_v24 }
 0x20f   : > { %v2110_v56 = vadd.f32 %v2109_v43, %v2079_v20  ;;  %v2149_v20 = vld [vmem:[%s4997_s5 + $0x40] sm:$0xff] }
 0x210   : > { %2192 = vmatpush.msrb.mxu2 %v2149_v20  ;;  %2164 = vmatpush.msrb.mxu1 %v2149_v20 }
 0x212   : > { %v1943_v35 = vpop.f32.mrf.mxu0 }
 0x213   : > { %v4335_v17 = vadd.f32 %v4275_v57, %v1943_v35 }
 0x215   : > { %v2080_v50 = vmul.f32 %v4335_v17, %v4335_v17  ;;  %v2041_v13 = vadd.f32 %v2040_v36, %v4335_v17 }
 0x217   : > { %v2111_v3 = vadd.f32 %v2110_v56, %v2080_v50  ;;  %v2042_v58 = vadd.f32 %v2041_v13, %v4344_v49  ;;  %v2148_v56 = vld [vmem:[%s4997_s5 + $0x38] sm:$0xff] }
 0x218   : > { %2193 = vmatpush.msrb.mxu2 %v2148_v56  ;;  %2165 = vmatpush.msrb.mxu1 %v2148_v56 }
 0x219   : > { %v2112_v16 = vadd.f32 %v2111_v3, %v2081_v55  ;;  %v2043_v59 = vadd.f32 %v2042_v58, %v4358_v31 }
 0x21a   : > { %2194 = vmatpush.msrb.mxu2 %v2147_v10  ;;  %2166 = vmatpush.msrb.mxu1 %v2147_v10 }
 0x21b   : > { %v2113_v26 = vadd.f32 %v2112_v16, %v2082_v19 }
 0x220   : > { %v1966_v38 = vpop.f32.mrf.mxu2 }
 0x221   : > { %v4418_v44 = vadd.f32 %v4275_v57, %v1966_v38 }
 0x223   : > { %v2089_v13 = vmul.f32 %v4418_v44, %v4418_v44 }
 0x228   : > { %v1968_v33 = vpop.f32.mrf.mxu2 }
 0x229   : > { %v4432_v3 = vadd.f32 %v4275_v57, %v1968_v33 }
 0x22b   : > { %v2090_v55 = vmul.f32 %v4432_v3, %v4432_v3 }
 0x231   : > { %v4424_v43 = vpop.f32.mrf.mxu3 }
 0x233   : > { %v1951_v22 = vpop.f32.mrf.mxu1 }
 0x234   : > { %v4362_v37 = vadd.f32 %v4275_v57, %v1951_v22  ;;  %v2088_v22 = vmul.f32 %v4403_v12, %v4403_v12 }
 0x236   : > { %v2083_v15 = vmul.f32 %v4362_v37, %v4362_v37  ;;  %v2044_v1 = vadd.f32 %v2043_v59, %v4362_v37 }
 0x238   : > { %v2114_v52 = vadd.f32 %v2113_v26, %v2083_v15  ;;  %v2146_v26 = vld [vmem:[%s4997_s5 + $0x28] sm:$0xff] }
 0x239   : > { %v1988_v38 = vpop.f32.mrf.mxu3  ;;  %2195 = vmatpush.msrb.mxu2 %v2146_v26  ;;  %2167 = vmatpush.msrb.mxu1 %v2146_v26 }
 0x23b   : > { %v1953_v34 = vpop.f32.mrf.mxu1 }
 0x23c   : > { %v4365_v14 = vadd.f32 %v4275_v57, %v1953_v34 }
 0x23e   : > { %v2084_v6 = vmul.f32 %v4365_v14, %v4365_v14  ;;  %v2045_v25 = vadd.f32 %v2044_v1, %v4365_v14 }
 0x240   : > { %v2115_v30 = vadd.f32 %v2114_v52, %v2084_v6  ;;  %v2046_v28 = vadd.f32 %v2045_v25, %v4379_v2  ;;  %v2145_v6 = vld [vmem:[%s4997_s5 + $0x20] sm:$0xff]  ;;  %v4458_v52 = vadd.f32 %v4275_v57, %v4324_v53 }
 0x241   : > { %2196 = vmatpush.msrb.mxu2 %v2145_v6  ;;  %2168 = vmatpush.msrb.mxu1 %v2145_v6 }
 0x242   : > { %v2116_v9 = vadd.f32 %v2115_v30, %v2085_v42  ;;  %v2047_v23 = vadd.f32 %v2046_v28, %v4386_v29  ;;  %v2093_v5 = vmul.f32 %v4458_v52, %v4458_v52 }
 0x244   : > { %v2117_v35 = vadd.f32 %v2116_v9, %v2086_v62  ;;  %v2048_v61 = vadd.f32 %v2047_v23, %v4395_v18  ;;  %v4467_v9 = vadd.f32 %v4275_v57, %v4347_v54  ;;  %v2143_v54 = vld [vmem:[%s4997_s5 + $0x10] sm:$0xff] }
 0x246   : > { %v2118_v39 = vadd.f32 %v2117_v35, %v2087_v45  ;;  %v2049_v47 = vadd.f32 %v2048_v61, %v4403_v12  ;;  %v2094_v33 = vmul.f32 %v4467_v9, %v4467_v9  ;;  %v4474_v35 = vadd.f32 %v4275_v57, %v4375_v46  ;;  %v2144_v61 = vld [vmem:[%s4997_s5 + $0x18] sm:$0xff] }
 0x247   : > { %2197 = vmatpush.msrb.mxu2 %v2144_v61  ;;  %2169 = vmatpush.msrb.mxu1 %v2144_v61 }
 0x248   : > { %v2119_v50 = vadd.f32 %v2118_v39, %v2088_v22  ;;  %v2050_v32 = vadd.f32 %v2049_v47, %v4418_v44  ;;  %v2095_v46 = vmul.f32 %v4474_v35, %v4474_v35  ;;  %v4490_v39 = vadd.f32 %v4275_v57, %v4398_v0  ;;  %v2141_v22 = vld [vmem:[%s4997_s5] sm:$0xff] }
 0x249   : > { %2198 = vmatpush.msrb.mxu2 %v2143_v54  ;;  %2170 = vmatpush.msrb.mxu1 %v2143_v54 }
 0x24a   : > { %v2120_v34 = vadd.f32 %v2119_v50, %v2089_v13  ;;  %v2051_v58 = vadd.f32 %v2050_v32, %v4432_v3  ;;  %v2096_v20 = vmul.f32 %v4490_v39, %v4490_v39  ;;  %v4506_v32 = vadd.f32 %v4275_v57, %v1988_v38 }
 0x24b   : > { %2199 = vmatpush.msrb.mxu2 %v2142_v63  ;;  %2171 = vmatpush.msrb.mxu1 %v2142_v63 }
 0x24c   : > { %v2121_v15 = vadd.f32 %v2120_v34, %v2090_v55  ;;  %v2098_v55 = vmul.f32 %v4506_v32, %v4506_v32 }
 0x24d   : > { %2200 = vmatpush.msrb.mxu2 %v2141_v22  ;;  %2172 = vmatpush.msrb.mxu1 %v2141_v22 }
 0x255   : > { %v1971_v36 = vpop.f32.mrf.mxu2 }
 0x256   : > { %v4435_v60 = vadd.f32 %v4275_v57, %v1971_v36  ;;  %v4500_v36 = vadd.f32 %v4275_v57, %v4424_v43 }
 0x258   : > { %v2091_v16 = vmul.f32 %v4435_v60, %v4435_v60  ;;  %v2052_v59 = vadd.f32 %v2051_v58, %v4435_v60  ;;  %v2097_v13 = vmul.f32 %v4500_v36, %v4500_v36 }
 0x25a   : > { %v2122_v25 = vadd.f32 %v2121_v15, %v2091_v16 }
 0x25d   : > { %v1973_v19 = vpop.f32.mrf.mxu2 }
 0x25e   : > { %v4448_v1 = vadd.f32 %v4275_v57, %v1973_v19 }
 0x260   : > { %v2053_v30 = vadd.f32 %v2052_v59, %v4448_v1  ;;  %v2092_v42 = vmul.f32 %v4448_v1, %v4448_v1 }
 0x262   : > { %v2123_v28 = vadd.f32 %v2122_v25, %v2092_v42  ;;  %v2054_v62 = vadd.f32 %v2053_v30, %v4458_v52  ;;  %v1991_v23 = vpop.f32.mrf.mxu3 }
 0x263   : > { %v4512_v58 = vadd.f32 %v4275_v57, %v1991_v23 }
 0x264   : > { %v2124_v53 = vadd.f32 %v2123_v28, %v2093_v5  ;;  %v2055_v45 = vadd.f32 %v2054_v62, %v4467_v9 }
 0x265   : > { %v2099_v15 = vmul.f32 %v4512_v58, %v4512_v58 }
 0x266   : > { %v2125_v4 = vadd.f32 %v2124_v53, %v2094_v33  ;;  %v2056_v41 = vadd.f32 %v2055_v45, %v4474_v35 }
 0x268   : > { %v2126_v47 = vadd.f32 %v2125_v4, %v2095_v46  ;;  %v2057_v0 = vadd.f32 %v2056_v41, %v4490_v39 }
 0x26a   : > { %v1993_v50 = vpop.f32.mrf.mxu3  ;;  %v2127_v56 = vadd.f32 %v2126_v47, %v2096_v20  ;;  %v2058_v10 = vadd.f32 %v2057_v0, %v4500_v36 }
 0x26b   : > { %v4519_v26 = vadd.f32 %v4275_v57, %v1993_v50 }
 0x26c   : > { %v2128_v34 = vadd.f32 %v2127_v56, %v2097_v13  ;;  %v2059_v43 = vadd.f32 %v2058_v10, %v4506_v32  ;;  %v3225_v13 = vmov 512.0  }
 0x26d   : > { %v2100_v30 = vmul.f32 %v4519_v26, %v4519_v26  ;;  %3009 = vrcp.f32 %v3225_v13 }
 0x26e   : > { %v2129_v19 = vadd.f32 %v2128_v34, %v2098_v55  ;;  %v2060_v59 = vadd.f32 %v2059_v43, %v4512_v58 }
 0x270   : > { %v2130_v38 = vadd.f32 %v2129_v19, %v2099_v15  ;;  %v2061_v25 = vadd.f32 %v2060_v59, %v4519_v26 }
 0x272   : > { %v2131_v5 = vadd.f32 %v2130_v38, %v2100_v30 }
 0x273   : > { %v3010_v10 = vpop.eup %3009 }
 0x274   : > { %v2178_v34 = vmul.f32 512.0, %v3010_v10  ;;  %vm2182_vm2 = vweird.f32 %v3010_v10 }
 0x276   : > { %v2179_v55 = vsub.f32 1.0, %v2178_v34 }
 0x278   : > { %v2180_v43 = vmul.f32 %v3010_v10, %v2179_v55 }
 0x279   : > { %v1996_v16 = vpop.f32.mrf.mxu3 }
 0x27a   : > { %v4522_v6 = vadd.f32 %v4275_v57, %v1996_v16  ;;  %v2181_v16 = vadd.f32 %v3010_v10, %v2180_v43  ;;  %v4611_v43 = vld [vmem:[%s4995_s3] ss:$0 sm:$0xff] }
 0x27c   : > { %v2101_v42 = vmul.f32 %v4522_v6, %v4522_v6  ;;  %v2062_v62 = vadd.f32 %v2061_v25, %v4522_v6  ;;  %v2183_v59 = vsel %vm2182_vm2, %v3010_v10, %v2181_v16 }
 0x27e   : > { %v2132_v23 = vadd.f32 %v2131_v5, %v2101_v42 }
 0x281   : > { %v1998_v28 = vpop.f32.mrf.mxu3 }
 0x282   : > { %v4531_v53 = vadd.f32 %v4275_v57, %v1998_v28 }
 0x284   : > { %v2063_v33 = vadd.f32 %v2062_v62, %v4531_v53  ;;  %v2102_v45 = vmul.f32 %v4531_v53, %v4531_v53 }
 0x286   : > { %v2064_v61 = vrot.slane %v2063_v33, 4  ;;  %v2133_v54 = vadd.f32 %v2132_v23, %v2102_v45 }
 0x288   : > { %v2065_v4 = vadd.f32 %v2064_v61, %v2063_v33  ;;  %v2134_v63 = vrot.slane %v2133_v54, 4 }
 0x28a   : > { %v2066_v46 = vrot.slane %v2065_v4, 2  ;;  %v2135_v41 = vadd.f32 %v2134_v63, %v2133_v54 }
 0x28c   : > { %v2067_v22 = vadd.f32 %v2066_v46, %v2065_v4  ;;  %v2136_v47 = vrot.slane %v2135_v41, 2 }
 0x28e   : > { %v2068_v20 = vrot.slane %v2067_v22, 1  ;;  %v2137_v0 = vadd.f32 %v2136_v47, %v2135_v41 }
 0x290   : > { %v2069_v50 = vadd.f32 %v2068_v20, %v2067_v22  ;;  %v2138_v56 = vrot.slane %v2137_v0, 1 }
 0x292   : > { %2173 = vmatmul.f32.vlgmr.msrb.gmra.mxu1 %v2069_v50  ;;  %v2139_v57 = vadd.f32 %v2138_v56, %v2137_v0 }
 0x294   : > { %2201 = vmatmul.f32.vlgmr.msrb.gmra.mxu2 %v2139_v57 }
 0x30f   : > { %v2174_v19 = vpop.f32.mrf.mxu1 }
 0x310   : > { %v2184_v15 = vmul.f32 %v2183_v59, %v2174_v19 }
 0x312   : > { %v2206_v25 = vmul.f32 %v2184_v15, %v2184_v15  ;;  %v4536_v61 = vperm.slane %v2184_v15, 0 }
 0x314   : > { %v2255_v63 = vsub.f32 %v4281_v7, %v4536_v61  ;;  %v2256_v46 = vsub.f32 %v4278_v27, %v4536_v61  ;;  %v2257_v41 = vsub.f32 %v4284_v21, %v4536_v61  ;;  %v2263_v22 = vsub.f32 %v4329_v24, %v4536_v61 }
 0x315   : > { %v2264_v47 = vsub.f32 %v4335_v17, %v4536_v61  ;;  %v2265_v0 = vsub.f32 %v4344_v49, %v4536_v61  ;;  %v2266_v7 = vsub.f32 %v4358_v31, %v4536_v61  ;;  %v2267_v27 = vsub.f32 %v4362_v37, %v4536_v61 }
 0x316   : > { %v2268_v21 = vsub.f32 %v4365_v14, %v4536_v61  ;;  %v2269_v24 = vsub.f32 %v4379_v2, %v4536_v61  ;;  %v2270_v17 = vsub.f32 %v4386_v29, %v4536_v61  ;;  %v2271_v49 = vsub.f32 %v4395_v18, %v4536_v61 }
 0x317   : > { %v2202_v38 = vpop.f32.mrf.mxu2  ;;  %v2272_v31 = vsub.f32 %v4403_v12, %v4536_v61  ;;  %v2273_v37 = vsub.f32 %v4418_v44, %v4536_v61  ;;  %v2279_v56 = vsub.f32 %v4474_v35, %v4536_v61  ;;  %v2280_v14 = vsub.f32 %v4490_v39, %v4536_v61 }
 0x318   : > { %v2205_v30 = vmul.f32 %v2202_v38, %v2183_v59  ;;  %v2281_v2 = vsub.f32 %v4500_v36, %v4536_v61  ;;  %v2282_v29 = vsub.f32 %v4506_v32, %v4536_v61  ;;  %v2283_v18 = vsub.f32 %v4512_v58, %v4536_v61 }
 0x319   : > { %v2284_v12 = vsub.f32 %v4519_v26, %v4536_v61  ;;  %v2285_v16 = vsub.f32 %v4522_v6, %v4536_v61  ;;  %v2286_v19 = vsub.f32 %v4531_v53, %v4536_v61  ;;  %v4632_v6 = vld [vmem:[%s4996_s4] ss:$0 sm:$0xff] }
 0x31a   : > { %v2207_v42 = vsub.f32 %v2205_v30, %v2206_v25 }
 0x31c   : > { %v2208_v28 = vmax.f32 %v2207_v42, 0.0 }
 0x31e   : > { %v2209_v5 = vadd.f32 1e-05, %v2208_v28 }
 0x320   : > { %3011 = vrsqrt.f32 %v2209_v5  ;;  %vm2216_vm6 = vweird.f32 %v2209_v5 }
 0x326   : > { %v3012_v62 = vpop.eup %3011 }
 0x327   : > { %v2211_v23 = vmul.f32 %v3012_v62, %v2209_v5  ;;  %vm2217_vm3 = vweird.f32 %v3012_v62 }
 0x328   : > { %vm2218_vm7 = vmor %vm2216_vm6, %vm2217_vm3 }
 0x329   : > { %v2212_v33 = vmul.f32 %v3012_v62, %v2211_v23 }
 0x32b   : > { %v2213_v45 = vmul.f32 0.5, %v2212_v33 }
 0x32d   : > { %v2214_v54 = vsub.f32 1.5, %v2213_v45 }
 0x32f   : > { %v2215_v4 = vmul.f32 %v3012_v62, %v2214_v54 }
 0x331   : > { %v2219_v20 = vsel %vm2218_vm7, %v3012_v62, %v2215_v4 }
 0x332   : > { %v4554_v50 = vperm.slane %v2219_v20, 0 }
 0x334   : > { %v4581_v44 = vmul.f32 %v4554_v50, %v2263_v22  ;;  %v4584_v35 = vmul.f32 %v4554_v50, %v2264_v47  ;;  %v4587_v39 = vmul.f32 %v4554_v50, %v2265_v0  ;;  %v4590_v36 = vmul.f32 %v4554_v50, %v2266_v7 }
 0x335   : > { %v4593_v32 = vmul.f32 %v4554_v50, %v2267_v27  ;;  %v4596_v58 = vmul.f32 %v4554_v50, %v2268_v21  ;;  %v4599_v26 = vmul.f32 %v4554_v50, %v2269_v24  ;;  %v4602_v57 = vmul.f32 %v4554_v50, %v2270_v17 }
 0x336   : > { %v2288_v13 = vmul.f32 %v4554_v50, %v2255_v63  ;;  %v2289_v10 = vmul.f32 %v4554_v50, %v2256_v46  ;;  %v2304_v34 = vmul.f32 %v4554_v50, %v2271_v49  ;;  %v2305_v55 = vmul.f32 %v4554_v50, %v2272_v31 }
 0x337   : > { %v2290_v59 = vmul.f32 %v4554_v50, %v2257_v41  ;;  %v2306_v15 = vmul.f32 %v4554_v50, %v2273_v37  ;;  %v2312_v38 = vmul.f32 %v4554_v50, %v2279_v56  ;;  %v4621_v25 = vmul.f32 %v4554_v50, %v2280_v14 }
 0x338   : > { %v4624_v30 = vmul.f32 %v4554_v50, %v2281_v2  ;;  %v4627_v42 = vmul.f32 %v4554_v50, %v2282_v29  ;;  %v4635_v53 = vmul.f32 %v4554_v50, %v2283_v18  ;;  %v4638_v28 = vmul.f32 %v4554_v50, %v2284_v12 }
 0x339   : > { %v4641_v5 = vmul.f32 %v4554_v50, %v2285_v16  ;;  %v4644_v62 = vmul.f32 %v4554_v50, %v2286_v19  ;;  %v2339_v23 = vmul.f32 %v4611_v43, %v2304_v34  ;;  %v2323_v33 = vmul.f32 %v4611_v43, %v2288_v13 }
 0x33a   : > { %v2340_v45 = vmul.f32 %v4611_v43, %v2305_v55  ;;  %v2324_v54 = vmul.f32 %v4611_v43, %v2289_v10  ;;  %v2341_v4 = vmul.f32 %v4611_v43, %v2306_v15  ;;  %v2274_v47 = vsub.f32 %v4432_v3, %v4536_v61 }
 0x33b   : > { %v4652_v63 = vadd.f32 %v4632_v6, %v2339_v23  ;;  %v4655_v46 = vadd.f32 %v4632_v6, %v2323_v33  ;;  %v2325_v0 = vmul.f32 %v4611_v43, %v2290_v59  ;;  %v2258_v17 = vsub.f32 %v4289_v11, %v4536_v61 }
 0x33c   : > { %v4658_v41 = vadd.f32 %v4632_v6, %v2340_v45  ;;  %v4661_v22 = vadd.f32 %v4632_v6, %v2324_v54  ;;  %v4666_v20 = vadd.f32 %v4632_v6, %v2341_v4  ;;  %v2307_v49 = vmul.f32 %v4554_v50, %v2274_v47 }
 0x33d   : > { %v2406_v7 = vsub.f32 0.0, %v4652_v63  ;;  %v2390_v27 = vsub.f32 0.0, %v4655_v46  ;;  %v2291_v56 = vmul.f32 %v4554_v50, %v2258_v17  ;;  %v4678_v2 = vadd.f32 %v4632_v6, %v2325_v0 }
 0x33e   : > { %v2407_v21 = vsub.f32 0.0, %v4658_v41  ;;  %v2391_v24 = vsub.f32 0.0, %v4661_v22  ;;  %v2408_v29 = vsub.f32 0.0, %v4666_v20  ;;  %v2342_v18 = vmul.f32 %v4611_v43, %v2307_v49 }
 0x33f   : > { %v2454_v31 = vmul.f32 1.442695, %v2406_v7  ;;  %v2422_v3 = vmul.f32 1.442695, %v2390_v27  ;;  %v2392_v11 = vsub.f32 0.0, %v4678_v2  ;;  %v2326_v12 = vmul.f32 %v4611_v43, %v2291_v56 }
 0x340   : > { %v2456_v37 = vmul.f32 1.442695, %v2407_v21  ;;  %v2424_v14 = vmul.f32 1.442695, %v2391_v24  ;;  %v2275_v13 = vsub.f32 %v4435_v60, %v4536_v61  ;;  %v2458_v10 = vmul.f32 1.442695, %v2408_v29 }
 0x341   : > { %3013 = vpow2.f32 %v2454_v31  ;;  %v2259_v34 = vsub.f32 %v4301_v8, %v4536_v61  ;;  %v4689_v55 = vadd.f32 %v4632_v6, %v2342_v18  ;;  %v2426_v33 = vmul.f32 1.442695, %v2392_v11 }
 0x342   : > { %3015 = vpow2.f32 %v2422_v3  ;;  %v2308_v19 = vmul.f32 %v4554_v50, %v2275_v13  ;;  %v4694_v45 = vadd.f32 %v4632_v6, %v2326_v12  ;;  %v2260_v8 = vsub.f32 %v4309_v51, %v4536_v61 }
 0x343   : > { %3017 = vpow2.f32 %v2456_v37  ;;  %v2292_v15 = vmul.f32 %v4554_v50, %v2259_v34  ;;  %v2276_v47 = vsub.f32 %v4448_v1, %v4536_v61  ;;  %v2409_v0 = vsub.f32 0.0, %v4689_v55 }
 0x344   : > { %3019 = vpow2.f32 %v2424_v14  ;;  %v2343_v7 = vmul.f32 %v4611_v43, %v2308_v19  ;;  %v2347_v27 = vmul.f32 %v4611_v43, %v2312_v38  ;;  %v2331_v21 = vmul.f32 %v4611_v43, %v4581_v44 }
 0x345   : > { %3021 = vpow2.f32 %v2458_v10  ;;  %v2393_v17 = vsub.f32 0.0, %v4694_v45  ;;  %v2327_v51 = vmul.f32 %v4611_v43, %v2292_v15  ;;  %v2309_v49 = vmul.f32 %v4554_v50, %v2276_v47 }
 0x346   : > { %v4709_v31 = vadd.f32 %v4632_v6, %v2347_v27  ;;  %v4712_v3 = vadd.f32 %v4632_v6, %v2331_v21  ;;  %v2293_v38 = vmul.f32 %v4554_v50, %v2260_v8  ;;  %v2261_v44 = vsub.f32 %v4315_v48, %v4536_v61 }
 0x347   : > { %v3014_v16 = vpop.eup %3013  ;;  %v2460_v56 = vmul.f32 1.442695, %v2409_v0  ;;  %v4718_v14 = vadd.f32 %v4632_v6, %v2343_v7  ;;  %v2428_v18 = vmul.f32 1.442695, %v2393_v17  ;;  %v4721_v11 = vadd.f32 %v4632_v6, %v2327_v51 }
 0x348   : > { %v3016_v59 = vpop.eup %3015  ;;  %v2502_v23 = vadd.f32 1.0, %v3014_v16  ;;  %v2348_v12 = vmul.f32 %v4611_v43, %v4621_v25  ;;  %v2277_v10 = vsub.f32 %v4458_v52, %v4536_v61  ;;  %v2344_v48 = vmul.f32 %v4611_v43, %v2309_v49 }
 0x349   : > { %v3018_v54 = vpop.eup %3017  ;;  %v2486_v60 = vadd.f32 1.0, %v3016_v59  ;;  %v2328_v59 = vmul.f32 %v4611_v43, %v2293_v38  ;;  %v2332_v25 = vmul.f32 %v4611_v43, %v4584_v35  ;;  %v2410_v52 = vsub.f32 0.0, %v4718_v14 }
 0x34a   : > { %v3020_v4 = vpop.eup %3019  ;;  %3023 = vrcp.f32 %v2502_v23  ;;  %v2503_v24 = vadd.f32 1.0, %v3018_v54  ;;  %v4732_v15 = vadd.f32 %v4632_v6, %v2348_v12  ;;  %v2333_v23 = vmul.f32 %v4611_v43, %v4587_v39 }
 0x34b   : > { %3025 = vrcp.f32 %v2486_v60  ;;  %v2487_v1 = vadd.f32 1.0, %v3020_v4  ;;  %v3022_v37 = vpop.eup %3021  ;;  %v4743_v54 = vadd.f32 %v4632_v6, %v2332_v25  ;;  %v2310_v35 = vmul.f32 %v4554_v50, %v2277_v10 }
 0x34c   : > { %3027 = vpow2.f32 %v2426_v33  ;;  %v2394_v33 = vsub.f32 0.0, %v4721_v11  ;;  %v4750_v8 = vadd.f32 %v4632_v6, %v2333_v23  ;;  %v2294_v39 = vmul.f32 %v4554_v50, %v2261_v44 }
 0x34d   : > { %3029 = vrcp.f32 %v2503_v24  ;;  %v2462_v0 = vmul.f32 1.442695, %v2410_v52  ;;  %v4754_v7 = vadd.f32 %v4632_v6, %v2344_v48  ;;  %v4757_v21 = vadd.f32 %v4632_v6, %v2328_v59 }
 0x34e   : > { %3031 = vrcp.f32 %v2487_v1  ;;  %v2430_v27 = vmul.f32 1.442695, %v2394_v33  ;;  %v2350_v24 = vmul.f32 %v4611_v43, %v4627_v42  ;;  %v2278_v51 = vsub.f32 %v4467_v9, %v4536_v61 }
 0x34f   : > { %3033 = vpow2.f32 %v2460_v56  ;;  %v2345_v1 = vmul.f32 %v4611_v43, %v2310_v35  ;;  %v2329_v44 = vmul.f32 %v4611_v43, %v2294_v39  ;;  %v2334_v42 = vmul.f32 %v4611_v43, %v4590_v36 }
 0x350   : > { %v3024_v29 = vpop.eup %3023  ;;  %3035 = vpow2.f32 %v2428_v18  ;;  %v4768_v56 = vadd.f32 %v4632_v6, %v2350_v24  ;;  %v2411_v9 = vsub.f32 0.0, %v4754_v7  ;;  %v2395_v18 = vsub.f32 0.0, %v4757_v21 }
 0x351   : > { %v3026_v13 = vpop.eup %3025  ;;  %v2566_v34 = vmul.f32 %v3024_v29, %v4652_v63  ;;  %v2349_v63 = vmul.f32 %v4611_v43, %v4624_v30  ;;  %v2335_v29 = vmul.f32 %v4611_v43, %v4593_v32  ;;  %v4779_v12 = vadd.f32 %v4632_v6, %v2334_v42 }
 0x352   : > { %v3028_v16 = vpop.eup %3027  ;;  %v2550_v19 = vmul.f32 %v3026_v13, %v4655_v46  ;;  %v2504_v46 = vadd.f32 1.0, %v3022_v37  ;;  %v4782_v36 = vadd.f32 %v4632_v6, %v2345_v1  ;;  %v2262_v32 = vsub.f32 %v4321_v40, %v4536_v61 }
 0x353   : > { %2614 = vxpose.xlu0.b32.start [1/16] (narrow) %v2566_v34, 16  ;;  %v2488_v60 = vadd.f32 1.0, %v3028_v16  ;;  %v4747_v4 = vadd.f32 %v4632_v6, %v2349_v63  ;;  %v3030_v30 = vpop.eup %3029  ;;  %v4793_v48 = vadd.f32 %v4632_v6, %v2329_v44  ;;  %v2464_v59 = vmul.f32 1.442695, %v2411_v9 }
 0x354   : > { %2582 = vxpose.xlu2.b32.start [1/16] (narrow) %v2550_v19, 16  ;;  %v3032_v47 = vpop.eup %3031  ;;  %3037 = vrcp.f32 %v2504_v46  ;;  %v2567_v49 = vmul.f32 %v3030_v30, %v4658_v41  ;;  %v2351_v41 = vmul.f32 %v4611_v43, %v4635_v53  ;;  %v4788_v53 = vadd.f32 %v4632_v6, %v2335_v29 }
 0x355   : > { %v3034_v17 = vpop.eup %3033  ;;  %3039 = vrcp.f32 %v2488_v60  ;;  %v2551_v37 = vmul.f32 %v3032_v47, %v4661_v22  ;;  %v2311_v19 = vmul.f32 %v4554_v50, %v2278_v51  ;;  %v2295_v25 = vmul.f32 %v4554_v50, %v2262_v32 }
 0x356   : > { %v3036_v38 = vpop.eup %3035  ;;  %3041 = vpow2.f32 %v2462_v0  ;;  %v2505_v22 = vadd.f32 1.0, %v3034_v17  ;;  %v4785_v10 = vadd.f32 %v4632_v6, %v2351_v41  ;;  %v2432_v52 = vmul.f32 1.442695, %v2395_v18 }
 0x357   : > { %3043 = vpow2.f32 %v2430_v27  ;;  %v2489_v13 = vadd.f32 1.0, %v3036_v38  ;;  %v2352_v63 = vmul.f32 %v4611_v43, %v4638_v28  ;;  %v2412_v40 = vsub.f32 0.0, %v4782_v36 }
 0x358   : > { %3045 = vrcp.f32 %v2505_v22  ;;  %v2396_v35 = vsub.f32 0.0, %v4793_v48  ;;  %v2336_v50 = vmul.f32 %v4611_v43, %v4596_v58  ;;  %v2346_v28 = vmul.f32 %v4611_v43, %v2311_v19 }
 0x359   : > { %3047 = vrcp.f32 %v2489_v13  ;;  %v4804_v60 = vadd.f32 %v4632_v6, %v2352_v63  ;;  %v2337_v30 = vmul.f32 %v4611_v43, %v4599_v26  ;;  %v2330_v39 = vmul.f32 %v4611_v43, %v2295_v25 }
 0x35a   : > { %v3038_v34 = vpop.eup %3037  ;;  %3049 = vpow2.f32 %v2464_v59  ;;  %v4815_v47 = vadd.f32 %v4632_v6, %v2336_v50  ;;  %v2466_v17 = vmul.f32 1.442695, %v2412_v40  ;;  %v4824_v26 = vadd.f32 %v4632_v6, %v2346_v28 }
 0x35b   : > { %2615 = vxpose.xlu0.b32.cont [2/16] (narrow) %v2567_v49, 16  ;;  %v3040_v16 = vpop.eup %3039  ;;  %v2568_v46 = vmul.f32 %v3038_v34, %v4666_v20  ;;  %v2353_v20 = vmul.f32 %v4611_v43, %v4641_v5  ;;  %3051 = vpow2.f32 %v2432_v52  ;;  %v4821_v27 = vadd.f32 %v4632_v6, %v2337_v30 }
 0x35c   : > { %2583 = vxpose.xlu2.b32.cont [2/16] (narrow) %v2551_v37, 16  ;;  %v3042_v23 = vpop.eup %3041  ;;  %v2552_v33 = vmul.f32 %v3040_v16, %v4678_v2  ;;  %v2434_v51 = vmul.f32 1.442695, %v2396_v35  ;;  %v4827_v49 = vadd.f32 %v4632_v6, %v2330_v39  ;;  %v2354_v1 = vmul.f32 %v4611_v43, %v4644_v62 }
 0x35d   : > { %v3044_v61 = vpop.eup %3043  ;;  %v2506_v2 = vadd.f32 1.0, %v3042_v23  ;;  %v4818_v58 = vadd.f32 %v4632_v6, %v2353_v20  ;;  %v2338_v41 = vmul.f32 %v4611_v43, %v4602_v57  ;;  %v2413_v29 = vsub.f32 0.0, %v4824_v26 }
 0x35e   : > { %v2490_v0 = vadd.f32 1.0, %v3044_v61  ;;  %v3046_v24 = vpop.eup %3045  ;;  %v4834_v9 = vadd.f32 %v4632_v6, %v2354_v1  ;;  %v2397_v62 = vsub.f32 0.0, %v4827_v49  ;;  %v2414_v59 = vsub.f32 0.0, %v4709_v31 }
 0x35f   : > { %v3048_v5 = vpop.eup %3047  ;;  %3053 = vrcp.f32 %v2506_v2  ;;  %v2569_v37 = vmul.f32 %v3046_v24, %v4689_v55  ;;  %v4841_v55 = vadd.f32 %v4632_v6, %v2338_v41  ;;  %v2468_v34 = vmul.f32 1.442695, %v2413_v29 }
 0x360   : > { %v3050_v38 = vpop.eup %3049  ;;  %3055 = vrcp.f32 %v2490_v0  ;;  %v2553_v42 = vmul.f32 %v3048_v5, %v4694_v45  ;;  %v2436_v32 = vmul.f32 1.442695, %v2397_v62  ;;  %v2398_v25 = vsub.f32 0.0, %v4712_v3 }
 0x361   : > { %v3052_v44 = vpop.eup %3051  ;;  %3057 = vpow2.f32 %v2466_v17  ;;  %v2507_v22 = vadd.f32 1.0, %v3050_v38  ;;  %v2415_v35 = vsub.f32 0.0, %v4732_v15  ;;  %v2399_v28 = vsub.f32 0.0, %v4743_v54 }
 0x362   : > { %3059 = vpow2.f32 %v2434_v51  ;;  %v2491_v18 = vadd.f32 1.0, %v3052_v44  ;;  %v2438_v40 = vmul.f32 1.442695, %v2398_v25  ;;  %v2416_v17 = vsub.f32 0.0, %v4747_v4 }
 0x363   : > { %2616 = vxpose.xlu0.b32.cont [3/16] (narrow) %v2568_v46, 16  ;;  %3061 = vrcp.f32 %v2507_v22  ;;  %v2470_v46 = vmul.f32 1.442695, %v2414_v59  ;;  %v2472_v39 = vmul.f32 1.442695, %v2415_v35  ;;  %v2400_v1 = vsub.f32 0.0, %v4750_v8 }
 0x364   : > { %2584 = vxpose.xlu2.b32.cont [3/16] (narrow) %v2552_v33, 16  ;;  %3063 = vrcp.f32 %v2491_v18  ;;  %v2440_v0 = vmul.f32 1.442695, %v2399_v28  ;;  %v2417_v62 = vsub.f32 0.0, %v4768_v56  ;;  %v2418_v59 = vsub.f32 0.0, %v4785_v10 }
 0x365   : > { %v3054_v45 = vpop.eup %3053  ;;  %3065 = vpow2.f32 %v2468_v34  ;;  %v2442_v41 = vmul.f32 1.442695, %v2400_v1  ;;  %v2402_v25 = vsub.f32 0.0, %v4788_v53  ;;  %v2403_v35 = vsub.f32 0.0, %v4815_v47 }
 0x366   : > { %v3056_v13 = vpop.eup %3055  ;;  %v2570_v57 = vmul.f32 %v3054_v45, %v4718_v14  ;;  %3067 = vpow2.f32 %v2436_v32  ;;  %v2401_v45 = vsub.f32 0.0, %v4779_v12 }
 0x367   : > { %v3058_v16 = vpop.eup %3057  ;;  %v2554_v19 = vmul.f32 %v3056_v13, %v4721_v11 }
 0x368   : > { %v3060_v43 = vpop.eup %3059  ;;  %v2508_v6 = vadd.f32 1.0, %v3058_v16  ;;  %v2476_v16 = vmul.f32 1.442695, %v2417_v62 }
 0x369   : > { %v2492_v52 = vadd.f32 1.0, %v3060_v43  ;;  %v3062_v63 = vpop.eup %3061 }
 0x36a   : > { %v3064_v23 = vpop.eup %3063  ;;  %3069 = vrcp.f32 %v2508_v6  ;;  %v2571_v61 = vmul.f32 %v3062_v63, %v4754_v7 }
 0x36b   : > { %2617 = vxpose.xlu0.b32.cont [4/16] (narrow) %v2569_v37, 16  ;;  %v3066_v14 = vpop.eup %3065  ;;  %3071 = vrcp.f32 %v2492_v52  ;;  %v2555_v33 = vmul.f32 %v3064_v23, %v4757_v21 }
 0x36c   : > { %2585 = vxpose.xlu2.b32.cont [4/16] (narrow) %v2553_v42, 16  ;;  %v3068_v11 = vpop.eup %3067  ;;  %3073 = vpow2.f32 %v2470_v46  ;;  %v2509_v50 = vadd.f32 1.0, %v3066_v14  ;;  %v2474_v42 = vmul.f32 1.442695, %v2416_v17  ;;  %v2478_v46 = vmul.f32 1.442695, %v2418_v59 }
 0x36d   : > { %3075 = vpow2.f32 %v2438_v40  ;;  %v2493_v20 = vadd.f32 1.0, %v3068_v11  ;;  %v2446_v40 = vmul.f32 1.442695, %v2402_v25  ;;  %v2419_v11 = vsub.f32 0.0, %v4804_v60 }
 0x36e   : > { %3077 = vrcp.f32 %v2509_v50 }
 0x36f   : > { %3079 = vrcp.f32 %v2493_v20 }
 0x370   : > { %v3070_v30 = vpop.eup %3069  ;;  %3081 = vpow2.f32 %v2472_v39 }
 0x371   : > { %v3072_v2 = vpop.eup %3071  ;;  %v2572_v24 = vmul.f32 %v3070_v30, %v4782_v36  ;;  %3083 = vpow2.f32 %v2440_v0  ;;  %v2480_v30 = vmul.f32 1.442695, %v2419_v11 }
 0x372   : > { %v3074_v7 = vpop.eup %3073  ;;  %v2556_v5 = vmul.f32 %v3072_v2, %v4793_v48  ;;  %v2448_v2 = vmul.f32 1.442695, %v2403_v35 }
 0x373   : > { %2618 = vxpose.xlu0.b32.cont [5/16] (narrow) %v2570_v57, 16  ;;  %v3076_v21 = vpop.eup %3075  ;;  %v2510_v51 = vadd.f32 1.0, %v3074_v7  ;;  %v2444_v57 = vmul.f32 1.442695, %v2401_v45  ;;  %v2420_v7 = vsub.f32 0.0, %v4818_v58 }
 0x374   : > { %2586 = vxpose.xlu2.b32.cont [5/16] (narrow) %v2554_v19, 16  ;;  %v2494_v38 = vadd.f32 1.0, %v3076_v21  ;;  %v3078_v37 = vpop.eup %3077  ;;  %v2404_v21 = vsub.f32 0.0, %v4821_v27 }
 0x375   : > { %v3080_v44 = vpop.eup %3079  ;;  %3085 = vrcp.f32 %v2510_v51  ;;  %v2573_v29 = vmul.f32 %v3078_v37, %v4824_v26  ;;  %v2482_v1 = vmul.f32 1.442695, %v2420_v7 }
 0x376   : > { %v3082_v36 = vpop.eup %3081  ;;  %3087 = vrcp.f32 %v2494_v38  ;;  %v2557_v22 = vmul.f32 %v3080_v44, %v4827_v49  ;;  %v2450_v38 = vmul.f32 1.442695, %v2404_v21 }
 0x377   : > { %v3084_v48 = vpop.eup %3083  ;;  %3089 = vpow2.f32 %v2474_v42  ;;  %v2511_v18 = vadd.f32 1.0, %v3082_v36  ;;  %v2421_v42 = vsub.f32 0.0, %v4834_v9  ;;  %v2405_v36 = vsub.f32 0.0, %v4841_v55 }
 0x378   : > { %3091 = vpow2.f32 %v2442_v41  ;;  %v2495_v13 = vadd.f32 1.0, %v3084_v48 }
 0x379   : > { %3093 = vrcp.f32 %v2511_v18  ;;  %v2484_v62 = vmul.f32 1.442695, %v2421_v42  ;;  %v2452_v18 = vmul.f32 1.442695, %v2405_v36 }
 0x37a   : > { %3095 = vrcp.f32 %v2495_v13 }
 0x37b   : > { %2619 = vxpose.xlu0.b32.cont [6/16] (narrow) %v2571_v61, 16  ;;  %v3086_v34 = vpop.eup %3085  ;;  %3097 = vpow2.f32 %v2476_v16 }
 0x37c   : > { %2587 = vxpose.xlu2.b32.cont [6/16] (narrow) %v2555_v33, 16  ;;  %v3088_v32 = vpop.eup %3087  ;;  %v2574_v43 = vmul.f32 %v3086_v34, %v4709_v31  ;;  %3099 = vpow2.f32 %v2444_v57 }
 0x37d   : > { %v3090_v26 = vpop.eup %3089  ;;  %v2558_v19 = vmul.f32 %v3088_v32, %v4712_v3 }
 0x37e   : > { %v3092_v49 = vpop.eup %3091  ;;  %v2512_v6 = vadd.f32 1.0, %v3090_v26 }
 0x37f   : > { %v2496_v52 = vadd.f32 1.0, %v3092_v49  ;;  %v3094_v63 = vpop.eup %3093 }
 0x380   : > { %v3096_v23 = vpop.eup %3095  ;;  %3101 = vrcp.f32 %v2512_v6  ;;  %v2575_v14 = vmul.f32 %v3094_v63, %v4732_v15 }
 0x381   : > { %v3098_v31 = vpop.eup %3097  ;;  %3103 = vrcp.f32 %v2496_v52  ;;  %v2559_v61 = vmul.f32 %v3096_v23, %v4743_v54 }
 0x382   : > { %v3100_v3 = vpop.eup %3099  ;;  %3105 = vpow2.f32 %v2478_v46  ;;  %v2513_v33 = vadd.f32 1.0, %v3098_v31  ;;  %v2706_v46 = vlaneseq }
 0x383   : > { %2620 = vxpose.xlu0.b32.cont [7/16] (narrow) %v2572_v24, 16  ;;  %3107 = vpow2.f32 %v2446_v40  ;;  %v2497_v50 = vadd.f32 1.0, %v3100_v3 }
 0x384   : > { %2588 = vxpose.xlu2.b32.cont [7/16] (narrow) %v2556_v5, 16  ;;  %3109 = vrcp.f32 %v2513_v33  ;;  %vm4886_vm13 = vcmp.lt.s32.totalorder %v2706_v46, 256 }
 0x385   : > { %3111 = vrcp.f32 %v2497_v50 }
 0x386   : > { %v3102_v28 = vpop.eup %3101  ;;  %3113 = vpow2.f32 %v2480_v30 }
 0x387   : > { %v3104_v20 = vpop.eup %3103  ;;  %v2576_v39 = vmul.f32 %v3102_v28, %v4747_v4  ;;  %3115 = vpow2.f32 %v2448_v2 }
 0x388   : > { %v3106_v15 = vpop.eup %3105  ;;  %v2560_v0 = vmul.f32 %v3104_v20, %v4750_v8 }
 0x389   : > { %v3108_v54 = vpop.eup %3107  ;;  %v2514_v24 = vadd.f32 1.0, %v3106_v15 }
 0x38a   : > { %v2498_v5 = vadd.f32 1.0, %v3108_v54  ;;  %v3110_v17 = vpop.eup %3109 }
 0x38b   : > { %2621 = vxpose.xlu0.b32.cont [8/16] (narrow) %v2573_v29, 16  ;;  %v3112_v51 = vpop.eup %3111  ;;  %3117 = vrcp.f32 %v2514_v24  ;;  %v2577_v37 = vmul.f32 %v3110_v17, %v4768_v56 }
 0x38c   : > { %2589 = vxpose.xlu2.b32.cont [8/16] (narrow) %v2557_v22, 16  ;;  %v3114_v4 = vpop.eup %3113  ;;  %3119 = vrcp.f32 %v2498_v5  ;;  %v2561_v44 = vmul.f32 %v3112_v51, %v4779_v12 }
 0x38d   : > { %v3116_v8 = vpop.eup %3115  ;;  %3121 = vpow2.f32 %v2482_v1  ;;  %v2515_v41 = vadd.f32 1.0, %v3114_v4 }
 0x38e   : > { %3123 = vpow2.f32 %v2450_v38  ;;  %v2499_v29 = vadd.f32 1.0, %v3116_v8 }
 0x38f   : > { %3125 = vrcp.f32 %v2515_v41 }
 0x390   : > { %3127 = vrcp.f32 %v2499_v29 }
 0x391   : > { %v3118_v48 = vpop.eup %3117  ;;  %3129 = vpow2.f32 %v2484_v62 }
 0x392   : > { %v3120_v22 = vpop.eup %3119  ;;  %v2578_v45 = vmul.f32 %v3118_v48, %v4785_v10  ;;  %3131 = vpow2.f32 %v2452_v18 }
 0x393   : > { %2622 = vxpose.xlu0.b32.cont [9/16] (narrow) %v2574_v43, 16  ;;  %v3122_v56 = vpop.eup %3121  ;;  %v2562_v13 = vmul.f32 %v3120_v22, %v4788_v53 }
 0x394   : > { %2590 = vxpose.xlu2.b32.cont [9/16] (narrow) %v2558_v19, 16  ;;  %v3124_v12 = vpop.eup %3123  ;;  %v2516_v34 = vadd.f32 1.0, %v3122_v56 }
 0x395   : > { %v2500_v32 = vadd.f32 1.0, %v3124_v12  ;;  %v3126_v16 = vpop.eup %3125 }
 0x396   : > { %v3128_v57 = vpop.eup %3127  ;;  %3133 = vrcp.f32 %v2516_v34  ;;  %v2579_v43 = vmul.f32 %v3126_v16, %v4804_v60 }
 0x397   : > { %v3130_v26 = vpop.eup %3129  ;;  %3135 = vrcp.f32 %v2500_v32  ;;  %v2563_v10 = vmul.f32 %v3128_v57, %v4815_v47 }
 0x398   : > { %v3132_v49 = vpop.eup %3131  ;;  %v2517_v19 = vadd.f32 1.0, %v3130_v26 }
 0x399   : > { %v2501_v53 = vadd.f32 1.0, %v3132_v49 }
 0x39a   : > { %3137 = vrcp.f32 %v2517_v19 }
 0x39b   : > { %2623 = vxpose.xlu0.b32.cont [10/16] (narrow) %v2575_v14, 16  ;;  %3139 = vrcp.f32 %v2501_v53 }
 0x39c   : > { %2591 = vxpose.xlu2.b32.cont [10/16] (narrow) %v2559_v61, 16  ;;  %v3134_v59 = vpop.eup %3133 }
 0x39d   : > { %v3136_v6 = vpop.eup %3135  ;;  %v2580_v25 = vmul.f32 %v3134_v59, %v4818_v58 }
 0x39e   : > { %v2564_v52 = vmul.f32 %v3136_v6, %v4821_v27 }
 0x3a0   : > { %v3138_v60 = vpop.eup %3137 }
 0x3a1   : > { %v3140_v63 = vpop.eup %3139  ;;  %v2581_v47 = vmul.f32 %v3138_v60, %v4834_v9 }
 0x3a2   : > { %v2565_v23 = vmul.f32 %v3140_v63, %v4841_v55 }
 0x3a3   : > { %2624 = vxpose.xlu0.b32.cont [11/16] (narrow) %v2576_v39, 16 }
 0x3a4   : > { %2592 = vxpose.xlu2.b32.cont [11/16] (narrow) %v2560_v0, 16 }
 0x3ab   : > { %2625 = vxpose.xlu0.b32.cont [12/16] (narrow) %v2577_v37, 16 }
 0x3ac   : > { %2593 = vxpose.xlu2.b32.cont [12/16] (narrow) %v2561_v44, 16 }
 0x3b3   : > { %2626 = vxpose.xlu0.b32.cont [13/16] (narrow) %v2578_v45, 16 }
 0x3b4   : > { %2594 = vxpose.xlu2.b32.cont [13/16] (narrow) %v2562_v13, 16 }
 0x3bb   : > { %2627 = vxpose.xlu0.b32.cont [14/16] (narrow) %v2579_v43, 16 }
 0x3bc   : > { %2595 = vxpose.xlu2.b32.cont [14/16] (narrow) %v2563_v10, 16 }
 0x3c3   : > { %2628 = vxpose.xlu0.b32.cont [15/16] (narrow) %v2580_v25, 16 }
 0x3c4   : > { %2596 = vxpose.xlu2.b32.cont [15/16] (narrow) %v2564_v52, 16 }
 0x3cb   : > { %2629 = vxpose.xlu0.b32.end [16/16] (narrow) %v2581_v47, 16 }
 0x3cc   : > { %2597 = vxpose.xlu2.b32.end [16/16] (narrow) %v2565_v23, 16 }
 0x3ed   : > { %v2598_v40 = vpop.trf.xlu2 }
 0x3f5   : > { %v2599_v0 = vpop.trf.xlu2 }
 0x3f7   : > { %v2630_v31 = vpop.trf.xlu0 }
 0x3f8   : > { %v2650_v58 = vrot.slane %v2630_v31, 7 }
 0x3fa   : > { %v2673_v9 = vsel %vm1262_vm9, %v2650_v58, %v2598_v40  ;;  %v2653_v55 = vsel %vm2652_vm8, %v2598_v40, %v2650_v58  ;;  %v2655_v14 = vsel %vm2654_vm10, %v2598_v40, %v2650_v58  ;;  %v2658_v3 = vsel %vm2657_vm12, %v2598_v40, %v2650_v58 }
 0x3fb   : > { %v2674_v61 = vrot.slane %v2673_v9, 7  ;;  %v2656_v11 = vrot.slane %v2655_v14, 1  ;;  %v2659_v33 = vrot.slane %v2658_v3, 2  ;;  %v2661_v35 = vsel %vm2660_vm14, %v2598_v40, %v2650_v58  ;;  %2710 = vst.msk [vmem:[%s4895_s9] sm:$0x3] %vm4886_vm13, %v2653_v55 }
 0x3fc   : > { %v2662_v50 = vrot.slane %v2661_v35, 3  ;;  %v2664_v28 = vsel %vm2663_vm15, %v2598_v40, %v2650_v58  ;;  %v2667_v20 = vsel %vm2666_vm0, %v2598_v40, %v2650_v58  ;;  %v2670_v30 = vsel %vm2669_vm1, %v2598_v40, %v2650_v58 }
 0x3fd   : > { %2717 = vst.msk [vmem:[%s4895_s9 + $0xe] sm:$0x3] %vm4886_vm13, %v2674_v61  ;;  %v2665_v2 = vrot.slane %v2664_v28, 4  ;;  %v2668_v15 = vrot.slane %v2667_v20, 5  ;;  %v2671_v54 = vrot.slane %v2670_v30, 6 }
 0x3fe   : > { %2711 = vst.msk [vmem:[%s4895_s9 + $0x2] sm:$0x3] %vm4886_vm13, %v2656_v11 }
 0x3ff   : > { %v2631_v39 = vpop.trf.xlu0  ;;  %2712 = vst.msk [vmem:[%s4895_s9 + $0x4] sm:$0x3] %vm4886_vm13, %v2659_v33 }
 0x400   : > { %v2651_v7 = vrot.slane %v2631_v39, 7  ;;  %2713 = vst.msk [vmem:[%s4895_s9 + $0x6] sm:$0x3] %vm4886_vm13, %v2662_v50 }
 0x401   : > { %2714 = vst.msk [vmem:[%s4895_s9 + $0x8] sm:$0x3] %vm4886_vm13, %v2665_v2 }
 0x402   : > { %v2675_v24 = vsel %vm2652_vm8, %v2599_v0, %v2651_v7  ;;  %v2676_v21 = vsel %vm2654_vm10, %v2599_v0, %v2651_v7  ;;  %v2678_v5 = vsel %vm2657_vm12, %v2599_v0, %v2651_v7  ;;  %v2680_v17 = vsel %vm2660_vm14, %v2599_v0, %v2651_v7  ;;  %2715 = vst.msk [vmem:[%s4895_s9 + $0xa] sm:$0x3] %vm4886_vm13, %v2668_v15 }
 0x403   : > { %v2677_v51 = vrot.slane %v2676_v21, 1  ;;  %v2679_v1 = vrot.slane %v2678_v5, 2  ;;  %v2681_v38 = vrot.slane %v2680_v17, 3  ;;  %v2682_v4 = vsel %vm2663_vm15, %v2599_v0, %v2651_v7  ;;  %2716 = vst.msk [vmem:[%s4895_s9 + $0xc] sm:$0x3] %vm4886_vm13, %v2671_v54 }
 0x404   : > { %v2683_v37 = vrot.slane %v2682_v4, 4  ;;  %v2684_v8 = vsel %vm2666_vm0, %v2599_v0, %v2651_v7  ;;  %v2686_v44 = vsel %vm2669_vm1, %v2599_v0, %v2651_v7  ;;  %v2688_v42 = vsel %vm1262_vm9, %v2651_v7, %v2599_v0  ;;  %2718 = vst.msk [vmem:[%s4895_s9 + $0x10] sm:$0x3] %vm4886_vm13, %v2675_v24 }
 0x405   : > { %v2685_v41 = vrot.slane %v2684_v8, 5  ;;  %2719 = vst.msk [vmem:[%s4895_s9 + $0x12] sm:$0x3] %vm4886_vm13, %v2677_v51  ;;  %v2687_v36 = vrot.slane %v2686_v44, 6  ;;  %v2689_v29 = vrot.slane %v2688_v42, 7 }
 0x406   : > { %2720 = vst.msk [vmem:[%s4895_s9 + $0x14] sm:$0x3] %vm4886_vm13, %v2679_v1 }
 0x407   : > { %2721 = vst.msk [vmem:[%s4895_s9 + $0x16] sm:$0x3] %vm4886_vm13, %v2681_v38 }
 0x408   : > { %2722 = vst.msk [vmem:[%s4895_s9 + $0x18] sm:$0x3] %vm4886_vm13, %v2683_v37 }
 0x409   : > { %2723 = vst.msk [vmem:[%s4895_s9 + $0x1a] sm:$0x3] %vm4886_vm13, %v2685_v41 }
 0x40a   : > { %2724 = vst.msk [vmem:[%s4895_s9 + $0x1c] sm:$0x3] %vm4886_vm13, %v2687_v36 }
 0x40b   : > { %2725 = vst.msk [vmem:[%s4895_s9 + $0x1e] sm:$0x3] %vm4886_vm13, %v2689_v29 }
 0x40c   : > { %3179 = shalt.err (!%p3176_p3)
}
 0x40d   : > { %s3226_s28 = smov 2  }
 0x40e   : > { %2956 = dma.vmem_to_hbm [thread:$0]  (%p3300_p5), %s2739_s15, 512, %s2741_s16, %s2727_s17, %s3223_s20, %s3223_s20, %s3226_s28  }
 0x40f PF: > { %p2962_p4 = scmp.ge.s32.totalorder %s3214_s24, 2  ;;  %s2755_s9 = sand.u32 1, %s3202_s21  }
 0x410   : > { %s2756_s25 = scalar_lea.sflag [#allocation5], %s2755_s9 }
 0x411   : > { %p2959_p7 = pnand %p2962_p4, %p3304_p6 }
 0x413   : > { %p2960_p8 = pneg %p2959_p7 }
 0x415   : > { %3197 = dma.done.wait (%p2960_p8), %s2756_s25, 512  }
 0x416   : > { %3199 = vsyncadd (%p2960_p8), %s2756_s25, 4294966784  ;;  %p16_p9 = scmp.ge.s32.totalorder %s3287_s27, 4   ;;  %s5011_s21 = smov %s3206_s22 }
 0x417   : > { %s5012_s22 = smov %s3210_s23  ;;  %s5013_s23 = smov %s3298_s30 }
 0x418   : > { %s5014_s24 = smov %s3287_s27  ;;  %18 = sbr.rel (!%p16_p9) target bundleno = 3 (0x3), region = 82 }
 0x41d   :  { %2762 = vsyncpa [#allocation5], 1 }
 0x41e   :  { %2764 = vsyncpa [#allocation5 + $0x1], 1 }

// kernel: tpu_custom_call.1
= control target key start
LH: loop header
LB: loop body
LE: loop exit
PB: predicated region body
PF: predicated region fallthrough
CT: control target
= control target key end

     0   :  { %11 = vsyncpa [#allocation5], 0  ;;  %s4908_s0 = inlined_call_operand.vmem [shape: bf16[2,16,16,8], index: 0, kind: input, shape index: {}]   ;;  %s4909_s1 = inlined_call_operand.vmem [shape: bf16[72,128], index: 1, kind: input, shape index: {}]   ;;  %s4910_s2 = inlined_call_operand.vmem [shape: f32[1,128], index: 2, kind: input, shape index: {}]   ;;  %s4911_s3 = inlined_call_operand.vmem [shape: f32[1,128], index: 3, kind: input, shape index: {}]   ;;  %s4912_s4 = inlined_call_operand.vmem [shape: f32[1,128], index: 4, kind: input, shape index: {}]   ;;  %s4913_s5 = inlined_call_operand.vmem [shape: f32[128,128], index: 5, kind: input, shape index: {}]   ;;  %s4914_s6 = inlined_call_operand.hbm [shape: f32[2,1,256,128], index: 6, kind: output, shape index: {}]  }
   0x1   :  { %13 = vsyncpa [#allocation5 + $0x1], 0  ;;  %s3153_s21 = smov 0   ;;  %s3155_s22 = smov 0  }
   0x2   :  { %s3157_s23 = smov 0   ;;  %s3159_s24 = smov 0  }
   0x3 LB: > { %s3174_s25 = sadd.s32 4294967295, %s3105_s24   ;;  %s2692_s26 = sadd.s32 4294967294, %s3105_s24   ;;  %s3105_s24 = sphi %s3159_s24, %s4945_s24   ;;  %s3101_s23 = sphi %s3157_s23, %s4944_s23   ;;  %s3097_s22 = sphi %s3155_s22, %s4943_s22   ;;  %s3093_s21 = sphi %s3153_s21, %s4942_s21  }
   0x4   : > { %s3178_s27 = sadd.s32 1, %s3105_s24   ;;  %s157_s28 = sadd.s32 1, %s3101_s23 }
   0x5   : > { %s154_s29 = ssub.s32 %s3105_s24, %s3178_s27  ;;  %p167_p0 = scmp.ne.s32.totalorder %s3101_s23, %s3097_s22 }
   0x6   : > { %p155_p1 = scmp.eq.s32.totalorder %s154_s29, 0  ;;  %p168_p2 = scmp.eq.s32.totalorder %s3174_s25, 1 }
   0x7   : > { %p173_p3 = scmp.ne.s32.totalorder %s3097_s22, %s3093_s21  ;;  %p174_p4 = scmp.eq.s32.totalorder %s2692_s26, 1 }
   0x8   : > { %s3189_s30 = scalar_select %p155_p1, %s3101_s23, %s157_s28  }
   0x9   : > { %p3191_p5 = por %p168_p2, %p167_p0  ;;  %p3195_p6 = por %p174_p4, %p173_p3 }
   0xa   : > { %p2695_p7 = scmp.ge.s32.totalorder %s3105_s24, 1  ;;  %p215_p8 = scmp.lt.s32.totalorder %s3105_s24, 3 }
   0xc   : > { %p216_p9 = pnand %p2695_p7, %p215_p8 }
   0xe   : > { %219 = sbr.rel (%p216_p9) target bundleno = 919 (0x397), region = 44 }
  0x13   : > { %p245_p10 = scmp.lt.s32.totalorder %s3174_s25, 1  ;;  %vm254_vm0 = vcmask 57344   ;;  %vm261_vm1 = vsmask.f32 256  ;;  %vm251_vm2 = vcmask 60416   ;;  %v3107_v4 = vmov 0  }
  0x14   : > { %vm3204_vm3 = vmand %vm254_vm0, %vm261_vm1  ;;  %v266_v1 = vld [vmem:[#allocation2 + $0xc] sm:$0x1]  ;;  %v269_v3 = vld [vmem:[#allocation2 + $0x18] sm:$0x1]  ;;  %vm317_vm4 = vsmask.f32 7938 }
  0x15   : > { %s246_s9 = scalar_select %p245_p10, %s3174_s25, 1  ;;  %v267_v2 = vsel %vm3204_vm3, 0, %v266_v1  ;;  %252 = vst.msk [vmem:[#allocation2] sm:$0xf] %vm251_vm2, %v3107_v4  ;;  %vm405_vm5 = vsmask.f32 4368  ;;  %vm3237_vm7 = vmand %vm251_vm2, %vm317_vm4 }
  0x16   : > { %268 = vst [vmem:[#allocation2 + $0xc] sm:$0x1] %v267_v2  ;;  %v270_v5 = vsel %vm3204_vm3, 0, %v269_v3  ;;  %vm3228_vm6 = vmor %vm261_vm1, %vm405_vm5  ;;  %v322_v29 = vld [vmem:[#allocation2 + $0x14] sm:$0x1]  ;;  %s3108_s14 = smov 24  }
  0x17   : > { %s2808_s10 = sshll.u32 %s246_s9, 7  ;;  %253 = vst.msk [vmem:[#allocation2 + $0x4] sm:$0xf] %vm251_vm2, %v3107_v4  ;;  %vm3243_vm8 = vmand %vm254_vm0, %vm317_vm4  ;;  %v325_v32 = vld [vmem:[#allocation2 + $0x20] sm:$0x1]  ;;  %vm1262_vm9 = vcmask 1046528  }
  0x18   : > { %s3215_s13 = scalar_lea.vmem %s4908_s0, %s2808_s10  ;;  %255 = vst.msk [vmem:[#allocation2 + $0x8] sm:$0x1] %vm254_vm0, %v3107_v4  ;;  %v323_v40 = vsel %vm3243_vm8, 0, %v322_v29  ;;  %v272_v41 = vld [vmem:[#allocation2 + $0x24] sm:$0x1]  ;;  %v326_v44 = vsel %vm3243_vm8, 0, %v325_v32 }
  0x19   : > { %v373_v6 = vld [vmem:[%s3215_s13] sm:$0xf]  ;;  %v374_v7 = vld [vmem:[%s3215_s13 + $0x4] sm:$0xf]  ;;  %257 = vst.msk [vmem:[#allocation2 + $0xcc] sm:$0xf] %vm251_vm2, %v3107_v4 }
  0x1a   : > { %v408_v8 = vshrl.u32 %v373_v6, 16  ;;  %v411_v9 = vshll.u32 %v373_v6, 16  ;;  %v416_v10 = vshrl.u32 %v374_v7, 16  ;;  %v419_v11 = vshll.u32 %v374_v7, 16  ;;  %258 = vst.msk [vmem:[#allocation2 + $0xd0] sm:$0xf] %vm251_vm2, %v3107_v4 }
  0x1b   : > { %v375_v12 = vld [vmem:[%s3215_s13 + $0x8] sm:$0xf]  ;;  %v376_v13 = vld [vmem:[%s3215_s13 + $0xc] sm:$0xf]  ;;  %259 = vst.msk [vmem:[#allocation2 + $0xd4] sm:$0x1] %vm254_vm0, %v3107_v4 }
  0x1c   : > { %v410_v15 = vrot.slane %v408_v8, 7  ;;  %v3232_v16 = vrot.slane %v416_v10, 7  ;;  %v425_v17 = vshrl.u32 %v375_v12, 16  ;;  %v428_v18 = vshll.u32 %v375_v12, 16  ;;  %271 = vst [vmem:[#allocation2 + $0x18] sm:$0x1] %v270_v5 }
  0x1d   : > { %v730_v20 = vld [vmem:[#allocation2 + $0xc] sm:$0xf]  ;;  %v433_v21 = vshrl.u32 %v376_v13, 16  ;;  %v436_v22 = vshll.u32 %v376_v13, 16  ;;  %v263_v27 = vld [vmem:[#allocation2] sm:$0x1] }
  0x1e   : > { %v413_v24 = vor.u32 %v411_v9, %v410_v15  ;;  %v414_v25 = vrot.slane %v410_v15, 4  ;;  %v421_v26 = vor.u32 %v419_v11, %v3232_v16  ;;  %v427_v28 = vrot.slane %v425_v17, 7  ;;  %v377_v42 = vld [vmem:[%s3215_s13 + $0x10] sm:$0xf]  ;;  %v378_v45 = vld [vmem:[%s3215_s13 + $0x14] sm:$0xf] }
  0x1f   : > { %v264_v30 = vsel %vm3204_vm3, 0, %v263_v27  ;;  %v3250_v31 = vrot.slane %v433_v21, 7  ;;  %v319_v35 = vld [vmem:[#allocation2 + $0x8] sm:$0x1]  ;;  %v442_v46 = vshrl.u32 %v377_v42, 16  ;;  %v273_v48 = vsel %vm3204_vm3, 0, %v272_v41 }
  0x20   : > { %v422_v33 = vsel %vm3228_vm6, %v414_v25, %v421_v26  ;;  %v731_v34 = vsel %vm3237_vm7, %v413_v24, %v730_v20  ;;  %265 = vst [vmem:[#allocation2] sm:$0x1] %v264_v30  ;;  %v431_v36 = vrot.slane %v427_v28, 4  ;;  %v320_v37 = vsel %vm3243_vm8, 0, %v319_v35  ;;  %v328_v53 = vld [vmem:[#allocation2 + $0x2c] sm:$0x1] }
  0x21   : > { %732 = vst [vmem:[#allocation2 + $0xc] sm:$0xf] %v731_v34  ;;  %v430_v38 = vor.u32 %v428_v18, %v427_v28  ;;  %v438_v39 = vor.u32 %v436_v22, %v3250_v31  ;;  %v450_v49 = vshrl.u32 %v378_v45, 16  ;;  %v444_v51 = vrot.slane %v442_v46, 7  ;;  %v340_v59 = vld [vmem:[#allocation2 + $0x5c] sm:$0x1] }
  0x22   : > { %733 = vst.msk [vmem:[#allocation2 + $0x10] sm:$0xf] %vm251_vm2, %v422_v33  ;;  %v453_v52 = vshll.u32 %v378_v45, 16  ;;  %v329_v55 = vsel %vm3243_vm8, 0, %v328_v53  ;;  %v445_v57 = vshll.u32 %v377_v42, 16  ;;  %v423_v62 = vrot.slane %v3232_v16, 4 }
  0x23   : > { %321 = vst [vmem:[#allocation2 + $0x8] sm:$0x1] %v320_v37  ;;  %v439_v43 = vsel %vm3228_vm6, %v431_v36, %v438_v39  ;;  %v737_v47 = vld [vmem:[#allocation2 + $0x18] sm:$0xf]  ;;  %v452_v54 = vrot.slane %v450_v49, 7  ;;  %v448_v56 = vrot.slane %v444_v51, 4 }
  0x24   : > { %740 = vst.msk [vmem:[#allocation2 + $0x1c] sm:$0xf] %vm251_vm2, %v439_v43  ;;  %v738_v50 = vsel %vm3237_vm7, %v430_v38, %v737_v47  ;;  %v284_v2 = vld [vmem:[#allocation2 + $0x54] sm:$0x1]  ;;  %v341_v3 = vsel %vm3243_vm8, 0, %v340_v59  ;;  %v440_v6 = vrot.slane %v3250_v31, 4  ;;  %v447_v8 = vor.u32 %v445_v57, %v444_v51 }
  0x25   : > { %324 = vst [vmem:[#allocation2 + $0x14] sm:$0x1] %v323_v40  ;;  %v455_v58 = vor.u32 %v453_v52, %v452_v54  ;;  %v457_v9 = vrot.slane %v452_v54, 4  ;;  %v285_v10 = vsel %vm3204_vm3, 0, %v284_v2  ;;  %v385_v16 = vld [vmem:[%s3215_s13 + $0x30] sm:$0xf] }
  0x26   : > { %739 = vst [vmem:[#allocation2 + $0x18] sm:$0xf] %v738_v50  ;;  %v510_v20 = vshrl.u32 %v385_v16, 16  ;;  %s3109_s15 = smov 48   ;;  %v386_v31 = vld [vmem:[%s3215_s13 + $0x34] sm:$0xf] }
  0x27   : > { %327 = vst [vmem:[#allocation2 + $0x20] sm:$0x1] %v326_v44  ;;  %v2813_v61 = vld [vmem:[#allocation2] sm:$0xff]  ;;  %v456_v1 = vsel %vm3228_vm6, %v448_v56, %v455_v58  ;;  %s3110_s16 = smov 16   ;;  %v513_v33 = vshll.u32 %v385_v16, 16  ;;  %v518_v34 = vshrl.u32 %v386_v31, 16 }
  0x28   : > { %274 = vst [vmem:[#allocation2 + $0x24] sm:$0x1] %v273_v48  ;;  %v1041_v5 = vshll.u32 %v2813_v61, 16  ;;  %v1263_v12 = vrot.slane %v2813_v61, 1  ;;  %v1039_v17 = vshrl.u32 %v2813_v61, 16  ;;  %v512_v32 = vrot.slane %v510_v20, 7 }
  0x29   : > { %v3275_v60 = vld [vmem:[#allocation2 + $0xc] sm:$0xff]  ;;  %330 = vst [vmem:[#allocation2 + $0x2c] sm:$0x1] %v329_v55  ;;  %v521_v35 = vshll.u32 %v386_v31, 16  ;;  %vm1037_vm10 = vsmask.f32 7424 }
  0x2a   : > { %v857_v63 = vld [vmem:[#allocation2 + $0x8] sm:$0x1]  ;;  %1348 = vrot.lane.b32.xlu1 %v3275_v60, %s3108_s14  ;;  %747 = vst.msk [vmem:[#allocation2 + $0x28] sm:$0xf] %vm251_vm2, %v456_v1  ;;  %v1043_v22 = vrot.slane %v1041_v5, 1  ;;  %v1053_v38 = vshll.u32 %v3275_v60, 16  ;;  %v515_v39 = vor.u32 %v513_v33, %v512_v32 }
  0x2b   : > { %v1005_v4 = vunpack.c.l.b16 %v857_v63  ;;  %342 = vst [vmem:[#allocation2 + $0x5c] sm:$0x1] %v341_v3  ;;  %v516_v40 = vrot.slane %v512_v32, 4  ;;  %v520_v41 = vrot.slane %v518_v34, 7  ;;  %v1266_v44 = vrot.slane %v3275_v60, 1  ;;  %s3111_s17 = smov 8  }
  0x2c   : > { %v734_v7 = vld [vmem:[#allocation2 + $0x14] sm:$0x1]  ;;  %286 = vst [vmem:[#allocation2 + $0x54] sm:$0x1] %v285_v10  ;;  %v1044_v36 = vor.u32 %v1043_v22, %v1039_v17  ;;  %v1051_v45 = vshrl.u32 %v3275_v60, 16  ;;  %v1055_v54 = vrot.slane %v1053_v38, 1 }
  0x2d   : > { %v1021_v11 = vpack.c.b16 %v1005_v4, %v1005_v4  ;;  %v3288_v13 = vld [vmem:[#allocation2 + $0x18] sm:$0xff]  ;;  %v735_v15 = vsel %vm3204_vm3, %v423_v62, %v734_v7  ;;  %v523_v48 = vor.u32 %v521_v35, %v520_v41  ;;  %v525_v49 = vrot.slane %v520_v41, 4  ;;  %v287_v51 = vld [vmem:[#allocation2 + $0x60] sm:$0x1]  ;;  %s3112_s18 = smov 40   ;;  %s3113_s19 = smov 64  }
  0x2e   : > { %736 = vst [vmem:[#allocation2 + $0x14] sm:$0x1] %v735_v15  ;;  %v741_v18 = vld [vmem:[#allocation2 + $0x20] sm:$0x1]  ;;  %1467 = vrot.lane.b32.xlu2 %v3288_v13, %s3109_s15  ;;  %v288_v55 = vsel %vm3204_vm3, 0, %v287_v51  ;;  %v1065_v60 = vshll.u32 %v3288_v13, 16  ;;  %v1056_v7 = vor.u32 %v1055_v54, %v1051_v45 }
  0x2f   : > { %v1264_v21 = vrot.slane %v1021_v11, 1  ;;  %v1046_v24 = vshll.u32 %v1021_v11, 16  ;;  %v742_v25 = vsel %vm3204_vm3, %v440_v6, %v741_v18  ;;  %v744_v26 = vld [vmem:[#allocation2 + $0x24] sm:$0xf]  ;;  %v524_v58 = vsel %vm3228_vm6, %v516_v40, %v523_v48  ;;  %289 = vst [vmem:[#allocation2 + $0x60] sm:$0x1] %v288_v55 }
  0x30   : > { %743 = vst [vmem:[#allocation2 + $0x20] sm:$0x1] %v742_v25  ;;  %v745_v27 = vsel %vm3237_vm7, %v447_v8, %v744_v26  ;;  %v748_v28 = vld [vmem:[#allocation2 + $0x2c] sm:$0x1]  ;;  %v387_v61 = vld [vmem:[%s3215_s13 + $0x38] sm:$0xf] }
  0x31   : > { %v1265_v29 = vsel %vm1262_vm9, %v1263_v12, %v1264_v21  ;;  %746 = vst [vmem:[#allocation2 + $0x24] sm:$0xf] %v745_v27  ;;  %v749_v30 = vsel %vm3204_vm3, %v457_v9, %v748_v28  ;;  %v1048_v37 = vrot.slane %v1046_v24, 1  ;;  %v1269_v1 = vrot.slane %v3288_v13, 1  ;;  %v388_v3 = vld [vmem:[%s3215_s13 + $0x3c] sm:$0xf] }
  0x32   : > { %1311 = vrot.lane.b32.xlu0 %v1265_v29, %s3110_s16  ;;  %750 = vst [vmem:[#allocation2 + $0x2c] sm:$0x1] %v749_v30  ;;  %1350 = vrot.lane.b32.xlu1 %v3288_v13, %s3108_s14  ;;  %v776_v46 = vld [vmem:[#allocation2 + $0x5c] sm:$0x1]  ;;  %v527_v4 = vshrl.u32 %v387_v61, 16  ;;  %v1063_v8 = vshrl.u32 %v3288_v13, 16 }
  0x33   : > { %v772_v42 = vld [vmem:[#allocation2 + $0x54] sm:$0xf]  ;;  %v1049_v52 = vsel %vm1037_vm10, %v1044_v36, %v1048_v37  ;;  %v777_v59 = vsel %vm3204_vm3, %v525_v49, %v776_v46  ;;  %775 = vst.msk [vmem:[#allocation2 + $0x58] sm:$0xf] %vm251_vm2, %v524_v58  ;;  %v1067_v9 = vrot.slane %v1065_v60, 1  ;;  %v530_v11 = vshll.u32 %v387_v61, 16 }
  0x34   : > { %v773_v50 = vsel %vm3237_vm7, %v515_v39, %v772_v42  ;;  %778 = vst [vmem:[#allocation2 + $0x5c] sm:$0x1] %v777_v59  ;;  %v529_v10 = vrot.slane %v527_v4, 7  ;;  %v535_v18 = vshrl.u32 %v388_v3, 16  ;;  %v275_v20 = vld [vmem:[#allocation2 + $0x30] sm:$0x1] }
  0x35   : > { %v860_v43 = vld [vmem:[#allocation2 + $0x14] sm:$0x1]  ;;  %774 = vst [vmem:[#allocation2 + $0x54] sm:$0xf] %v773_v50  ;;  %v538_v25 = vshll.u32 %v388_v3, 16  ;;  %v1068_v27 = vor.u32 %v1067_v9, %v1063_v8  ;;  %v276_v30 = vsel %vm3204_vm3, 0, %v275_v20 }
  0x36   : > { %v1006_v47 = vunpack.c.l.b16 %v860_v43  ;;  %v532_v22 = vor.u32 %v530_v11, %v529_v10  ;;  %v779_v13 = vld [vmem:[#allocation2 + $0x60] sm:$0xf]  ;;  %v3334_v24 = vrot.slane %v535_v18, 7  ;;  %v343_v26 = vld [vmem:[#allocation2 + $0x68] sm:$0x1]  ;;  %v533_v28 = vrot.slane %v529_v10, 4 }
  0x37   : > { %v863_v53 = vld [vmem:[#allocation2 + $0x20] sm:$0x1]  ;;  %v379_v31 = vld [vmem:[%s3215_s13 + $0x18] sm:$0xf]  ;;  %v296_v36 = vld [vmem:[#allocation2 + $0x84] sm:$0x1] }
  0x38   : > { %v1022_v56 = vpack.c.b16 %v1006_v47, %v1006_v47  ;;  %v1007_v57 = vunpack.c.l.b16 %v863_v53  ;;  %v3330_v17 = vld [vmem:[#allocation2 + $0x24] sm:$0xff]  ;;  %v780_v29 = vsel %vm3237_vm7, %v532_v22, %v779_v13  ;;  %v540_v37 = vor.u32 %v538_v25, %v3334_v24  ;;  %277 = vst [vmem:[#allocation2 + $0x30] sm:$0x1] %v276_v30  ;;  %v380_v38 = vld [vmem:[%s3215_s13 + $0x1c] sm:$0xf]  ;;  %s3114_s20 = smov 32  }
  0x39   : > { %v866_v21 = vld [vmem:[#allocation2 + $0x2c] sm:$0x1]  ;;  %v1077_v35 = vshll.u32 %v3330_v17, 16  ;;  %781 = vst [vmem:[#allocation2 + $0x60] sm:$0xf] %v780_v29  ;;  %v459_v39 = vshrl.u32 %v379_v31, 16 }
  0x3a   : > { %1230 = vrot.lane.b32.xlu0 %v1049_v52, %s3111_s17  ;;  %v1267_v62 = vrot.slane %v1022_v56, 1  ;;  %v1023_v63 = vpack.c.b16 %v1007_v57, %v1007_v57  ;;  %v1058_v2 = vshll.u32 %v1022_v56, 16  ;;  %v1008_v34 = vunpack.c.l.b16 %v866_v21  ;;  %v352_v43 = vld [vmem:[#allocation2 + $0x8c] sm:$0x1]  ;;  %v393_v47 = vld [vmem:[%s3215_s13 + $0x50] sm:$0xf] }
  0x3b   : > { %v344_v40 = vsel %vm3243_vm8, 0, %v343_v26  ;;  %v462_v41 = vshll.u32 %v379_v31, 16  ;;  %v467_v42 = vshrl.u32 %v380_v38, 16  ;;  %v461_v45 = vrot.slane %v459_v39, 7  ;;  %v394_v48 = vld [vmem:[%s3215_s13 + $0x54] sm:$0xf] }
  0x3c   : > { %v1268_v5 = vsel %vm1262_vm9, %v1266_v44, %v1267_v62  ;;  %v1270_v6 = vrot.slane %v1023_v63, 1  ;;  %v1060_v15 = vrot.slane %v1058_v2, 1  ;;  %v1070_v16 = vshll.u32 %v1023_v63, 16  ;;  %345 = vst [vmem:[#allocation2 + $0x68] sm:$0x1] %v344_v40  ;;  %s3115_s26 = smov 56  }
  0x3d   : > { %1430 = vrot.lane.b32.xlu2 %v1268_v5, %s3112_s18  ;;  %v541_v44 = vsel %vm3228_vm6, %v533_v28, %v540_v37  ;;  %v470_v46 = vshll.u32 %v380_v38, 16  ;;  %v3356_v50 = vpack.c.b16 %v1008_v34, %v1008_v34  ;;  %v1075_v51 = vshrl.u32 %v3330_v17, 16  ;;  %v331_v53 = vld [vmem:[#allocation2 + $0x38] sm:$0x1]  ;;  %v878_v62 = vld [vmem:[#allocation2 + $0x5c] sm:$0x1] }
  0x3e   : > { %v3328_v12 = vsel %vm1262_vm9, %v1269_v1, %v1270_v6  ;;  %v1061_v32 = vsel %vm1037_vm10, %v1056_v7, %v1060_v15  ;;  %v1072_v33 = vrot.slane %v1070_v16, 1  ;;  %782 = vst.msk [vmem:[#allocation2 + $0x64] sm:$0xf] %vm251_vm2, %v541_v44  ;;  %v3360_v52 = vrot.slane %v467_v42, 7  ;;  %v3383_v13 = vld [vmem:[#allocation2 + $0x54] sm:$0xff]  ;;  %s242_s28 = sand.u32 1, %s3097_s22  }
  0x3f   : > { %1549 = vrot.lane.b32.xlu1 %v3328_v12, %s3113_s19  ;;  %v464_v54 = vor.u32 %v462_v41, %v461_v45  ;;  %v465_v55 = vrot.slane %v461_v45, 4  ;;  %v297_v56 = vsel %vm3204_vm3, 0, %v296_v36  ;;  %v353_v57 = vsel %vm3243_vm8, 0, %v352_v43  ;;  %v751_v6 = vld [vmem:[#allocation2 + $0x30] sm:$0xf]  ;;  %s2696_s29 = sshll.u32 %s242_s28, 8 }
  0x40   : > { %v3354_v49 = vsel %vm1037_vm10, %v1068_v27, %v1072_v33  ;;  %v1079_v58 = vrot.slane %v1077_v35, 1  ;;  %v472_v59 = vor.u32 %v470_v46, %v3360_v52  ;;  %v542_v60 = vrot.slane %v3334_v24, 4  ;;  %298 = vst [vmem:[#allocation2 + $0x84] sm:$0x1] %v297_v56  ;;  %v299_v28 = vld [vmem:[#allocation2 + $0x90] sm:$0x1] }
  0x41   : > { %v578_v61 = vshrl.u32 %v393_v47, 16  ;;  %354 = vst [vmem:[#allocation2 + $0x8c] sm:$0x1] %v353_v57  ;;  %v581_v63 = vshll.u32 %v393_v47, 16  ;;  %v586_v1 = vshrl.u32 %v394_v48, 16  ;;  %v589_v2 = vshll.u32 %v394_v48, 16 }
  0x42   : > { %1313 = vrot.lane.b32.xlu0 %v1268_v5, %s3110_s16  ;;  %v332_v3 = vsel %vm3243_vm8, 0, %v331_v53  ;;  %v1082_v4 = vshll.u32 %v3356_v50, 16  ;;  %v473_v5 = vsel %vm3228_vm6, %v465_v55, %v472_v59  ;;  %v752_v8 = vsel %vm3237_vm7, %v464_v54, %v751_v6  ;;  %v355_v29 = vld [vmem:[#allocation2 + $0x98] sm:$0x1]  ;;  %v389_v44 = vld [vmem:[%s3215_s13 + $0x40] sm:$0xf] }
  0x43   : > { %v580_v7 = vrot.slane %v578_v61, 7  ;;  %333 = vst [vmem:[#allocation2 + $0x38] sm:$0x1] %v332_v3  ;;  %v783_v9 = vld [vmem:[#allocation2 + $0x68] sm:$0x1]  ;;  %v588_v10 = vrot.slane %v586_v1, 7  ;;  %v1080_v21 = vor.u32 %v1079_v58, %v1075_v51  ;;  %v1012_v24 = vunpack.c.l.b16 %v878_v62 }
  0x44   : > { %754 = vst.msk [vmem:[#allocation2 + $0x34] sm:$0xf] %vm251_vm2, %v473_v5  ;;  %v784_v11 = vsel %vm3204_vm3, %v542_v60, %v783_v9  ;;  %v1084_v22 = vrot.slane %v1082_v4, 1  ;;  %v474_v25 = vrot.slane %v3360_v52, 4  ;;  %v1272_v33 = vrot.slane %v3330_v17, 1  ;;  %s4792_s9 = scalar_lea.vmem [#allocation4], %s2696_s29 }
  0x45   : > { %1232 = vrot.lane.b32.xlu2 %v1061_v32, %s3111_s17  ;;  %753 = vst [vmem:[#allocation2 + $0x30] sm:$0xf] %v752_v8  ;;  %v583_v15 = vor.u32 %v581_v63, %v580_v7  ;;  %v584_v16 = vrot.slane %v580_v7, 4  ;;  %v591_v18 = vor.u32 %v589_v2, %v588_v10  ;;  %v593_v20 = vrot.slane %v588_v10, 4  ;;  %v395_v41 = vld [vmem:[%s3215_s13 + $0x58] sm:$0xf] }
  0x46   : > { %785 = vst [vmem:[#allocation2 + $0x68] sm:$0x1] %v784_v11  ;;  %v3401_v37 = vsel %vm1037_vm10, %v1080_v21, %v1084_v22  ;;  %v3403_v38 = vpack.c.b16 %v1012_v24, %v1012_v24  ;;  %v300_v40 = vsel %vm3204_vm3, 0, %v299_v28  ;;  %v1273_v42 = vrot.slane %v3356_v50, 1  ;;  %v390_v45 = vld [vmem:[%s3215_s13 + $0x44] sm:$0xf] }
  0x47   : > { %1395 = vrot.lane.b32.xlu1 %v1061_v32, %s3114_s20  ;;  %v592_v26 = vsel %vm3228_vm6, %v584_v16, %v591_v18  ;;  %v800_v27 = vld [vmem:[#allocation2 + $0x84] sm:$0xf]  ;;  %v290_v32 = vld [vmem:[#allocation2 + $0x6c] sm:$0x1]  ;;  %v1125_v43 = vshll.u32 %v3383_v13, 16  ;;  %v595_v46 = vshrl.u32 %v395_v41, 16 }
  0x48   : > { %v801_v30 = vsel %vm3237_vm7, %v583_v15, %v800_v27  ;;  %803 = vst.msk [vmem:[#allocation2 + $0x88] sm:$0xf] %vm251_vm2, %v592_v26  ;;  %v804_v31 = vld [vmem:[#allocation2 + $0x8c] sm:$0x1]  ;;  %v291_v36 = vsel %vm3204_vm3, 0, %v290_v32  ;;  %v356_v47 = vsel %vm3243_vm8, 0, %v355_v29  ;;  %v3422_v53 = vsel %vm1262_vm9, %v1272_v33, %v1273_v42 }
  0x49   : > { %802 = vst [vmem:[#allocation2 + $0x84] sm:$0xf] %v801_v30  ;;  %v805_v34 = vsel %vm3204_vm3, %v593_v20, %v804_v31  ;;  %v544_v48 = vshrl.u32 %v389_v44, 16  ;;  %v1130_v51 = vshll.u32 %v3403_v38, 16  ;;  %v547_v52 = vshll.u32 %v389_v44, 16  ;;  %v3432_v7 = vld [vmem:[#allocation2 + $0x60] sm:$0xff] }
  0x4a   : > { %1514 = vrot.lane.b32.xlu0 %v3354_v49, %s3115_s26  ;;  %v755_v35 = vld [vmem:[#allocation2 + $0x38] sm:$0x1]  ;;  %806 = vst [vmem:[#allocation2 + $0x8c] sm:$0x1] %v805_v34  ;;  %v552_v50 = vshrl.u32 %v390_v45, 16  ;;  %v1123_v54 = vshrl.u32 %v3383_v13, 16 }
  0x4b   : > { %v756_v39 = vsel %vm3204_vm3, %v474_v25, %v755_v35  ;;  %292 = vst [vmem:[#allocation2 + $0x6c] sm:$0x1] %v291_v36  ;;  %v1127_v55 = vrot.slane %v1125_v43, 1  ;;  %v546_v56 = vrot.slane %v544_v48, 7  ;;  %v555_v58 = vshll.u32 %v390_v45, 16  ;;  %s2831_s10 = sshll.u32 %s3174_s25, 8 }
  0x4c   : > { %757 = vst [vmem:[#allocation2 + $0x38] sm:$0x1] %v756_v39  ;;  %v3425_v57 = vrot.slane %v552_v50, 7  ;;  %v396_v59 = vld [vmem:[%s3215_s13 + $0x5c] sm:$0xf]  ;;  %v597_v60 = vrot.slane %v595_v46, 7 }
  0x4d   : > { %1397 = vrot.lane.b32.xlu2 %v3354_v49, %s3114_s20  ;;  %301 = vst [vmem:[#allocation2 + $0x90] sm:$0x1] %v300_v40  ;;  %v549_v61 = vor.u32 %v547_v52, %v546_v56  ;;  %v598_v62 = vshll.u32 %v395_v41, 16  ;;  %v1132_v63 = vrot.slane %v1130_v51, 1  ;;  %v1128_v1 = vor.u32 %v1127_v55, %v1123_v54  ;;  %v881_v2 = vld [vmem:[#allocation2 + $0x68] sm:$0x1] }
  0x4e   : > { %357 = vst [vmem:[#allocation2 + $0x98] sm:$0x1] %v356_v47  ;;  %v550_v3 = vrot.slane %v546_v56, 4  ;;  %v603_v5 = vshrl.u32 %v396_v59, 16  ;;  %v1285_v6 = vrot.slane %v3403_v38, 1  ;;  %v557_v8 = vor.u32 %v555_v58, %v3425_v57  ;;  %v3465_v42 = vld [vmem:[#allocation2 + $0x30] sm:$0xff] }
  0x4f   : > { %1469 = vrot.lane.b32.xlu1 %v3330_v17, %s3109_s15  ;;  %v601_v10 = vrot.slane %v597_v60, 4  ;;  %v600_v11 = vor.u32 %v598_v62, %v597_v60  ;;  %v346_v16 = vld [vmem:[#allocation2 + $0x74] sm:$0x1]  ;;  %v1013_v18 = vunpack.c.l.b16 %v881_v2  ;;  %v302_v24 = vld [vmem:[#allocation2 + $0x9c] sm:$0x1]  ;;  %v3444_v25 = vsel %vm1037_vm10, %v1128_v1, %v1132_v63  ;;  %s3063_s12 = scalar_lea.hbm %s4914_s6, 512 }
  0x50   : > { %v558_v22 = vsel %vm3228_vm6, %v550_v3, %v557_v8  ;;  %v606_v26 = vshll.u32 %v396_v59, 16  ;;  %v397_v27 = vld [vmem:[%s3215_s13 + $0x60] sm:$0xf]  ;;  %v1137_v28 = vshll.u32 %v3432_v7, 16  ;;  %v347_v31 = vsel %vm3243_vm8, 0, %v346_v16  ;;  %v3457_v33 = vld [vmem:[#allocation2 + $0x84] sm:$0xff] }
  0x51   : > { %v890_v20 = vld [vmem:[#allocation2 + $0x8c] sm:$0x1]  ;;  %789 = vst.msk [vmem:[#allocation2 + $0x70] sm:$0xf] %vm251_vm2, %v558_v22  ;;  %v398_v32 = vld [vmem:[%s3215_s13 + $0x64] sm:$0xf]  ;;  %v3461_v38 = vpack.c.b16 %v1013_v18, %v1013_v18 }
  0x52   : > { %1432 = vrot.lane.b32.xlu0 %v3328_v12, %s3112_s18  ;;  %v786_v4 = vld [vmem:[#allocation2 + $0x6c] sm:$0xf]  ;;  %v358_v36 = vld [vmem:[#allocation2 + $0xa4] sm:$0x1]  ;;  %v1016_v39 = vunpack.c.l.b16 %v890_v20  ;;  %348 = vst [vmem:[#allocation2 + $0x74] sm:$0x1] %v347_v31 }
  0x53   : > { %v787_v9 = vsel %vm3237_vm7, %v549_v61, %v786_v4  ;;  %v869_v21 = vld [vmem:[#allocation2 + $0x38] sm:$0x1]  ;;  %v303_v40 = vsel %vm3204_vm3, 0, %v302_v24  ;;  %v612_v41 = vshrl.u32 %v397_v27, 16  ;;  %v615_v46 = vshll.u32 %v397_v27, 16 }
  0x54   : > { %788 = vst [vmem:[#allocation2 + $0x6c] sm:$0xf] %v787_v9  ;;  %v807_v15 = vld [vmem:[#allocation2 + $0x90] sm:$0xf]  ;;  %v1009_v43 = vunpack.c.l.b16 %v869_v21  ;;  %v620_v48 = vshrl.u32 %v398_v32, 16  ;;  %v623_v51 = vshll.u32 %v398_v32, 16  ;;  %v3477_v54 = vpack.c.b16 %v1016_v39, %v1016_v39 }
  0x55   : > { %1516 = vrot.lane.b32.xlu2 %v3401_v37, %s3115_s26  ;;  %v808_v29 = vsel %vm3237_vm7, %v600_v11, %v807_v15  ;;  %v811_v30 = vld [vmem:[#allocation2 + $0x98] sm:$0x1]  ;;  %304 = vst [vmem:[#allocation2 + $0x9c] sm:$0x1] %v303_v40  ;;  %v614_v47 = vrot.slane %v612_v41, 7  ;;  %v359_v52 = vsel %vm3243_vm8, 0, %v358_v36 }
  0x56   : > { %809 = vst [vmem:[#allocation2 + $0x90] sm:$0xf] %v808_v29  ;;  %v1173_v50 = vshll.u32 %v3457_v33, 16  ;;  %v559_v55 = vrot.slane %v3425_v57, 4  ;;  %v622_v58 = vrot.slane %v620_v48, 7  ;;  %v1135_v59 = vshrl.u32 %v3432_v7, 16 }
  0x57   : > { %1234 = vrot.lane.b32.xlu1 %v3354_v49, %s3111_s17  ;;  %v1284_v49 = vrot.slane %v3383_v13, 1  ;;  %v618_v56 = vrot.slane %v614_v47, 4  ;;  %360 = vst [vmem:[#allocation2 + $0xa4] sm:$0x1] %v359_v52  ;;  %v1139_v60 = vrot.slane %v1137_v28, 1  ;;  %v1142_v61 = vshll.u32 %v3461_v38, 16 }
  0x58   : > { %v617_v62 = vor.u32 %v615_v46, %v614_v47  ;;  %v1025_v63 = vpack.c.b16 %v1009_v43, %v1009_v43  ;;  %v625_v1 = vor.u32 %v623_v51, %v622_v58  ;;  %v1171_v2 = vshrl.u32 %v3457_v33, 16 }
  0x59   : > { %v1175_v3 = vrot.slane %v1173_v50, 1  ;;  %v790_v57 = vld [vmem:[#allocation2 + $0x74] sm:$0x1]  ;;  %v1178_v4 = vshll.u32 %v3477_v54, 16  ;;  %v627_v9 = vrot.slane %v622_v58, 4  ;;  %v1144_v11 = vrot.slane %v1142_v61, 1 }
  0x5a   : > { %1551 = vrot.lane.b32.xlu0 %v3422_v53, %s3113_s19  ;;  %v1087_v16 = vshrl.u32 %v3465_v42, 16  ;;  %v1094_v20 = vshll.u32 %v1025_v63, 16  ;;  %v1287_v32 = vrot.slane %v3432_v7, 1  ;;  %v1296_v41 = vrot.slane %v3457_v33, 1 }
  0x5b   : > { %v1176_v22 = vor.u32 %v1175_v3, %v1171_v2  ;;  %v1180_v24 = vrot.slane %v1178_v4, 1  ;;  %v3520_v40 = vld [vmem:[#allocation2 + $0x6c] sm:$0xff]  ;;  %v1297_v43 = vrot.slane %v3477_v54, 1  ;;  %v1275_v46 = vrot.slane %v3465_v42, 1 }
  0x5c   : > { %v814_v8 = vld [vmem:[#allocation2 + $0x9c] sm:$0xf]  ;;  %v1096_v28 = vrot.slane %v1094_v20, 1  ;;  %v1276_v47 = vrot.slane %v1025_v63, 1  ;;  %v1149_v48 = vshll.u32 %v3520_v40, 16  ;;  %v1147_v58 = vshrl.u32 %v3520_v40, 16 }
  0x5d   : > { %1315 = vrot.lane.b32.xlu2 %v3328_v12, %s3110_s16  ;;  %v605_v12 = vrot.slane %v603_v5, 7  ;;  %v791_v5 = vsel %vm3204_vm3, %v559_v55, %v790_v57  ;;  %v815_v15 = vsel %vm3237_vm7, %v617_v62, %v814_v8  ;;  %v3537_v51 = vsel %vm1262_vm9, %v1296_v41, %v1297_v43  ;;  %v278_v62 = vld [vmem:[#allocation2 + $0x3c] sm:$0x1]  ;;  %v334_v63 = vld [vmem:[#allocation2 + $0x44] sm:$0x1] }
  0x5e   : > { %792 = vst [vmem:[#allocation2 + $0x74] sm:$0x1] %v791_v5  ;;  %v818_v21 = vld [vmem:[#allocation2 + $0xa4] sm:$0x1]  ;;  %v279_v2 = vsel %vm3204_vm3, 0, %v278_v62  ;;  %v335_v3 = vsel %vm3243_vm8, 0, %v334_v63 }
  0x5f   : > { %1352 = vrot.lane.b32.xlu1 %v3330_v17, %s3108_s14  ;;  %v3455_v17 = vsel %vm1262_vm9, %v1284_v49, %v1285_v6  ;;  %v608_v34 = vor.u32 %v606_v26, %v605_v12  ;;  %v610_v35 = vrot.slane %v605_v12, 4  ;;  %v1089_v49 = vshll.u32 %v3465_v42, 16  ;;  %816 = vst [vmem:[#allocation2 + $0x9c] sm:$0xf] %v815_v15  ;;  %v381_v5 = vld [vmem:[%s3215_s13 + $0x20] sm:$0xf] }
  0x60   : > { %v626_v6 = vsel %vm3228_vm6, %v618_v56, %v625_v1  ;;  %v819_v12 = vsel %vm3204_vm3, %v627_v9, %v818_v21  ;;  %v3542_v56 = vsel %vm1262_vm9, %v1275_v46, %v1276_v47  ;;  %280 = vst [vmem:[#allocation2 + $0x3c] sm:$0x1] %v279_v2  ;;  %v476_v8 = vshrl.u32 %v381_v5, 16  ;;  %v850_v46 = vld [vmem:[%s4909_s1 + $0x20] sm:$0xf] }
  0x61   : > { %v609_v44 = vsel %vm3228_vm6, %v601_v10, %v608_v34  ;;  %v812_v45 = vsel %vm3204_vm3, %v610_v35, %v811_v30  ;;  %v1140_v10 = vor.u32 %v1139_v60, %v1135_v59  ;;  %v1091_v18 = vrot.slane %v1089_v49, 1  ;;  %817 = vst.msk [vmem:[#allocation2 + $0xa0] sm:$0xf] %vm251_vm2, %v626_v6  ;;  %v382_v6 = vld [vmem:[%s3215_s13 + $0x24] sm:$0xf] }
  0x62   : > { %1244 = vrot.lane.b32.xlu0 %v3444_v25, %s3111_s17  ;;  %810 = vst.msk [vmem:[#allocation2 + $0x94] sm:$0xf] %vm251_vm2, %v609_v44  ;;  %v3509_v30 = vsel %vm1037_vm10, %v1176_v22, %v1180_v24  ;;  %v1288_v34 = vrot.slane %v3461_v38, 1  ;;  %v1151_v59 = vrot.slane %v1149_v48, 1  ;;  %v484_v9 = vshrl.u32 %v382_v6, 16 }
  0x63   : > { %813 = vst [vmem:[#allocation2 + $0x98] sm:$0x1] %v812_v45  ;;  %v3504_v26 = vsel %vm1037_vm10, %v1140_v10, %v1144_v11  ;;  %v1092_v27 = vor.u32 %v1091_v18, %v1087_v16  ;;  %v478_v16 = vrot.slane %v476_v8, 7  ;;  %v479_v18 = vshll.u32 %v381_v5, 16 }
  0x64   : > { %820 = vst [vmem:[#allocation2 + $0xa4] sm:$0x1] %v819_v12  ;;  %v1152_v11 = vor.u32 %v1151_v59, %v1147_v58  ;;  %v486_v20 = vrot.slane %v484_v9, 7  ;;  %v487_v21 = vshll.u32 %v382_v6, 16  ;;  %v1290_v22 = vrot.slane %v3520_v40, 1 }
  0x65   : > { %1325 = vrot.lane.b32.xlu2 %v3455_v17, %s3110_s16  ;;  %v3516_v36 = vsel %vm1037_vm10, %v1092_v27, %v1096_v28  ;;  %v884_v39 = vld [vmem:[#allocation2 + $0x74] sm:$0x1]  ;;  %336 = vst [vmem:[#allocation2 + $0x44] sm:$0x1] %v335_v3  ;;  %v481_v28 = vor.u32 %v479_v18, %v478_v16  ;;  %vm1908_vm11 = vcmask 1043456   ;;  %vm1581_vm12 = vcmask 64512  }
  0x66   : > { %v1014_v45 = vunpack.c.l.b16 %v884_v39  ;;  %v391_v6 = vld [vmem:[%s3215_s13 + $0x48] sm:$0xf]  ;;  %v2811_v18 = vld [vmem:[%s4909_s1 + $0x10] sm:$0xff]  ;;  %vm1614_vm13 = vcmask 130048   ;;  %vm1647_vm14 = vcmask 195584   ;;  %vm1713_vm15 = vcmask 326656  }
  0x67   : > { %1362 = vrot.lane.b32.xlu1 %v3432_v7, %s3108_s14  ;;  %v3528_v7 = vsel %vm1262_vm9, %v1287_v32, %v1288_v34  ;;  %v489_v32 = vor.u32 %v487_v21, %v486_v20  ;;  %v491_v34 = vrot.slane %v486_v20, 4  ;;  %v758_v39 = vld [vmem:[#allocation2 + $0x3c] sm:$0xf]  ;;  %v564_v21 = vshll.u32 %v391_v6, 16 }
  0x68   : > { %v1030_v55 = vpack.c.b16 %v1014_v45, %v1014_v45  ;;  %v3553_v57 = vld [vmem:[#allocation2 + $0x9c] sm:$0xff]  ;;  %v759_v43 = vsel %vm3237_vm7, %v481_v28, %v758_v39  ;;  %v2810_v28 = vld [vmem:[%s4909_s1 + $0x8] sm:$0xff]  ;;  %vm1680_vm0 = vcmask 261120   ;;  %vm1746_vm1 = vcmask 392192  }
  0x69   : > { %v3511_v31 = vld [vmem:[#allocation2 + $0x90] sm:$0xff]  ;;  %v1197_v27 = vshll.u32 %v3553_v57, 16  ;;  %v1195_v45 = vshrl.u32 %v3553_v57, 16  ;;  %760 = vst [vmem:[#allocation2 + $0x3c] sm:$0xf] %v759_v43  ;;  %v1302_v9 = vrot.slane %v3553_v57, 1 }
  0x6a   : > { %1399 = vrot.lane.b32.xlu0 %v3401_v37, %s3114_s20  ;;  %v893_v29 = vld [vmem:[#allocation2 + $0x98] sm:$0x1]  ;;  %v1185_v44 = vshll.u32 %v3511_v31, 16  ;;  %v1183_v52 = vshrl.u32 %v3511_v31, 16  ;;  %v1154_v1 = vshll.u32 %v1030_v55, 16  ;;  %v1291_v24 = vrot.slane %v1030_v55, 1 }
  0x6b   : > { %v1017_v35 = vunpack.c.l.b16 %v893_v29  ;;  %v896_v61 = vld [vmem:[#allocation2 + $0xa4] sm:$0x1]  ;;  %v482_v29 = vrot.slane %v478_v16, 4  ;;  %v1299_v55 = vrot.slane %v3511_v31, 1  ;;  %vm1779_vm4 = vcmask 457728  }
  0x6c   : > { %v1187_v50 = vrot.slane %v1185_v44, 1  ;;  %v1018_v4 = vunpack.c.l.b16 %v896_v61  ;;  %v1156_v15 = vrot.slane %v1154_v1, 1  ;;  %v762_v44 = vld [vmem:[#allocation2 + $0x44] sm:$0x1]  ;;  %v3586_v48 = vsel %vm1262_vm9, %v1290_v22, %v1291_v24  ;;  %v293_v1 = vld [vmem:[#allocation2 + $0x78] sm:$0x1] }
  0x6d   : > { %1434 = vrot.lane.b32.xlu2 %v3422_v53, %s3112_s18  ;;  %v3530_v38 = vpack.c.b16 %v1017_v35, %v1017_v35  ;;  %v490_v41 = vsel %vm3228_vm6, %v482_v29, %v489_v32  ;;  %v763_v47 = vsel %vm3204_vm3, %v491_v34, %v762_v44  ;;  %v294_v3 = vsel %vm3204_vm3, 0, %v293_v1 }
  0x6e   : > { %v1188_v60 = vor.u32 %v1187_v50, %v1183_v52  ;;  %v3565_v12 = vpack.c.b16 %v1018_v4, %v1018_v4  ;;  %v3571_v35 = vsel %vm1037_vm10, %v1152_v11, %v1156_v15  ;;  %v1199_v52 = vrot.slane %v1197_v27, 1  ;;  %761 = vst.msk [vmem:[#allocation2 + $0x40] sm:$0xf] %vm251_vm2, %v490_v41  ;;  %v392_v4 = vld [vmem:[%s3215_s13 + $0x4c] sm:$0xf] }
  0x6f   : > { %1471 = vrot.lane.b32.xlu1 %v3465_v42, %s3109_s15  ;;  %v1190_v54 = vshll.u32 %v3530_v38, 16  ;;  %v1300_v58 = vrot.slane %v3530_v38, 1  ;;  %764 = vst [vmem:[#allocation2 + $0x44] sm:$0x1] %v763_v47  ;;  %v2812_v38 = vld [vmem:[%s4909_s1 + $0x18] sm:$0xff]  ;;  %v569_v8 = vshrl.u32 %v392_v4, 16 }
  0x70   : > { %v1202_v50 = vshll.u32 %v3565_v12, 16  ;;  %v1200_v61 = vor.u32 %v1199_v52, %v1195_v45  ;;  %295 = vst [vmem:[#allocation2 + $0x78] sm:$0x1] %v294_v3  ;;  %v1303_v11 = vrot.slane %v3565_v12, 1  ;;  %v561_v15 = vshrl.u32 %v391_v6, 16 }
  0x71   : > { %v1192_v49 = vrot.slane %v1190_v54, 1  ;;  %v1865_v54 = vunpack.c.l.b16 %v850_v46  ;;  %v571_v16 = vrot.slane %v569_v8, 7  ;;  %v572_v22 = vshll.u32 %v392_v4, 16  ;;  %v2809_v46 = vld [vmem:[%s4909_s1] sm:$0xff]  ;;  %v337_v47 = vld [vmem:[#allocation2 + $0x50] sm:$0x1] }
  0x72   : > { %1409 = vrot.lane.b32.xlu0 %v3504_v26, %s3114_s20  ;;  %v1204_v62 = vrot.slane %v1202_v50, 1  ;;  %v563_v20 = vrot.slane %v561_v15, 7  ;;  %v3627_v12 = vsel %vm1262_vm9, %v1302_v9, %v1303_v11  ;;  %v281_v50 = vld [vmem:[#allocation2 + $0x48] sm:$0x1]  ;;  %v361_v6 = vld [vmem:[#allocation2 + $0xb0] sm:$0x1] }
  0x73   : > { %v3560_v10 = vsel %vm1037_vm10, %v1188_v60, %v1192_v49  ;;  %v1870_v59 = vpack.c.b16 %v1865_v54, %v1865_v54  ;;  %v349_v49 = vld [vmem:[#allocation2 + $0x80] sm:$0x1]  ;;  %v576_v24 = vrot.slane %v571_v16, 4  ;;  %v574_v39 = vor.u32 %v572_v22, %v571_v16  ;;  %v305_v16 = vld [vmem:[#allocation2 + $0xa8] sm:$0x1] }
  0x74   : > { %v350_v2 = vsel %vm3243_vm8, 0, %v349_v49  ;;  %v3612_v5 = vsel %vm1037_vm10, %v1200_v61, %v1204_v62  ;;  %v567_v29 = vrot.slane %v563_v20, 4  ;;  %v566_v34 = vor.u32 %v564_v21, %v563_v20 }
  0x75   : > { %1252 = vrot.lane.b32.xlu2 %v3509_v30, %s3111_s17  ;;  %v1910_v63 = vsel %vm1908_vm11, %v1870_v59, 0  ;;  %351 = vst [vmem:[#allocation2 + $0x80] sm:$0x1] %v350_v2  ;;  %v282_v54 = vsel %vm3204_vm3, 0, %v281_v50  ;;  %v383_v59 = vld [vmem:[%s3215_s13 + $0x28] sm:$0xf] }
  0x76   : > { %1915 = vmatpush.bf16.msra.mxu0 %v1910_v63  ;;  %2833 = vmatpush.bf16.msra.mxu2 %v1910_v63  ;;  %283 = vst [vmem:[#allocation2 + $0x48] sm:$0x1] %v282_v54  ;;  %v493_v62 = vshrl.u32 %v383_v59, 16  ;;  %v496_v2 = vshll.u32 %v383_v59, 16  ;;  %vm1812_vm5 = vcmask 523264   ;;  %vm1875_vm11 = vcmask 588800  }
  0x77   : > { %1518 = vrot.lane.b32.xlu1 %v3516_v36, %s3115_s26  ;;  %2834 = vmatpush.bf16.msra.mxu3 %v1910_v63  ;;  %v793_v41 = vld [vmem:[#allocation2 + $0x78] sm:$0xf] }
  0x78   : > { %2832 = vmatpush.bf16.msra.mxu1 %v1910_v63  ;;  %v794_v44 = vsel %vm3237_vm7, %v566_v34, %v793_v41  ;;  %v495_v1 = vrot.slane %v493_v62, 7  ;;  %v399_v41 = vld [vmem:[%s3215_s13 + $0x68] sm:$0xf] }
  0x79   : > { %795 = vst [vmem:[#allocation2 + $0x78] sm:$0xf] %v794_v44 }
  0x7a   : > { %1444 = vrot.lane.b32.xlu0 %v3528_v7, %s3112_s18  ;;  %1916 = vmatpush.bf16.msra.mxu0 %v2812_v38  ;;  %v499_v15 = vrot.slane %v495_v1, 4  ;;  %v498_v21 = vor.u32 %v496_v2, %v495_v1 }
  0x7b   : > { %2836 = vmatpush.bf16.msra.mxu2 %v2812_v38  ;;  %2837 = vmatpush.bf16.msra.mxu3 %v2812_v38 }
  0x7c   : > { %2835 = vmatpush.bf16.msra.mxu1 %v2812_v38  ;;  %v797_v32 = vld [vmem:[#allocation2 + $0x80] sm:$0x1] }
  0x7d   : > { %1333 = vrot.lane.b32.xlu2 %v3537_v51, %s3110_s16  ;;  %v798_v43 = vsel %vm3204_vm3, %v576_v24, %v797_v32  ;;  %v765_v24 = vld [vmem:[#allocation2 + $0x48] sm:$0xf] }
  0x7e   : > { %1917 = vmatpush.bf16.msra.mxu0 %v2811_v18  ;;  %799 = vst [vmem:[#allocation2 + $0x80] sm:$0x1] %v798_v43  ;;  %v766_v34 = vsel %vm3237_vm7, %v498_v21, %v765_v24  ;;  %v3032_v21 = vld [vmem:[#allocation2] sm:$0xff] }
  0x7f   : > { %1553 = vrot.lane.b32.xlu1 %v3542_v56, %s3113_s19  ;;  %2839 = vmatpush.bf16.msra.mxu2 %v2811_v18  ;;  %767 = vst [vmem:[#allocation2 + $0x48] sm:$0xf] %v766_v34 }
  0x80   : > { %2840 = vmatpush.bf16.msra.mxu3 %v2811_v18  ;;  %2838 = vmatpush.bf16.msra.mxu1 %v2811_v18  ;;  %v362_v18 = vsel %vm3243_vm8, 0, %v361_v6 }
  0x81   : > { %363 = vst [vmem:[#allocation2 + $0xb0] sm:$0x1] %v362_v18 }
  0x82   : > { %1481 = vrot.lane.b32.xlu0 %v3520_v40, %s3109_s15  ;;  %1918 = vmatpush.bf16.msra.mxu0 %v2810_v28 }
  0x83   : > { %2842 = vmatpush.bf16.msra.mxu2 %v2810_v28 }
  0x84   : > { %2843 = vmatpush.bf16.msra.mxu3 %v2810_v28  ;;  %2841 = vmatpush.bf16.msra.mxu1 %v2810_v28  ;;  %v306_v28 = vsel %vm3204_vm3, 0, %v305_v16 }
  0x85   : > { %1370 = vrot.lane.b32.xlu2 %v3511_v31, %s3108_s14  ;;  %v3599_v31 = vsel %vm1262_vm9, %v1299_v55, %v1300_v58  ;;  %v872_v55 = vld [vmem:[#allocation2 + $0x44] sm:$0x1]  ;;  %v384_v58 = vld [vmem:[%s3215_s13 + $0x2c] sm:$0xf]  ;;  %307 = vst [vmem:[#allocation2 + $0xa8] sm:$0x1] %v306_v28 }
  0x86   : > { %1919 = vmatpush.bf16.msra.mxu0 %v2809_v46  ;;  %v501_v61 = vshrl.u32 %v384_v58, 16  ;;  %v1010_v49 = vunpack.c.l.b16 %v872_v55  ;;  %v504_v3 = vshll.u32 %v384_v58, 16  ;;  %v632_v55 = vshll.u32 %v399_v41, 16 }
  0x87   : > { %1417 = vrot.lane.b32.xlu1 %v3560_v10, %s3114_s20  ;;  %2845 = vmatpush.bf16.msra.mxu2 %v2809_v46 }
  0x88   : > { %v3594_v60 = vpop.permute.xlu2 %1467  ;;  %2846 = vmatpush.bf16.msra.mxu3 %v2809_v46  ;;  %2844 = vmatpush.bf16.msra.mxu1 %v2809_v46  ;;  %v503_v38 = vrot.slane %v501_v61, 7  ;;  %v3675_v20 = vpack.c.b16 %v1010_v49, %v1010_v49  ;;  %v629_v46 = vshrl.u32 %v399_v41, 16 }
  0x8a   : > { %1528 = vrot.lane.b32.xlu0 %v3571_v35, %s3115_s26  ;;  %v508_v4 = vrot.slane %v503_v38, 4  ;;  %v506_v22 = vor.u32 %v504_v3, %v503_v38  ;;  %v1106_v50 = vshll.u32 %v3675_v20, 16  ;;  %v825_v38 = vld [vmem:[#allocation2 + $0xb0] sm:$0x1]  ;;  %v1279_v41 = vrot.slane %v3675_v20, 1 }
  0x8c   : > { %v507_v32 = vsel %vm3228_vm6, %v499_v15, %v506_v22  ;;  %v1108_v1 = vrot.slane %v1106_v50, 1  ;;  %v887_v15 = vld [vmem:[#allocation2 + $0x80] sm:$0x1] }
  0x8d   : > { %1563 = vrot.lane.b32.xlu2 %v3586_v48, %s3113_s19  ;;  %768 = vst.msk [vmem:[#allocation2 + $0x4c] sm:$0xf] %vm251_vm2, %v507_v32 }
  0x8f   : > { %1489 = vrot.lane.b32.xlu1 %v3553_v57, %s3109_s15 }
  0x92   : > { %1452 = vrot.lane.b32.xlu0 %v3599_v31, %s3112_s18 }
  0x95   : > { %1536 = vrot.lane.b32.xlu2 %v3612_v5, %s3115_s26 }
  0x97   : > { %v3622_v27 = vpop.permute.xlu2 %1430  ;;  %1236 = vrot.lane.b32.xlu1 %v3401_v37, %s3111_s17  ;;  %v575_v37 = vsel %vm3228_vm6, %v567_v29, %v574_v39  ;;  %v400_v29 = vld [vmem:[%s3215_s13 + $0x6c] sm:$0xf] }
  0x98   : > { %796 = vst.msk [vmem:[#allocation2 + $0x7c] sm:$0xf] %vm251_vm2, %v575_v37  ;;  %v637_v43 = vshrl.u32 %v400_v29, 16  ;;  %v640_v58 = vshll.u32 %v400_v29, 16  ;;  %v1015_v29 = vunpack.c.l.b16 %v887_v15 }
  0x9a   : > { %1571 = vrot.lane.b32.xlu0 %v3627_v12, %s3113_s19  ;;  %v639_v54 = vrot.slane %v637_v43, 7  ;;  %v1031_v43 = vpack.c.b16 %v1015_v29, %v1015_v29 }
  0x9c   : > { %v3643_v45 = vpop.permute.xlu1 %1348  ;;  %v644_v59 = vrot.slane %v639_v54, 4  ;;  %v642_v3 = vor.u32 %v640_v58, %v639_v54  ;;  %v3033_v58 = vld [vmem:[#allocation2 + $0xc] sm:$0xff] }
  0x9d   : > { %1317 = vrot.lane.b32.xlu2 %v3422_v53, %s3110_s16  ;;  %v338_v53 = vsel %vm3243_vm8, 0, %v337_v47 }
  0x9e   : > { %339 = vst [vmem:[#allocation2 + $0x50] sm:$0x1] %v338_v53  ;;  %v631_v53 = vrot.slane %v629_v46, 7  ;;  %v826_v6 = vsel %vm3204_vm3, %v644_v59, %v825_v38 }
  0x9f   : > { %v3648_v52 = vpop.permute.xlu2 %1232  ;;  %1354 = vrot.lane.b32.xlu1 %v3465_v42, %s3108_s14  ;;  %v3660_v42 = vld [vmem:[#allocation2 + $0x3c] sm:$0xff]  ;;  %827 = vst [vmem:[#allocation2 + $0xb0] sm:$0x1] %v826_v6 }
  0xa0   : > { %v1101_v11 = vshll.u32 %v3660_v42, 16  ;;  %v1099_v37 = vshrl.u32 %v3660_v42, 16  ;;  %v634_v49 = vor.u32 %v632_v55, %v631_v53  ;;  %v635_v2 = vrot.slane %v631_v53, 4 }
  0xa1   : > { %v1166_v55 = vshll.u32 %v1031_v43, 16  ;;  %v1585_v59 = vsel %vm1581_vm12, %v3033_v58, %v3648_v52 }
  0xa2   : > { %1246 = vrot.lane.b32.xlu0 %v3504_v26, %s3111_s17  ;;  %v1103_v44 = vrot.slane %v1101_v11, 1  ;;  %v643_v18 = vsel %vm3228_vm6, %v635_v2, %v642_v3 }
  0xa3   : > { %824 = vst.msk [vmem:[#allocation2 + $0xac] sm:$0xf] %vm251_vm2, %v643_v18 }
  0xa4   : > { %v3662_v63 = vpop.permute.xlu0 %1311  ;;  %v3670_v9 = vpop.permute.xlu1 %1350  ;;  %v1104_v62 = vor.u32 %v1103_v44, %v1099_v37 }
  0xa5   : > { %1327 = vrot.lane.b32.xlu2 %v3528_v7, %s3110_s16 }
  0xa6   : > { %v3709_v28 = vsel %vm1037_vm10, %v1104_v62, %v1108_v1  ;;  %v1168_v1 = vrot.slane %v1166_v55, 1 }
  0xa7   : > { %v3666_v8 = vpop.permute.xlu2 %1397  ;;  %1364 = vrot.lane.b32.xlu1 %v3520_v40, %s3108_s14  ;;  %v769_v40 = vld [vmem:[#allocation2 + $0x50] sm:$0x1] }
  0xa8   : > { %v770_v39 = vsel %vm3204_vm3, %v508_v4, %v769_v40  ;;  %v821_v4 = vld [vmem:[#allocation2 + $0xa8] sm:$0xf]  ;;  %v3711_v40 = vld [vmem:[#allocation2 + $0x78] sm:$0xff] }
  0xa9   : > { %771 = vst [vmem:[#allocation2 + $0x50] sm:$0x1] %v770_v39  ;;  %v822_v16 = vsel %vm3237_vm7, %v634_v49, %v821_v4  ;;  %v1278_v39 = vrot.slane %v3660_v42, 1  ;;  %v1161_v37 = vshll.u32 %v3711_v40, 16  ;;  %v1159_v54 = vshrl.u32 %v3711_v40, 16 }
  0xaa   : > { %1401 = vrot.lane.b32.xlu0 %v3516_v36, %s3114_s20  ;;  %823 = vst [vmem:[#allocation2 + $0xa8] sm:$0xf] %v822_v16 }
  0xab   : > { %v3732_v20 = vsel %vm1262_vm9, %v1278_v39, %v1279_v41  ;;  %v1163_v53 = vrot.slane %v1161_v37, 1  ;;  %v899_v39 = vld [vmem:[#allocation2 + $0xb0] sm:$0x1] }
  0xac   : > { %v1231_v47 = vpop.permute.xlu0 %1230 }
  0xad   : > { %1436 = vrot.lane.b32.xlu2 %v3542_v56, %s3112_s18  ;;  %v1583_v22 = vsel %vm1581_vm12, %v3032_v21, %v1231_v47  ;;  %v1164_v38 = vor.u32 %v1163_v53, %v1159_v54 }
  0xae   : > { %v1616_v32 = vsel %vm1614_vm13, %v1583_v22, %v3662_v63  ;;  %v1294_v22 = vrot.slane %v1031_v43, 1  ;;  %v1019_v43 = vunpack.c.l.b16 %v899_v39 }
  0xaf   : > { %v3694_v61 = vpop.permute.xlu2 %1516  ;;  %1473 = vrot.lane.b32.xlu1 %v3660_v42, %s3109_s15  ;;  %v1649_v44 = vsel %vm1647_vm14, %v1616_v32, %v3643_v45  ;;  %v3754_v6 = vsel %vm1037_vm10, %v1164_v38, %v1168_v1 }
  0xb0   : > { %v875_v52 = vld [vmem:[#allocation2 + $0x50] sm:$0x1]  ;;  %v1035_v55 = vpack.c.b16 %v1019_v43, %v1019_v43 }
  0xb1   : > { %v1550_v11 = vpop.permute.xlu1 %1549  ;;  %v1011_v15 = vunpack.c.l.b16 %v875_v52 }
  0xb2   : > { %1411 = vrot.lane.b32.xlu0 %v3571_v35, %s3114_s20  ;;  %v1214_v38 = vshll.u32 %v1035_v55, 16  ;;  %v1306_v39 = vrot.slane %v1035_v55, 1 }
  0xb4   : > { %v1314_v24 = vpop.permute.xlu0 %1313  ;;  %v1216_v52 = vrot.slane %v1214_v38, 1 }
  0xb5   : > { %1254 = vrot.lane.b32.xlu2 %v3560_v10, %s3111_s17 }
  0xb7   : > { %v3717_v34 = vpop.permute.xlu2 %1315  ;;  %1520 = vrot.lane.b32.xlu1 %v3709_v28, %s3115_s26 }
  0xb9   : > { %v1396_v46 = vpop.permute.xlu1 %1395 }
  0xba   : > { %1446 = vrot.lane.b32.xlu0 %v3586_v48, %s3112_s18  ;;  %v1682_v63 = vsel %vm1680_vm0, %v1649_v44, %v1396_v46 }
  0xbb   : > { %v1715_v47 = vsel %vm1713_vm15, %v1682_v63, %v3622_v27 }
  0xbc   : > { %v1515_v50 = vpop.permute.xlu0 %1514  ;;  %v1748_v45 = vsel %vm1746_vm1, %v1715_v47, %v3594_v60  ;;  %v1618_v60 = vsel %vm1614_vm13, %v1585_v59, %v1314_v24  ;;  %v1027_v24 = vpack.c.b16 %v1011_v15, %v1011_v15  ;;  %v3776_v47 = vld [vmem:[#allocation2 + $0xa8] sm:$0xff] }
  0xbd   : > { %v1781_v62 = vsel %vm1779_vm4, %v1748_v45, %v1515_v50  ;;  %1335 = vrot.lane.b32.xlu2 %v3599_v31, %s3110_s16  ;;  %v1651_v3 = vsel %vm1647_vm14, %v1618_v60, %v3670_v9  ;;  %v1293_v9 = vrot.slane %v3711_v40, 1  ;;  %v1209_v58 = vshll.u32 %v3776_v47, 16 }
  0xbe   : > { %v1814_v27 = vsel %vm1812_vm5, %v1781_v62, %v1550_v11  ;;  %v3756_v11 = vld [vmem:[#allocation2 + $0x48] sm:$0xff]  ;;  %v1684_v16 = vsel %vm1680_vm0, %v1651_v3, %v3666_v8  ;;  %v1118_v63 = vshll.u32 %v1027_v24, 16  ;;  %v1282_v15 = vrot.slane %v1027_v24, 1 }
  0xbf   : > { %v3743_v49 = vpop.permute.xlu2 %1325  ;;  %1555 = vrot.lane.b32.xlu1 %v3732_v20, %s3113_s19  ;;  %2787 = vmatmul.msk.bf16.vlgmr.msra.gmra.mxu0 %vm1875_vm11, %v1814_v27  ;;  %v1113_v29 = vshll.u32 %v3756_v11, 16  ;;  %v3773_v8 = vsel %vm1262_vm9, %v1293_v9, %v1294_v22  ;;  %v1111_v44 = vshrl.u32 %v3756_v11, 16  ;;  %v1207_v27 = vshrl.u32 %v3776_v47, 16 }
  0xc0   : > { %v1120_v53 = vrot.slane %v1118_v63, 1  ;;  %v1211_v60 = vrot.slane %v1209_v58, 1  ;;  %v1305_v24 = vrot.slane %v3776_v47, 1 }
  0xc1   : > { %v1470_v2 = vpop.permute.xlu1 %1469  ;;  %v1115_v46 = vrot.slane %v1113_v29, 1 }
  0xc2   : > { %1483 = vrot.lane.b32.xlu0 %v3711_v40, %s3109_s15  ;;  %v3825_v63 = vsel %vm1262_vm9, %v1305_v24, %v1306_v39  ;;  %v364_v24 = vld [vmem:[#allocation2 + $0xbc] sm:$0x1] }
  0xc3   : > { %v1116_v54 = vor.u32 %v1115_v46, %v1111_v44 }
  0xc4   : > { %v1433_v4 = vpop.permute.xlu0 %1432 }
  0xc5   : > { %1240 = vrot.lane.b32.xlu2 %v3709_v28, %s3111_s17  ;;  %v1717_v18 = vsel %vm1713_vm15, %v1684_v16, %v1433_v4  ;;  %v1281_v4 = vrot.slane %v3756_v11, 1 }
  0xc6   : > { %v1750_v41 = vsel %vm1746_vm1, %v1717_v18, %v1470_v2  ;;  %v1212_v2 = vor.u32 %v1211_v60, %v1207_v27  ;;  %v3847_v60 = vld [vmem:[#allocation2 + $0x54] sm:$0xff] }
  0xc7   : > { %v3763_v21 = vpop.permute.xlu2 %1434  ;;  %1530 = vrot.lane.b32.xlu1 %v3754_v6, %s3115_s26  ;;  %v1783_v50 = vsel %vm1779_vm4, %v1750_v41, %v3694_v61  ;;  %v3792_v61 = vsel %vm1037_vm10, %v1116_v54, %v1120_v53  ;;  %v3814_v22 = vsel %vm1262_vm9, %v1281_v4, %v1282_v15  ;;  %v308_v15 = vld [vmem:[#allocation2 + $0xb4] sm:$0x1] }
  0xc8   : > { %v3805_v18 = vsel %vm1037_vm10, %v1212_v2, %v1216_v52 }
  0xc9   : > { %v1235_v32 = vpop.permute.xlu1 %1234 }
  0xca   : > { %1372 = vrot.lane.b32.xlu0 %v3553_v57, %s3108_s14 }
  0xcc   : > { %v1552_v37 = vpop.permute.xlu0 %1551 }
  0xcd   : > { %1321 = vrot.lane.b32.xlu2 %v3732_v20, %s3110_s16  ;;  %v1816_v45 = vsel %vm1812_vm5, %v1783_v50, %v1552_v37  ;;  %v3034_v37 = vld [vmem:[#allocation2 + $0x18] sm:$0xff] }
  0xce   : > { %v1587_v44 = vsel %vm1581_vm12, %v3034_v37, %v1235_v32  ;;  %v365_v37 = vsel %vm3243_vm8, 0, %v364_v24  ;;  %v3036_v24 = vld [vmem:[#allocation2 + $0x24] sm:$0xff] }
  0xcf   : > { %v3783_v57 = vpop.permute.xlu2 %1252  ;;  %1565 = vrot.lane.b32.xlu1 %v3773_v8, %s3113_s19  ;;  %2788 = vmatmul.msk.bf16.gmra.mxu0 %vm1875_vm11, %v1816_v45  ;;  %v1620_v50 = vsel %vm1614_vm13, %v1587_v44, %v3717_v34  ;;  %366 = vst [vmem:[#allocation2 + $0xbc] sm:$0x1] %v365_v37 }
  0xd1   : > { %v1353_v59 = vpop.permute.xlu1 %1352 }
  0xd2   : > { %1419 = vrot.lane.b32.xlu0 %v3612_v5, %s3114_s20  ;;  %v1653_v45 = vsel %vm1647_vm14, %v1620_v50, %v1353_v59 }
  0xd4   : > { %v1245_v62 = vpop.permute.xlu0 %1244 }
  0xd5   : > { %1358 = vrot.lane.b32.xlu2 %v3756_v11, %s3108_s14 }
  0xd7   : > { %v3797_v1 = vpop.permute.xlu2 %1333  ;;  %1405 = vrot.lane.b32.xlu1 %v3792_v61, %s3114_s20 }
  0xd9   : > { %v1363_v3 = vpop.permute.xlu1 %1362 }
  0xda   : > { %1454 = vrot.lane.b32.xlu0 %v3627_v12, %s3112_s18 }
  0xdc   : > { %v1400_v16 = vpop.permute.xlu0 %1399 }
  0xdd   : > { %1491 = vrot.lane.b32.xlu2 %v3776_v47, %s3109_s15 }
  0xdf   : > { %v3809_v9 = vpop.permute.xlu2 %1370  ;;  %1538 = vrot.lane.b32.xlu1 %v3805_v18, %s3115_s26 }
  0xe1   : > { %v1472_v29 = vpop.permute.xlu1 %1471 }
  0xe2   : > { %1440 = vrot.lane.b32.xlu0 %v3814_v22, %s3112_s18 }
  0xe4   : > { %v1410_v41 = vpop.permute.xlu0 %1409 }
  0xe5   : > { %1477 = vrot.lane.b32.xlu2 %v3383_v13, %s3109_s15  ;;  %v1686_v13 = vsel %vm1680_vm0, %v1653_v45, %v1400_v16 }
  0xe6   : > { %v1719_v32 = vsel %vm1713_vm15, %v1686_v13, %v3763_v21  ;;  %v1597_v21 = vsel %vm1581_vm12, %v3847_v60, %v1245_v62 }
  0xe7   : > { %v1564_v46 = vpop.permute.xlu2 %1563  ;;  %1524 = vrot.lane.b32.xlu1 %v3444_v25, %s3115_s26  ;;  %v1752_v34 = vsel %vm1746_vm1, %v1719_v32, %v1472_v29  ;;  %v309_v29 = vsel %vm3204_vm3, 0, %v308_v15 }
  0xe8   : > { %310 = vst [vmem:[#allocation2 + $0xb4] sm:$0x1] %v309_v29 }
  0xe9   : > { %v1519_v43 = vpop.permute.xlu1 %1518 }
  0xea   : > { %1573 = vrot.lane.b32.xlu0 %v3825_v63, %s3113_s19  ;;  %v1785_v55 = vsel %vm1779_vm4, %v1752_v34, %v1519_v43 }
  0xec   : > { %v1445_v54 = vpop.permute.xlu0 %1444 }
  0xed   : > { %1559 = vrot.lane.b32.xlu2 %v3455_v17, %s3113_s19 }
  0xef   : > { %v3837_v53 = vpop.permute.xlu2 %1536  ;;  %1319 = vrot.lane.b32.xlu1 %v3542_v56, %s3110_s16 }
  0xf1   : > { %v1554_v58 = vpop.permute.xlu1 %1553 }
  0xf2   : > { %1238 = vrot.lane.b32.xlu0 %v3516_v36, %s3111_s17  ;;  %v1818_v59 = vsel %vm1812_vm5, %v1785_v55, %v1554_v58  ;;  %v1630_v36 = vsel %vm1614_vm13, %v1597_v21, %v3743_v49 }
  0xf3   : > { %2789 = vmatmul.msk.bf16.gmra.mxu0 %vm1875_vm11, %v1818_v59  ;;  %v1663_v38 = vsel %vm1647_vm14, %v1630_v36, %v1363_v3 }
  0xf4   : > { %v1482_v27 = vpop.permute.xlu0 %1481  ;;  %v1696_v52 = vsel %vm1680_vm0, %v1663_v38, %v1410_v41  ;;  %v402_v41 = vld [vmem:[%s3215_s13 + $0x74] sm:$0xf] }
  0xf5   : > { %1248 = vrot.lane.b32.xlu2 %v3571_v35, %s3111_s17  ;;  %v1729_v62 = vsel %vm1713_vm15, %v1696_v52, %v1445_v54  ;;  %v657_v13 = vshll.u32 %v402_v41, 16  ;;  %v832_v52 = vld [vmem:[#allocation2 + $0xbc] sm:$0x1] }
  0xf6   : > { %v1762_v35 = vsel %vm1746_vm1, %v1729_v62, %v1482_v27 }
  0xf7   : > { %v3853_v56 = vpop.permute.xlu2 %1317  ;;  %1329 = vrot.lane.b32.xlu1 %v3586_v48, %s3110_s16  ;;  %v1605_v48 = vsel %vm1581_vm12, %v3457_v33, %v3783_v57 }
  0xf8   : > { %v1638_v57 = vsel %vm1614_vm13, %v1605_v48, %v3797_v1 }
  0xf9   : > { %v1418_v2 = vpop.permute.xlu1 %1417 }
  0xfa   : > { %1356 = vrot.lane.b32.xlu0 %v3660_v42, %s3108_s14 }
  0xfc   : > { %v1529_v4 = vpop.permute.xlu0 %1528 }
  0xfd   : > { %v1795_v49 = vsel %vm1779_vm4, %v1762_v35, %v1529_v4  ;;  %1403 = vrot.lane.b32.xlu2 %v3709_v28, %s3114_s20  ;;  %v401_v28 = vld [vmem:[%s3215_s13 + $0x70] sm:$0xf] }
  0xfe   : > { %v1828_v3 = vsel %vm1812_vm5, %v1795_v49, %v1564_v46  ;;  %v646_v44 = vshrl.u32 %v401_v28, 16  ;;  %v654_v46 = vshrl.u32 %v402_v41, 16  ;;  %v649_v1 = vshll.u32 %v401_v28, 16 }
  0xff   : > { %v3872_v16 = vpop.permute.xlu2 %1327  ;;  %2794 = vmatmul.msk.bf16.vlgmr.msra.gmra.mxu2 %vm1875_vm11, %v1828_v3  ;;  %1438 = vrot.lane.b32.xlu1 %v3732_v20, %s3112_s18  ;;  %v1671_v20 = vsel %vm1647_vm14, %v1638_v57, %v3809_v9  ;;  %v828_v9 = vld [vmem:[#allocation2 + $0xb4] sm:$0xf] }
 0x100   : > { %v648_v50 = vrot.slane %v646_v44, 7  ;;  %v656_v45 = vrot.slane %v654_v46, 7  ;;  %v1704_v54 = vsel %vm1680_vm0, %v1671_v20, %v1418_v2 }
 0x101   : > { %v1490_v39 = vpop.permute.xlu1 %1489 }
 0x102   : > { %1366 = vrot.lane.b32.xlu0 %v3711_v40, %s3108_s14  ;;  %v651_v34 = vor.u32 %v649_v1, %v648_v50  ;;  %v652_v55 = vrot.slane %v648_v50, 4  ;;  %v659_v58 = vor.u32 %v657_v13, %v656_v45  ;;  %v661_v36 = vrot.slane %v656_v45, 4 }
 0x104   : > { %v1453_v43 = vpop.permute.xlu0 %1452  ;;  %v660_v27 = vsel %vm3228_vm6, %v652_v55, %v659_v58  ;;  %v829_v21 = vsel %vm3237_vm7, %v651_v34, %v828_v9  ;;  %v367_v58 = vld [vmem:[#allocation2 + $0xc8] sm:$0x1]  ;;  %v311_v9 = vld [vmem:[#allocation2 + $0xc0] sm:$0x1] }
 0x105   : > { %1413 = vrot.lane.b32.xlu2 %v3754_v6, %s3114_s20  ;;  %v1737_v32 = vsel %vm1713_vm15, %v1704_v54, %v1453_v43  ;;  %830 = vst [vmem:[#allocation2 + $0xb4] sm:$0xf] %v829_v21 }
 0x106   : > { %v1770_v38 = vsel %vm1746_vm1, %v1737_v32, %v1490_v39  ;;  %831 = vst.msk [vmem:[#allocation2 + $0xb8] sm:$0xf] %vm251_vm2, %v660_v27  ;;  %v368_v27 = vsel %vm3243_vm8, 0, %v367_v58 }
 0x107   : > { %v1437_v59 = vpop.permute.xlu2 %1436  ;;  %1256 = vrot.lane.b32.xlu1 %v3612_v5, %s3111_s17  ;;  %v833_v5 = vsel %vm3204_vm3, %v661_v36, %v832_v52  ;;  %v1803_v35 = vsel %vm1779_vm4, %v1770_v38, %v3837_v53  ;;  %v312_v38 = vsel %vm3204_vm3, 0, %v311_v9  ;;  %369 = vst [vmem:[#allocation2 + $0xc8] sm:$0x1] %v368_v27  ;;  %v404_v52 = vld [vmem:[%s3215_s13 + $0x7c] sm:$0xf]  ;;  %v3038_v27 = vld [vmem:[#allocation2 + $0x84] sm:$0xff] }
 0x108   : > { %834 = vst [vmem:[#allocation2 + $0xbc] sm:$0x1] %v833_v5  ;;  %v671_v5 = vshrl.u32 %v404_v52, 16 }
 0x109   : > { %v1237_v2 = vpop.permute.xlu1 %1236  ;;  %313 = vst [vmem:[#allocation2 + $0xc0] sm:$0x1] %v312_v38 }
 0x10a   : > { %1475 = vrot.lane.b32.xlu0 %v3756_v11, %s3109_s15  ;;  %v1589_v39 = vsel %vm1581_vm12, %v3036_v24, %v1237_v2 }
 0x10b   : > { %v1622_v44 = vsel %vm1614_vm13, %v1589_v39, %v3853_v56 }
 0x10c   : > { %v1572_v62 = vpop.permute.xlu0 %1571 }
 0x10d   : > { %1448 = vrot.lane.b32.xlu2 %v3773_v8, %s3112_s18  ;;  %v1836_v4 = vsel %vm1812_vm5, %v1803_v35, %v1572_v62  ;;  %v3946_v37 = vld [vmem:[#allocation2 + $0xb4] sm:$0xff] }
 0x10e   : > { %2798 = vmatmul.msk.bf16.vlgmr.msra.gmra.mxu3 %vm1875_vm11, %v1836_v4  ;;  %v1221_v43 = vshll.u32 %v3946_v37, 16  ;;  %v1219_v56 = vshrl.u32 %v3946_v37, 16  ;;  %v1308_v62 = vrot.slane %v3946_v37, 1 }
 0x10f   : > { %v3911_v48 = vpop.permute.xlu2 %1254  ;;  %1337 = vrot.lane.b32.xlu1 %v3627_v12, %s3110_s16 }
 0x110   : > { %v1223_v13 = vrot.slane %v1221_v43, 1 }
 0x111   : > { %v1355_v49 = vpop.permute.xlu1 %1354 }
 0x112   : > { %1522 = vrot.lane.b32.xlu0 %v3792_v61, %s3115_s26  ;;  %v1655_v46 = vsel %vm1647_vm14, %v1622_v44, %v1355_v49  ;;  %v1224_v21 = vor.u32 %v1223_v13, %v1219_v56  ;;  %v835_v56 = vld [vmem:[#allocation2 + $0xc0] sm:$0xf] }
 0x114   : > { %v3917_v3 = vpop.permute.xlu0 %1246 }
 0x115   : > { %1485 = vrot.lane.b32.xlu2 %v3457_v33, %s3109_s15 }
 0x117   : > { %v3921_v53 = vpop.permute.xlu2 %1335  ;;  %1242 = vrot.lane.b32.xlu1 %v3792_v61, %s3111_s17  ;;  %v902_v61 = vld [vmem:[#allocation2 + $0xbc] sm:$0x1] }
 0x118   : > { %v1020_v41 = vunpack.c.l.b16 %v902_v61  ;;  %v673_v61 = vrot.slane %v671_v5, 7 }
 0x119   : > { %v3925_v15 = vpop.permute.xlu1 %1364 }
 0x11a   : > { %1557 = vrot.lane.b32.xlu0 %v3814_v22, %s3113_s19  ;;  %v1036_v20 = vpack.c.b16 %v1020_v41, %v1020_v41  ;;  %v674_v41 = vshll.u32 %v404_v52, 16  ;;  %v678_v44 = vrot.slane %v673_v61, 4  ;;  %v370_v52 = vld [vmem:[#allocation2 + $0xd4] sm:$0x1] }
 0x11c   : > { %v1402_v12 = vpop.permute.xlu0 %1401  ;;  %v1226_v54 = vshll.u32 %v1036_v20, 16  ;;  %v1309_v35 = vrot.slane %v1036_v20, 1 }
 0x11d   : > { %1374 = vrot.lane.b32.xlu2 %v3776_v47, %s3108_s14  ;;  %v1688_v50 = vsel %vm1680_vm0, %v1655_v46, %v1402_v12  ;;  %v3037_v12 = vld [vmem:[#allocation2 + $0x60] sm:$0xff] }
 0x11e   : > { %v1228_v36 = vrot.slane %v1226_v54, 1  ;;  %v3989_v46 = vsel %vm1262_vm9, %v1308_v62, %v1309_v35 }
 0x11f   : > { %v3931_v29 = vpop.permute.xlu2 %1240  ;;  %1323 = vrot.lane.b32.xlu1 %v3814_v22, %s3110_s16 }
 0x121   : > { %v1474_v33 = vpop.permute.xlu1 %1473 }
 0x122   : > { %1532 = vrot.lane.b32.xlu0 %v3509_v30, %s3115_s26 }
 0x124   : > { %v3937_v57 = vpop.permute.xlu0 %1411 }
 0x125   : > { %1421 = vrot.lane.b32.xlu2 %v3805_v18, %s3114_s20 }
 0x127   : > { %v3942_v28 = vpop.permute.xlu2 %1321  ;;  %1360 = vrot.lane.b32.xlu1 %v3847_v60, %s3108_s14  ;;  %v1721_v60 = vsel %vm1713_vm15, %v1688_v50, %v1437_v59  ;;  %v676_v50 = vor.u32 %v674_v41, %v673_v61 }
 0x128   : > { %v1754_v32 = vsel %vm1746_vm1, %v1721_v60, %v1474_v33  ;;  %v3982_v33 = vsel %vm1037_vm10, %v1224_v21, %v1228_v36  ;;  %v839_v60 = vld [vmem:[#allocation2 + $0xc8] sm:$0x1] }
 0x129   : > { %v1521_v22 = vpop.permute.xlu1 %1520  ;;  %v840_v13 = vsel %vm3204_vm3, %v678_v44, %v839_v60 }
 0x12a   : > { %1567 = vrot.lane.b32.xlu0 %v3537_v51, %s3113_s19  ;;  %v1787_v34 = vsel %vm1779_vm4, %v1754_v32, %v1521_v22  ;;  %841 = vst [vmem:[#allocation2 + $0xc8] sm:$0x1] %v840_v13 }
 0x12c   : > { %v1447_v1 = vpop.permute.xlu0 %1446 }
 0x12d   : > { %1456 = vrot.lane.b32.xlu2 %v3825_v63, %s3112_s18 }
 0x12f   : > { %v3958_v45 = vpop.permute.xlu2 %1358  ;;  %1493 = vrot.lane.b32.xlu1 %v3946_v37, %s3109_s15 }
 0x131   : > { %v1556_v55 = vpop.permute.xlu1 %1555 }
 0x132   : > { %1407 = vrot.lane.b32.xlu0 %v3444_v25, %s3114_s20  ;;  %v1820_v59 = vsel %vm1812_vm5, %v1787_v34, %v1556_v55  ;;  %v403_v25 = vld [vmem:[%s3215_s13 + $0x78] sm:$0xf] }
 0x133   : > { %2790 = vmatmul.msk.bf16.gmra.mxu0 %vm1875_vm11, %v1820_v59  ;;  %v663_v4 = vshrl.u32 %v403_v25, 16  ;;  %v666_v39 = vshll.u32 %v403_v25, 16 }
 0x134   : > { %v1484_v2 = vpop.permute.xlu0 %1483 }
 0x135   : > { %1442 = vrot.lane.b32.xlu2 %v3455_v17, %s3112_s18  ;;  %v665_v24 = vrot.slane %v663_v4, 7  ;;  %v1599_v17 = vsel %vm1581_vm12, %v3037_v12, %v3917_v3 }
 0x136   : > { %v1632_v54 = vsel %vm1614_vm13, %v1599_v17, %v3872_v16 }
 0x137   : > { %v3978_v49 = vpop.permute.xlu2 %1491  ;;  %1479 = vrot.lane.b32.xlu1 %v3037_v12, %s3109_s15  ;;  %v668_v20 = vor.u32 %v666_v39, %v665_v24  ;;  %v669_v43 = vrot.slane %v665_v24, 4  ;;  %v1665_v55 = vsel %vm1647_vm14, %v1632_v54, %v3925_v15 }
 0x138   : > { %v1698_v58 = vsel %vm1680_vm0, %v1665_v55, %v3937_v57 }
 0x139   : > { %v1531_v22 = vpop.permute.xlu1 %1530  ;;  %v677_v32 = vsel %vm3228_vm6, %v669_v43, %v676_v50  ;;  %v836_v34 = vsel %vm3237_vm7, %v668_v20, %v835_v56  ;;  %v1731_v16 = vsel %vm1713_vm15, %v1698_v58, %v1447_v1 }
 0x13a   : > { %1540 = vrot.lane.b32.xlu0 %v3982_v33, %s3115_s26  ;;  %837 = vst [vmem:[#allocation2 + $0xc0] sm:$0xf] %v836_v34  ;;  %v1764_v19 = vsel %vm1746_vm1, %v1731_v16, %v1484_v2  ;;  %v905_v2 = vld [vmem:[#allocation2 + $0xc8] sm:$0x1] }
 0x13b   : > { %838 = vst.msk [vmem:[#allocation2 + $0xc4] sm:$0xf] %vm251_vm2, %v677_v32  ;;  %v1797_v59 = vsel %vm1779_vm4, %v1764_v19, %v1531_v22  ;;  %v1381_v62 = vunpack.c.l.b16 %v905_v2 }
 0x13c   : > { %v1373_v3 = vpop.permute.xlu0 %1372 }
 0x13d   : > { %1575 = vrot.lane.b32.xlu2 %v3989_v46, %s3113_s19  ;;  %v1382_v12 = vpack.c.b16 %v1381_v62, %v1381_v62 }
 0x13f   : > { %v1478_v14 = vpop.permute.xlu2 %1477  ;;  %1561 = vrot.lane.b32.xlu1 %v3528_v7, %s3113_s19  ;;  %v1391_v43 = vshll.u32 %v1382_v12, 16  ;;  %v1428_v34 = vrot.slane %v1382_v12, 1 }
 0x141   : > { %v1566_v15 = vpop.permute.xlu1 %1565  ;;  %v1393_v56 = vrot.slane %v1391_v43, 1 }
 0x142   : > { %1526 = vrot.lane.b32.xlu0 %v3504_v26, %s3115_s26  ;;  %v1830_v9 = vsel %vm1812_vm5, %v1797_v59, %v1566_v15  ;;  %v1593_v26 = vsel %vm1581_vm12, %v3660_v42, %v3931_v29  ;;  %v371_v42 = vsel %vm3243_vm8, 0, %v370_v52  ;;  %v2829_v5 = vld [vmem:[#allocation2 + $0xc0] sm:$0xff] }
 0x143   : > { %2795 = vmatmul.msk.bf16.gmra.mxu2 %vm1875_vm11, %v1830_v9  ;;  %372 = vst [vmem:[#allocation2 + $0xd4] sm:$0x1] %v371_v42  ;;  %v1384_v44 = vshrl.u32 %v2829_v5, 16  ;;  %v1427_v32 = vrot.slane %v2829_v5, 1  ;;  %v3040_v42 = vld [vmem:[#allocation2 + $0x30] sm:$0xff] }
 0x144   : > { %v1420_v57 = vpop.permute.xlu0 %1419 }
 0x145   : > { %1250 = vrot.lane.b32.xlu2 %v3754_v6, %s3111_s17  ;;  %v1626_v6 = vsel %vm1614_vm13, %v1593_v26, %v3942_v28  ;;  %v1429_v58 = vsel %vm1262_vm9, %v1427_v32, %v1428_v34 }
 0x146   : > { %v1659_v29 = vsel %vm1647_vm14, %v1626_v6, %v3958_v45 }
 0x147   : > { %v1560_v1 = vpop.permute.xlu2 %1559  ;;  %1368 = vrot.lane.b32.xlu1 %v3038_v27, %s3108_s14 }
 0x149   : > { %v1406_v7 = vpop.permute.xlu1 %1405 }
 0x14a   : > { %1331 = vrot.lane.b32.xlu0 %v3773_v8, %s3110_s16  ;;  %v3039_v8 = vld [vmem:[#allocation2 + $0x90] sm:$0xff] }
 0x14b   : > { %v1607_v25 = vsel %vm1581_vm12, %v3039_v8, %v3911_v48  ;;  %v908_v16 = vld [vmem:[#allocation2 + $0xd4] sm:$0x1] }
 0x14c   : > { %v1455_v21 = vpop.permute.xlu0 %1454  ;;  %v1640_v48 = vsel %vm1614_vm13, %v1607_v25, %v3921_v53  ;;  %v1386_v53 = vshll.u32 %v2829_v5, 16  ;;  %v1500_v19 = vunpack.c.l.b16 %v908_v16 }
 0x14d   : > { %1415 = vrot.lane.b32.xlu2 %v3509_v30, %s3114_s20  ;;  %v314_v30 = vld [vmem:[#allocation2 + $0xcc] sm:$0x1]  ;;  %v1673_v23 = vsel %vm1647_vm14, %v1640_v48, %v1373_v3 }
 0x14e   : > { %v1706_v35 = vsel %vm1680_vm0, %v1673_v23, %v1420_v57  ;;  %v1388_v20 = vrot.slane %v1386_v53, 1  ;;  %v1501_v9 = vpack.c.b16 %v1500_v19, %v1500_v19  ;;  %v3041_v53 = vld [vmem:[#allocation2 + $0x6c] sm:$0xff] }
 0x14f   : > { %v4025_v36 = vpop.permute.xlu2 %1248  ;;  %1450 = vrot.lane.b32.xlu1 %v3537_v51, %s3112_s18  ;;  %v315_v51 = vsel %vm3204_vm3, 0, %v314_v30  ;;  %v1739_v45 = vsel %vm1713_vm15, %v1706_v35, %v1455_v21 }
 0x150   : > { %316 = vst [vmem:[#allocation2 + $0xcc] sm:$0x1] %v315_v51  ;;  %v1772_v39 = vsel %vm1746_vm1, %v1739_v45, %v3978_v49  ;;  %v1389_v49 = vor.u32 %v1388_v20, %v1384_v44  ;;  %v1510_v21 = vshll.u32 %v1501_v9, 16  ;;  %v1547_v6 = vrot.slane %v1501_v9, 1 }
 0x151   : > { %v1539_v38 = vpop.permute.xlu1 %1538 }
 0x152   : > { %1258 = vrot.lane.b32.xlu0 %v3805_v18, %s3111_s17  ;;  %v1692_v18 = vsel %vm1680_vm0, %v1659_v29, %v1406_v7  ;;  %v1805_v17 = vsel %vm1779_vm4, %v1772_v39, %v1539_v38  ;;  %v1394_v3 = vsel %vm1037_vm10, %v1389_v49, %v1393_v56  ;;  %v1512_v52 = vrot.slane %v1510_v21, 1 }
 0x154   : > { %v1441_v28 = vpop.permute.xlu0 %1440 }
 0x155   : > { %1339 = vrot.lane.b32.xlu2 %v3825_v63, %s3110_s16  ;;  %v1725_v0 = vsel %vm1713_vm15, %v1692_v18, %v1441_v28 }
 0x156   : > { %v1758_v61 = vsel %vm1746_vm1, %v1725_v0, %v1478_v14 }
 0x157   : > { %v4049_v4 = vpop.permute.xlu2 %1403  ;;  %1376 = vrot.lane.b32.xlu1 %v3946_v37, %s3108_s14  ;;  %v2830_v14 = vld [vmem:[#allocation2 + $0xcc] sm:$0xff] }
 0x158   : > { %v1505_v57 = vshll.u32 %v2830_v14, 16  ;;  %v1503_v27 = vshrl.u32 %v2830_v14, 16  ;;  %v1546_v26 = vrot.slane %v2830_v14, 1 }
 0x159   : > { %v1525_v24 = vpop.permute.xlu1 %1524 }
 0x15a   : > { %1487 = vrot.lane.b32.xlu0 %v3039_v8, %s3109_s15  ;;  %v1791_v63 = vsel %vm1779_vm4, %v1758_v61, %v1525_v24  ;;  %v1507_v7 = vrot.slane %v1505_v57, 1  ;;  %v1601_v61 = vsel %vm1581_vm12, %v3041_v53, %v4025_v36 }
 0x15b   : > { %v1824_v41 = vsel %vm1812_vm5, %v1791_v63, %v1560_v1 }
 0x15c   : > { %v1574_v22 = vpop.permute.xlu0 %1573  ;;  %2792 = vmatmul.msk.bf16.vlgmr.msra.gmra.mxu1 %vm1875_vm11, %v1824_v41  ;;  %v1508_v2 = vor.u32 %v1507_v7, %v1503_v27 }
 0x15d   : > { %v1838_v50 = vsel %vm1812_vm5, %v1805_v17, %v1574_v22  ;;  %1534 = vrot.lane.b32.xlu2 %v3560_v10, %s3115_s26 }
 0x15e   : > { %2799 = vmatmul.msk.bf16.gmra.mxu3 %vm1875_vm11, %v1838_v50  ;;  %v1513_v25 = vsel %vm1037_vm10, %v1508_v2, %v1512_v52 }
 0x15f   : > { %v4066_v60 = vpop.permute.xlu2 %1413  ;;  %1569 = vrot.lane.b32.xlu1 %v3599_v31, %s3113_s19 }
 0x161   : > { %v1320_v13 = vpop.permute.xlu1 %1319 }
 0x162   : > { %1423 = vrot.lane.b32.xlu0 %v3982_v33, %s3114_s20 }
 0x164   : > { %v1239_v54 = vpop.permute.xlu0 %1238 }
 0x165   : > { %1458 = vrot.lane.b32.xlu2 %v3989_v46, %s3112_s18  ;;  %v1591_v51 = vsel %vm1581_vm12, %v3040_v42, %v1239_v54 }
 0x167   : > { %v1449_v10 = vpop.permute.xlu2 %1448  ;;  %1542 = vrot.lane.b32.xlu1 %v1394_v3, %s3115_s26 }
 0x169   : > { %v1330_v55 = vpop.permute.xlu1 %1329 }
 0x16a   : > { %1495 = vrot.lane.b32.xlu0 %v2829_v5, %s3109_s15  ;;  %v1634_v63 = vsel %vm1614_vm13, %v1601_v61, %v1330_v55 }
 0x16c   : > { %v1357_v31 = vpop.permute.xlu0 %1356 }
 0x16d   : > { %1577 = vrot.lane.b32.xlu2 %v1429_v58, %s3113_s19 }
 0x16f   : > { %1341 = vrot.lane.b32.xlu1 %v3989_v46, %s3110_s16  ;;  %v1486_v59 = vpop.permute.xlu2 %1485 }
 0x171   : > { %v1439_v15 = vpop.permute.xlu1 %1438 }
 0x172   : > { %1260 = vrot.lane.b32.xlu0 %v3982_v33, %s3111_s17  ;;  %v1548_v33 = vsel %vm1262_vm9, %v1546_v26, %v1547_v6 }
 0x174   : > { %v1367_v1 = vpop.permute.xlu0 %1366 }
 0x175   : > { %1378 = vrot.lane.b32.xlu2 %v2829_v5, %s3108_s14  ;;  %v1624_v5 = vsel %vm1614_vm13, %v1591_v51, %v1320_v13  ;;  %v1667_v39 = vsel %vm1647_vm14, %v1634_v63, %v1367_v1  ;;  %v3042_v13 = vld [vmem:[#allocation2 + $0x9c] sm:$0xff]  ;;  %v1921_v63 = vpop.f32.mrf.mxu0  ;;  %s2626_s14 = scalar_lea.hbm %s4914_s6, %s2831_s10 }
 0x176   : > { %v1657_v62 = vsel %vm1647_vm14, %v1624_v5, %v1357_v31  ;;  %v1700_v17 = vsel %vm1680_vm0, %v1667_v39, %v4066_v60  ;;  %s2629_s16 = sshll.u32 %s2626_s14, 4  ;;  %s2630_s16 = int_to_ptr.hbm [resolvable:$true] %s2629_s16 }
 0x177   : > { %1460 = vrot.lane.b32.xlu1 %v1429_v58, %s3112_s18  ;;  %v1375_v38 = vpop.permute.xlu2 %1374  ;;  %v1690_v48 = vsel %vm1680_vm0, %v1657_v62, %v4049_v4  ;;  %v1733_v44 = vsel %vm1713_vm15, %v1700_v17, %v1449_v10  ;;  %s2615_s18 = scalar_lea.sflag [#allocation5], %s242_s28 }
 0x178   : > { %v1723_v23 = vsel %vm1713_vm15, %v1690_v48, %v1439_v15  ;;  %v1766_v43 = vsel %vm1746_vm1, %v1733_v44, %v1486_v59 }
 0x179   : > { %v1257_v46 = vpop.permute.xlu1 %1256 }
 0x17a   : > { %1425 = vrot.lane.b32.xlu0 %v1394_v3, %s3114_s20  ;;  %v1609_v54 = vsel %vm1581_vm12, %v3042_v13, %v1257_v46 }
 0x17c   : > { %v1476_v8 = vpop.permute.xlu0 %1475 }
 0x17d   : > { %1497 = vrot.lane.b32.xlu2 %v2830_v14, %s3109_s15  ;;  %v1756_v0 = vsel %vm1746_vm1, %v1723_v23, %v1476_v8  ;;  %s2627_s15 = sshll.u32 %s4792_s9, 4  ;;  %s2628_s15 = int_to_ptr.vmem [resolvable:$true] %s2627_s15 }
 0x17f   : > { %1579 = vrot.lane.b32.xlu1 %v1548_v33, %s3113_s19  ;;  %v1422_v29 = vpop.permute.xlu2 %1421  ;;  %s3057_s19 = sshra.s32 %s2630_s16, 4  ;;  %s3058_s19 = int_to_ptr.hbm [resolvable:$true] %s3057_s19 }
 0x180   : > { %s3059_s20 = scalar_lea.hbm %s3058_s19, 256  ;;  %p3064_p0 = scmp.lt.s32.totalorder %s3058_s19, %s4914_s6 }
 0x181   : > { %v1338_v30 = vpop.permute.xlu1 %1337  ;;  %p3060_p11 = scmp.ne.s32.totalorder %s3058_s19, %s3059_s20  ;;  %p3065_p1 = scmp.lt.s32.totalorder %s3063_s12, %s3059_s20 }
 0x182   : > { %1544 = vrot.lane.b32.xlu0 %v1513_v25, %s3115_s26  ;;  %v1642_v60 = vsel %vm1614_vm13, %v1609_v54, %v1338_v30 }
 0x183   : > { %v1675_v10 = vsel %vm1647_vm14, %v1642_v60, %v1375_v38  ;;  %p3061_p12 = pnand %p3060_p11, %p3191_p5  ;;  %p3066_p2 = por %p3065_p1, %p3064_p0 }
 0x184   : > { %v1523_v28 = vpop.permute.xlu0 %1522  ;;  %v1708_v34 = vsel %vm1680_vm0, %v1675_v10, %v1422_v29 }
 0x185   : > { %v1789_v35 = vsel %vm1779_vm4, %v1756_v0, %v1523_v28  ;;  %p3062_p13 = pneg %p3061_p12 }
 0x187   : > { %v1457_v24 = vpop.permute.xlu2 %1456  ;;  %p3067_p3 = pnand %p3066_p2, %p3062_p13 }
 0x188   : > { %v1741_v58 = vsel %vm1713_vm15, %v1708_v34, %v1457_v24 }
 0x189   : > { %v1243_v18 = vpop.permute.xlu1 %1242 }
 0x18a   : > { %v1595_v19 = vsel %vm1581_vm12, %v3756_v11, %v1243_v18 }
 0x18c   : > { %v1558_v45 = vpop.permute.xlu0 %1557 }
 0x18d   : > { %v1822_v12 = vsel %vm1812_vm5, %v1789_v35, %v1558_v45 }
 0x18e   : > { %2791 = vmatmul.msk.bf16.gmra.mxu0 %vm1875_vm11, %v1822_v12 }
 0x18f   : > { %v1443_v22 = vpop.permute.xlu2 %1442 }
 0x191   : > { %v1324_v4 = vpop.permute.xlu1 %1323 }
 0x192   : > { %v1628_v15 = vsel %vm1614_vm13, %v1595_v19, %v1324_v4 }
 0x194   : > { %v1533_v41 = vpop.permute.xlu0 %1532 }
 0x195   : > { %v1799_v36 = vsel %vm1779_vm4, %v1766_v43, %v1533_v41  ;;  %v1923_v43 = vpop.f32.mrf.mxu0 }
 0x197   : > { %v1576_v56 = vpop.permute.xlu2 %1575 }
 0x199   : > { %v1361_v20 = vpop.permute.xlu1 %1360 }
 0x19a   : > { %v1661_v57 = vsel %vm1647_vm14, %v1628_v15, %v1361_v20 }
 0x19c   : > { %v1568_v50 = vpop.permute.xlu0 %1567 }
 0x19d   : > { %v1832_v49 = vsel %vm1812_vm5, %v1799_v36, %v1568_v50  ;;  %v1926_v60 = vpop.f32.mrf.mxu0 }
 0x19e   : > { %2796 = vmatmul.msk.bf16.gmra.mxu2 %vm1875_vm11, %v1832_v49 }
 0x19f   : > { %v1251_v31 = vpop.permute.xlu2 %1250 }
 0x1a0   : > { %v1603_v33 = vsel %vm1581_vm12, %v3711_v40, %v1251_v31 }
 0x1a1   : > { %v1494_v3 = vpop.permute.xlu1 %1493 }
 0x1a2   : > { %v1774_v16 = vsel %vm1746_vm1, %v1741_v58, %v1494_v3 }
 0x1a4   : > { %v1408_v32 = vpop.permute.xlu0 %1407 }
 0x1a5   : > { %v1694_v1 = vsel %vm1680_vm0, %v1661_v57, %v1408_v32  ;;  %v4166_v57 = vld [vmem:[%s4910_s2] ss:$0 sm:$0xff] }
 0x1a6   : > { %v1727_v7 = vsel %vm1713_vm15, %v1694_v1, %v1443_v22 }
 0x1a7   : > { %v1416_v6 = vpop.permute.xlu2 %1415 }
 0x1a9   : > { %v1480_v55 = vpop.permute.xlu1 %1479 }
 0x1aa   : > { %v1760_v21 = vsel %vm1746_vm1, %v1727_v7, %v1480_v55  ;;  %v4172_v7 = vadd.f32 %v4166_v57, %v1921_v63 }
 0x1ac   : > { %v1541_v14 = vpop.permute.xlu0 %1540 }
 0x1ad   : > { %v1807_v59 = vsel %vm1779_vm4, %v1774_v16, %v1541_v14  ;;  %v1928_v16 = vpop.f32.mrf.mxu0 }
 0x1ae   : > { %v1840_v9 = vsel %vm1812_vm5, %v1807_v59, %v1576_v56 }
 0x1af   : > { %2800 = vmatmul.msk.bf16.gmra.mxu3 %vm1875_vm11, %v1840_v9  ;;  %v1340_v52 = vpop.permute.xlu2 %1339  ;;  %v4161_v9 = vpop.f32.mrf.mxu2 }
 0x1b1   : > { %v1562_v27 = vpop.permute.xlu1 %1561 }
 0x1b4   : > { %v1527_v26 = vpop.permute.xlu0 %1526 }
 0x1b5   : > { %v1793_v11 = vsel %vm1779_vm4, %v1760_v21, %v1527_v26  ;;  %v1931_v14 = vpop.f32.mrf.mxu0  ;;  %v4175_v21 = vadd.f32 %v4166_v57, %v1926_v60  ;;  %v2155_v60 = vld [vmem:[%s4913_s5 + $0x70] sm:$0xff] }
 0x1b6   : > { %v1826_v46 = vsel %vm1812_vm5, %v1793_v11, %v1562_v27  ;;  %v4169_v27 = vadd.f32 %v4166_v57, %v1923_v43  ;;  %v4180_v11 = vadd.f32 %v4166_v57, %v1928_v16 }
 0x1b7   : > { %2793 = vmatmul.msk.bf16.gmra.mxu1 %vm1875_vm11, %v1826_v46  ;;  %v1535_v42 = vpop.permute.xlu2 %1534  ;;  %v2156_v46 = vld [vmem:[%s4913_s5 + $0x78] sm:$0xff] }
 0x1b8   : > { %2185 = vmatpush.msrb.mxu2 %v2156_v46  ;;  %2157 = vmatpush.msrb.mxu1 %v2156_v46 }
 0x1b9   : > { %v1369_v38 = vpop.permute.xlu1 %1368 }
 0x1ba   : > { %2186 = vmatpush.msrb.mxu2 %v2155_v60  ;;  %2158 = vmatpush.msrb.mxu1 %v2155_v60 }
 0x1bc   : > { %v1332_v2 = vpop.permute.xlu0 %1331 }
 0x1bd   : > { %v1636_v30 = vsel %vm1614_vm13, %v1603_v33, %v1332_v2  ;;  %v1933_v19 = vpop.f32.mrf.mxu0  ;;  %v2033_v2 = vadd.f32 %v4169_v27, %v4172_v7  ;;  %v4194_v33 = vpop.f32.mrf.mxu2 }
 0x1be   : > { %v1669_v51 = vsel %vm1647_vm14, %v1636_v30, %v1369_v38  ;;  %v2071_v38 = vmul.f32 %v4172_v7, %v4172_v7 }
 0x1bf   : > { %v1702_v28 = vsel %vm1680_vm0, %v1669_v51, %v1416_v6  ;;  %v1459_v0 = vpop.permute.xlu2 %1458  ;;  %v2072_v6 = vmul.f32 %v4169_v27, %v4169_v27  ;;  %v2034_v30 = vadd.f32 %v2033_v2, %v4175_v21  ;;  %v4200_v51 = vadd.f32 %v4166_v57, %v1933_v19 }
 0x1c0   : > { %v4270_v2 = vadd.f32 %v4166_v57, %v4161_v9 }
 0x1c1   : > { %v1451_v8 = vpop.permute.xlu1 %1450 }
 0x1c2   : > { %v1735_v62 = vsel %vm1713_vm15, %v1702_v28, %v1451_v8  ;;  %v4192_v8 = vadd.f32 %v4166_v57, %v1931_v14 }
 0x1c4   : > { %v1259_v25 = vpop.permute.xlu0 %1258 }
 0x1c5   : > { %v1611_v35 = vsel %vm1581_vm12, %v3776_v47, %v1259_v25  ;;  %v1936_v59 = vpop.f32.mrf.mxu0  ;;  %v2103_v25 = vadd.f32 %v2072_v6, %v2071_v38 }
 0x1c6   : > { %v1644_v12 = vsel %vm1614_vm13, %v1611_v35, %v1340_v52  ;;  %v2073_v52 = vmul.f32 %v4175_v21, %v4175_v21  ;;  %v1961_v63 = vpop.f32.mrf.mxu2 }
 0x1c7   : > { %v1578_v41 = vpop.permute.xlu2 %1577 }
 0x1c8   : > { %v2104_v28 = vadd.f32 %v2103_v25, %v2073_v52 }
 0x1c9   : > { %v1377_v29 = vpop.permute.xlu1 %1376 }
 0x1ca   : > { %v1677_v53 = vsel %vm1647_vm14, %v1644_v12, %v1377_v29 }
 0x1cc   : > { %v1488_v5 = vpop.permute.xlu0 %1487 }
 0x1cd   : > { %v1768_v48 = vsel %vm1746_vm1, %v1735_v62, %v1488_v5  ;;  %v1938_v15 = vpop.f32.mrf.mxu0  ;;  %v2035_v5 = vadd.f32 %v2034_v30, %v4180_v11  ;;  %v2075_v62 = vmul.f32 %v4192_v8, %v4192_v8 }
 0x1ce   : > { %v1801_v18 = vsel %vm1779_vm4, %v1768_v48, %v1535_v42  ;;  %v2074_v42 = vmul.f32 %v4180_v11, %v4180_v11  ;;  %v4206_v48 = vadd.f32 %v4166_v57, %v1936_v59 }
 0x1cf   : > { %v1379_v50 = vpop.permute.xlu2 %1378 }
 0x1d1   : > { %v1570_v23 = vpop.permute.xlu1 %1569 }
 0x1d2   : > { %v1834_v40 = vsel %vm1812_vm5, %v1801_v18, %v1570_v23  ;;  %v2105_v18 = vadd.f32 %v2104_v28, %v2074_v42  ;;  %v2036_v23 = vadd.f32 %v2035_v5, %v4192_v8  ;;  %v2085_v42 = vmul.f32 %v4270_v2, %v4270_v2  ;;  %v2153_v5 = vld [vmem:[%s4913_s5 + $0x60] sm:$0xff] }
 0x1d3   : > { %2797 = vmatmul.msk.bf16.gmra.mxu2 %vm1875_vm11, %v1834_v40  ;;  %v4212_v40 = vadd.f32 %v4166_v57, %v1938_v15 }
 0x1d4   : > { %v1424_v45 = vpop.permute.xlu0 %1423  ;;  %v2037_v12 = vadd.f32 %v2036_v23, %v4200_v51 }
 0x1d5   : > { %v1710_v61 = vsel %vm1680_vm0, %v1677_v53, %v1424_v45  ;;  %v2106_v45 = vadd.f32 %v2105_v18, %v2075_v62  ;;  %v4215_v53 = vpop.f32.mrf.mxu3  ;;  %v4286_v18 = vadd.f32 %v4166_v57, %v1961_v63  ;;  %v2151_v63 = vld [vmem:[%s4913_s5 + $0x50] sm:$0xff] }
 0x1d6   : > { %v1743_v4 = vsel %vm1713_vm15, %v1710_v61, %v1459_v0  ;;  %v2076_v0 = vmul.f32 %v4200_v51, %v4200_v51  ;;  %v2077_v61 = vmul.f32 %v4206_v48, %v4206_v48 }
 0x1d7   : > { %v1498_v10 = vpop.permute.xlu2 %1497 }
 0x1d9   : > { %v1543_v24 = vpop.permute.xlu1 %1542  ;;  %v1946_v1 = vpop.f32.mrf.mxu1 }
 0x1dc   : > { %v1496_v39 = vpop.permute.xlu0 %1495 }
 0x1dd   : > { %v1776_v17 = vsel %vm1746_vm1, %v1743_v4, %v1496_v39  ;;  %v2107_v4 = vadd.f32 %v2106_v45, %v2076_v0  ;;  %v2038_v39 = vadd.f32 %v2037_v12, %v4206_v48  ;;  %v2087_v45 = vmul.f32 %v4286_v18, %v4286_v18 }
 0x1de   : > { %v1809_v22 = vsel %vm1779_vm4, %v1776_v17, %v1543_v24 }
 0x1df   : > { %v1842_v44 = vsel %vm1812_vm5, %v1809_v22, %v1578_v41  ;;  %v2078_v41 = vmul.f32 %v4212_v40, %v4212_v40 }
 0x1e0   : > { %2801 = vmatmul.msk.bf16.gmra.mxu3 %vm1875_vm11, %v1842_v44  ;;  %v2108_v44 = vadd.f32 %v2107_v4, %v2077_v61  ;;  %v2152_v4 = vld [vmem:[%s4913_s5 + $0x58] sm:$0xff] }
 0x1e1   : > { %v1342_v47 = vpop.permute.xlu1 %1341  ;;  %v1948_v29 = vpop.f32.mrf.mxu1 }
 0x1e2   : > { %v2109_v43 = vadd.f32 %v2108_v44, %v2078_v41  ;;  %v2150_v41 = vld [vmem:[%s4913_s5 + $0x48] sm:$0xff] }
 0x1e4   : > { %v1261_v20 = vpop.permute.xlu0 %1260 }
 0x1e5   : > { %v1613_v36 = vsel %vm1581_vm12, %v3946_v37, %v1261_v20 }
 0x1e6   : > { %v1646_v49 = vsel %vm1614_vm13, %v1613_v36, %v1342_v47  ;;  %v2039_v47 = vadd.f32 %v2038_v39, %v4212_v40 }
 0x1e7   : > { %v1679_v54 = vsel %vm1647_vm14, %v1646_v49, %v1379_v50  ;;  %v4235_v49 = vadd.f32 %v4166_v57, %v1946_v1 }
 0x1e9   : > { %v1461_v56 = vpop.permute.xlu1 %1460 }
 0x1ec   : > { %v1426_v13 = vpop.permute.xlu0 %1425 }
 0x1ed   : > { %v1712_v3 = vsel %vm1680_vm0, %v1679_v54, %v1426_v13  ;;  %v4238_v54 = vpop.f32.mrf.mxu3 }
 0x1ee   : > { %v1745_v32 = vsel %vm1713_vm15, %v1712_v3, %v1461_v56 }
 0x1ef   : > { %v1778_v55 = vsel %vm1746_vm1, %v1745_v32, %v1498_v10  ;;  %v2154_v32 = vld [vmem:[%s4913_s5 + $0x68] sm:$0xff]  ;;  %v1963_v10 = vpop.f32.mrf.mxu2 }
 0x1f0   : > { %2187 = vmatpush.msrb.mxu2 %v2154_v32  ;;  %2159 = vmatpush.msrb.mxu1 %v2154_v32  ;;  %v4294_v12 = vadd.f32 %v4166_v57, %v1963_v10  ;;  %v2147_v10 = vld [vmem:[%s4913_s5 + $0x30] sm:$0xff] }
 0x1f1   : > { %v1580_v34 = vpop.permute.xlu1 %1579 }
 0x1f2   : > { %2188 = vmatpush.msrb.mxu2 %v2153_v5  ;;  %2160 = vmatpush.msrb.mxu1 %v2153_v5 }
 0x1f4   : > { %v1545_v31 = vpop.permute.xlu0 %1544  ;;  %2189 = vmatpush.msrb.mxu2 %v2152_v4  ;;  %2161 = vmatpush.msrb.mxu1 %v2152_v4 }
 0x1f5   : > { %v1811_v58 = vsel %vm1779_vm4, %v1778_v55, %v1545_v31  ;;  %v2081_v55 = vmul.f32 %v4235_v49, %v4235_v49  ;;  %v4249_v31 = vadd.f32 %v4166_v57, %v1948_v29  ;;  %v4266_v46 = vpop.f32.mrf.mxu3  ;;  %v4277_v29 = vadd.f32 %v4166_v57, %v4194_v33 }
 0x1f6   : > { %v1844_v37 = vsel %vm1812_vm5, %v1811_v58, %v1580_v34  ;;  %2190 = vmatpush.msrb.mxu2 %v2151_v63  ;;  %2162 = vmatpush.msrb.mxu1 %v2151_v63  ;;  %v2142_v63 = vld [vmem:[%s4913_s5 + $0x8] sm:$0xff] }
 0x1f7   : > { %2802 = vmatmul.msk.bf16.gmra.mxu3 %vm1875_vm11, %v1844_v37  ;;  %v2082_v19 = vmul.f32 %v4249_v31, %v4249_v31  ;;  %v2086_v62 = vmul.f32 %v4277_v29, %v4277_v29 }
 0x1f8   : > { %2191 = vmatpush.msrb.mxu2 %v2150_v41  ;;  %2163 = vmatpush.msrb.mxu1 %v2150_v41 }
 0x1fd   : > { %v4289_v0 = vpop.f32.mrf.mxu3 }
 0x20b   : > { %v1941_v26 = vpop.f32.mrf.mxu0 }
 0x20c   : > { %v4220_v24 = vadd.f32 %v4166_v57, %v1941_v26 }
 0x20e   : > { %v2079_v20 = vmul.f32 %v4220_v24, %v4220_v24  ;;  %v2040_v36 = vadd.f32 %v2039_v47, %v4220_v24 }
 0x210   : > { %v2110_v56 = vadd.f32 %v2109_v43, %v2079_v20  ;;  %v2149_v20 = vld [vmem:[%s4913_s5 + $0x40] sm:$0xff] }
 0x211   : > { %2192 = vmatpush.msrb.mxu2 %v2149_v20  ;;  %2164 = vmatpush.msrb.mxu1 %v2149_v20 }
 0x213   : > { %v1943_v35 = vpop.f32.mrf.mxu0 }
 0x214   : > { %v4226_v17 = vadd.f32 %v4166_v57, %v1943_v35 }
 0x216   : > { %v2080_v50 = vmul.f32 %v4226_v17, %v4226_v17  ;;  %v2041_v13 = vadd.f32 %v2040_v36, %v4226_v17 }
 0x218   : > { %v2111_v3 = vadd.f32 %v2110_v56, %v2080_v50  ;;  %v2042_v58 = vadd.f32 %v2041_v13, %v4235_v49  ;;  %v2148_v56 = vld [vmem:[%s4913_s5 + $0x38] sm:$0xff] }
 0x219   : > { %2193 = vmatpush.msrb.mxu2 %v2148_v56  ;;  %2165 = vmatpush.msrb.mxu1 %v2148_v56 }
 0x21a   : > { %v2112_v16 = vadd.f32 %v2111_v3, %v2081_v55  ;;  %v2043_v59 = vadd.f32 %v2042_v58, %v4249_v31 }
 0x21b   : > { %2194 = vmatpush.msrb.mxu2 %v2147_v10  ;;  %2166 = vmatpush.msrb.mxu1 %v2147_v10 }
 0x21c   : > { %v2113_v26 = vadd.f32 %v2112_v16, %v2082_v19 }
 0x221   : > { %v1966_v38 = vpop.f32.mrf.mxu2 }
 0x222   : > { %v4309_v44 = vadd.f32 %v4166_v57, %v1966_v38 }
 0x224   : > { %v2089_v13 = vmul.f32 %v4309_v44, %v4309_v44 }
 0x229   : > { %v1968_v33 = vpop.f32.mrf.mxu2 }
 0x22a   : > { %v4323_v3 = vadd.f32 %v4166_v57, %v1968_v33 }
 0x22c   : > { %v2090_v55 = vmul.f32 %v4323_v3, %v4323_v3 }
 0x232   : > { %v4315_v43 = vpop.f32.mrf.mxu3 }
 0x234   : > { %v1951_v22 = vpop.f32.mrf.mxu1 }
 0x235   : > { %v4253_v37 = vadd.f32 %v4166_v57, %v1951_v22  ;;  %v2088_v22 = vmul.f32 %v4294_v12, %v4294_v12 }
 0x237   : > { %v2083_v15 = vmul.f32 %v4253_v37, %v4253_v37  ;;  %v2044_v1 = vadd.f32 %v2043_v59, %v4253_v37 }
 0x239   : > { %v2114_v52 = vadd.f32 %v2113_v26, %v2083_v15  ;;  %v2146_v26 = vld [vmem:[%s4913_s5 + $0x28] sm:$0xff] }
 0x23a   : > { %v1988_v38 = vpop.f32.mrf.mxu3  ;;  %2195 = vmatpush.msrb.mxu2 %v2146_v26  ;;  %2167 = vmatpush.msrb.mxu1 %v2146_v26 }
 0x23c   : > { %v1953_v34 = vpop.f32.mrf.mxu1 }
 0x23d   : > { %v4256_v14 = vadd.f32 %v4166_v57, %v1953_v34 }
 0x23f   : > { %v2084_v6 = vmul.f32 %v4256_v14, %v4256_v14  ;;  %v2045_v25 = vadd.f32 %v2044_v1, %v4256_v14 }
 0x241   : > { %v2115_v30 = vadd.f32 %v2114_v52, %v2084_v6  ;;  %v2046_v28 = vadd.f32 %v2045_v25, %v4270_v2  ;;  %v2145_v6 = vld [vmem:[%s4913_s5 + $0x20] sm:$0xff]  ;;  %v4349_v52 = vadd.f32 %v4166_v57, %v4215_v53 }
 0x242   : > { %2196 = vmatpush.msrb.mxu2 %v2145_v6  ;;  %2168 = vmatpush.msrb.mxu1 %v2145_v6 }
 0x243   : > { %v2116_v9 = vadd.f32 %v2115_v30, %v2085_v42  ;;  %v2047_v23 = vadd.f32 %v2046_v28, %v4277_v29  ;;  %v2093_v5 = vmul.f32 %v4349_v52, %v4349_v52 }
 0x245   : > { %v2117_v35 = vadd.f32 %v2116_v9, %v2086_v62  ;;  %v2048_v61 = vadd.f32 %v2047_v23, %v4286_v18  ;;  %v4358_v9 = vadd.f32 %v4166_v57, %v4238_v54  ;;  %v2143_v54 = vld [vmem:[%s4913_s5 + $0x10] sm:$0xff] }
 0x247   : > { %v2118_v39 = vadd.f32 %v2117_v35, %v2087_v45  ;;  %v2049_v47 = vadd.f32 %v2048_v61, %v4294_v12  ;;  %v2094_v33 = vmul.f32 %v4358_v9, %v4358_v9  ;;  %v4365_v35 = vadd.f32 %v4166_v57, %v4266_v46  ;;  %v2144_v61 = vld [vmem:[%s4913_s5 + $0x18] sm:$0xff] }
 0x248   : > { %2197 = vmatpush.msrb.mxu2 %v2144_v61  ;;  %2169 = vmatpush.msrb.mxu1 %v2144_v61 }
 0x249   : > { %v2119_v50 = vadd.f32 %v2118_v39, %v2088_v22  ;;  %v2050_v32 = vadd.f32 %v2049_v47, %v4309_v44  ;;  %v2095_v46 = vmul.f32 %v4365_v35, %v4365_v35  ;;  %v4381_v39 = vadd.f32 %v4166_v57, %v4289_v0  ;;  %v2141_v22 = vld [vmem:[%s4913_s5] sm:$0xff] }
 0x24a   : > { %2198 = vmatpush.msrb.mxu2 %v2143_v54  ;;  %2170 = vmatpush.msrb.mxu1 %v2143_v54 }
 0x24b   : > { %v2120_v34 = vadd.f32 %v2119_v50, %v2089_v13  ;;  %v2051_v58 = vadd.f32 %v2050_v32, %v4323_v3  ;;  %v2096_v20 = vmul.f32 %v4381_v39, %v4381_v39  ;;  %v4397_v32 = vadd.f32 %v4166_v57, %v1988_v38 }
 0x24c   : > { %2199 = vmatpush.msrb.mxu2 %v2142_v63  ;;  %2171 = vmatpush.msrb.mxu1 %v2142_v63 }
 0x24d   : > { %v2121_v15 = vadd.f32 %v2120_v34, %v2090_v55  ;;  %v2098_v55 = vmul.f32 %v4397_v32, %v4397_v32 }
 0x24e   : > { %2200 = vmatpush.msrb.mxu2 %v2141_v22  ;;  %2172 = vmatpush.msrb.mxu1 %v2141_v22 }
 0x256   : > { %v1971_v36 = vpop.f32.mrf.mxu2 }
 0x257   : > { %v4326_v60 = vadd.f32 %v4166_v57, %v1971_v36  ;;  %v4391_v36 = vadd.f32 %v4166_v57, %v4315_v43 }
 0x259   : > { %v2091_v16 = vmul.f32 %v4326_v60, %v4326_v60  ;;  %v2052_v59 = vadd.f32 %v2051_v58, %v4326_v60  ;;  %v2097_v13 = vmul.f32 %v4391_v36, %v4391_v36 }
 0x25b   : > { %v2122_v25 = vadd.f32 %v2121_v15, %v2091_v16 }
 0x25e   : > { %v1973_v19 = vpop.f32.mrf.mxu2 }
 0x25f   : > { %v4339_v1 = vadd.f32 %v4166_v57, %v1973_v19 }
 0x261   : > { %v2053_v30 = vadd.f32 %v2052_v59, %v4339_v1  ;;  %v2092_v42 = vmul.f32 %v4339_v1, %v4339_v1 }
 0x263   : > { %v2123_v28 = vadd.f32 %v2122_v25, %v2092_v42  ;;  %v2054_v62 = vadd.f32 %v2053_v30, %v4349_v52  ;;  %v1991_v23 = vpop.f32.mrf.mxu3 }
 0x264   : > { %v4403_v58 = vadd.f32 %v4166_v57, %v1991_v23 }
 0x265   : > { %v2124_v53 = vadd.f32 %v2123_v28, %v2093_v5  ;;  %v2055_v45 = vadd.f32 %v2054_v62, %v4358_v9 }
 0x266   : > { %v2099_v15 = vmul.f32 %v4403_v58, %v4403_v58 }
 0x267   : > { %v2125_v4 = vadd.f32 %v2124_v53, %v2094_v33  ;;  %v2056_v41 = vadd.f32 %v2055_v45, %v4365_v35 }
 0x269   : > { %v2126_v47 = vadd.f32 %v2125_v4, %v2095_v46  ;;  %v2057_v0 = vadd.f32 %v2056_v41, %v4381_v39 }
 0x26b   : > { %v1993_v50 = vpop.f32.mrf.mxu3  ;;  %v2127_v56 = vadd.f32 %v2126_v47, %v2096_v20  ;;  %v2058_v10 = vadd.f32 %v2057_v0, %v4391_v36 }
 0x26c   : > { %v4410_v26 = vadd.f32 %v4166_v57, %v1993_v50 }
 0x26d   : > { %v2128_v34 = vadd.f32 %v2127_v56, %v2097_v13  ;;  %v2059_v43 = vadd.f32 %v2058_v10, %v4397_v32  ;;  %v3116_v13 = vmov 512.0  }
 0x26e   : > { %v2100_v30 = vmul.f32 %v4410_v26, %v4410_v26  ;;  %2900 = vrcp.f32 %v3116_v13 }
 0x26f   : > { %v2129_v19 = vadd.f32 %v2128_v34, %v2098_v55  ;;  %v2060_v59 = vadd.f32 %v2059_v43, %v4403_v58 }
 0x271   : > { %v2130_v38 = vadd.f32 %v2129_v19, %v2099_v15  ;;  %v2061_v25 = vadd.f32 %v2060_v59, %v4410_v26 }
 0x273   : > { %v2131_v5 = vadd.f32 %v2130_v38, %v2100_v30 }
 0x274   : > { %v2901_v10 = vpop.eup %2900 }
 0x275   : > { %v2178_v34 = vmul.f32 512.0, %v2901_v10  ;;  %vm2182_vm2 = vweird.f32 %v2901_v10 }
 0x277   : > { %v2179_v55 = vsub.f32 1.0, %v2178_v34 }
 0x279   : > { %v2180_v43 = vmul.f32 %v2901_v10, %v2179_v55 }
 0x27a   : > { %v1996_v16 = vpop.f32.mrf.mxu3 }
 0x27b   : > { %v4413_v6 = vadd.f32 %v4166_v57, %v1996_v16  ;;  %v2181_v16 = vadd.f32 %v2901_v10, %v2180_v43 }
 0x27d   : > { %v2101_v42 = vmul.f32 %v4413_v6, %v4413_v6  ;;  %v2062_v62 = vadd.f32 %v2061_v25, %v4413_v6  ;;  %v2183_v59 = vsel %vm2182_vm2, %v2901_v10, %v2181_v16 }
 0x27f   : > { %v2132_v23 = vadd.f32 %v2131_v5, %v2101_v42 }
 0x282   : > { %v1998_v28 = vpop.f32.mrf.mxu3 }
 0x283   : > { %v4422_v53 = vadd.f32 %v4166_v57, %v1998_v28 }
 0x285   : > { %v2063_v33 = vadd.f32 %v2062_v62, %v4422_v53  ;;  %v2102_v45 = vmul.f32 %v4422_v53, %v4422_v53 }
 0x287   : > { %v2064_v61 = vrot.slane %v2063_v33, 4  ;;  %v2133_v54 = vadd.f32 %v2132_v23, %v2102_v45 }
 0x289   : > { %v2065_v4 = vadd.f32 %v2064_v61, %v2063_v33  ;;  %v2134_v63 = vrot.slane %v2133_v54, 4 }
 0x28b   : > { %v2066_v46 = vrot.slane %v2065_v4, 2  ;;  %v2135_v41 = vadd.f32 %v2134_v63, %v2133_v54 }
 0x28d   : > { %v2067_v22 = vadd.f32 %v2066_v46, %v2065_v4  ;;  %v2136_v47 = vrot.slane %v2135_v41, 2 }
 0x28f   : > { %v2068_v20 = vrot.slane %v2067_v22, 1  ;;  %v2137_v0 = vadd.f32 %v2136_v47, %v2135_v41 }
 0x291   : > { %v2069_v50 = vadd.f32 %v2068_v20, %v2067_v22  ;;  %v2138_v56 = vrot.slane %v2137_v0, 1 }
 0x293   : > { %2173 = vmatmul.f32.vlgmr.msrb.gmra.mxu1 %v2069_v50  ;;  %v2139_v57 = vadd.f32 %v2138_v56, %v2137_v0 }
 0x295   : > { %2201 = vmatmul.f32.vlgmr.msrb.gmra.mxu2 %v2139_v57 }
 0x310   : > { %v2174_v19 = vpop.f32.mrf.mxu1 }
 0x311   : > { %v2184_v15 = vmul.f32 %v2183_v59, %v2174_v19 }
 0x313   : > { %v2206_v25 = vmul.f32 %v2184_v15, %v2184_v15  ;;  %v4427_v54 = vperm.slane %v2184_v15, 0 }
 0x315   : > { %v2255_v63 = vsub.f32 %v4172_v7, %v4427_v54  ;;  %v2256_v46 = vsub.f32 %v4169_v27, %v4427_v54  ;;  %v2257_v41 = vsub.f32 %v4175_v21, %v4427_v54  ;;  %v2258_v22 = vsub.f32 %v4180_v11, %v4427_v54 }
 0x316   : > { %v2259_v47 = vsub.f32 %v4192_v8, %v4427_v54  ;;  %v2260_v20 = vsub.f32 %v4200_v51, %v4427_v54  ;;  %v2261_v27 = vsub.f32 %v4206_v48, %v4427_v54  ;;  %v2262_v7 = vsub.f32 %v4212_v40, %v4427_v54 }
 0x317   : > { %v2263_v21 = vsub.f32 %v4220_v24, %v4427_v54  ;;  %v2264_v8 = vsub.f32 %v4226_v17, %v4427_v54  ;;  %v2265_v51 = vsub.f32 %v4235_v49, %v4427_v54  ;;  %v2266_v50 = vsub.f32 %v4249_v31, %v4427_v54 }
 0x318   : > { %v2202_v38 = vpop.f32.mrf.mxu2  ;;  %v2267_v48 = vsub.f32 %v4253_v37, %v4427_v54  ;;  %v2268_v40 = vsub.f32 %v4256_v14, %v4427_v54  ;;  %v2269_v24 = vsub.f32 %v4270_v2, %v4427_v54  ;;  %v2270_v56 = vsub.f32 %v4277_v29, %v4427_v54 }
 0x319   : > { %v2205_v30 = vmul.f32 %v2202_v38, %v2183_v59  ;;  %v2271_v17 = vsub.f32 %v4286_v18, %v4427_v54  ;;  %v2272_v49 = vsub.f32 %v4294_v12, %v4427_v54  ;;  %v2273_v31 = vsub.f32 %v4309_v44, %v4427_v54 }
 0x31a   : > { %v2274_v37 = vsub.f32 %v4323_v3, %v4427_v54  ;;  %v2275_v14 = vsub.f32 %v4326_v60, %v4427_v54  ;;  %v2276_v2 = vsub.f32 %v4339_v1, %v4427_v54  ;;  %v2277_v29 = vsub.f32 %v4349_v52, %v4427_v54 }
 0x31b   : > { %v2207_v42 = vsub.f32 %v2205_v30, %v2206_v25  ;;  %v2278_v18 = vsub.f32 %v4358_v9, %v4427_v54  ;;  %v2279_v12 = vsub.f32 %v4365_v35, %v4427_v54  ;;  %v2280_v44 = vsub.f32 %v4381_v39, %v4427_v54 }
 0x31c   : > { %v2281_v3 = vsub.f32 %v4391_v36, %v4427_v54  ;;  %v2282_v60 = vsub.f32 %v4397_v32, %v4427_v54  ;;  %v2283_v1 = vsub.f32 %v4403_v58, %v4427_v54  ;;  %v2284_v52 = vsub.f32 %v4410_v26, %v4427_v54 }
 0x31d   : > { %v2208_v28 = vmax.f32 %v2207_v42, 0.0  ;;  %v2285_v9 = vsub.f32 %v4413_v6, %v4427_v54  ;;  %v2286_v35 = vsub.f32 %v4422_v53, %v4427_v54  ;;  %v4502_v6 = vld [vmem:[%s4911_s3] ss:$0 sm:$0xff] }
 0x31f   : > { %v2209_v5 = vadd.f32 1e-05, %v2208_v28 }
 0x321   : > { %2902 = vrsqrt.f32 %v2209_v5  ;;  %vm2216_vm6 = vweird.f32 %v2209_v5 }
 0x327   : > { %v2903_v62 = vpop.eup %2902 }
 0x328   : > { %v2211_v23 = vmul.f32 %v2903_v62, %v2209_v5  ;;  %vm2217_vm3 = vweird.f32 %v2903_v62 }
 0x329   : > { %vm4441_vm7 = vmor %vm2216_vm6, %vm2217_vm3 }
 0x32a   : > { %v2212_v33 = vmul.f32 %v2903_v62, %v2211_v23 }
 0x32c   : > { %v2213_v45 = vmul.f32 0.5, %v2212_v33 }
 0x32e   : > { %v2214_v61 = vsub.f32 1.5, %v2213_v45 }
 0x330   : > { %v2215_v4 = vmul.f32 %v2903_v62, %v2214_v61 }
 0x332   : > { %v2219_v11 = vsel %vm4441_vm7, %v2903_v62, %v2215_v4 }
 0x333   : > { %v2287_v57 = vperm.slane %v2219_v11, 0 }
 0x335   : > { %v2288_v13 = vmul.f32 %v2287_v57, %v2255_v63  ;;  %v2289_v39 = vmul.f32 %v2287_v57, %v2256_v46  ;;  %v2290_v10 = vmul.f32 %v2287_v57, %v2257_v41  ;;  %v2291_v34 = vmul.f32 %v2287_v57, %v2258_v22 }
 0x336   : > { %v2292_v36 = vmul.f32 %v2287_v57, %v2259_v47  ;;  %v2293_v55 = vmul.f32 %v2287_v57, %v2260_v20  ;;  %v2294_v43 = vmul.f32 %v2287_v57, %v2261_v27  ;;  %v2295_v32 = vmul.f32 %v2287_v57, %v2262_v7  ;;  %v4507_v47 = vld [vmem:[%s4912_s4] ss:$0 sm:$0xff] }
 0x337   : > { %v2296_v16 = vmul.f32 %v2287_v57, %v2263_v21  ;;  %v2297_v19 = vmul.f32 %v2287_v57, %v2264_v8  ;;  %v2298_v58 = vmul.f32 %v2287_v57, %v2265_v51  ;;  %v2299_v59 = vmul.f32 %v2287_v57, %v2266_v50 }
 0x338   : > { %v2300_v15 = vmul.f32 %v2287_v57, %v2267_v48  ;;  %v2301_v26 = vmul.f32 %v2287_v57, %v2268_v40  ;;  %v2302_v38 = vmul.f32 %v2287_v57, %v2269_v24  ;;  %v2303_v25 = vmul.f32 %v2287_v57, %v2270_v56 }
 0x339   : > { %v2304_v53 = vmul.f32 %v2287_v57, %v2271_v17  ;;  %v2305_v30 = vmul.f32 %v2287_v57, %v2272_v49  ;;  %v2306_v42 = vmul.f32 %v2287_v57, %v2273_v31  ;;  %v2307_v28 = vmul.f32 %v2287_v57, %v2274_v37 }
 0x33a   : > { %v2308_v5 = vmul.f32 %v2287_v57, %v2275_v14  ;;  %v2309_v62 = vmul.f32 %v2287_v57, %v2276_v2  ;;  %v2310_v23 = vmul.f32 %v2287_v57, %v2277_v29  ;;  %v2311_v33 = vmul.f32 %v2287_v57, %v2278_v18 }
 0x33b   : > { %v2312_v45 = vmul.f32 %v2287_v57, %v2279_v12  ;;  %v2313_v61 = vmul.f32 %v2287_v57, %v2280_v44  ;;  %v2314_v54 = vmul.f32 %v2287_v57, %v2281_v3  ;;  %v2315_v4 = vmul.f32 %v2287_v57, %v2282_v60 }
 0x33c   : > { %v2316_v63 = vmul.f32 %v2287_v57, %v2283_v1  ;;  %v2317_v46 = vmul.f32 %v2287_v57, %v2284_v52  ;;  %v2318_v41 = vmul.f32 %v2287_v57, %v2285_v9  ;;  %v2319_v22 = vmul.f32 %v2287_v57, %v2286_v35 }
 0x33d   : > { %v2323_v20 = vmul.f32 %v4502_v6, %v2288_v13  ;;  %v2324_v0 = vmul.f32 %v4502_v6, %v2289_v39  ;;  %v2325_v27 = vmul.f32 %v4502_v6, %v2290_v10  ;;  %v2326_v7 = vmul.f32 %v4502_v6, %v2291_v34 }
 0x33e   : > { %v2327_v21 = vmul.f32 %v4502_v6, %v2292_v36  ;;  %v2328_v11 = vmul.f32 %v4502_v6, %v2293_v55  ;;  %v2329_v8 = vmul.f32 %v4502_v6, %v2294_v43  ;;  %v2330_v51 = vmul.f32 %v4502_v6, %v2295_v32 }
 0x33f   : > { %v2331_v50 = vmul.f32 %v4502_v6, %v2296_v16  ;;  %v2332_v48 = vmul.f32 %v4502_v6, %v2297_v19  ;;  %v2333_v40 = vmul.f32 %v4502_v6, %v2298_v58  ;;  %v2334_v24 = vmul.f32 %v4502_v6, %v2299_v59 }
 0x340   : > { %v2335_v56 = vmul.f32 %v4502_v6, %v2300_v15  ;;  %v2336_v17 = vmul.f32 %v4502_v6, %v2301_v26  ;;  %v2337_v49 = vmul.f32 %v4502_v6, %v2302_v38  ;;  %v2338_v31 = vmul.f32 %v4502_v6, %v2303_v25 }
 0x341   : > { %v2339_v37 = vmul.f32 %v4502_v6, %v2304_v53  ;;  %v4527_v57 = vadd.f32 %v4507_v47, %v2323_v20  ;;  %v4530_v14 = vadd.f32 %v4507_v47, %v2324_v0  ;;  %v4533_v2 = vadd.f32 %v4507_v47, %v2325_v27 }
 0x342   : > { %v2340_v29 = vmul.f32 %v4502_v6, %v2305_v30  ;;  %v2341_v18 = vmul.f32 %v4502_v6, %v2306_v42  ;;  %v4538_v12 = vmul.f32 %v4502_v6, %v2307_v28  ;;  %v4541_v44 = vadd.f32 %v4507_v47, %v2326_v7 }
 0x343   : > { %v4544_v3 = vmul.f32 %v4502_v6, %v2308_v5  ;;  %v4547_v60 = vmul.f32 %v4502_v6, %v2309_v62  ;;  %v4550_v1 = vmul.f32 %v4502_v6, %v2310_v23  ;;  %v4553_v52 = vadd.f32 %v4507_v47, %v2327_v21 }
 0x344   : > { %v4556_v9 = vmul.f32 %v4502_v6, %v2311_v33  ;;  %v4559_v35 = vmul.f32 %v4502_v6, %v2312_v45  ;;  %v4562_v13 = vadd.f32 %v4507_v47, %v2328_v11  ;;  %v4565_v39 = vadd.f32 %v4507_v47, %v2329_v8 }
 0x345   : > { %v4568_v10 = vmul.f32 %v4502_v6, %v2313_v61  ;;  %v2390_v34 = vsub.f32 0.0, %v4527_v57  ;;  %v2391_v36 = vsub.f32 0.0, %v4530_v14  ;;  %v2392_v55 = vsub.f32 0.0, %v4533_v2 }
 0x346   : > { %v4574_v43 = vmul.f32 %v4502_v6, %v2314_v54  ;;  %v4577_v32 = vmul.f32 %v4502_v6, %v2315_v4  ;;  %v4580_v16 = vadd.f32 %v4507_v47, %v2330_v51  ;;  %v2393_v19 = vsub.f32 0.0, %v4541_v44 }
 0x347   : > { %v4584_v58 = vmul.f32 %v4502_v6, %v2316_v63  ;;  %v4587_v59 = vmul.f32 %v4502_v6, %v2317_v46  ;;  %v4590_v15 = vadd.f32 %v4507_v47, %v2331_v50  ;;  %v2394_v26 = vsub.f32 0.0, %v4553_v52 }
 0x348   : > { %v4594_v38 = vmul.f32 %v4502_v6, %v2318_v41  ;;  %v4597_v25 = vadd.f32 %v4507_v47, %v2332_v48  ;;  %v2395_v53 = vsub.f32 0.0, %v4562_v13  ;;  %v2396_v30 = vsub.f32 0.0, %v4565_v39 }
 0x349   : > { %v4602_v42 = vadd.f32 %v4507_v47, %v2333_v40  ;;  %v2422_v28 = vmul.f32 1.442695, %v2390_v34  ;;  %v2424_v5 = vmul.f32 1.442695, %v2391_v36  ;;  %v2426_v62 = vmul.f32 1.442695, %v2392_v55 }
 0x34a   : > { %v4605_v23 = vmul.f32 %v4502_v6, %v2319_v22  ;;  %v4608_v33 = vadd.f32 %v4507_v47, %v2334_v24  ;;  %v2397_v45 = vsub.f32 0.0, %v4580_v16  ;;  %v2428_v61 = vmul.f32 1.442695, %v2393_v19 }
 0x34b   : > { %v4612_v54 = vadd.f32 %v4507_v47, %v2335_v56  ;;  %v2398_v4 = vsub.f32 0.0, %v4590_v15  ;;  %2904 = vpow2.f32 %v2422_v28  ;;  %v2430_v63 = vmul.f32 1.442695, %v2394_v26 }
 0x34c   : > { %v4616_v46 = vadd.f32 %v4507_v47, %v2336_v17  ;;  %v2399_v41 = vsub.f32 0.0, %v4597_v25  ;;  %2906 = vpow2.f32 %v2424_v5  ;;  %v2432_v6 = vmul.f32 1.442695, %v2395_v53 }
 0x34d   : > { %v4620_v22 = vadd.f32 %v4507_v47, %v2337_v49  ;;  %v2400_v20 = vsub.f32 0.0, %v4602_v42  ;;  %2908 = vpow2.f32 %v2426_v62  ;;  %v2434_v0 = vmul.f32 1.442695, %v2396_v30 }
 0x34e   : > { %v4624_v27 = vadd.f32 %v4507_v47, %v2338_v31  ;;  %v2401_v7 = vsub.f32 0.0, %v4608_v33  ;;  %2910 = vpow2.f32 %v2428_v61  ;;  %v2436_v21 = vmul.f32 1.442695, %v2397_v45 }
 0x34f   : > { %v4628_v11 = vadd.f32 %v4507_v47, %v2339_v37  ;;  %v2402_v8 = vsub.f32 0.0, %v4612_v54  ;;  %2912 = vpow2.f32 %v2430_v63  ;;  %v2438_v51 = vmul.f32 1.442695, %v2398_v4 }
 0x350   : > { %v4632_v50 = vadd.f32 %v4507_v47, %v2340_v29  ;;  %v2403_v48 = vsub.f32 0.0, %v4616_v46  ;;  %2914 = vpow2.f32 %v2432_v6  ;;  %v2440_v40 = vmul.f32 1.442695, %v2399_v41 }
 0x351   : > { %v4635_v24 = vpop.eup %2904  ;;  %v4638_v56 = vadd.f32 %v4507_v47, %v2341_v18  ;;  %v2404_v17 = vsub.f32 0.0, %v4620_v22  ;;  %2916 = vpow2.f32 %v2434_v0  ;;  %v2442_v49 = vmul.f32 1.442695, %v2400_v20 }
 0x352   : > { %v4641_v31 = vpop.eup %2906  ;;  %v4645_v37 = vadd.f32 %v4507_v47, %v4538_v12  ;;  %v2405_v29 = vsub.f32 0.0, %v4624_v27  ;;  %2918 = vpow2.f32 %v2436_v21  ;;  %v2444_v34 = vmul.f32 1.442695, %v2401_v7 }
 0x353   : > { %v4648_v36 = vpop.eup %2908  ;;  %v4652_v18 = vadd.f32 %v4507_v47, %v4544_v3  ;;  %v2406_v55 = vsub.f32 0.0, %v4628_v11  ;;  %2920 = vpow2.f32 %v2438_v51  ;;  %v2446_v19 = vmul.f32 1.442695, %v2402_v8 }
 0x354   : > { %v4655_v26 = vpop.eup %2910  ;;  %v4659_v12 = vadd.f32 %v4507_v47, %v4547_v60  ;;  %v2407_v53 = vsub.f32 0.0, %v4632_v50  ;;  %2922 = vpow2.f32 %v2440_v40  ;;  %v2448_v30 = vmul.f32 1.442695, %v2403_v48 }
 0x355   : > { %v4662_v28 = vpop.eup %2912  ;;  %v4666_v3 = vadd.f32 %v4507_v47, %v4550_v1  ;;  %v2408_v5 = vsub.f32 0.0, %v4638_v56  ;;  %2924 = vpow2.f32 %v2442_v49  ;;  %v2450_v62 = vmul.f32 1.442695, %v2404_v17 }
 0x356   : > { %v4669_v45 = vpop.eup %2914  ;;  %v4673_v60 = vadd.f32 %v4507_v47, %v4556_v9  ;;  %v2409_v61 = vsub.f32 0.0, %v4645_v37  ;;  %2926 = vpow2.f32 %v2444_v34  ;;  %v2452_v4 = vmul.f32 1.442695, %v2405_v29 }
 0x357   : > { %v4676_v63 = vpop.eup %2916  ;;  %v4680_v1 = vadd.f32 %v4507_v47, %v4559_v35  ;;  %v2410_v41 = vsub.f32 0.0, %v4652_v18  ;;  %2928 = vpow2.f32 %v2446_v19  ;;  %v2454_v6 = vmul.f32 1.442695, %v2406_v55 }
 0x358   : > { %v4683_v20 = vpop.eup %2918  ;;  %v4687_v9 = vadd.f32 %v4507_v47, %v4568_v10  ;;  %v2411_v0 = vsub.f32 0.0, %v4659_v12  ;;  %2930 = vpow2.f32 %v2448_v30  ;;  %v2456_v7 = vmul.f32 1.442695, %v2407_v53 }
 0x359   : > { %v4690_v21 = vpop.eup %2920  ;;  %v4694_v35 = vadd.f32 %v4507_v47, %v4574_v43  ;;  %v2412_v8 = vsub.f32 0.0, %v4666_v3  ;;  %2932 = vpow2.f32 %v2450_v62  ;;  %v2458_v51 = vmul.f32 1.442695, %v2408_v5 }
 0x35a   : > { %v4697_v48 = vpop.eup %2922  ;;  %v4701_v10 = vadd.f32 %v4507_v47, %v4577_v32  ;;  %v2413_v40 = vsub.f32 0.0, %v4673_v60  ;;  %2934 = vpow2.f32 %v2452_v4  ;;  %v2460_v17 = vmul.f32 1.442695, %v2409_v61 }
 0x35b   : > { %4932 = vst [vmem:[#allocation7_spill] sm:$0xff] %v4694_v35  ;;  %v4704_v49 = vpop.eup %2924  ;;  %v4708_v43 = vadd.f32 %v4507_v47, %v4584_v58  ;;  %v2414_v29 = vsub.f32 0.0, %v4680_v1  ;;  %2936 = vpow2.f32 %v2454_v6  ;;  %v2462_v34 = vmul.f32 1.442695, %v2410_v41 }
 0x35c   : > { %4933 = vst [vmem:[#allocation8_spill] sm:$0xff] %v4701_v10  ;;  %v4711_v55 = vpop.eup %2926  ;;  %v4715_v32 = vadd.f32 %v4507_v47, %v4587_v59  ;;  %v2415_v19 = vsub.f32 0.0, %v4687_v9  ;;  %2938 = vpow2.f32 %v2456_v7  ;;  %v2464_v53 = vmul.f32 1.442695, %v2411_v0 }
 0x35d   : > { %4934 = vst [vmem:[#allocation9_spill] sm:$0xff] %v4708_v43  ;;  %v4718_v30 = vpop.eup %2928  ;;  %v4722_v58 = vadd.f32 %v4507_v47, %v4594_v38  ;;  %v2416_v5 = vsub.f32 0.0, %v4694_v35  ;;  %2940 = vpow2.f32 %v2458_v51  ;;  %v2466_v62 = vmul.f32 1.442695, %v2412_v8 }
 0x35e   : > { %v4725_v61 = vpop.eup %2930  ;;  %v4729_v59 = vadd.f32 %v4507_v47, %v4605_v23  ;;  %v2417_v4 = vsub.f32 0.0, %v4701_v10  ;;  %2942 = vpow2.f32 %v2460_v17  ;;  %v2468_v41 = vmul.f32 1.442695, %v2413_v40 }
 0x35f   : > { %4935 = vst [vmem:[#allocation10_spill] sm:$0xff] %v4722_v58  ;;  %v4732_v6 = vpop.eup %2932  ;;  %v2418_v0 = vsub.f32 0.0, %v4708_v43  ;;  %2944 = vpow2.f32 %v2462_v34  ;;  %v2470_v38 = vmul.f32 1.442695, %v2414_v29  ;;  %v2419_v8 = vsub.f32 0.0, %v4715_v32 }
 0x360   : > { %4936 = vst [vmem:[#allocation11_spill] sm:$0xff] %v4729_v59  ;;  %v4735_v7 = vpop.eup %2934  ;;  %2946 = vpow2.f32 %v2464_v53  ;;  %v2472_v51 = vmul.f32 1.442695, %v2415_v19  ;;  %v2420_v47 = vsub.f32 0.0, %v4722_v58  ;;  %v2474_v23 = vmul.f32 1.442695, %v2416_v5 }
 0x361   : > { %v4738_v35 = vpop.eup %2936  ;;  %2948 = vpow2.f32 %v2466_v62  ;;  %v2421_v40 = vsub.f32 0.0, %v4729_v59  ;;  %v2476_v43 = vmul.f32 1.442695, %v2417_v4  ;;  %v2478_v29 = vmul.f32 1.442695, %v2418_v0 }
 0x362   : > { %v4741_v17 = vpop.eup %2938  ;;  %2950 = vpow2.f32 %v2468_v41  ;;  %v2480_v19 = vmul.f32 1.442695, %v2419_v8  ;;  %v2482_v58 = vmul.f32 1.442695, %v2420_v47  ;;  %v2486_v4 = vadd.f32 1.0, %v4635_v24 }
 0x363   : > { %v4744_v34 = vpop.eup %2940  ;;  %2952 = vpow2.f32 %v2470_v38  ;;  %v2484_v5 = vmul.f32 1.442695, %v2421_v40  ;;  %v2487_v0 = vadd.f32 1.0, %v4641_v31  ;;  %v2488_v8 = vadd.f32 1.0, %v4648_v36 }
 0x364   : > { %v4746_v10 = vpop.eup %2942  ;;  %2954 = vpow2.f32 %v2472_v51  ;;  %v2490_v24 = vadd.f32 1.0, %v4662_v28  ;;  %v2491_v31 = vadd.f32 1.0, %v4669_v45  ;;  %v2492_v36 = vadd.f32 1.0, %v4676_v63 }
 0x365   : > { %v4748_v53 = vpop.eup %2944  ;;  %2956 = vpow2.f32 %v2474_v23  ;;  %v2494_v28 = vadd.f32 1.0, %v4690_v21  ;;  %v2495_v45 = vadd.f32 1.0, %v4697_v48  ;;  %v2496_v63 = vadd.f32 1.0, %v4704_v49 }
 0x366   : > { %v4750_v62 = vpop.eup %2946  ;;  %2958 = vpow2.f32 %v2476_v43  ;;  %v2489_v43 = vadd.f32 1.0, %v4655_v26  ;;  %v2493_v26 = vadd.f32 1.0, %v4683_v20  ;;  %v2499_v48 = vadd.f32 1.0, %v4725_v61 }
 0x367   : > { %v4752_v59 = vpop.eup %2948  ;;  %2960 = vpow2.f32 %v2478_v29  ;;  %v2500_v49 = vadd.f32 1.0, %v4732_v6 }
 0x368   : > { %v4755_v41 = vpop.eup %2950  ;;  %2962 = vpow2.f32 %v2480_v19 }
 0x369   : > { %v4758_v38 = vpop.eup %2952  ;;  %2964 = vpow2.f32 %v2482_v58 }
 0x36a   : > { %v4761_v51 = vpop.eup %2954  ;;  %2966 = vpow2.f32 %v2484_v5 }
 0x36b   : > { %v4764_v47 = vpop.eup %2956  ;;  %2968 = vrcp.f32 %v2486_v4 }
 0x36c   : > { %v4768_v23 = vpop.eup %2958  ;;  %2970 = vrcp.f32 %v2487_v0  ;;  %v2497_v0 = vadd.f32 1.0, %v4711_v55 }
 0x36d   : > { %v4771_v58 = vpop.eup %2960  ;;  %2972 = vrcp.f32 %v2488_v8 }
 0x36e   : > { %v4774_v40 = vpop.eup %2962  ;;  %2974 = vrcp.f32 %v2489_v43  ;;  %v2498_v43 = vadd.f32 1.0, %v4718_v30  ;;  %v2501_v30 = vadd.f32 1.0, %v4735_v7 }
 0x36f   : > { %v4779_v29 = vpop.eup %2964  ;;  %2976 = vrcp.f32 %v2490_v24 }
 0x370   : > { %v4782_v19 = vpop.eup %2966  ;;  %2978 = vrcp.f32 %v2491_v31 }
 0x371   : > { %v2969_v5 = vpop.eup %2968  ;;  %2980 = vrcp.f32 %v2492_v36  ;;  %v2502_v36 = vadd.f32 1.0, %v4738_v35 }
 0x372   : > { %v2971_v4 = vpop.eup %2970  ;;  %2982 = vrcp.f32 %v2493_v26  ;;  %v2550_v20 = vmul.f32 %v2969_v5, %v4527_v57 }
 0x373   : > { %v2973_v8 = vpop.eup %2972  ;;  %2984 = vrcp.f32 %v2494_v28  ;;  %v2551_v21 = vmul.f32 %v2971_v4, %v4530_v14 }
 0x374   : > { %v2975_v24 = vpop.eup %2974  ;;  %2986 = vrcp.f32 %v2495_v45  ;;  %v2552_v31 = vmul.f32 %v2973_v8, %v4533_v2  ;;  %2582 = vst [vmem:[%s4792_s9] sm:$0xff] %v2550_v20 }
 0x375   : > { %v2977_v57 = vpop.eup %2976  ;;  %2988 = vrcp.f32 %v2496_v63  ;;  %v2553_v55 = vmul.f32 %v2975_v24, %v4541_v44  ;;  %2583 = vst [vmem:[%s4792_s9 + $0x8] sm:$0xff] %v2551_v21  ;;  %v2503_v44 = vadd.f32 1.0, %v4741_v17 }
 0x376   : > { %v2979_v14 = vpop.eup %2978  ;;  %2990 = vrcp.f32 %v2497_v0  ;;  %v2554_v2 = vmul.f32 %v2977_v57, %v4553_v52  ;;  %2584 = vst [vmem:[%s4792_s9 + $0x10] sm:$0xff] %v2552_v31  ;;  %v2504_v52 = vadd.f32 1.0, %v4744_v34  ;;  %v2517_v57 = vadd.f32 1.0, %v4782_v19 }
 0x377   : > { %v2981_v61 = vpop.eup %2980  ;;  %2992 = vrcp.f32 %v2498_v43  ;;  %v2555_v26 = vmul.f32 %v2979_v14, %v4562_v13  ;;  %2585 = vst [vmem:[%s4792_s9 + $0x18] sm:$0xff] %v2553_v55  ;;  %v2505_v13 = vadd.f32 1.0, %v4746_v10 }
 0x378   : > { %v2983_v6 = vpop.eup %2982  ;;  %2994 = vrcp.f32 %v2499_v48  ;;  %v2556_v28 = vmul.f32 %v2981_v61, %v4565_v39  ;;  %2586 = vst [vmem:[%s4792_s9 + $0x20] sm:$0xff] %v2554_v2  ;;  %v2506_v39 = vadd.f32 1.0, %v4748_v53  ;;  %v4937_v2 = vld [vmem:[#allocation7_spill] sm:$0xff] }
 0x379   : > { %v2985_v7 = vpop.eup %2984  ;;  %2996 = vrcp.f32 %v2500_v49  ;;  %v2557_v45 = vmul.f32 %v2983_v6, %v4580_v16  ;;  %2587 = vst [vmem:[%s4792_s9 + $0x28] sm:$0xff] %v2555_v26  ;;  %v2507_v16 = vadd.f32 1.0, %v4750_v62 }
 0x37a   : > { %v2987_v35 = vpop.eup %2986  ;;  %2998 = vrcp.f32 %v2501_v30  ;;  %v2558_v5 = vmul.f32 %v2985_v7, %v4590_v15  ;;  %2588 = vst [vmem:[%s4792_s9 + $0x30] sm:$0xff] %v2556_v28  ;;  %v2508_v15 = vadd.f32 1.0, %v4752_v59 }
 0x37b   : > { %v2989_v17 = vpop.eup %2988  ;;  %3000 = vrcp.f32 %v2502_v36  ;;  %v2559_v63 = vmul.f32 %v2987_v35, %v4597_v25  ;;  %2589 = vst [vmem:[%s4792_s9 + $0x38] sm:$0xff] %v2557_v45  ;;  %v2509_v25 = vadd.f32 1.0, %v4755_v41  ;;  %v4938_v36 = vld [vmem:[#allocation8_spill] sm:$0xff]  ;;  %v4941_v35 = vld [vmem:[#allocation11_spill] sm:$0xff] }
 0x37c   : > { %v2991_v34 = vpop.eup %2990  ;;  %3002 = vrcp.f32 %v2503_v44  ;;  %v2560_v4 = vmul.f32 %v2989_v17, %v4602_v42  ;;  %2590 = vst [vmem:[%s4792_s9 + $0x40] sm:$0xff] %v2558_v5  ;;  %v2510_v42 = vadd.f32 1.0, %v4758_v38 }
 0x37d   : > { %v2993_v10 = vpop.eup %2992  ;;  %3004 = vrcp.f32 %v2504_v52  ;;  %v2561_v0 = vmul.f32 %v2991_v34, %v4608_v33  ;;  %2591 = vst [vmem:[%s4792_s9 + $0x48] sm:$0xff] %v2559_v63  ;;  %v2511_v33 = vadd.f32 1.0, %v4761_v51  ;;  %v4940_v52 = vld [vmem:[#allocation10_spill] sm:$0xff] }
 0x37e   : > { %v2995_v53 = vpop.eup %2994  ;;  %3006 = vrcp.f32 %v2505_v13  ;;  %v2562_v20 = vmul.f32 %v2993_v10, %v4612_v54  ;;  %2592 = vst [vmem:[%s4792_s9 + $0x50] sm:$0xff] %v2560_v4  ;;  %v2512_v54 = vadd.f32 1.0, %v4764_v47 }
 0x37f   : > { %v2997_v62 = vpop.eup %2996  ;;  %3008 = vrcp.f32 %v2506_v39  ;;  %v2563_v8 = vmul.f32 %v2995_v53, %v4616_v46  ;;  %2593 = vst [vmem:[%s4792_s9 + $0x58] sm:$0xff] %v2561_v0  ;;  %v2513_v46 = vadd.f32 1.0, %v4768_v23 }
 0x380   : > { %v2999_v59 = vpop.eup %2998  ;;  %3010 = vrcp.f32 %v2507_v16  ;;  %v2564_v43 = vmul.f32 %v2997_v62, %v4620_v22  ;;  %2594 = vst [vmem:[%s4792_s9 + $0x60] sm:$0xff] %v2562_v20  ;;  %v2514_v22 = vadd.f32 1.0, %v4771_v58 }
 0x381   : > { %v3001_v41 = vpop.eup %3000  ;;  %3012 = vrcp.f32 %v2508_v15  ;;  %v2565_v21 = vmul.f32 %v2999_v59, %v4624_v27  ;;  %2595 = vst [vmem:[%s4792_s9 + $0x68] sm:$0xff] %v2563_v8  ;;  %v2515_v27 = vadd.f32 1.0, %v4774_v40 }
 0x382   : > { %v3003_v38 = vpop.eup %3002  ;;  %3014 = vrcp.f32 %v2509_v25  ;;  %v2566_v24 = vmul.f32 %v3001_v41, %v4628_v11  ;;  %2596 = vst [vmem:[%s4792_s9 + $0x70] sm:$0xff] %v2564_v43  ;;  %v2516_v11 = vadd.f32 1.0, %v4779_v29 }
 0x383   : > { %v3005_v51 = vpop.eup %3004  ;;  %3016 = vrcp.f32 %v2510_v42  ;;  %v2567_v48 = vmul.f32 %v3003_v38, %v4632_v50  ;;  %2597 = vst [vmem:[%s4792_s9 + $0x78] sm:$0xff] %v2565_v21 }
 0x384   : > { %v3007_v47 = vpop.eup %3006  ;;  %3018 = vrcp.f32 %v2511_v33  ;;  %v2568_v23 = vmul.f32 %v3005_v51, %v4638_v56  ;;  %2598 = vst [vmem:[%s4792_s9 + $0x80] sm:$0xff] %v2566_v24 }
 0x385   : > { %v3009_v31 = vpop.eup %3008  ;;  %3020 = vrcp.f32 %v2512_v54  ;;  %v2569_v58 = vmul.f32 %v3007_v47, %v4645_v37  ;;  %2599 = vst [vmem:[%s4792_s9 + $0x88] sm:$0xff] %v2567_v48 }
 0x386   : > { %v3011_v50 = vpop.eup %3010  ;;  %3022 = vrcp.f32 %v2513_v46  ;;  %v2570_v40 = vmul.f32 %v3009_v31, %v4652_v18  ;;  %2600 = vst [vmem:[%s4792_s9 + $0x90] sm:$0xff] %v2568_v23 }
 0x387   : > { %v3013_v49 = vpop.eup %3012  ;;  %3024 = vrcp.f32 %v2514_v22  ;;  %v2571_v56 = vmul.f32 %v3011_v50, %v4659_v12  ;;  %2601 = vst [vmem:[%s4792_s9 + $0x98] sm:$0xff] %v2569_v58 }
 0x388   : > { %v3015_v29 = vpop.eup %3014  ;;  %3026 = vrcp.f32 %v2515_v27  ;;  %v2572_v37 = vmul.f32 %v3013_v49, %v4666_v3  ;;  %2602 = vst [vmem:[%s4792_s9 + $0xa0] sm:$0xff] %v2570_v40 }
 0x389   : > { %v3017_v19 = vpop.eup %3016  ;;  %3028 = vrcp.f32 %v2516_v11  ;;  %v2573_v18 = vmul.f32 %v3015_v29, %v4673_v60  ;;  %2603 = vst [vmem:[%s4792_s9 + $0xa8] sm:$0xff] %v2571_v56 }
 0x38a   : > { %v3019_v55 = vpop.eup %3018  ;;  %3030 = vrcp.f32 %v2517_v57  ;;  %v2574_v12 = vmul.f32 %v3017_v19, %v4680_v1  ;;  %2604 = vst [vmem:[%s4792_s9 + $0xb0] sm:$0xff] %v2572_v37 }
 0x38b   : > { %v3021_v14 = vpop.eup %3020  ;;  %v2575_v30 = vmul.f32 %v3019_v55, %v4687_v9  ;;  %2605 = vst [vmem:[%s4792_s9 + $0xb8] sm:$0xff] %v2573_v18  ;;  %v4939_v9 = vld [vmem:[#allocation9_spill] sm:$0xff] }
 0x38c   : > { %v3023_v3 = vpop.eup %3022  ;;  %v2576_v60 = vmul.f32 %v3021_v14, %v4937_v2  ;;  %2606 = vst [vmem:[%s4792_s9 + $0xc0] sm:$0xff] %v2574_v12 }
 0x38d   : > { %v3025_v61 = vpop.eup %3024  ;;  %v2577_v26 = vmul.f32 %v3023_v3, %v4938_v36  ;;  %2607 = vst [vmem:[%s4792_s9 + $0xc8] sm:$0xff] %v2575_v30 }
 0x38e   : > { %v3027_v1 = vpop.eup %3026  ;;  %v2578_v6 = vmul.f32 %v3025_v61, %v4939_v9  ;;  %2608 = vst [vmem:[%s4792_s9 + $0xd0] sm:$0xff] %v2576_v60 }
 0x38f   : > { %v3029_v44 = vpop.eup %3028  ;;  %v2579_v28 = vmul.f32 %v3027_v1, %v4715_v32  ;;  %2609 = vst [vmem:[%s4792_s9 + $0xd8] sm:$0xff] %v2577_v26 }
 0x390   : > { %v3031_v7 = vpop.eup %3030  ;;  %v2580_v45 = vmul.f32 %v3029_v44, %v4940_v52  ;;  %2610 = vst [vmem:[%s4792_s9 + $0xe0] sm:$0xff] %v2578_v6 }
 0x391   : > { %v2581_v13 = vmul.f32 %v3031_v7, %v4941_v35  ;;  %2611 = vst [vmem:[%s4792_s9 + $0xe8] sm:$0xff] %v2579_v28 }
 0x392   : > { %2612 = vst [vmem:[%s4792_s9 + $0xf0] sm:$0xff] %v2580_v45 }
 0x393   : > { %2613 = vst [vmem:[%s4792_s9 + $0xf8] sm:$0xff] %v2581_v13 }
 0x394   : > { %3070 = shalt.err (!%p3067_p3)
}
 0x395   : > { %s3117_s28 = smov 128  }
 0x396   : > { %2847 = dma.vmem_to_hbm [thread:$0]  (%p3191_p5), %s2628_s15, 4096, %s2630_s16, %s2615_s18, %s3117_s28, %s3117_s28, %s3111_s17  }
 0x397 PF: > { %p2853_p4 = scmp.ge.s32.totalorder %s3105_s24, 2  ;;  %s2644_s9 = sand.u32 1, %s3093_s21  }
 0x398   : > { %s2645_s13 = scalar_lea.sflag [#allocation5], %s2644_s9 }
 0x399   : > { %p2850_p7 = pnand %p2853_p4, %p3195_p6 }
 0x39b   : > { %p2851_p8 = pneg %p2850_p7 }
 0x39d   : > { %3088 = dma.done.wait (%p2851_p8), %s2645_s13, 4096  }
 0x39e   : > { %3090 = vsyncadd (%p2851_p8), %s2645_s13, 4294963200  ;;  %p16_p9 = scmp.ge.s32.totalorder %s3178_s27, 4   ;;  %s4942_s21 = smov %s3097_s22 }
 0x39f   : > { %s4943_s22 = smov %s3101_s23  ;;  %s4944_s23 = smov %s3189_s30 }
 0x3a0   : > { %s4945_s24 = smov %s3178_s27  ;;  %18 = sbr.rel (!%p16_p9) target bundleno = 3 (0x3), region = 82 }
 0x3a5   :  { %2651 = vsyncpa [#allocation5], 1 }
 0x3a6   :  { %2653 = vsyncpa [#allocation5 + $0x1], 1 }

</bundles_post_ra>
